<compile_context>
chip_gen: v6e
topology: v6e:2x2x1
jax: 0.10.0
libtpu: 0.0.40
codegen_flags: <defaults>
</compile_context>

<pallas_src>
import functools
import math

import numpy as np
import jax
import jax.numpy as jnp
from jax.experimental import pallas as pl
from jax.experimental.pallas import tpu as pltpu

BN_EPS = 1e-5


def _round_up(x, m):
    return (x + m - 1) // m * m


def _device_kind():
    try:
        return jax.devices()[0].device_kind.lower()
    except Exception:
        return ""


def _pick_tiles(M, K, N):
    """Generation-aware matmul tiles (v6e/v7x: 256-wide MXU, else 128)."""
    kind = _device_kind()
    wide_mxu = ("v6" in kind) or ("v7" in kind)
    Kp = _round_up(K, 128)
    Np = _round_up(N, 128)
    tn = 256 if (wide_mxu and Np % 256 == 0) else 128
    tm_pref = 256 if wide_mxu else 128
    tm = tm_pref if M >= tm_pref else _round_up(M, 8)
    max_tk = 2048 if wide_mxu else 1024
    tk = 128
    for cand in (2048, 1024, 512, 256, 128):
        if cand <= max_tk and Kp % cand == 0:
            tk = cand
            break
    return tm, tk, tn


# ----------------------------------------------------------------------------
# Pallas kernels
# ----------------------------------------------------------------------------
def _matmul_affine_kernel(a_ref, w_ref, scale_ref, shift_ref, o_ref, acc_ref, *, relu):
    k = pl.program_id(2)

    @pl.when(k == 0)
    def _():
        acc_ref[...] = jnp.zeros_like(acc_ref)

    acc_ref[...] += jnp.dot(a_ref[...], w_ref[...],
                            preferred_element_type=jnp.float32)

    @pl.when(k == pl.num_programs(2) - 1)
    def _():
        y = acc_ref[...] * scale_ref[...] + shift_ref[...]
        if relu:
            y = jnp.maximum(y, 0.0)
        o_ref[...] = y.astype(o_ref.dtype)


def matmul_affine(a, w, scale, shift, relu, out_dtype=jnp.bfloat16):
    """out = maybe_relu((a @ w) * scale + shift); bf16 operands, f32 accumulate."""
    M, K = a.shape
    K2, N = w.shape
    assert K == K2
    tm, tk, tn = _pick_tiles(M, K, N)
    Mp, Kp, Np = _round_up(M, tm), _round_up(K, tk), _round_up(N, tn)

    a = a.astype(jnp.bfloat16)
    w = w.astype(jnp.bfloat16)
    if (Mp, Kp) != (M, K):          # only pad when strictly needed
        a = jnp.pad(a, ((0, Mp - M), (0, Kp - K)))
    if (Kp, Np) != (K, N):
        w = jnp.pad(w, ((0, Kp - K), (0, Np - N)))
    s = jnp.pad(scale.astype(jnp.float32), (0, Np - N)).reshape(1, Np)
    b = jnp.pad(shift.astype(jnp.float32), (0, Np - N)).reshape(1, Np)

    grid = (Mp // tm, Np // tn, Kp // tk)
    try:
        cost = pl.CostEstimate(flops=2 * Mp * Kp * Np, transcendentals=0,
                               bytes_accessed=(Mp * Kp + Kp * Np + Mp * Np) * 2)
    except Exception:
        cost = None

    out = pl.pallas_call(
        functools.partial(_matmul_affine_kernel, relu=relu),
        out_shape=jax.ShapeDtypeStruct((Mp, Np), out_dtype),
        grid_spec=pltpu.PrefetchScalarGridSpec(
            num_scalar_prefetch=0,
            grid=grid,
            in_specs=[
                pl.BlockSpec((tm, tk), lambda i, j, k: (i, k)),
                pl.BlockSpec((tk, tn), lambda i, j, k: (k, j)),
                pl.BlockSpec((1, tn), lambda i, j, k: (0, j)),
                pl.BlockSpec((1, tn), lambda i, j, k: (0, j)),
            ],
            out_specs=pl.BlockSpec((tm, tn), lambda i, j, k: (i, j)),
            scratch_shapes=[pltpu.VMEM((tm, tn), jnp.float32)],
        ),
        compiler_params=pltpu.CompilerParams(
            dimension_semantics=("parallel", "parallel", "arbitrary")),
        cost_estimate=cost,
    )(a, w, s, b)
    return out[:M, :N]


def _gap_kernel(x_ref, o_ref, acc_ref, *, inv_count):
    c = pl.program_id(1)

    @pl.when(c == 0)
    def _():
        acc_ref[...] = jnp.zeros_like(acc_ref)

    acc_ref[...] += jnp.sum(x_ref[...].astype(jnp.float32), axis=1)

    @pl.when(c == pl.num_programs(1) - 1)
    def _():
        o_ref[0] = (acc_ref[...] * inv_count).astype(o_ref.dtype)


def global_avg_pool(x, out_dtype=jnp.bfloat16):
    """(B,H,W,C) -> (B,C); nn.AdaptiveAvgPool2d(1), chunked spatial reduction."""
    B, H, W, C = x.shape
    HW = H * W
    chunk = min(1024, _round_up(HW, 8))
    HWp = _round_up(HW, chunk)
    xr = x.reshape(B, HW, C)
    if HWp != HW:
        xr = jnp.pad(xr, ((0, 0), (0, HWp - HW), (0, 0)))
    out = pl.pallas_call(
        functools.partial(_gap_kernel, inv_count=1.0 / HW),
        out_shape=jax.ShapeDtypeStruct((B, 1, C), out_dtype),
        grid_spec=pltpu.PrefetchScalarGridSpec(
            num_scalar_prefetch=0,
            grid=(B, HWp // chunk),
            in_specs=[pl.BlockSpec((1, chunk, C), lambda b, c: (b, c, 0))],
            out_specs=pl.BlockSpec((1, 1, C), lambda b, c: (b, 0, 0)),
            scratch_shapes=[pltpu.VMEM((1, C), jnp.float32)],
        ),
        compiler_params=pltpu.CompilerParams(
            dimension_semantics=("parallel", "arbitrary")),
    )(xr)
    return out.reshape(B, C)


def _resize_kernel(i0_ref, i1_ref, f_ref, x0_ref, x1_ref, ww_ref, o_ref):
    oh = pl.program_id(1)
    w1 = f_ref[oh].astype(jnp.float32) * (1.0 / 65536.0)
    r0 = x0_ref[0, 0].astype(jnp.float32)
    r1 = x1_ref[0, 0].astype(jnp.float32)
    row = r0 + (r1 - r0) * w1                                         # H interp
    out = jnp.dot(ww_ref[...], row, preferred_element_type=jnp.float32)  # W interp
    o_ref[0, 0] = out.astype(o_ref.dtype)


def _interp_coords(out_size, in_size):
    o = np.arange(out_size, dtype=np.float64)
    src = (o + 0.5) * (in_size / out_size) - 0.5
    src = np.clip(src, 0.0, in_size - 1)
    i0 = np.floor(src).astype(np.int32)
    i1 = np.minimum(i0 + 1, in_size - 1).astype(np.int32)
    frac = src - i0
    return i0, i1, frac


def _interp_matrix(out_size, in_size):
    i0, i1, frac = _interp_coords(out_size, in_size)
    m = np.zeros((out_size, in_size), np.float64)
    m[np.arange(out_size), i0] += 1.0 - frac
    m[np.arange(out_size), i1] += frac
    return jnp.asarray(m, jnp.float32)


def bilinear_resize(x, out_h, out_w, out_dtype=None):
    """F.interpolate(mode='bilinear', align_corners=False) on NHWC (fused kernel)."""
    B, H, W, C = x.shape
    out_dtype = out_dtype or x.dtype
    i0, i1, frac = _interp_coords(out_h, H)
    frac_fp = jnp.asarray(np.round(frac * 65536.0).astype(np.int32))
    i0 = jnp.asarray(i0)
    i1 = jnp.asarray(i1)
    ww = _interp_matrix(out_w, W)                                   # (out_w, W)

    return pl.pallas_call(
        _resize_kernel,
        out_shape=jax.ShapeDtypeStruct((B, out_h, out_w, C), out_dtype),
        grid_spec=pltpu.PrefetchScalarGridSpec(
            num_scalar_prefetch=3,
            grid=(B, out_h),
            in_specs=[
                pl.BlockSpec((1, 1, W, C),
                             lambda b, oh, i0r, i1r, fr: (b, i0r[oh], 0, 0)),
                pl.BlockSpec((1, 1, W, C),
                             lambda b, oh, i0r, i1r, fr: (b, i1r[oh], 0, 0)),
                pl.BlockSpec((out_w, W),
                             lambda b, oh, i0r, i1r, fr: (0, 0)),
            ],
            out_specs=pl.BlockSpec((1, 1, out_w, C),
                                   lambda b, oh, i0r, i1r, fr: (b, oh, 0, 0)),
        ),
        compiler_params=pltpu.CompilerParams(
            dimension_semantics=("parallel", "arbitrary")),
    )(i0, i1, frac_fp, x, x, ww)


# ----------------------------------------------------------------------------
# Conv wrappers (im2col glue in plain JAX; static hyper-params)
# ----------------------------------------------------------------------------
def _im2col(x, kh, kw, stride, dilation, padding):
    B, H, W, C = x.shape
    xp = jnp.pad(x, ((0, 0), (padding, padding), (padding, padding), (0, 0)))
    Ho = (H + 2 * padding - dilation * (kh - 1) - 1) // stride + 1
    Wo = (W + 2 * padding - dilation * (kw - 1) - 1) // stride + 1
    cols = []
    for i in range(kh):
        for j in range(kw):
            patch = jax.lax.slice(
                xp,
                (0, i * dilation, j * dilation, 0),
                (B, i * dilation + (Ho - 1) * stride + 1,
                 j * dilation + (Wo - 1) * stride + 1, C),
                (1, stride, stride, 1))
            cols.append(patch)
    patches = jnp.concatenate(cols, axis=-1)          # (B, Ho, Wo, kh*kw*C)
    return patches.reshape(B * Ho * Wo, kh * kw * C), (B, Ho, Wo)


def conv2d(x, wp, cfg, *, relu, out_dtype=jnp.bfloat16):
    kh, kw, stride, dilation, padding = cfg
    B = x.shape[0]
    if kh == 1 and kw == 1 and stride == 1 and padding == 0:
        _, Ho, Wo, C = x.shape
        patches = x.reshape(B * Ho * Wo, C)            # 1x1 conv: no im2col
    else:
        # TODO(synk): move the kh*kw taps into the matmul kernel's reduction grid
        # (direct conv) to avoid the 9x bf16 patch expansion for the 3x3 ASPP convs.
        patches, (B, Ho, Wo) = _im2col(x, kh, kw, stride, dilation, padding)
    y = matmul_affine(patches, wp["w"], wp["scale"], wp["shift"], relu,
                      out_dtype=out_dtype)
    return y.reshape(B, Ho, Wo, -1)


# ----------------------------------------------------------------------------
# Parameter init (weights = arrays only; static conv configs kept separately)
# ----------------------------------------------------------------------------
def _conv_layer(key, cin, cout, k, *, stride=1, dilation=1, padding=0,
                bn=True, bias_key=None):
    fan_in = cin * k * k
    std = math.sqrt(2.0 / fan_in)                      # kaiming_normal_
    w = (jax.random.normal(key, (k, k, cin, cout), jnp.float32) * std
         ).reshape(k * k * cin, cout).astype(jnp.bfloat16)
    if bn:
        # eval-mode BN folded: gamma=1, beta=0, mean=0, var=1
        scale = jnp.full((cout,), 1.0 / math.sqrt(1.0 + BN_EPS), jnp.float32)
        shift = jnp.zeros((cout,), jnp.float32)
    else:
        bound = 1.0 / math.sqrt(fan_in)
        scale = jnp.ones((cout,), jnp.float32)
        shift = jax.random.uniform(bias_key, (cout,), jnp.float32, -bound, bound)
    return {"w": w, "scale": scale, "shift": shift}, (k, k, stride, dilation, padding)


def init_model(key, ch_in, n_classes):
    ks = jax.random.split(key, 16)
    params, cfgs = {}, {}

    def add(name, *args, **kwargs):
        params[name], cfgs[name] = _conv_layer(*args, **kwargs)

    # stand-in backbone (see TODO in forward)
    add("stem", ks[0], ch_in, 64, 3, stride=2, padding=1)
    add("layer1", ks[1], 64, 256, 3, stride=2, padding=1)
    add("layer4", ks[2], 256, 2048, 3, stride=2, padding=1)
    # DeepLabHeadV3Plus
    add("low_proj", ks[3], 256, 48, 1)
    add("aspp0", ks[4], 2048, 256, 1)
    add("aspp1", ks[5], 2048, 256, 3, dilation=6, padding=6)
    add("aspp2", ks[6], 2048, 256, 3, dilation=12, padding=12)
    add("aspp3", ks[7], 2048, 256, 3, dilation=18, padding=18)
    add("aspp_pool", ks[8], 2048, 256, 1)
    add("aspp_proj", ks[9], 5 * 256, 256, 1)
    add("cls0", ks[10], 304, 256, 3, padding=1)
    add("cls1", ks[11], 256, n_classes, 1, bn=False, bias_key=ks[12])
    return params, cfgs


# ----------------------------------------------------------------------------
# DeepLabv3plus forward
# ----------------------------------------------------------------------------
def deeplabv3plus_forward(cfgs, params, x_nchw):
    B, _, H_in, W_in = x_nchw.shape
    x = jnp.transpose(x_nchw, (0, 2, 3, 1)).astype(jnp.bfloat16)   # -> NHWC

    # ---- backbone ----
    # TODO(synk): ResNet(ch_in, Bottleneck, [3,4,23,3], replace_stride_with_dilation)
    # is not defined in the reference source; minimal strided conv+BN+ReLU stand-in
    # producing the feature shapes the decoder needs (x1: 256ch @ /4, x4: 2048ch @ /8).
    h = conv2d(x, params["stem"], cfgs["stem"], relu=True)          # /2,  64
    x1 = conv2d(h, params["layer1"], cfgs["layer1"], relu=True)     # /4,  256
    x4 = conv2d(x1, params["layer4"], cfgs["layer4"], relu=True)    # /8, 2048

    # ---- DeepLabHeadV3Plus ----
    low = conv2d(x1, params["low_proj"], cfgs["low_proj"], relu=True)   # (B,H/4,W/4,48)

    # ASPP branches
    b0 = conv2d(x4, params["aspp0"], cfgs["aspp0"], relu=True)
    b1 = conv2d(x4, params["aspp1"], cfgs["aspp1"], relu=True)
    b2 = conv2d(x4, params["aspp2"], cfgs["aspp2"], relu=True)
    b3 = conv2d(x4, params["aspp3"], cfgs["aspp3"], relu=True)

    Bc, H4, W4, _ = x4.shape
    pooled = global_avg_pool(x4)                                     # (B, 2048)
    pp = params["aspp_pool"]
    pb = matmul_affine(pooled, pp["w"], pp["scale"], pp["shift"], relu=True)  # (B,256)
    # bilinear upsample 1x1 -> H4xW4 (align_corners=False) is an exact broadcast
    b4 = jnp.broadcast_to(pb[:, None, None, :], (Bc, H4, W4, pb.shape[-1]))

    cat = jnp.concatenate([b0, b1, b2, b3, b4], axis=-1)             # (B,H4,W4,1280)
    aspp_out = conv2d(cat, params["aspp_proj"], cfgs["aspp_proj"], relu=True)
    # Dropout(0.1): identity (eval mode)

    up = bilinear_resize(aspp_out, low.shape[1], low.shape[2])       # to /4 resolution
    dec_in = jnp.concatenate([low, up], axis=-1)                     # (B,H/4,W/4,304)
    hid = conv2d(dec_in, params["cls0"], cfgs["cls0"], relu=True)    # (B,H/4,W/4,256)
    logits = conv2d(hid, params["cls1"], cfgs["cls1"], relu=False)   # (B,H/4,W/4,nc)

    out = bilinear_resize(logits, H_in, W_in, out_dtype=jnp.float32)  # to input res
    return jnp.transpose(out, (0, 3, 1, 2))                          # -> NCHW


# ----------------------------------------------------------------------------
if __name__ == "__main__":
    key = jax.random.PRNGKey(0)
    pkey, xkey = jax.random.split(key)

    B, CH_IN, H, W, N_CLASSES = 2, 3, 32, 32, 5
    params, cfgs = init_model(pkey, CH_IN, N_CLASSES)
    x = jax.random.normal(xkey, (B, CH_IN, H, W), jnp.float32)

    fwd = jax.jit(functools.partial(deeplabv3plus_forward, cfgs))
    y = jax.block_until_ready(fwd(params, x))
    assert y.shape == (B, N_CLASSES, H, W), y.shape
    assert jnp.all(jnp.isfinite(y))
    print("KERNEL_OK")
</pallas_src>

<mosaic_0001>
module attributes {stable_mosaic.version = 11 : i64} {
  func.func @_matmul_affine_kernel(%arg0: i32, %arg1: i32, %arg2: i32, %arg3: memref<128x128xbf16, #tpu.memory_space<vmem>>, %arg4: memref<128x128xbf16, #tpu.memory_space<vmem>>, %arg5: memref<1x128xf32, #tpu.memory_space<vmem>>, %arg6: memref<1x128xf32, #tpu.memory_space<vmem>>, %arg7: memref<128x128xbf16, #tpu.memory_space<vmem>>, %arg8: memref<128x128xf32, #tpu.memory_space<vmem>>) attributes {dimension_semantics = [#tpu.dimension_semantics<parallel>, #tpu.dimension_semantics<parallel>, #tpu.dimension_semantics<arbitrary>], iteration_bounds = array<i64: 4, 1, 1>, scalar_prefetch = 0 : i64, scratch_operands = 1 : i64, tpu.core_type = #tpu.core_type<tc>, window_params = [{transform_indices = @transform_0, window_bounds = array<i64: 128, 128>}, {transform_indices = @transform_1, window_bounds = array<i64: 128, 128>}, {transform_indices = @transform_2, window_bounds = array<i64: 1, 128>}, {transform_indices = @transform_3, window_bounds = array<i64: 1, 128>}, {transform_indices = @transform_4, window_bounds = array<i64: 128, 128>}]} {
    %c0_i32 = arith.constant 0 : i32
    %0 = arith.cmpi eq, %arg2, %c0_i32 : i32
    %1 = arith.extui %0 : i1 to i32
    %c0_i32_0 = arith.constant 0 : i32
    %2 = arith.cmpi ne, %1, %c0_i32_0 : i32
    scf.if %2 {
      %cst_10 = arith.constant 0.000000e+00 : f32
      %12 = vector.broadcast %cst_10 : f32 to vector<128x128xf32>
      %c0_11 = arith.constant 0 : index
      %c0_12 = arith.constant 0 : index
      %13 = vector.load %arg8[%c0_11, %c0_12] : memref<128x128xf32, #tpu.memory_space<vmem>>, vector<128x128xf32>
      tpu.vector_store %arg8[%c0_11, %c0_12], %12 {strides = array<i32>} : memref<128x128xf32, #tpu.memory_space<vmem>>, vector<128x128xf32>,
    } else {
    }
    %c0 = arith.constant 0 : index
    %c0_1 = arith.constant 0 : index
    %3 = vector.load %arg8[%c0, %c0_1] : memref<128x128xf32, #tpu.memory_space<vmem>>, vector<128x128xf32>
    %c0_2 = arith.constant 0 : index
    %c0_3 = arith.constant 0 : index
    %4 = vector.load %arg3[%c0_2, %c0_3] : memref<128x128xbf16, #tpu.memory_space<vmem>>, vector<128x128xbf16>
    %c0_4 = arith.constant 0 : index
    %c0_5 = arith.constant 0 : index
    %5 = vector.load %arg4[%c0_4, %c0_5] : memref<128x128xbf16, #tpu.memory_space<vmem>>, vector<128x128xbf16>
    %cst = arith.constant dense<0.000000e+00> : vector<128x128xf32>
    %6 = tpu.matmul %4, %5, %cst {dimension_numbers = #tpu.dot_dimension_numbers<[1], [0], [0], [1], [0, 0, 1, 1], [], []>} : vector<128x128xbf16>, vector<128x128xbf16>, vector<128x128xf32> -> vector<128x128xf32>
    %7 = arith.addf %3, %6 : vector<128x128xf32>
    %c0_6 = arith.constant 0 : index
    %c0_7 = arith.constant 0 : index
    %8 = vector.load %arg8[%c0_6, %c0_7] : memref<128x128xf32, #tpu.memory_space<vmem>>, vector<128x128xf32>
    tpu.vector_store %arg8[%c0_6, %c0_7], %7 {strides = array<i32>} : memref<128x128xf32, #tpu.memory_space<vmem>>, vector<128x128xf32>,
    %c0_i32_8 = arith.constant 0 : i32
    %9 = arith.cmpi eq, %arg2, %c0_i32_8 : i32
    %10 = arith.extui %9 : i1 to i32
    %c0_i32_9 = arith.constant 0 : i32
    %11 = arith.cmpi ne, %10, %c0_i32_9 : i32
    scf.if %11 {
      %c0_10 = arith.constant 0 : index
      %c0_11 = arith.constant 0 : index
      %12 = vector.load %arg8[%c0_10, %c0_11] : memref<128x128xf32, #tpu.memory_space<vmem>>, vector<128x128xf32>
      %c0_12 = arith.constant 0 : index
      %c0_13 = arith.constant 0 : index
      %13 = vector.load %arg5[%c0_12, %c0_13] : memref<1x128xf32, #tpu.memory_space<vmem>>, vector<1x128xf32>
      %14 = vector.broadcast %13 : vector<1x128xf32> to vector<128x128xf32>
      %15 = arith.mulf %12, %14 : vector<128x128xf32>
      %c0_14 = arith.constant 0 : index
      %c0_15 = arith.constant 0 : index
      %16 = vector.load %arg6[%c0_14, %c0_15] : memref<1x128xf32, #tpu.memory_space<vmem>>, vector<1x128xf32>
      %17 = vector.broadcast %16 : vector<1x128xf32> to vector<128x128xf32>
      %18 = arith.addf %15, %17 : vector<128x128xf32>
      %cst_16 = arith.constant 0.000000e+00 : f32
      %19 = vector.broadcast %cst_16 : f32 to vector<128x128xf32>
      %20 = arith.maximumf %18, %19 : vector<128x128xf32>
      %21 = arith.truncf %20 : vector<128x128xf32> to vector<128x128xbf16>
      %c0_17 = arith.constant 0 : index
      %c0_18 = arith.constant 0 : index
      %22 = vector.load %arg7[%c0_17, %c0_18] : memref<128x128xbf16, #tpu.memory_space<vmem>>, vector<128x128xbf16>
      tpu.vector_store %arg7[%c0_17, %c0_18], %21 {strides = array<i32>} : memref<128x128xbf16, #tpu.memory_space<vmem>>, vector<128x128xbf16>,
    } else {
    }
    return
  }
  func.func @transform_0(%arg0: i32, %arg1: i32, %arg2: i32) -> (i32, i32) {
    %c0_i32 = arith.constant 0 : i32
    return %arg0, %arg2 : i32, i32
  }
  func.func @transform_1(%arg0: i32, %arg1: i32, %arg2: i32) -> (i32, i32) {
    %c0_i32 = arith.constant 0 : i32
    return %arg2, %arg1 : i32, i32
  }
  func.func @transform_2(%arg0: i32, %arg1: i32, %arg2: i32) -> (i32, i32) {
    %c0_i32 = arith.constant 0 : i32
    %c0_i32_0 = arith.constant 0 : i32
    return %c0_i32, %arg1 : i32, i32
  }
  func.func @transform_3(%arg0: i32, %arg1: i32, %arg2: i32) -> (i32, i32) {
    %c0_i32 = arith.constant 0 : i32
    %c0_i32_0 = arith.constant 0 : i32
    return %c0_i32, %arg1 : i32, i32
  }
  func.func @transform_4(%arg0: i32, %arg1: i32, %arg2: i32) -> (i32, i32) {
    %c0_i32 = arith.constant 0 : i32
    return %arg0, %arg1 : i32, i32
  }
}

module attributes {stable_mosaic.version = 11 : i64} {
  func.func @_matmul_affine_kernel(%arg0: i32, %arg1: i32, %arg2: i32, %arg3: memref<128x128xbf16, #tpu.memory_space<vmem>>, %arg4: memref<128x128xbf16, #tpu.memory_space<vmem>>, %arg5: memref<1x128xf32, #tpu.memory_space<vmem>>, %arg6: memref<1x128xf32, #tpu.memory_space<vmem>>, %arg7: memref<128x128xbf16, #tpu.memory_space<vmem>>, %arg8: memref<128x128xf32, #tpu.memory_space<vmem>>) attributes {dimension_semantics = [#tpu.dimension_semantics<parallel>, #tpu.dimension_semantics<parallel>, #tpu.dimension_semantics<arbitrary>], iteration_bounds = array<i64: 1, 2, 5>, scalar_prefetch = 0 : i64, scratch_operands = 1 : i64, tpu.core_type = #tpu.core_type<tc>, window_params = [{transform_indices = @transform_0, window_bounds = array<i64: 128, 128>}, {transform_indices = @transform_1, window_bounds = array<i64: 128, 128>}, {transform_indices = @transform_2, window_bounds = array<i64: 1, 128>}, {transform_indices = @transform_3, window_bounds = array<i64: 1, 128>}, {transform_indices = @transform_4, window_bounds = array<i64: 128, 128>}]} {
    %c0_i32 = arith.constant 0 : i32
    %0 = arith.cmpi eq, %arg2, %c0_i32 : i32
    %1 = arith.extui %0 : i1 to i32
    %c0_i32_0 = arith.constant 0 : i32
    %2 = arith.cmpi ne, %1, %c0_i32_0 : i32
    scf.if %2 {
      %cst_9 = arith.constant 0.000000e+00 : f32
      %12 = vector.broadcast %cst_9 : f32 to vector<128x128xf32>
      %c0_10 = arith.constant 0 : index
      %c0_11 = arith.constant 0 : index
      %13 = vector.load %arg8[%c0_10, %c0_11] : memref<128x128xf32, #tpu.memory_space<vmem>>, vector<128x128xf32>
      tpu.vector_store %arg8[%c0_10, %c0_11], %12 {strides = array<i32>} : memref<128x128xf32, #tpu.memory_space<vmem>>, vector<128x128xf32>,
    } else {
    }
    %c0 = arith.constant 0 : index
    %c0_1 = arith.constant 0 : index
    %3 = vector.load %arg8[%c0, %c0_1] : memref<128x128xf32, #tpu.memory_space<vmem>>, vector<128x128xf32>
    %c0_2 = arith.constant 0 : index
    %c0_3 = arith.constant 0 : index
    %4 = vector.load %arg3[%c0_2, %c0_3] : memref<128x128xbf16, #tpu.memory_space<vmem>>, vector<128x128xbf16>
    %c0_4 = arith.constant 0 : index
    %c0_5 = arith.constant 0 : index
    %5 = vector.load %arg4[%c0_4, %c0_5] : memref<128x128xbf16, #tpu.memory_space<vmem>>, vector<128x128xbf16>
    %cst = arith.constant dense<0.000000e+00> : vector<128x128xf32>
    %6 = tpu.matmul %4, %5, %cst {dimension_numbers = #tpu.dot_dimension_numbers<[1], [0], [0], [1], [0, 0, 1, 1], [], []>} : vector<128x128xbf16>, vector<128x128xbf16>, vector<128x128xf32> -> vector<128x128xf32>
    %7 = arith.addf %3, %6 : vector<128x128xf32>
    %c0_6 = arith.constant 0 : index
    %c0_7 = arith.constant 0 : index
    %8 = vector.load %arg8[%c0_6, %c0_7] : memref<128x128xf32, #tpu.memory_space<vmem>>, vector<128x128xf32>
    tpu.vector_store %arg8[%c0_6, %c0_7], %7 {strides = array<i32>} : memref<128x128xf32, #tpu.memory_space<vmem>>, vector<128x128xf32>,
    %c4_i32 = arith.constant 4 : i32
    %9 = arith.cmpi eq, %arg2, %c4_i32 : i32
    %10 = arith.extui %9 : i1 to i32
    %c0_i32_8 = arith.constant 0 : i32
    %11 = arith.cmpi ne, %10, %c0_i32_8 : i32
    scf.if %11 {
      %c0_9 = arith.constant 0 : index
      %c0_10 = arith.constant 0 : index
      %12 = vector.load %arg8[%c0_9, %c0_10] : memref<128x128xf32, #tpu.memory_space<vmem>>, vector<128x128xf32>
      %c0_11 = arith.constant 0 : index
      %c0_12 = arith.constant 0 : index
      %13 = vector.load %arg5[%c0_11, %c0_12] : memref<1x128xf32, #tpu.memory_space<vmem>>, vector<1x128xf32>
      %14 = vector.broadcast %13 : vector<1x128xf32> to vector<128x128xf32>
      %15 = arith.mulf %12, %14 : vector<128x128xf32>
      %c0_13 = arith.constant 0 : index
      %c0_14 = arith.constant 0 : index
      %16 = vector.load %arg6[%c0_13, %c0_14] : memref<1x128xf32, #tpu.memory_space<vmem>>, vector<1x128xf32>
      %17 = vector.broadcast %16 : vector<1x128xf32> to vector<128x128xf32>
      %18 = arith.addf %15, %17 : vector<128x128xf32>
      %cst_15 = arith.constant 0.000000e+00 : f32
      %19 = vector.broadcast %cst_15 : f32 to vector<128x128xf32>
      %20 = arith.maximumf %18, %19 : vector<128x128xf32>
      %21 = arith.truncf %20 : vector<128x128xf32> to vector<128x128xbf16>
      %c0_16 = arith.constant 0 : index
      %c0_17 = arith.constant 0 : index
      %22 = vector.load %arg7[%c0_16, %c0_17] : memref<128x128xbf16, #tpu.memory_space<vmem>>, vector<128x128xbf16>
      tpu.vector_store %arg7[%c0_16, %c0_17], %21 {strides = array<i32>} : memref<128x128xbf16, #tpu.memory_space<vmem>>, vector<128x128xbf16>,
    } else {
    }
    return
  }
  func.func @transform_0(%arg0: i32, %arg1: i32, %arg2: i32) -> (i32, i32) {
    %c0_i32 = arith.constant 0 : i32
    return %arg0, %arg2 : i32, i32
  }
  func.func @transform_1(%arg0: i32, %arg1: i32, %arg2: i32) -> (i32, i32) {
    %c0_i32 = arith.constant 0 : i32
    return %arg2, %arg1 : i32, i32
  }
  func.func @transform_2(%arg0: i32, %arg1: i32, %arg2: i32) -> (i32, i32) {
    %c0_i32 = arith.constant 0 : i32
    %c0_i32_0 = arith.constant 0 : i32
    return %c0_i32, %arg1 : i32, i32
  }
  func.func @transform_3(%arg0: i32, %arg1: i32, %arg2: i32) -> (i32, i32) {
    %c0_i32 = arith.constant 0 : i32
    %c0_i32_0 = arith.constant 0 : i32
    return %c0_i32, %arg1 : i32, i32
  }
  func.func @transform_4(%arg0: i32, %arg1: i32, %arg2: i32) -> (i32, i32) {
    %c0_i32 = arith.constant 0 : i32
    return %arg0, %arg1 : i32, i32
  }
}

module attributes {stable_mosaic.version = 11 : i64} {
  func.func @_matmul_affine_kernel(%arg0: i32, %arg1: i32, %arg2: i32, %arg3: memref<32x256xbf16, #tpu.memory_space<vmem>>, %arg4: memref<256x128xbf16, #tpu.memory_space<vmem>>, %arg5: memref<1x128xf32, #tpu.memory_space<vmem>>, %arg6: memref<1x128xf32, #tpu.memory_space<vmem>>, %arg7: memref<32x128xbf16, #tpu.memory_space<vmem>>, %arg8: memref<32x128xf32, #tpu.memory_space<vmem>>) attributes {dimension_semantics = [#tpu.dimension_semantics<parallel>, #tpu.dimension_semantics<parallel>, #tpu.dimension_semantics<arbitrary>], iteration_bounds = array<i64: 1, 16, 9>, scalar_prefetch = 0 : i64, scratch_operands = 1 : i64, tpu.core_type = #tpu.core_type<tc>, window_params = [{transform_indices = @transform_0, window_bounds = array<i64: 32, 256>}, {transform_indices = @transform_1, window_bounds = array<i64: 256, 128>}, {transform_indices = @transform_2, window_bounds = array<i64: 1, 128>}, {transform_indices = @transform_3, window_bounds = array<i64: 1, 128>}, {transform_indices = @transform_4, window_bounds = array<i64: 32, 128>}]} {
    %c0_i32 = arith.constant 0 : i32
    %0 = arith.cmpi eq, %arg2, %c0_i32 : i32
    %1 = arith.extui %0 : i1 to i32
    %c0_i32_0 = arith.constant 0 : i32
    %2 = arith.cmpi ne, %1, %c0_i32_0 : i32
    scf.if %2 {
      %cst_9 = arith.constant 0.000000e+00 : f32
      %12 = vector.broadcast %cst_9 : f32 to vector<32x128xf32>
      %c0_10 = arith.constant 0 : index
      %c0_11 = arith.constant 0 : index
      %13 = vector.load %arg8[%c0_10, %c0_11] : memref<32x128xf32, #tpu.memory_space<vmem>>, vector<32x128xf32>
      tpu.vector_store %arg8[%c0_10, %c0_11], %12 {strides = array<i32>} : memref<32x128xf32, #tpu.memory_space<vmem>>, vector<32x128xf32>,
    } else {
    }
    %c0 = arith.constant 0 : index
    %c0_1 = arith.constant 0 : index
    %3 = vector.load %arg8[%c0, %c0_1] : memref<32x128xf32, #tpu.memory_space<vmem>>, vector<32x128xf32>
    %c0_2 = arith.constant 0 : index
    %c0_3 = arith.constant 0 : index
    %4 = vector.load %arg3[%c0_2, %c0_3] : memref<32x256xbf16, #tpu.memory_space<vmem>>, vector<32x256xbf16>
    %c0_4 = arith.constant 0 : index
    %c0_5 = arith.constant 0 : index
    %5 = vector.load %arg4[%c0_4, %c0_5] : memref<256x128xbf16, #tpu.memory_space<vmem>>, vector<256x128xbf16>
    %cst = arith.constant dense<0.000000e+00> : vector<32x128xf32>
    %6 = tpu.matmul %4, %5, %cst {dimension_numbers = #tpu.dot_dimension_numbers<[1], [0], [0], [1], [0, 0, 1, 1], [], []>} : vector<32x256xbf16>, vector<256x128xbf16>, vector<32x128xf32> -> vector<32x128xf32>
    %7 = arith.addf %3, %6 : vector<32x128xf32>
    %c0_6 = arith.constant 0 : index
    %c0_7 = arith.constant 0 : index
    %8 = vector.load %arg8[%c0_6, %c0_7] : memref<32x128xf32, #tpu.memory_space<vmem>>, vector<32x128xf32>
    tpu.vector_store %arg8[%c0_6, %c0_7], %7 {strides = array<i32>} : memref<32x128xf32, #tpu.memory_space<vmem>>, vector<32x128xf32>,
    %c8_i32 = arith.constant 8 : i32
    %9 = arith.cmpi eq, %arg2, %c8_i32 : i32
    %10 = arith.extui %9 : i1 to i32
    %c0_i32_8 = arith.constant 0 : i32
    %11 = arith.cmpi ne, %10, %c0_i32_8 : i32
    scf.if %11 {
      %c0_9 = arith.constant 0 : index
      %c0_10 = arith.constant 0 : index
      %12 = vector.load %arg8[%c0_9, %c0_10] : memref<32x128xf32, #tpu.memory_space<vmem>>, vector<32x128xf32>
      %c0_11 = arith.constant 0 : index
      %c0_12 = arith.constant 0 : index
      %13 = vector.load %arg5[%c0_11, %c0_12] : memref<1x128xf32, #tpu.memory_space<vmem>>, vector<1x128xf32>
      %14 = vector.broadcast %13 : vector<1x128xf32> to vector<32x128xf32>
      %15 = arith.mulf %12, %14 : vector<32x128xf32>
      %c0_13 = arith.constant 0 : index
      %c0_14 = arith.constant 0 : index
      %16 = vector.load %arg6[%c0_13, %c0_14] : memref<1x128xf32, #tpu.memory_space<vmem>>, vector<1x128xf32>
      %17 = vector.broadcast %16 : vector<1x128xf32> to vector<32x128xf32>
      %18 = arith.addf %15, %17 : vector<32x128xf32>
      %cst_15 = arith.constant 0.000000e+00 : f32
      %19 = vector.broadcast %cst_15 : f32 to vector<32x128xf32>
      %20 = arith.maximumf %18, %19 : vector<32x128xf32>
      %21 = arith.truncf %20 : vector<32x128xf32> to vector<32x128xbf16>
      %c0_16 = arith.constant 0 : index
      %c0_17 = arith.constant 0 : index
      %22 = vector.load %arg7[%c0_16, %c0_17] : memref<32x128xbf16, #tpu.memory_space<vmem>>, vector<32x128xbf16>
      tpu.vector_store %arg7[%c0_16, %c0_17], %21 {strides = array<i32>} : memref<32x128xbf16, #tpu.memory_space<vmem>>, vector<32x128xbf16>,
    } else {
    }
    return
  }
  func.func @transform_0(%arg0: i32, %arg1: i32, %arg2: i32) -> (i32, i32) {
    %c0_i32 = arith.constant 0 : i32
    return %arg0, %arg2 : i32, i32
  }
  func.func @transform_1(%arg0: i32, %arg1: i32, %arg2: i32) -> (i32, i32) {
    %c0_i32 = arith.constant 0 : i32
    return %arg2, %arg1 : i32, i32
  }
  func.func @transform_2(%arg0: i32, %arg1: i32, %arg2: i32) -> (i32, i32) {
    %c0_i32 = arith.constant 0 : i32
    %c0_i32_0 = arith.constant 0 : i32
    return %c0_i32, %arg1 : i32, i32
  }
  func.func @transform_3(%arg0: i32, %arg1: i32, %arg2: i32) -> (i32, i32) {
    %c0_i32 = arith.constant 0 : i32
    %c0_i32_0 = arith.constant 0 : i32
    return %c0_i32, %arg1 : i32, i32
  }
  func.func @transform_4(%arg0: i32, %arg1: i32, %arg2: i32) -> (i32, i32) {
    %c0_i32 = arith.constant 0 : i32
    return %arg0, %arg1 : i32, i32
  }
}

module attributes {stable_mosaic.version = 11 : i64} {
  func.func @_matmul_affine_kernel(%arg0: i32, %arg1: i32, %arg2: i32, %arg3: memref<32x1024xbf16, #tpu.memory_space<vmem>>, %arg4: memref<1024x128xbf16, #tpu.memory_space<vmem>>, %arg5: memref<1x128xf32, #tpu.memory_space<vmem>>, %arg6: memref<1x128xf32, #tpu.memory_space<vmem>>, %arg7: memref<32x128xbf16, #tpu.memory_space<vmem>>, %arg8: memref<32x128xf32, #tpu.memory_space<vmem>>) attributes {dimension_semantics = [#tpu.dimension_semantics<parallel>, #tpu.dimension_semantics<parallel>, #tpu.dimension_semantics<arbitrary>], iteration_bounds = array<i64: 1, 2, 18>, scalar_prefetch = 0 : i64, scratch_operands = 1 : i64, tpu.core_type = #tpu.core_type<tc>, window_params = [{transform_indices = @transform_0, window_bounds = array<i64: 32, 1024>}, {transform_indices = @transform_1, window_bounds = array<i64: 1024, 128>}, {transform_indices = @transform_2, window_bounds = array<i64: 1, 128>}, {transform_indices = @transform_3, window_bounds = array<i64: 1, 128>}, {transform_indices = @transform_4, window_bounds = array<i64: 32, 128>}]} {
    %c0_i32 = arith.constant 0 : i32
    %0 = arith.cmpi eq, %arg2, %c0_i32 : i32
    %1 = arith.extui %0 : i1 to i32
    %c0_i32_0 = arith.constant 0 : i32
    %2 = arith.cmpi ne, %1, %c0_i32_0 : i32
    scf.if %2 {
      %cst_9 = arith.constant 0.000000e+00 : f32
      %12 = vector.broadcast %cst_9 : f32 to vector<32x128xf32>
      %c0_10 = arith.constant 0 : index
      %c0_11 = arith.constant 0 : index
      %13 = vector.load %arg8[%c0_10, %c0_11] : memref<32x128xf32, #tpu.memory_space<vmem>>, vector<32x128xf32>
      tpu.vector_store %arg8[%c0_10, %c0_11], %12 {strides = array<i32>} : memref<32x128xf32, #tpu.memory_space<vmem>>, vector<32x128xf32>,
    } else {
    }
    %c0 = arith.constant 0 : index
    %c0_1 = arith.constant 0 : index
    %3 = vector.load %arg8[%c0, %c0_1] : memref<32x128xf32, #tpu.memory_space<vmem>>, vector<32x128xf32>
    %c0_2 = arith.constant 0 : index
    %c0_3 = arith.constant 0 : index
    %4 = vector.load %arg3[%c0_2, %c0_3] : memref<32x1024xbf16, #tpu.memory_space<vmem>>, vector<32x1024xbf16>
    %c0_4 = arith.constant 0 : index
    %c0_5 = arith.constant 0 : index
    %5 = vector.load %arg4[%c0_4, %c0_5] : memref<1024x128xbf16, #tpu.memory_space<vmem>>, vector<1024x128xbf16>
    %cst = arith.constant dense<0.000000e+00> : vector<32x128xf32>
    %6 = tpu.matmul %4, %5, %cst {dimension_numbers = #tpu.dot_dimension_numbers<[1], [0], [0], [1], [0, 0, 1, 1], [], []>} : vector<32x1024xbf16>, vector<1024x128xbf16>, vector<32x128xf32> -> vector<32x128xf32>
    %7 = arith.addf %3, %6 : vector<32x128xf32>
    %c0_6 = arith.constant 0 : index
    %c0_7 = arith.constant 0 : index
    %8 = vector.load %arg8[%c0_6, %c0_7] : memref<32x128xf32, #tpu.memory_space<vmem>>, vector<32x128xf32>
    tpu.vector_store %arg8[%c0_6, %c0_7], %7 {strides = array<i32>} : memref<32x128xf32, #tpu.memory_space<vmem>>, vector<32x128xf32>,
    %c17_i32 = arith.constant 17 : i32
    %9 = arith.cmpi eq, %arg2, %c17_i32 : i32
    %10 = arith.extui %9 : i1 to i32
    %c0_i32_8 = arith.constant 0 : i32
    %11 = arith.cmpi ne, %10, %c0_i32_8 : i32
    scf.if %11 {
      %c0_9 = arith.constant 0 : index
      %c0_10 = arith.constant 0 : index
      %12 = vector.load %arg8[%c0_9, %c0_10] : memref<32x128xf32, #tpu.memory_space<vmem>>, vector<32x128xf32>
      %c0_11 = arith.constant 0 : index
      %c0_12 = arith.constant 0 : index
      %13 = vector.load %arg5[%c0_11, %c0_12] : memref<1x128xf32, #tpu.memory_space<vmem>>, vector<1x128xf32>
      %14 = vector.broadcast %13 : vector<1x128xf32> to vector<32x128xf32>
      %15 = arith.mulf %12, %14 : vector<32x128xf32>
      %c0_13 = arith.constant 0 : index
      %c0_14 = arith.constant 0 : index
      %16 = vector.load %arg6[%c0_13, %c0_14] : memref<1x128xf32, #tpu.memory_space<vmem>>, vector<1x128xf32>
      %17 = vector.broadcast %16 : vector<1x128xf32> to vector<32x128xf32>
      %18 = arith.addf %15, %17 : vector<32x128xf32>
      %cst_15 = arith.constant 0.000000e+00 : f32
      %19 = vector.broadcast %cst_15 : f32 to vector<32x128xf32>
      %20 = arith.maximumf %18, %19 : vector<32x128xf32>
      %21 = arith.truncf %20 : vector<32x128xf32> to vector<32x128xbf16>
      %c0_16 = arith.constant 0 : index
      %c0_17 = arith.constant 0 : index
      %22 = vector.load %arg7[%c0_16, %c0_17] : memref<32x128xbf16, #tpu.memory_space<vmem>>, vector<32x128xbf16>
      tpu.vector_store %arg7[%c0_16, %c0_17], %21 {strides = array<i32>} : memref<32x128xbf16, #tpu.memory_space<vmem>>, vector<32x128xbf16>,
    } else {
    }
    return
  }
  func.func @transform_0(%arg0: i32, %arg1: i32, %arg2: i32) -> (i32, i32) {
    %c0_i32 = arith.constant 0 : i32
    return %arg0, %arg2 : i32, i32
  }
  func.func @transform_1(%arg0: i32, %arg1: i32, %arg2: i32) -> (i32, i32) {
    %c0_i32 = arith.constant 0 : i32
    return %arg2, %arg1 : i32, i32
  }
  func.func @transform_2(%arg0: i32, %arg1: i32, %arg2: i32) -> (i32, i32) {
    %c0_i32 = arith.constant 0 : i32
    %c0_i32_0 = arith.constant 0 : i32
    return %c0_i32, %arg1 : i32, i32
  }
  func.func @transform_3(%arg0: i32, %arg1: i32, %arg2: i32) -> (i32, i32) {
    %c0_i32 = arith.constant 0 : i32
    %c0_i32_0 = arith.constant 0 : i32
    return %c0_i32, %arg1 : i32, i32
  }
  func.func @transform_4(%arg0: i32, %arg1: i32, %arg2: i32) -> (i32, i32) {
    %c0_i32 = arith.constant 0 : i32
    return %arg0, %arg1 : i32, i32
  }
}

module attributes {stable_mosaic.version = 11 : i64} {
  func.func @_matmul_affine_kernel(%arg0: i32, %arg1: i32, %arg2: i32, %arg3: memref<32x1024xbf16, #tpu.memory_space<vmem>>, %arg4: memref<1024x128xbf16, #tpu.memory_space<vmem>>, %arg5: memref<1x128xf32, #tpu.memory_space<vmem>>, %arg6: memref<1x128xf32, #tpu.memory_space<vmem>>, %arg7: memref<32x128xbf16, #tpu.memory_space<vmem>>, %arg8: memref<32x128xf32, #tpu.memory_space<vmem>>) attributes {dimension_semantics = [#tpu.dimension_semantics<parallel>, #tpu.dimension_semantics<parallel>, #tpu.dimension_semantics<arbitrary>], iteration_bounds = array<i64: 1, 2, 2>, scalar_prefetch = 0 : i64, scratch_operands = 1 : i64, tpu.core_type = #tpu.core_type<tc>, window_params = [{transform_indices = @transform_0, window_bounds = array<i64: 32, 1024>}, {transform_indices = @transform_1, window_bounds = array<i64: 1024, 128>}, {transform_indices = @transform_2, window_bounds = array<i64: 1, 128>}, {transform_indices = @transform_3, window_bounds = array<i64: 1, 128>}, {transform_indices = @transform_4, window_bounds = array<i64: 32, 128>}]} {
    %c0_i32 = arith.constant 0 : i32
    %0 = arith.cmpi eq, %arg2, %c0_i32 : i32
    %1 = arith.extui %0 : i1 to i32
    %c0_i32_0 = arith.constant 0 : i32
    %2 = arith.cmpi ne, %1, %c0_i32_0 : i32
    scf.if %2 {
      %cst_9 = arith.constant 0.000000e+00 : f32
      %12 = vector.broadcast %cst_9 : f32 to vector<32x128xf32>
      %c0_10 = arith.constant 0 : index
      %c0_11 = arith.constant 0 : index
      %13 = vector.load %arg8[%c0_10, %c0_11] : memref<32x128xf32, #tpu.memory_space<vmem>>, vector<32x128xf32>
      tpu.vector_store %arg8[%c0_10, %c0_11], %12 {strides = array<i32>} : memref<32x128xf32, #tpu.memory_space<vmem>>, vector<32x128xf32>,
    } else {
    }
    %c0 = arith.constant 0 : index
    %c0_1 = arith.constant 0 : index
    %3 = vector.load %arg8[%c0, %c0_1] : memref<32x128xf32, #tpu.memory_space<vmem>>, vector<32x128xf32>
    %c0_2 = arith.constant 0 : index
    %c0_3 = arith.constant 0 : index
    %4 = vector.load %arg3[%c0_2, %c0_3] : memref<32x1024xbf16, #tpu.memory_space<vmem>>, vector<32x1024xbf16>
    %c0_4 = arith.constant 0 : index
    %c0_5 = arith.constant 0 : index
    %5 = vector.load %arg4[%c0_4, %c0_5] : memref<1024x128xbf16, #tpu.memory_space<vmem>>, vector<1024x128xbf16>
    %cst = arith.constant dense<0.000000e+00> : vector<32x128xf32>
    %6 = tpu.matmul %4, %5, %cst {dimension_numbers = #tpu.dot_dimension_numbers<[1], [0], [0], [1], [0, 0, 1, 1], [], []>} : vector<32x1024xbf16>, vector<1024x128xbf16>, vector<32x128xf32> -> vector<32x128xf32>
    %7 = arith.addf %3, %6 : vector<32x128xf32>
    %c0_6 = arith.constant 0 : index
    %c0_7 = arith.constant 0 : index
    %8 = vector.load %arg8[%c0_6, %c0_7] : memref<32x128xf32, #tpu.memory_space<vmem>>, vector<32x128xf32>
    tpu.vector_store %arg8[%c0_6, %c0_7], %7 {strides = array<i32>} : memref<32x128xf32, #tpu.memory_space<vmem>>, vector<32x128xf32>,
    %c1_i32 = arith.constant 1 : i32
    %9 = arith.cmpi eq, %arg2, %c1_i32 : i32
    %10 = arith.extui %9 : i1 to i32
    %c0_i32_8 = arith.constant 0 : i32
    %11 = arith.cmpi ne, %10, %c0_i32_8 : i32
    scf.if %11 {
      %c0_9 = arith.constant 0 : index
      %c0_10 = arith.constant 0 : index
      %12 = vector.load %arg8[%c0_9, %c0_10] : memref<32x128xf32, #tpu.memory_space<vmem>>, vector<32x128xf32>
      %c0_11 = arith.constant 0 : index
      %c0_12 = arith.constant 0 : index
      %13 = vector.load %arg5[%c0_11, %c0_12] : memref<1x128xf32, #tpu.memory_space<vmem>>, vector<1x128xf32>
      %14 = vector.broadcast %13 : vector<1x128xf32> to vector<32x128xf32>
      %15 = arith.mulf %12, %14 : vector<32x128xf32>
      %c0_13 = arith.constant 0 : index
      %c0_14 = arith.constant 0 : index
      %16 = vector.load %arg6[%c0_13, %c0_14] : memref<1x128xf32, #tpu.memory_space<vmem>>, vector<1x128xf32>
      %17 = vector.broadcast %16 : vector<1x128xf32> to vector<32x128xf32>
      %18 = arith.addf %15, %17 : vector<32x128xf32>
      %cst_15 = arith.constant 0.000000e+00 : f32
      %19 = vector.broadcast %cst_15 : f32 to vector<32x128xf32>
      %20 = arith.maximumf %18, %19 : vector<32x128xf32>
      %21 = arith.truncf %20 : vector<32x128xf32> to vector<32x128xbf16>
      %c0_16 = arith.constant 0 : index
      %c0_17 = arith.constant 0 : index
      %22 = vector.load %arg7[%c0_16, %c0_17] : memref<32x128xbf16, #tpu.memory_space<vmem>>, vector<32x128xbf16>
      tpu.vector_store %arg7[%c0_16, %c0_17], %21 {strides = array<i32>} : memref<32x128xbf16, #tpu.memory_space<vmem>>, vector<32x128xbf16>,
    } else {
    }
    return
  }
  func.func @transform_0(%arg0: i32, %arg1: i32, %arg2: i32) -> (i32, i32) {
    %c0_i32 = arith.constant 0 : i32
    return %arg0, %arg2 : i32, i32
  }
  func.func @transform_1(%arg0: i32, %arg1: i32, %arg2: i32) -> (i32, i32) {
    %c0_i32 = arith.constant 0 : i32
    return %arg2, %arg1 : i32, i32
  }
  func.func @transform_2(%arg0: i32, %arg1: i32, %arg2: i32) -> (i32, i32) {
    %c0_i32 = arith.constant 0 : i32
    %c0_i32_0 = arith.constant 0 : i32
    return %c0_i32, %arg1 : i32, i32
  }
  func.func @transform_3(%arg0: i32, %arg1: i32, %arg2: i32) -> (i32, i32) {
    %c0_i32 = arith.constant 0 : i32
    %c0_i32_0 = arith.constant 0 : i32
    return %c0_i32, %arg1 : i32, i32
  }
  func.func @transform_4(%arg0: i32, %arg1: i32, %arg2: i32) -> (i32, i32) {
    %c0_i32 = arith.constant 0 : i32
    return %arg0, %arg1 : i32, i32
  }
}

module attributes {stable_mosaic.version = 11 : i64} {
  func.func @_gap_kernel(%arg0: i32, %arg1: i32, %arg2: memref<1x16x2048xbf16, #tpu.memory_space<vmem>>, %arg3: memref<1x1x2048xbf16, #tpu.memory_space<vmem>>, %arg4: memref<1x2048xf32, #tpu.memory_space<vmem>>) attributes {dimension_semantics = [#tpu.dimension_semantics<parallel>, #tpu.dimension_semantics<arbitrary>], iteration_bounds = array<i64: 2, 1>, scalar_prefetch = 0 : i64, scratch_operands = 1 : i64, tpu.core_type = #tpu.core_type<tc>, window_params = [{transform_indices = @transform_0, window_bounds = array<i64: 1, 16, 2048>}, {transform_indices = @transform_1, window_bounds = array<i64: 1, 1, 2048>}]} {
    %c0_i32 = arith.constant 0 : i32
    %0 = arith.cmpi eq, %arg1, %c0_i32 : i32
    %1 = arith.extui %0 : i1 to i32
    %c0_i32_0 = arith.constant 0 : i32
    %2 = arith.cmpi ne, %1, %c0_i32_0 : i32
    scf.if %2 {
      %cst_9 = arith.constant 0.000000e+00 : f32
      %12 = vector.broadcast %cst_9 : f32 to vector<1x2048xf32>
      %c0_10 = arith.constant 0 : index
      %c0_11 = arith.constant 0 : index
      %13 = vector.load %arg4[%c0_10, %c0_11] : memref<1x2048xf32, #tpu.memory_space<vmem>>, vector<1x2048xf32>
      tpu.vector_store %arg4[%c0_10, %c0_11], %12 {strides = array<i32>} : memref<1x2048xf32, #tpu.memory_space<vmem>>, vector<1x2048xf32>,
    } else {
    }
    %c0 = arith.constant 0 : index
    %c0_1 = arith.constant 0 : index
    %3 = vector.load %arg4[%c0, %c0_1] : memref<1x2048xf32, #tpu.memory_space<vmem>>, vector<1x2048xf32>
    %c0_2 = arith.constant 0 : index
    %c0_3 = arith.constant 0 : index
    %c0_4 = arith.constant 0 : index
    %4 = vector.load %arg2[%c0_2, %c0_3, %c0_4] : memref<1x16x2048xbf16, #tpu.memory_space<vmem>>, vector<1x16x2048xbf16>
    %5 = arith.extf %4 : vector<1x16x2048xbf16> to vector<1x16x2048xf32>
    %cst = arith.constant dense<0.000000e+00> : vector<1x2048xf32>
    %6 = vector.multi_reduction <add>, %5, %cst [1] : vector<1x16x2048xf32> to vector<1x2048xf32>
    %7 = arith.addf %3, %6 : vector<1x2048xf32>
    %c0_5 = arith.constant 0 : index
    %c0_6 = arith.constant 0 : index
    %8 = vector.load %arg4[%c0_5, %c0_6] : memref<1x2048xf32, #tpu.memory_space<vmem>>, vector<1x2048xf32>
    tpu.vector_store %arg4[%c0_5, %c0_6], %7 {strides = array<i32>} : memref<1x2048xf32, #tpu.memory_space<vmem>>, vector<1x2048xf32>,
    %c0_i32_7 = arith.constant 0 : i32
    %9 = arith.cmpi eq, %arg1, %c0_i32_7 : i32
    %10 = arith.extui %9 : i1 to i32
    %c0_i32_8 = arith.constant 0 : i32
    %11 = arith.cmpi ne, %10, %c0_i32_8 : i32
    scf.if %11 {
      %c0_9 = arith.constant 0 : index
      %c0_10 = arith.constant 0 : index
      %12 = vector.load %arg4[%c0_9, %c0_10] : memref<1x2048xf32, #tpu.memory_space<vmem>>, vector<1x2048xf32>
      %cst_11 = arith.constant 6.250000e-02 : f32
      %13 = vector.broadcast %cst_11 : f32 to vector<1x2048xf32>
      %14 = arith.mulf %12, %13 : vector<1x2048xf32>
      %15 = arith.truncf %14 : vector<1x2048xf32> to vector<1x2048xbf16>
      %c0_12 = arith.constant 0 : index
      %c0_13 = arith.constant 0 : index
      %c0_14 = arith.constant 0 : index
      %16 = vector.load %arg3[%c0_12, %c0_13, %c0_14] : memref<1x1x2048xbf16, #tpu.memory_space<vmem>>, vector<1x1x2048xbf16>
      %17 = vector.shape_cast %16 : vector<1x1x2048xbf16> to vector<1x2048xbf16>
      %18 = vector.shape_cast %15 : vector<1x2048xbf16> to vector<1x1x2048xbf16>
      tpu.vector_store %arg3[%c0_12, %c0_13, %c0_14], %18 {strides = array<i32>} : memref<1x1x2048xbf16, #tpu.memory_space<vmem>>, vector<1x1x2048xbf16>,
    } else {
    }
    return
  }
  func.func @transform_0(%arg0: i32, %arg1: i32) -> (i32, i32, i32) {
    %c0_i32 = arith.constant 0 : i32
    %c0_i32_0 = arith.constant 0 : i32
    return %arg0, %arg1, %c0_i32 : i32, i32, i32
  }
  func.func @transform_1(%arg0: i32, %arg1: i32) -> (i32, i32, i32) {
    %c0_i32 = arith.constant 0 : i32
    %c0_i32_0 = arith.constant 0 : i32
    %c0_i32_1 = arith.constant 0 : i32
    return %arg0, %c0_i32, %c0_i32_0 : i32, i32, i32
  }
}

module attributes {stable_mosaic.version = 11 : i64} {
  func.func @_matmul_affine_kernel(%arg0: i32, %arg1: i32, %arg2: i32, %arg3: memref<8x1024xbf16, #tpu.memory_space<vmem>>, %arg4: memref<1024x128xbf16, #tpu.memory_space<vmem>>, %arg5: memref<1x128xf32, #tpu.memory_space<vmem>>, %arg6: memref<1x128xf32, #tpu.memory_space<vmem>>, %arg7: memref<8x128xbf16, #tpu.memory_space<vmem>>, %arg8: memref<8x128xf32, #tpu.memory_space<vmem>>) attributes {dimension_semantics = [#tpu.dimension_semantics<parallel>, #tpu.dimension_semantics<parallel>, #tpu.dimension_semantics<arbitrary>], iteration_bounds = array<i64: 1, 2, 2>, scalar_prefetch = 0 : i64, scratch_operands = 1 : i64, tpu.core_type = #tpu.core_type<tc>, window_params = [{transform_indices = @transform_0, window_bounds = array<i64: 8, 1024>}, {transform_indices = @transform_1, window_bounds = array<i64: 1024, 128>}, {transform_indices = @transform_2, window_bounds = array<i64: 1, 128>}, {transform_indices = @transform_3, window_bounds = array<i64: 1, 128>}, {transform_indices = @transform_4, window_bounds = array<i64: 8, 128>}]} {
    %c0_i32 = arith.constant 0 : i32
    %0 = arith.cmpi eq, %arg2, %c0_i32 : i32
    %1 = arith.extui %0 : i1 to i32
    %c0_i32_0 = arith.constant 0 : i32
    %2 = arith.cmpi ne, %1, %c0_i32_0 : i32
    scf.if %2 {
      %cst_9 = arith.constant 0.000000e+00 : f32
      %12 = vector.broadcast %cst_9 : f32 to vector<8x128xf32>
      %c0_10 = arith.constant 0 : index
      %c0_11 = arith.constant 0 : index
      %13 = vector.load %arg8[%c0_10, %c0_11] : memref<8x128xf32, #tpu.memory_space<vmem>>, vector<8x128xf32>
      tpu.vector_store %arg8[%c0_10, %c0_11], %12 {strides = array<i32>} : memref<8x128xf32, #tpu.memory_space<vmem>>, vector<8x128xf32>,
    } else {
    }
    %c0 = arith.constant 0 : index
    %c0_1 = arith.constant 0 : index
    %3 = vector.load %arg8[%c0, %c0_1] : memref<8x128xf32, #tpu.memory_space<vmem>>, vector<8x128xf32>
    %c0_2 = arith.constant 0 : index
    %c0_3 = arith.constant 0 : index
    %4 = vector.load %arg3[%c0_2, %c0_3] : memref<8x1024xbf16, #tpu.memory_space<vmem>>, vector<8x1024xbf16>
    %c0_4 = arith.constant 0 : index
    %c0_5 = arith.constant 0 : index
    %5 = vector.load %arg4[%c0_4, %c0_5] : memref<1024x128xbf16, #tpu.memory_space<vmem>>, vector<1024x128xbf16>
    %cst = arith.constant dense<0.000000e+00> : vector<8x128xf32>
    %6 = tpu.matmul %4, %5, %cst {dimension_numbers = #tpu.dot_dimension_numbers<[1], [0], [0], [1], [0, 0, 1, 1], [], []>} : vector<8x1024xbf16>, vector<1024x128xbf16>, vector<8x128xf32> -> vector<8x128xf32>
    %7 = arith.addf %3, %6 : vector<8x128xf32>
    %c0_6 = arith.constant 0 : index
    %c0_7 = arith.constant 0 : index
    %8 = vector.load %arg8[%c0_6, %c0_7] : memref<8x128xf32, #tpu.memory_space<vmem>>, vector<8x128xf32>
    tpu.vector_store %arg8[%c0_6, %c0_7], %7 {strides = array<i32>} : memref<8x128xf32, #tpu.memory_space<vmem>>, vector<8x128xf32>,
    %c1_i32 = arith.constant 1 : i32
    %9 = arith.cmpi eq, %arg2, %c1_i32 : i32
    %10 = arith.extui %9 : i1 to i32
    %c0_i32_8 = arith.constant 0 : i32
    %11 = arith.cmpi ne, %10, %c0_i32_8 : i32
    scf.if %11 {
      %c0_9 = arith.constant 0 : index
      %c0_10 = arith.constant 0 : index
      %12 = vector.load %arg8[%c0_9, %c0_10] : memref<8x128xf32, #tpu.memory_space<vmem>>, vector<8x128xf32>
      %c0_11 = arith.constant 0 : index
      %c0_12 = arith.constant 0 : index
      %13 = vector.load %arg5[%c0_11, %c0_12] : memref<1x128xf32, #tpu.memory_space<vmem>>, vector<1x128xf32>
      %14 = vector.broadcast %13 : vector<1x128xf32> to vector<8x128xf32>
      %15 = arith.mulf %12, %14 : vector<8x128xf32>
      %c0_13 = arith.constant 0 : index
      %c0_14 = arith.constant 0 : index
      %16 = vector.load %arg6[%c0_13, %c0_14] : memref<1x128xf32, #tpu.memory_space<vmem>>, vector<1x128xf32>
      %17 = vector.broadcast %16 : vector<1x128xf32> to vector<8x128xf32>
      %18 = arith.addf %15, %17 : vector<8x128xf32>
      %cst_15 = arith.constant 0.000000e+00 : f32
      %19 = vector.broadcast %cst_15 : f32 to vector<8x128xf32>
      %20 = arith.maximumf %18, %19 : vector<8x128xf32>
      %21 = arith.truncf %20 : vector<8x128xf32> to vector<8x128xbf16>
      %c0_16 = arith.constant 0 : index
      %c0_17 = arith.constant 0 : index
      %22 = vector.load %arg7[%c0_16, %c0_17] : memref<8x128xbf16, #tpu.memory_space<vmem>>, vector<8x128xbf16>
      tpu.vector_store %arg7[%c0_16, %c0_17], %21 {strides = array<i32>} : memref<8x128xbf16, #tpu.memory_space<vmem>>, vector<8x128xbf16>,
    } else {
    }
    return
  }
  func.func @transform_0(%arg0: i32, %arg1: i32, %arg2: i32) -> (i32, i32) {
    %c0_i32 = arith.constant 0 : i32
    return %arg0, %arg2 : i32, i32
  }
  func.func @transform_1(%arg0: i32, %arg1: i32, %arg2: i32) -> (i32, i32) {
    %c0_i32 = arith.constant 0 : i32
    return %arg2, %arg1 : i32, i32
  }
  func.func @transform_2(%arg0: i32, %arg1: i32, %arg2: i32) -> (i32, i32) {
    %c0_i32 = arith.constant 0 : i32
    %c0_i32_0 = arith.constant 0 : i32
    return %c0_i32, %arg1 : i32, i32
  }
  func.func @transform_3(%arg0: i32, %arg1: i32, %arg2: i32) -> (i32, i32) {
    %c0_i32 = arith.constant 0 : i32
    %c0_i32_0 = arith.constant 0 : i32
    return %c0_i32, %arg1 : i32, i32
  }
  func.func @transform_4(%arg0: i32, %arg1: i32, %arg2: i32) -> (i32, i32) {
    %c0_i32 = arith.constant 0 : i32
    return %arg0, %arg1 : i32, i32
  }
}

module attributes {stable_mosaic.version = 11 : i64} {
  func.func @_matmul_affine_kernel(%arg0: i32, %arg1: i32, %arg2: i32, %arg3: memref<32x256xbf16, #tpu.memory_space<vmem>>, %arg4: memref<256x128xbf16, #tpu.memory_space<vmem>>, %arg5: memref<1x128xf32, #tpu.memory_space<vmem>>, %arg6: memref<1x128xf32, #tpu.memory_space<vmem>>, %arg7: memref<32x128xbf16, #tpu.memory_space<vmem>>, %arg8: memref<32x128xf32, #tpu.memory_space<vmem>>) attributes {dimension_semantics = [#tpu.dimension_semantics<parallel>, #tpu.dimension_semantics<parallel>, #tpu.dimension_semantics<arbitrary>], iteration_bounds = array<i64: 1, 2, 5>, scalar_prefetch = 0 : i64, scratch_operands = 1 : i64, tpu.core_type = #tpu.core_type<tc>, window_params = [{transform_indices = @transform_0, window_bounds = array<i64: 32, 256>}, {transform_indices = @transform_1, window_bounds = array<i64: 256, 128>}, {transform_indices = @transform_2, window_bounds = array<i64: 1, 128>}, {transform_indices = @transform_3, window_bounds = array<i64: 1, 128>}, {transform_indices = @transform_4, window_bounds = array<i64: 32, 128>}]} {
    %c0_i32 = arith.constant 0 : i32
    %0 = arith.cmpi eq, %arg2, %c0_i32 : i32
    %1 = arith.extui %0 : i1 to i32
    %c0_i32_0 = arith.constant 0 : i32
    %2 = arith.cmpi ne, %1, %c0_i32_0 : i32
    scf.if %2 {
      %cst_9 = arith.constant 0.000000e+00 : f32
      %12 = vector.broadcast %cst_9 : f32 to vector<32x128xf32>
      %c0_10 = arith.constant 0 : index
      %c0_11 = arith.constant 0 : index
      %13 = vector.load %arg8[%c0_10, %c0_11] : memref<32x128xf32, #tpu.memory_space<vmem>>, vector<32x128xf32>
      tpu.vector_store %arg8[%c0_10, %c0_11], %12 {strides = array<i32>} : memref<32x128xf32, #tpu.memory_space<vmem>>, vector<32x128xf32>,
    } else {
    }
    %c0 = arith.constant 0 : index
    %c0_1 = arith.constant 0 : index
    %3 = vector.load %arg8[%c0, %c0_1] : memref<32x128xf32, #tpu.memory_space<vmem>>, vector<32x128xf32>
    %c0_2 = arith.constant 0 : index
    %c0_3 = arith.constant 0 : index
    %4 = vector.load %arg3[%c0_2, %c0_3] : memref<32x256xbf16, #tpu.memory_space<vmem>>, vector<32x256xbf16>
    %c0_4 = arith.constant 0 : index
    %c0_5 = arith.constant 0 : index
    %5 = vector.load %arg4[%c0_4, %c0_5] : memref<256x128xbf16, #tpu.memory_space<vmem>>, vector<256x128xbf16>
    %cst = arith.constant dense<0.000000e+00> : vector<32x128xf32>
    %6 = tpu.matmul %4, %5, %cst {dimension_numbers = #tpu.dot_dimension_numbers<[1], [0], [0], [1], [0, 0, 1, 1], [], []>} : vector<32x256xbf16>, vector<256x128xbf16>, vector<32x128xf32> -> vector<32x128xf32>
    %7 = arith.addf %3, %6 : vector<32x128xf32>
    %c0_6 = arith.constant 0 : index
    %c0_7 = arith.constant 0 : index
    %8 = vector.load %arg8[%c0_6, %c0_7] : memref<32x128xf32, #tpu.memory_space<vmem>>, vector<32x128xf32>
    tpu.vector_store %arg8[%c0_6, %c0_7], %7 {strides = array<i32>} : memref<32x128xf32, #tpu.memory_space<vmem>>, vector<32x128xf32>,
    %c4_i32 = arith.constant 4 : i32
    %9 = arith.cmpi eq, %arg2, %c4_i32 : i32
    %10 = arith.extui %9 : i1 to i32
    %c0_i32_8 = arith.constant 0 : i32
    %11 = arith.cmpi ne, %10, %c0_i32_8 : i32
    scf.if %11 {
      %c0_9 = arith.constant 0 : index
      %c0_10 = arith.constant 0 : index
      %12 = vector.load %arg8[%c0_9, %c0_10] : memref<32x128xf32, #tpu.memory_space<vmem>>, vector<32x128xf32>
      %c0_11 = arith.constant 0 : index
      %c0_12 = arith.constant 0 : index
      %13 = vector.load %arg5[%c0_11, %c0_12] : memref<1x128xf32, #tpu.memory_space<vmem>>, vector<1x128xf32>
      %14 = vector.broadcast %13 : vector<1x128xf32> to vector<32x128xf32>
      %15 = arith.mulf %12, %14 : vector<32x128xf32>
      %c0_13 = arith.constant 0 : index
      %c0_14 = arith.constant 0 : index
      %16 = vector.load %arg6[%c0_13, %c0_14] : memref<1x128xf32, #tpu.memory_space<vmem>>, vector<1x128xf32>
      %17 = vector.broadcast %16 : vector<1x128xf32> to vector<32x128xf32>
      %18 = arith.addf %15, %17 : vector<32x128xf32>
      %cst_15 = arith.constant 0.000000e+00 : f32
      %19 = vector.broadcast %cst_15 : f32 to vector<32x128xf32>
      %20 = arith.maximumf %18, %19 : vector<32x128xf32>
      %21 = arith.truncf %20 : vector<32x128xf32> to vector<32x128xbf16>
      %c0_16 = arith.constant 0 : index
      %c0_17 = arith.constant 0 : index
      %22 = vector.load %arg7[%c0_16, %c0_17] : memref<32x128xbf16, #tpu.memory_space<vmem>>, vector<32x128xbf16>
      tpu.vector_store %arg7[%c0_16, %c0_17], %21 {strides = array<i32>} : memref<32x128xbf16, #tpu.memory_space<vmem>>, vector<32x128xbf16>,
    } else {
    }
    return
  }
  func.func @transform_0(%arg0: i32, %arg1: i32, %arg2: i32) -> (i32, i32) {
    %c0_i32 = arith.constant 0 : i32
    return %arg0, %arg2 : i32, i32
  }
  func.func @transform_1(%arg0: i32, %arg1: i32, %arg2: i32) -> (i32, i32) {
    %c0_i32 = arith.constant 0 : i32
    return %arg2, %arg1 : i32, i32
  }
  func.func @transform_2(%arg0: i32, %arg1: i32, %arg2: i32) -> (i32, i32) {
    %c0_i32 = arith.constant 0 : i32
    %c0_i32_0 = arith.constant 0 : i32
    return %c0_i32, %arg1 : i32, i32
  }
  func.func @transform_3(%arg0: i32, %arg1: i32, %arg2: i32) -> (i32, i32) {
    %c0_i32 = arith.constant 0 : i32
    %c0_i32_0 = arith.constant 0 : i32
    return %c0_i32, %arg1 : i32, i32
  }
  func.func @transform_4(%arg0: i32, %arg1: i32, %arg2: i32) -> (i32, i32) {
    %c0_i32 = arith.constant 0 : i32
    return %arg0, %arg1 : i32, i32
  }
}

module attributes {stable_mosaic.version = 11 : i64} {
  func.func @_resize_kernel(%arg0: i32, %arg1: i32, %arg2: memref<8xi32, #tpu.memory_space<smem>>, %arg3: memref<8xi32, #tpu.memory_space<smem>>, %arg4: memref<8xi32, #tpu.memory_space<smem>>, %arg5: memref<1x1x4x256xbf16, #tpu.memory_space<vmem>>, %arg6: memref<1x1x4x256xbf16, #tpu.memory_space<vmem>>, %arg7: memref<8x4xf32, #tpu.memory_space<vmem>>, %arg8: memref<1x1x8x256xbf16, #tpu.memory_space<vmem>>) attributes {dimension_semantics = [#tpu.dimension_semantics<parallel>, #tpu.dimension_semantics<arbitrary>], iteration_bounds = array<i64: 2, 8>, scalar_prefetch = 3 : i64, scratch_operands = 0 : i64, tpu.core_type = #tpu.core_type<tc>, window_params = [{transform_indices = @transform_0, window_bounds = array<i64: 1, 1, 4, 256>}, {transform_indices = @transform_1, window_bounds = array<i64: 1, 1, 4, 256>}, {pipeline_mode = #tpu.pipeline_mode<synchronous>, transform_indices = @transform_2, window_bounds = array<i64: 8, 4>}, {transform_indices = @transform_3, window_bounds = array<i64: 1, 1, 8, 256>}]} {
    %0 = arith.index_cast %arg1 : i32 to index
    %1 = memref.load %arg4[%0] : memref<8xi32, #tpu.memory_space<smem>>
    %2 = arith.sitofp %1 : i32 to f32
    %cst = arith.constant 1.52587891E-5 : f32
    %3 = arith.mulf %2, %cst : f32
    %c0 = arith.constant 0 : index
    %c0_0 = arith.constant 0 : index
    %c0_1 = arith.constant 0 : index
    %c0_2 = arith.constant 0 : index
    %4 = vector.load %arg5[%c0, %c0_0, %c0_1, %c0_2] : memref<1x1x4x256xbf16, #tpu.memory_space<vmem>>, vector<1x1x4x256xbf16>
    %5 = vector.shape_cast %4 : vector<1x1x4x256xbf16> to vector<4x256xbf16>
    %6 = arith.extf %5 : vector<4x256xbf16> to vector<4x256xf32>
    %c0_3 = arith.constant 0 : index
    %c0_4 = arith.constant 0 : index
    %c0_5 = arith.constant 0 : index
    %c0_6 = arith.constant 0 : index
    %7 = vector.load %arg6[%c0_3, %c0_4, %c0_5, %c0_6] : memref<1x1x4x256xbf16, #tpu.memory_space<vmem>>, vector<1x1x4x256xbf16>
    %8 = vector.shape_cast %7 : vector<1x1x4x256xbf16> to vector<4x256xbf16>
    %9 = arith.extf %8 : vector<4x256xbf16> to vector<4x256xf32>
    %10 = arith.subf %9, %6 : vector<4x256xf32>
    %11 = vector.broadcast %3 : f32 to vector<4x256xf32>
    %12 = arith.mulf %10, %11 : vector<4x256xf32>
    %13 = arith.addf %6, %12 : vector<4x256xf32>
    %c0_7 = arith.constant 0 : index
    %c0_8 = arith.constant 0 : index
    %14 = vector.load %arg7[%c0_7, %c0_8] : memref<8x4xf32, #tpu.memory_space<vmem>>, vector<8x4xf32>
    %cst_9 = arith.constant dense<0.000000e+00> : vector<8x256xf32>
    %15 = tpu.matmul %14, %13, %cst_9 {dimension_numbers = #tpu.dot_dimension_numbers<[1], [0], [0], [1], [0, 0, 1, 1], [], []>} : vector<8x4xf32>, vector<4x256xf32>, vector<8x256xf32> -> vector<8x256xf32>
    %16 = arith.truncf %15 : vector<8x256xf32> to vector<8x256xbf16>
    %c0_10 = arith.constant 0 : index
    %c0_11 = arith.constant 0 : index
    %c0_12 = arith.constant 0 : index
    %c0_13 = arith.constant 0 : index
    %17 = vector.load %arg8[%c0_10, %c0_11, %c0_12, %c0_13] : memref<1x1x8x256xbf16, #tpu.memory_space<vmem>>, vector<1x1x8x256xbf16>
    %18 = vector.shape_cast %17 : vector<1x1x8x256xbf16> to vector<8x256xbf16>
    %19 = vector.shape_cast %16 : vector<8x256xbf16> to vector<1x1x8x256xbf16>
    tpu.vector_store %arg8[%c0_10, %c0_11, %c0_12, %c0_13], %19 {strides = array<i32>} : memref<1x1x8x256xbf16, #tpu.memory_space<vmem>>, vector<1x1x8x256xbf16>,
    return
  }
  func.func @transform_0(%arg0: i32, %arg1: i32, %arg2: memref<8xi32, #tpu.memory_space<smem>>, %arg3: memref<8xi32, #tpu.memory_space<smem>>, %arg4: memref<8xi32, #tpu.memory_space<smem>>) -> (i32, i32, i32, i32) {
    %0 = arith.index_cast %arg1 : i32 to index
    %1 = memref.load %arg2[%0] : memref<8xi32, #tpu.memory_space<smem>>
    %c0_i32 = arith.constant 0 : i32
    %c0_i32_0 = arith.constant 0 : i32
    %c0_i32_1 = arith.constant 0 : i32
    return %arg0, %1, %c0_i32, %c0_i32_0 : i32, i32, i32, i32
  }
  func.func @transform_1(%arg0: i32, %arg1: i32, %arg2: memref<8xi32, #tpu.memory_space<smem>>, %arg3: memref<8xi32, #tpu.memory_space<smem>>, %arg4: memref<8xi32, #tpu.memory_space<smem>>) -> (i32, i32, i32, i32) {
    %0 = arith.index_cast %arg1 : i32 to index
    %1 = memref.load %arg3[%0] : memref<8xi32, #tpu.memory_space<smem>>
    %c0_i32 = arith.constant 0 : i32
    %c0_i32_0 = arith.constant 0 : i32
    %c0_i32_1 = arith.constant 0 : i32
    return %arg0, %1, %c0_i32, %c0_i32_0 : i32, i32, i32, i32
  }
  func.func @transform_2(%arg0: i32, %arg1: i32, %arg2: memref<8xi32, #tpu.memory_space<smem>>, %arg3: memref<8xi32, #tpu.memory_space<smem>>, %arg4: memref<8xi32, #tpu.memory_space<smem>>) -> (i32, i32) {
    %c0_i32 = arith.constant 0 : i32
    %c0_i32_0 = arith.constant 0 : i32
    %c0_i32_1 = arith.constant 0 : i32
    return %c0_i32, %c0_i32_0 : i32, i32
  }
  func.func @transform_3(%arg0: i32, %arg1: i32, %arg2: memref<8xi32, #tpu.memory_space<smem>>, %arg3: memref<8xi32, #tpu.memory_space<smem>>, %arg4: memref<8xi32, #tpu.memory_space<smem>>) -> (i32, i32, i32, i32) {
    %c0_i32 = arith.constant 0 : i32
    %c0_i32_0 = arith.constant 0 : i32
    %c0_i32_1 = arith.constant 0 : i32
    return %arg0, %arg1, %c0_i32, %c0_i32_0 : i32, i32, i32, i32
  }
}

module attributes {stable_mosaic.version = 11 : i64} {
  func.func @_matmul_affine_kernel(%arg0: i32, %arg1: i32, %arg2: i32, %arg3: memref<128x256xbf16, #tpu.memory_space<vmem>>, %arg4: memref<256x128xbf16, #tpu.memory_space<vmem>>, %arg5: memref<1x128xf32, #tpu.memory_space<vmem>>, %arg6: memref<1x128xf32, #tpu.memory_space<vmem>>, %arg7: memref<128x128xbf16, #tpu.memory_space<vmem>>, %arg8: memref<128x128xf32, #tpu.memory_space<vmem>>) attributes {dimension_semantics = [#tpu.dimension_semantics<parallel>, #tpu.dimension_semantics<parallel>, #tpu.dimension_semantics<arbitrary>], iteration_bounds = array<i64: 1, 1, 1>, scalar_prefetch = 0 : i64, scratch_operands = 1 : i64, tpu.core_type = #tpu.core_type<tc>, window_params = [{transform_indices = @transform_0, window_bounds = array<i64: 128, 256>}, {transform_indices = @transform_1, window_bounds = array<i64: 256, 128>}, {transform_indices = @transform_2, window_bounds = array<i64: 1, 128>}, {transform_indices = @transform_3, window_bounds = array<i64: 1, 128>}, {transform_indices = @transform_4, window_bounds = array<i64: 128, 128>}]} {
    %c0_i32 = arith.constant 0 : i32
    %0 = arith.cmpi eq, %arg2, %c0_i32 : i32
    %1 = arith.extui %0 : i1 to i32
    %c0_i32_0 = arith.constant 0 : i32
    %2 = arith.cmpi ne, %1, %c0_i32_0 : i32
    scf.if %2 {
      %cst_10 = arith.constant 0.000000e+00 : f32
      %12 = vector.broadcast %cst_10 : f32 to vector<128x128xf32>
      %c0_11 = arith.constant 0 : index
      %c0_12 = arith.constant 0 : index
      %13 = vector.load %arg8[%c0_11, %c0_12] : memref<128x128xf32, #tpu.memory_space<vmem>>, vector<128x128xf32>
      tpu.vector_store %arg8[%c0_11, %c0_12], %12 {strides = array<i32>} : memref<128x128xf32, #tpu.memory_space<vmem>>, vector<128x128xf32>,
    } else {
    }
    %c0 = arith.constant 0 : index
    %c0_1 = arith.constant 0 : index
    %3 = vector.load %arg8[%c0, %c0_1] : memref<128x128xf32, #tpu.memory_space<vmem>>, vector<128x128xf32>
    %c0_2 = arith.constant 0 : index
    %c0_3 = arith.constant 0 : index
    %4 = vector.load %arg3[%c0_2, %c0_3] : memref<128x256xbf16, #tpu.memory_space<vmem>>, vector<128x256xbf16>
    %c0_4 = arith.constant 0 : index
    %c0_5 = arith.constant 0 : index
    %5 = vector.load %arg4[%c0_4, %c0_5] : memref<256x128xbf16, #tpu.memory_space<vmem>>, vector<256x128xbf16>
    %cst = arith.constant dense<0.000000e+00> : vector<128x128xf32>
    %6 = tpu.matmul %4, %5, %cst {dimension_numbers = #tpu.dot_dimension_numbers<[1], [0], [0], [1], [0, 0, 1, 1], [], []>} : vector<128x256xbf16>, vector<256x128xbf16>, vector<128x128xf32> -> vector<128x128xf32>
    %7 = arith.addf %3, %6 : vector<128x128xf32>
    %c0_6 = arith.constant 0 : index
    %c0_7 = arith.constant 0 : index
    %8 = vector.load %arg8[%c0_6, %c0_7] : memref<128x128xf32, #tpu.memory_space<vmem>>, vector<128x128xf32>
    tpu.vector_store %arg8[%c0_6, %c0_7], %7 {strides = array<i32>} : memref<128x128xf32, #tpu.memory_space<vmem>>, vector<128x128xf32>,
    %c0_i32_8 = arith.constant 0 : i32
    %9 = arith.cmpi eq, %arg2, %c0_i32_8 : i32
    %10 = arith.extui %9 : i1 to i32
    %c0_i32_9 = arith.constant 0 : i32
    %11 = arith.cmpi ne, %10, %c0_i32_9 : i32
    scf.if %11 {
      %c0_10 = arith.constant 0 : index
      %c0_11 = arith.constant 0 : index
      %12 = vector.load %arg8[%c0_10, %c0_11] : memref<128x128xf32, #tpu.memory_space<vmem>>, vector<128x128xf32>
      %c0_12 = arith.constant 0 : index
      %c0_13 = arith.constant 0 : index
      %13 = vector.load %arg5[%c0_12, %c0_13] : memref<1x128xf32, #tpu.memory_space<vmem>>, vector<1x128xf32>
      %14 = vector.broadcast %13 : vector<1x128xf32> to vector<128x128xf32>
      %15 = arith.mulf %12, %14 : vector<128x128xf32>
      %c0_14 = arith.constant 0 : index
      %c0_15 = arith.constant 0 : index
      %16 = vector.load %arg6[%c0_14, %c0_15] : memref<1x128xf32, #tpu.memory_space<vmem>>, vector<1x128xf32>
      %17 = vector.broadcast %16 : vector<1x128xf32> to vector<128x128xf32>
      %18 = arith.addf %15, %17 : vector<128x128xf32>
      %cst_16 = arith.constant 0.000000e+00 : f32
      %19 = vector.broadcast %cst_16 : f32 to vector<128x128xf32>
      %20 = arith.maximumf %18, %19 : vector<128x128xf32>
      %21 = arith.truncf %20 : vector<128x128xf32> to vector<128x128xbf16>
      %c0_17 = arith.constant 0 : index
      %c0_18 = arith.constant 0 : index
      %22 = vector.load %arg7[%c0_17, %c0_18] : memref<128x128xbf16, #tpu.memory_space<vmem>>, vector<128x128xbf16>
      tpu.vector_store %arg7[%c0_17, %c0_18], %21 {strides = array<i32>} : memref<128x128xbf16, #tpu.memory_space<vmem>>, vector<128x128xbf16>,
    } else {
    }
    return
  }
  func.func @transform_0(%arg0: i32, %arg1: i32, %arg2: i32) -> (i32, i32) {
    %c0_i32 = arith.constant 0 : i32
    return %arg0, %arg2 : i32, i32
  }
  func.func @transform_1(%arg0: i32, %arg1: i32, %arg2: i32) -> (i32, i32) {
    %c0_i32 = arith.constant 0 : i32
    return %arg2, %arg1 : i32, i32
  }
  func.func @transform_2(%arg0: i32, %arg1: i32, %arg2: i32) -> (i32, i32) {
    %c0_i32 = arith.constant 0 : i32
    %c0_i32_0 = arith.constant 0 : i32
    return %c0_i32, %arg1 : i32, i32
  }
  func.func @transform_3(%arg0: i32, %arg1: i32, %arg2: i32) -> (i32, i32) {
    %c0_i32 = arith.constant 0 : i32
    %c0_i32_0 = arith.constant 0 : i32
    return %c0_i32, %arg1 : i32, i32
  }
  func.func @transform_4(%arg0: i32, %arg1: i32, %arg2: i32) -> (i32, i32) {
    %c0_i32 = arith.constant 0 : i32
    return %arg0, %arg1 : i32, i32
  }
}

module attributes {stable_mosaic.version = 11 : i64} {
  func.func @_matmul_affine_kernel(%arg0: i32, %arg1: i32, %arg2: i32, %arg3: memref<128x256xbf16, #tpu.memory_space<vmem>>, %arg4: memref<256x128xbf16, #tpu.memory_space<vmem>>, %arg5: memref<1x128xf32, #tpu.memory_space<vmem>>, %arg6: memref<1x128xf32, #tpu.memory_space<vmem>>, %arg7: memref<128x128xbf16, #tpu.memory_space<vmem>>, %arg8: memref<128x128xf32, #tpu.memory_space<vmem>>) attributes {dimension_semantics = [#tpu.dimension_semantics<parallel>, #tpu.dimension_semantics<parallel>, #tpu.dimension_semantics<arbitrary>], iteration_bounds = array<i64: 1, 2, 11>, scalar_prefetch = 0 : i64, scratch_operands = 1 : i64, tpu.core_type = #tpu.core_type<tc>, window_params = [{transform_indices = @transform_0, window_bounds = array<i64: 128, 256>}, {transform_indices = @transform_1, window_bounds = array<i64: 256, 128>}, {transform_indices = @transform_2, window_bounds = array<i64: 1, 128>}, {transform_indices = @transform_3, window_bounds = array<i64: 1, 128>}, {transform_indices = @transform_4, window_bounds = array<i64: 128, 128>}]} {
    %c0_i32 = arith.constant 0 : i32
    %0 = arith.cmpi eq, %arg2, %c0_i32 : i32
    %1 = arith.extui %0 : i1 to i32
    %c0_i32_0 = arith.constant 0 : i32
    %2 = arith.cmpi ne, %1, %c0_i32_0 : i32
    scf.if %2 {
      %cst_9 = arith.constant 0.000000e+00 : f32
      %12 = vector.broadcast %cst_9 : f32 to vector<128x128xf32>
      %c0_10 = arith.constant 0 : index
      %c0_11 = arith.constant 0 : index
      %13 = vector.load %arg8[%c0_10, %c0_11] : memref<128x128xf32, #tpu.memory_space<vmem>>, vector<128x128xf32>
      tpu.vector_store %arg8[%c0_10, %c0_11], %12 {strides = array<i32>} : memref<128x128xf32, #tpu.memory_space<vmem>>, vector<128x128xf32>,
    } else {
    }
    %c0 = arith.constant 0 : index
    %c0_1 = arith.constant 0 : index
    %3 = vector.load %arg8[%c0, %c0_1] : memref<128x128xf32, #tpu.memory_space<vmem>>, vector<128x128xf32>
    %c0_2 = arith.constant 0 : index
    %c0_3 = arith.constant 0 : index
    %4 = vector.load %arg3[%c0_2, %c0_3] : memref<128x256xbf16, #tpu.memory_space<vmem>>, vector<128x256xbf16>
    %c0_4 = arith.constant 0 : index
    %c0_5 = arith.constant 0 : index
    %5 = vector.load %arg4[%c0_4, %c0_5] : memref<256x128xbf16, #tpu.memory_space<vmem>>, vector<256x128xbf16>
    %cst = arith.constant dense<0.000000e+00> : vector<128x128xf32>
    %6 = tpu.matmul %4, %5, %cst {dimension_numbers = #tpu.dot_dimension_numbers<[1], [0], [0], [1], [0, 0, 1, 1], [], []>} : vector<128x256xbf16>, vector<256x128xbf16>, vector<128x128xf32> -> vector<128x128xf32>
    %7 = arith.addf %3, %6 : vector<128x128xf32>
    %c0_6 = arith.constant 0 : index
    %c0_7 = arith.constant 0 : index
    %8 = vector.load %arg8[%c0_6, %c0_7] : memref<128x128xf32, #tpu.memory_space<vmem>>, vector<128x128xf32>
    tpu.vector_store %arg8[%c0_6, %c0_7], %7 {strides = array<i32>} : memref<128x128xf32, #tpu.memory_space<vmem>>, vector<128x128xf32>,
    %c10_i32 = arith.constant 10 : i32
    %9 = arith.cmpi eq, %arg2, %c10_i32 : i32
    %10 = arith.extui %9 : i1 to i32
    %c0_i32_8 = arith.constant 0 : i32
    %11 = arith.cmpi ne, %10, %c0_i32_8 : i32
    scf.if %11 {
      %c0_9 = arith.constant 0 : index
      %c0_10 = arith.constant 0 : index
      %12 = vector.load %arg8[%c0_9, %c0_10] : memref<128x128xf32, #tpu.memory_space<vmem>>, vector<128x128xf32>
      %c0_11 = arith.constant 0 : index
      %c0_12 = arith.constant 0 : index
      %13 = vector.load %arg5[%c0_11, %c0_12] : memref<1x128xf32, #tpu.memory_space<vmem>>, vector<1x128xf32>
      %14 = vector.broadcast %13 : vector<1x128xf32> to vector<128x128xf32>
      %15 = arith.mulf %12, %14 : vector<128x128xf32>
      %c0_13 = arith.constant 0 : index
      %c0_14 = arith.constant 0 : index
      %16 = vector.load %arg6[%c0_13, %c0_14] : memref<1x128xf32, #tpu.memory_space<vmem>>, vector<1x128xf32>
      %17 = vector.broadcast %16 : vector<1x128xf32> to vector<128x128xf32>
      %18 = arith.addf %15, %17 : vector<128x128xf32>
      %cst_15 = arith.constant 0.000000e+00 : f32
      %19 = vector.broadcast %cst_15 : f32 to vector<128x128xf32>
      %20 = arith.maximumf %18, %19 : vector<128x128xf32>
      %21 = arith.truncf %20 : vector<128x128xf32> to vector<128x128xbf16>
      %c0_16 = arith.constant 0 : index
      %c0_17 = arith.constant 0 : index
      %22 = vector.load %arg7[%c0_16, %c0_17] : memref<128x128xbf16, #tpu.memory_space<vmem>>, vector<128x128xbf16>
      tpu.vector_store %arg7[%c0_16, %c0_17], %21 {strides = array<i32>} : memref<128x128xbf16, #tpu.memory_space<vmem>>, vector<128x128xbf16>,
    } else {
    }
    return
  }
  func.func @transform_0(%arg0: i32, %arg1: i32, %arg2: i32) -> (i32, i32) {
    %c0_i32 = arith.constant 0 : i32
    return %arg0, %arg2 : i32, i32
  }
  func.func @transform_1(%arg0: i32, %arg1: i32, %arg2: i32) -> (i32, i32) {
    %c0_i32 = arith.constant 0 : i32
    return %arg2, %arg1 : i32, i32
  }
  func.func @transform_2(%arg0: i32, %arg1: i32, %arg2: i32) -> (i32, i32) {
    %c0_i32 = arith.constant 0 : i32
    %c0_i32_0 = arith.constant 0 : i32
    return %c0_i32, %arg1 : i32, i32
  }
  func.func @transform_3(%arg0: i32, %arg1: i32, %arg2: i32) -> (i32, i32) {
    %c0_i32 = arith.constant 0 : i32
    %c0_i32_0 = arith.constant 0 : i32
    return %c0_i32, %arg1 : i32, i32
  }
  func.func @transform_4(%arg0: i32, %arg1: i32, %arg2: i32) -> (i32, i32) {
    %c0_i32 = arith.constant 0 : i32
    return %arg0, %arg1 : i32, i32
  }
}

module attributes {stable_mosaic.version = 11 : i64} {
  func.func @_matmul_affine_kernel(%arg0: i32, %arg1: i32, %arg2: i32, %arg3: memref<128x256xbf16, #tpu.memory_space<vmem>>, %arg4: memref<256x128xbf16, #tpu.memory_space<vmem>>, %arg5: memref<1x128xf32, #tpu.memory_space<vmem>>, %arg6: memref<1x128xf32, #tpu.memory_space<vmem>>, %arg7: memref<128x128xbf16, #tpu.memory_space<vmem>>, %arg8: memref<128x128xf32, #tpu.memory_space<vmem>>) attributes {dimension_semantics = [#tpu.dimension_semantics<parallel>, #tpu.dimension_semantics<parallel>, #tpu.dimension_semantics<arbitrary>], iteration_bounds = array<i64: 1, 1, 1>, scalar_prefetch = 0 : i64, scratch_operands = 1 : i64, tpu.core_type = #tpu.core_type<tc>, window_params = [{transform_indices = @transform_0, window_bounds = array<i64: 128, 256>}, {transform_indices = @transform_1, window_bounds = array<i64: 256, 128>}, {transform_indices = @transform_2, window_bounds = array<i64: 1, 128>}, {transform_indices = @transform_3, window_bounds = array<i64: 1, 128>}, {transform_indices = @transform_4, window_bounds = array<i64: 128, 128>}]} {
    %c0_i32 = arith.constant 0 : i32
    %0 = arith.cmpi eq, %arg2, %c0_i32 : i32
    %1 = arith.extui %0 : i1 to i32
    %c0_i32_0 = arith.constant 0 : i32
    %2 = arith.cmpi ne, %1, %c0_i32_0 : i32
    scf.if %2 {
      %cst_10 = arith.constant 0.000000e+00 : f32
      %12 = vector.broadcast %cst_10 : f32 to vector<128x128xf32>
      %c0_11 = arith.constant 0 : index
      %c0_12 = arith.constant 0 : index
      %13 = vector.load %arg8[%c0_11, %c0_12] : memref<128x128xf32, #tpu.memory_space<vmem>>, vector<128x128xf32>
      tpu.vector_store %arg8[%c0_11, %c0_12], %12 {strides = array<i32>} : memref<128x128xf32, #tpu.memory_space<vmem>>, vector<128x128xf32>,
    } else {
    }
    %c0 = arith.constant 0 : index
    %c0_1 = arith.constant 0 : index
    %3 = vector.load %arg8[%c0, %c0_1] : memref<128x128xf32, #tpu.memory_space<vmem>>, vector<128x128xf32>
    %c0_2 = arith.constant 0 : index
    %c0_3 = arith.constant 0 : index
    %4 = vector.load %arg3[%c0_2, %c0_3] : memref<128x256xbf16, #tpu.memory_space<vmem>>, vector<128x256xbf16>
    %c0_4 = arith.constant 0 : index
    %c0_5 = arith.constant 0 : index
    %5 = vector.load %arg4[%c0_4, %c0_5] : memref<256x128xbf16, #tpu.memory_space<vmem>>, vector<256x128xbf16>
    %cst = arith.constant dense<0.000000e+00> : vector<128x128xf32>
    %6 = tpu.matmul %4, %5, %cst {dimension_numbers = #tpu.dot_dimension_numbers<[1], [0], [0], [1], [0, 0, 1, 1], [], []>} : vector<128x256xbf16>, vector<256x128xbf16>, vector<128x128xf32> -> vector<128x128xf32>
    %7 = arith.addf %3, %6 : vector<128x128xf32>
    %c0_6 = arith.constant 0 : index
    %c0_7 = arith.constant 0 : index
    %8 = vector.load %arg8[%c0_6, %c0_7] : memref<128x128xf32, #tpu.memory_space<vmem>>, vector<128x128xf32>
    tpu.vector_store %arg8[%c0_6, %c0_7], %7 {strides = array<i32>} : memref<128x128xf32, #tpu.memory_space<vmem>>, vector<128x128xf32>,
    %c0_i32_8 = arith.constant 0 : i32
    %9 = arith.cmpi eq, %arg2, %c0_i32_8 : i32
    %10 = arith.extui %9 : i1 to i32
    %c0_i32_9 = arith.constant 0 : i32
    %11 = arith.cmpi ne, %10, %c0_i32_9 : i32
    scf.if %11 {
      %c0_10 = arith.constant 0 : index
      %c0_11 = arith.constant 0 : index
      %12 = vector.load %arg8[%c0_10, %c0_11] : memref<128x128xf32, #tpu.memory_space<vmem>>, vector<128x128xf32>
      %c0_12 = arith.constant 0 : index
      %c0_13 = arith.constant 0 : index
      %13 = vector.load %arg5[%c0_12, %c0_13] : memref<1x128xf32, #tpu.memory_space<vmem>>, vector<1x128xf32>
      %14 = vector.broadcast %13 : vector<1x128xf32> to vector<128x128xf32>
      %15 = arith.mulf %12, %14 : vector<128x128xf32>
      %c0_14 = arith.constant 0 : index
      %c0_15 = arith.constant 0 : index
      %16 = vector.load %arg6[%c0_14, %c0_15] : memref<1x128xf32, #tpu.memory_space<vmem>>, vector<1x128xf32>
      %17 = vector.broadcast %16 : vector<1x128xf32> to vector<128x128xf32>
      %18 = arith.addf %15, %17 : vector<128x128xf32>
      %19 = arith.truncf %18 : vector<128x128xf32> to vector<128x128xbf16>
      %c0_16 = arith.constant 0 : index
      %c0_17 = arith.constant 0 : index
      %20 = vector.load %arg7[%c0_16, %c0_17] : memref<128x128xbf16, #tpu.memory_space<vmem>>, vector<128x128xbf16>
      tpu.vector_store %arg7[%c0_16, %c0_17], %19 {strides = array<i32>} : memref<128x128xbf16, #tpu.memory_space<vmem>>, vector<128x128xbf16>,
    } else {
    }
    return
  }
  func.func @transform_0(%arg0: i32, %arg1: i32, %arg2: i32) -> (i32, i32) {
    %c0_i32 = arith.constant 0 : i32
    return %arg0, %arg2 : i32, i32
  }
  func.func @transform_1(%arg0: i32, %arg1: i32, %arg2: i32) -> (i32, i32) {
    %c0_i32 = arith.constant 0 : i32
    return %arg2, %arg1 : i32, i32
  }
  func.func @transform_2(%arg0: i32, %arg1: i32, %arg2: i32) -> (i32, i32) {
    %c0_i32 = arith.constant 0 : i32
    %c0_i32_0 = arith.constant 0 : i32
    return %c0_i32, %arg1 : i32, i32
  }
  func.func @transform_3(%arg0: i32, %arg1: i32, %arg2: i32) -> (i32, i32) {
    %c0_i32 = arith.constant 0 : i32
    %c0_i32_0 = arith.constant 0 : i32
    return %c0_i32, %arg1 : i32, i32
  }
  func.func @transform_4(%arg0: i32, %arg1: i32, %arg2: i32) -> (i32, i32) {
    %c0_i32 = arith.constant 0 : i32
    return %arg0, %arg1 : i32, i32
  }
}

module attributes {stable_mosaic.version = 11 : i64} {
  func.func @_resize_kernel(%arg0: i32, %arg1: i32, %arg2: memref<32xi32, #tpu.memory_space<smem>>, %arg3: memref<32xi32, #tpu.memory_space<smem>>, %arg4: memref<32xi32, #tpu.memory_space<smem>>, %arg5: memref<1x1x8x5xbf16, #tpu.memory_space<vmem>>, %arg6: memref<1x1x8x5xbf16, #tpu.memory_space<vmem>>, %arg7: memref<32x8xf32, #tpu.memory_space<vmem>>, %arg8: memref<1x1x32x5xf32, #tpu.memory_space<vmem>>) attributes {dimension_semantics = [#tpu.dimension_semantics<parallel>, #tpu.dimension_semantics<arbitrary>], iteration_bounds = array<i64: 2, 32>, scalar_prefetch = 3 : i64, scratch_operands = 0 : i64, tpu.core_type = #tpu.core_type<tc>, window_params = [{transform_indices = @transform_0, window_bounds = array<i64: 1, 1, 8, 5>}, {transform_indices = @transform_1, window_bounds = array<i64: 1, 1, 8, 5>}, {pipeline_mode = #tpu.pipeline_mode<synchronous>, transform_indices = @transform_2, window_bounds = array<i64: 32, 8>}, {transform_indices = @transform_3, window_bounds = array<i64: 1, 1, 32, 5>}]} {
    %0 = arith.index_cast %arg1 : i32 to index
    %1 = memref.load %arg4[%0] : memref<32xi32, #tpu.memory_space<smem>>
    %2 = arith.sitofp %1 : i32 to f32
    %cst = arith.constant 1.52587891E-5 : f32
    %3 = arith.mulf %2, %cst : f32
    %c0 = arith.constant 0 : index
    %c0_0 = arith.constant 0 : index
    %c0_1 = arith.constant 0 : index
    %c0_2 = arith.constant 0 : index
    %4 = vector.load %arg5[%c0, %c0_0, %c0_1, %c0_2] : memref<1x1x8x5xbf16, #tpu.memory_space<vmem>>, vector<1x1x8x5xbf16>
    %5 = vector.shape_cast %4 : vector<1x1x8x5xbf16> to vector<8x5xbf16>
    %6 = arith.extf %5 : vector<8x5xbf16> to vector<8x5xf32>
    %c0_3 = arith.constant 0 : index
    %c0_4 = arith.constant 0 : index
    %c0_5 = arith.constant 0 : index
    %c0_6 = arith.constant 0 : index
    %7 = vector.load %arg6[%c0_3, %c0_4, %c0_5, %c0_6] : memref<1x1x8x5xbf16, #tpu.memory_space<vmem>>, vector<1x1x8x5xbf16>
    %8 = vector.shape_cast %7 : vector<1x1x8x5xbf16> to vector<8x5xbf16>
    %9 = arith.extf %8 : vector<8x5xbf16> to vector<8x5xf32>
    %10 = arith.subf %9, %6 : vector<8x5xf32>
    %11 = vector.broadcast %3 : f32 to vector<8x5xf32>
    %12 = arith.mulf %10, %11 : vector<8x5xf32>
    %13 = arith.addf %6, %12 : vector<8x5xf32>
    %c0_7 = arith.constant 0 : index
    %c0_8 = arith.constant 0 : index
    %14 = vector.load %arg7[%c0_7, %c0_8] : memref<32x8xf32, #tpu.memory_space<vmem>>, vector<32x8xf32>
    %cst_9 = arith.constant dense<0.000000e+00> : vector<32x5xf32>
    %15 = tpu.matmul %14, %13, %cst_9 {dimension_numbers = #tpu.dot_dimension_numbers<[1], [0], [0], [1], [0, 0, 1, 1], [], []>} : vector<32x8xf32>, vector<8x5xf32>, vector<32x5xf32> -> vector<32x5xf32>
    %c0_10 = arith.constant 0 : index
    %c0_11 = arith.constant 0 : index
    %c0_12 = arith.constant 0 : index
    %c0_13 = arith.constant 0 : index
    %16 = vector.load %arg8[%c0_10, %c0_11, %c0_12, %c0_13] : memref<1x1x32x5xf32, #tpu.memory_space<vmem>>, vector<1x1x32x5xf32>
    %17 = vector.shape_cast %16 : vector<1x1x32x5xf32> to vector<32x5xf32>
    %18 = vector.shape_cast %15 : vector<32x5xf32> to vector<1x1x32x5xf32>
    tpu.vector_store %arg8[%c0_10, %c0_11, %c0_12, %c0_13], %18 {strides = array<i32>} : memref<1x1x32x5xf32, #tpu.memory_space<vmem>>, vector<1x1x32x5xf32>,
    return
  }
  func.func @transform_0(%arg0: i32, %arg1: i32, %arg2: memref<32xi32, #tpu.memory_space<smem>>, %arg3: memref<32xi32, #tpu.memory_space<smem>>, %arg4: memref<32xi32, #tpu.memory_space<smem>>) -> (i32, i32, i32, i32) {
    %0 = arith.index_cast %arg1 : i32 to index
    %1 = memref.load %arg2[%0] : memref<32xi32, #tpu.memory_space<smem>>
    %c0_i32 = arith.constant 0 : i32
    %c0_i32_0 = arith.constant 0 : i32
    %c0_i32_1 = arith.constant 0 : i32
    return %arg0, %1, %c0_i32, %c0_i32_0 : i32, i32, i32, i32
  }
  func.func @transform_1(%arg0: i32, %arg1: i32, %arg2: memref<32xi32, #tpu.memory_space<smem>>, %arg3: memref<32xi32, #tpu.memory_space<smem>>, %arg4: memref<32xi32, #tpu.memory_space<smem>>) -> (i32, i32, i32, i32) {
    %0 = arith.index_cast %arg1 : i32 to index
    %1 = memref.load %arg3[%0] : memref<32xi32, #tpu.memory_space<smem>>
    %c0_i32 = arith.constant 0 : i32
    %c0_i32_0 = arith.constant 0 : i32
    %c0_i32_1 = arith.constant 0 : i32
    return %arg0, %1, %c0_i32, %c0_i32_0 : i32, i32, i32, i32
  }
  func.func @transform_2(%arg0: i32, %arg1: i32, %arg2: memref<32xi32, #tpu.memory_space<smem>>, %arg3: memref<32xi32, #tpu.memory_space<smem>>, %arg4: memref<32xi32, #tpu.memory_space<smem>>) -> (i32, i32) {
    %c0_i32 = arith.constant 0 : i32
    %c0_i32_0 = arith.constant 0 : i32
    %c0_i32_1 = arith.constant 0 : i32
    return %c0_i32, %c0_i32_0 : i32, i32
  }
  func.func @transform_3(%arg0: i32, %arg1: i32, %arg2: memref<32xi32, #tpu.memory_space<smem>>, %arg3: memref<32xi32, #tpu.memory_space<smem>>, %arg4: memref<32xi32, #tpu.memory_space<smem>>) -> (i32, i32, i32, i32) {
    %c0_i32 = arith.constant 0 : i32
    %c0_i32_0 = arith.constant 0 : i32
    %c0_i32_1 = arith.constant 0 : i32
    return %arg0, %arg1, %c0_i32, %c0_i32_0 : i32, i32, i32, i32
  }
}

</mosaic_0001>

<bundles_post_ra>
// kernel: deeplabv3plus_forward.15
= control target key start
LH: loop header
LB: loop body
LE: loop exit
PB: predicated region body
PF: predicated region fallthrough
CT: control target
= control target key end

     0   :  { %s1142_s15 = smov 0   ;;  %s1144_s16 = smov 0   ;;  %s1232_s0 = inlined_call_operand.vmem [shape: bf16[512,128], index: 0, kind: input, shape index: {}]   ;;  %s1233_s1 = inlined_call_operand.vmem [shape: bf16[128,128], index: 1, kind: input, shape index: {}]   ;;  %s1234_s2 = inlined_call_operand.vmem [shape: f32[1,128], index: 2, kind: input, shape index: {}]   ;;  %s1235_s3 = inlined_call_operand.vmem [shape: f32[1,128], index: 3, kind: input, shape index: {}]   ;;  %s1236_s4 = inlined_call_operand.vmem [shape: bf16[512,128], index: 4, kind: output, shape index: {}]  }
   0x1   :  { %s1146_s17 = smov 0  }
   0x2 LB: > { %s33_s18 = sadd.s32 1, %s1111_s16  ;;  %p885_p0 = scmp.ge.s32.totalorder %s1115_s17, 1  ;;  %s1115_s17 = sphi %s1146_s17, %s14_s17   ;;  %s1111_s16 = sphi %s1144_s16, %s1238_s16   ;;  %s1107_s15 = sphi %s1142_s15, %s1237_s15  }
   0x3   : > { %p35_p1 = scmp.ge.s32.totalorder %s33_s18, 4  ;;  %p221_p2 = scmp.lt.s32.totalorder %s1115_s17, 5 }
   0x5   : > { %s1240_s18 = smov (%p35_p1, %s33_s18), 0  ;;  %p222_p3 = pnand %p885_p0, %p221_p2 }
   0x6   : > { %s886_s21 = sshll.u32 (!%p222_p3), %s1107_s15, 4 }
   0x7   : > { %225 = sbr.rel (%p222_p3) target bundleno = 261 (0x105), region = 36  ;;  %p268_p4 = scmp.lt.s32.totalorder (!%p222_p3), %s886_s21, 63 }
   0xc   : > { %v1077_v0 = vld [vmem:[%s1233_s1 + $0x38] sm:$0xff]   ;;  %v1078_v1 = vld [vmem:[%s1233_s1 + $0x30] sm:$0xff]   ;;  %s1242_s21 = smov (!%p268_p4, %s886_s21), 63  ;;  %v1079_v2 = vld [vmem:[%s1233_s1 + $0x28] sm:$0xff]  }
   0xd   : > { %1005 = vmatprep.subr.bf16.mxu0 %v1077_v0  ;;  %1037 = vmatprep.subr.bf16.mxu1 %v1077_v0  ;;  %s887_s26 = sshll.u32 %s1242_s21, 2  ;;  %v1080_v3 = vld [vmem:[%s1233_s1 + $0x20] sm:$0xff]   ;;  %v1081_v6 = vld [vmem:[%s1233_s1 + $0x18] sm:$0xff]   ;;  %v1082_v7 = vld [vmem:[%s1233_s1 + $0x10] sm:$0xff]  }
   0xe   : > { %1006 = vmatpush3.bf16.msra.mxu0 %v1077_v0  ;;  %1045 = vmatpush3.bf16.msra.mxu1 %v1077_v0  ;;  %s1177_s29 = scalar_lea.vmem %s1232_s0, %s887_s26  ;;  %v1083_v8 = vld [vmem:[%s1233_s1 + $0x8] sm:$0xff]   ;;  %v1084_v9 = vld [vmem:[%s1233_s1] sm:$0xff]   ;;  %s1213_s24 = scalar_lea.vmem %s1236_s4, %s887_s26 }
   0xf   : > { %1007 = vmatprep.subr.bf16.mxu0 %v1078_v1  ;;  %1038 = vmatprep.subr.bf16.mxu1 %v1078_v1  ;;  %v1085_v4 = vld [vmem:[%s1177_s29] sm:$0xff]   ;;  %v1087_v10 = vld [vmem:[%s1177_s29 + $0x8] sm:$0xff]   ;;  %v1089_v12 = vld [vmem:[%s1177_s29 + $0x10] sm:$0xff]  }
  0x10   : > { %v1086_v5 = vld [vmem:[%s1177_s29 + $0x20] sm:$0xff]   ;;  %1021 = vmatprep.mubr.bf16.mxu0 %v1085_v4  ;;  %v1088_v11 = vld [vmem:[%s1177_s29 + $0x28] sm:$0xff]   ;;  %v1090_v13 = vld [vmem:[%s1177_s29 + $0x30] sm:$0xff]  }
  0x11   : > { %1029 = vmatprep.mubr.bf16.mxu1 %v1086_v5  ;;  %v1091_v14 = vld [vmem:[%s1177_s29 + $0x18] sm:$0xff]   ;;  %v906_v16 = vld [vmem:[%s1234_s2] ss:$0 sm:$0xff] }
  0x12   : > { %1008 = vmatpush3.bf16.msra.mxu0 %v1078_v1  ;;  %1046 = vmatpush3.bf16.msra.mxu1 %v1078_v1  ;;  %v1092_v15 = vld [vmem:[%s1177_s29 + $0x38] sm:$0xff]   ;;  %v907_v21 = vld [vmem:[%s1235_s3] ss:$0 sm:$0xff] }
  0x13   : > { %1009 = vmatprep.subr.bf16.mxu0 %v1079_v2  ;;  %1039 = vmatprep.subr.bf16.mxu1 %v1079_v2 }
  0x16   : > { %1010 = vmatpush3.bf16.msra.mxu0 %v1079_v2  ;;  %1047 = vmatpush3.bf16.msra.mxu1 %v1079_v2 }
  0x17   : > { %1011 = vmatprep.subr.bf16.mxu0 %v1080_v3  ;;  %1040 = vmatprep.subr.bf16.mxu1 %v1080_v3 }
  0x1a   : > { %1012 = vmatpush3.bf16.msra.mxu0 %v1080_v3  ;;  %1048 = vmatpush3.bf16.msra.mxu1 %v1080_v3 }
  0x1b   : > { %1013 = vmatprep.subr.bf16.mxu0 %v1081_v6  ;;  %1041 = vmatprep.subr.bf16.mxu1 %v1081_v6 }
  0x1e   : > { %1014 = vmatpush3.bf16.msra.mxu0 %v1081_v6  ;;  %1049 = vmatpush3.bf16.msra.mxu1 %v1081_v6 }
  0x1f   : > { %1015 = vmatprep.subr.bf16.mxu0 %v1082_v7  ;;  %1042 = vmatprep.subr.bf16.mxu1 %v1082_v7 }
  0x22   : > { %1016 = vmatpush3.bf16.msra.mxu0 %v1082_v7  ;;  %1050 = vmatpush3.bf16.msra.mxu1 %v1082_v7 }
  0x23   : > { %1017 = vmatprep.subr.bf16.mxu0 %v1083_v8  ;;  %1043 = vmatprep.subr.bf16.mxu1 %v1083_v8 }
  0x26   : > { %1018 = vmatpush3.bf16.msra.mxu0 %v1083_v8  ;;  %1051 = vmatpush3.bf16.msra.mxu1 %v1083_v8 }
  0x27   : > { %1019 = vmatprep.subr.bf16.mxu0 %v1084_v9  ;;  %1044 = vmatprep.subr.bf16.mxu1 %v1084_v9 }
  0x2a   : > { %1020 = vmatpush3.bf16.msra.mxu0 %v1084_v9  ;;  %1052 = vmatpush3.bf16.msra.mxu1 %v1084_v9 }
  0x2d   : > { %1022 = vmatmul.mubr.bf16.vlgmr.msra.gmra.mxu0 %v1087_v10  ;;  %1030 = vmatmul.mubr.bf16.vlgmr.msra.gmra.mxu1 %v1088_v11 }
  0x2e   : > { %1025 = vmatprep.mubr.bf16.mxu0 %v1089_v12  ;;  %1033 = vmatprep.mubr.bf16.mxu1 %v1090_v13 }
  0x35   : > { %1026 = vmatmul.mubr.bf16.gmra.mxu0 %v1091_v14  ;;  %1034 = vmatmul.mubr.bf16.gmra.mxu1 %v1092_v15 }
  0xed   : > { %v1023_v17 = vpop.f32.mrf.mxu0  ;;  %v1031_v18 = vpop.f32.mrf.mxu1 }
  0xee   : > { %v622_v19 = vmul.f32 %v1023_v17, %v906_v16  ;;  %v630_v20 = vmul.f32 %v1031_v18, %v906_v16 }
  0xef   : > { %v499_v22 = vpop.f32.mrf.mxu0  ;;  %v531_v23 = vpop.f32.mrf.mxu1 }
  0xf0   : > { %v620_v24 = vmul.f32 %v906_v16, %v499_v22  ;;  %v628_v25 = vmul.f32 %v906_v16, %v531_v23  ;;  %v645_v28 = vadd.f32 %v907_v21, %v622_v19  ;;  %v653_v29 = vadd.f32 %v907_v21, %v630_v20 }
  0xf1   : > { %v1024_v26 = vpop.f32.mrf.mxu0  ;;  %v1032_v27 = vpop.f32.mrf.mxu1 }
  0xf2   : > { %v623_v30 = vmul.f32 %v1024_v26, %v906_v16  ;;  %v631_v31 = vmul.f32 %v1032_v27, %v906_v16  ;;  %v643_v34 = vadd.f32 %v907_v21, %v620_v24  ;;  %v651_v35 = vadd.f32 %v907_v21, %v628_v25 }
  0xf3   : > { %v502_v32 = vpop.f32.mrf.mxu0  ;;  %v534_v33 = vpop.f32.mrf.mxu1  ;;  %v661_v42 = vmax.f32 %v645_v28, 0.0  ;;  %v669_v43 = vmax.f32 %v653_v29, 0.0 }
  0xf4   : > { %v621_v36 = vmul.f32 %v906_v16, %v502_v32  ;;  %v629_v37 = vmul.f32 %v906_v16, %v534_v33  ;;  %v646_v38 = vadd.f32 %v907_v21, %v623_v30  ;;  %v654_v39 = vadd.f32 %v907_v21, %v631_v31 }
  0xf5   : > { %v1027_v40 = vpop.f32.mrf.mxu0  ;;  %v1035_v41 = vpop.f32.mrf.mxu1  ;;  %v659_v52 = vmax.f32 %v643_v34, 0.0  ;;  %v667_v53 = vmax.f32 %v651_v35, 0.0 }
  0xf6   : > { %v644_v44 = vadd.f32 %v907_v21, %v621_v36  ;;  %v652_v45 = vadd.f32 %v907_v21, %v629_v37  ;;  %v662_v46 = vmax.f32 %v646_v38, 0.0  ;;  %v670_v47 = vmax.f32 %v654_v39, 0.0 }
  0xf7   : > { %v626_v48 = vmul.f32 %v1027_v40, %v906_v16  ;;  %v634_v49 = vmul.f32 %v1035_v41, %v906_v16  ;;  %v515_v50 = vpop.f32.mrf.mxu0  ;;  %v547_v51 = vpop.f32.mrf.mxu1 }
  0xf8   : > { %v660_v54 = vmax.f32 %v644_v44, 0.0  ;;  %v668_v55 = vmax.f32 %v652_v45, 0.0  ;;  %v950_v56 = vpack.c.bf16 %v662_v46, %v661_v42  ;;  %v970_v57 = vpack.c.bf16 %v670_v47, %v669_v43 }
  0xf9   : > { %v624_v58 = vmul.f32 %v906_v16, %v515_v50  ;;  %v632_v59 = vmul.f32 %v906_v16, %v547_v51  ;;  %v1028_v60 = vpop.f32.mrf.mxu0  ;;  %v1036_v61 = vpop.f32.mrf.mxu1  ;;  %v649_v0 = vadd.f32 %v907_v21, %v626_v48  ;;  %v657_v1 = vadd.f32 %v907_v21, %v634_v49 }
  0xfa   : > { %v945_v62 = vpack.c.bf16 %v660_v54, %v659_v52  ;;  %v965_v63 = vpack.c.bf16 %v668_v55, %v667_v53  ;;  %982 = vst [vmem:[%s1213_s24 + $0x8] sm:$0xff] %v950_v56   ;;  %986 = vst [vmem:[%s1213_s24 + $0x28] sm:$0xff] %v970_v57   ;;  %v627_v2 = vmul.f32 %v1028_v60, %v906_v16 }
  0xfb   : > { %v635_v3 = vmul.f32 %v1036_v61, %v906_v16  ;;  %v518_v4 = vpop.f32.mrf.mxu0  ;;  %v550_v5 = vpop.f32.mrf.mxu1  ;;  %v647_v6 = vadd.f32 %v907_v21, %v624_v58  ;;  %v655_v7 = vadd.f32 %v907_v21, %v632_v59  ;;  %v665_v14 = vmax.f32 %v649_v0, 0.0 }
  0xfc   : > { %946 = vst [vmem:[%s1213_s24] sm:$0xff] %v945_v62   ;;  %985 = vst [vmem:[%s1213_s24 + $0x20] sm:$0xff] %v965_v63   ;;  %v625_v8 = vmul.f32 %v906_v16, %v518_v4  ;;  %v633_v9 = vmul.f32 %v906_v16, %v550_v5  ;;  %v650_v10 = vadd.f32 %v907_v21, %v627_v2  ;;  %v673_v15 = vmax.f32 %v657_v1, 0.0 }
  0xfd   : > { %v658_v11 = vadd.f32 %v907_v21, %v635_v3  ;;  %v663_v19 = vmax.f32 %v647_v6, 0.0  ;;  %v671_v20 = vmax.f32 %v655_v7, 0.0 }
  0xfe   : > { %v648_v12 = vadd.f32 %v907_v21, %v625_v8  ;;  %v656_v13 = vadd.f32 %v907_v21, %v633_v9  ;;  %v666_v17 = vmax.f32 %v650_v10, 0.0 }
  0xff   : > { %v674_v18 = vmax.f32 %v658_v11, 0.0 }
 0x100   : > { %v664_v22 = vmax.f32 %v648_v12, 0.0  ;;  %v672_v23 = vmax.f32 %v656_v13, 0.0  ;;  %v960_v24 = vpack.c.bf16 %v666_v17, %v665_v14 }
 0x101   : > { %v980_v25 = vpack.c.bf16 %v674_v18, %v673_v15 }
 0x102   : > { %v955_v26 = vpack.c.bf16 %v664_v22, %v663_v19  ;;  %v975_v16 = vpack.c.bf16 %v672_v23, %v671_v20  ;;  %984 = vst [vmem:[%s1213_s24 + $0x18] sm:$0xff] %v960_v24  }
 0x103   : > { %988 = vst [vmem:[%s1213_s24 + $0x38] sm:$0xff] %v980_v25  }
 0x104   : > { %983 = vst [vmem:[%s1213_s24 + $0x10] sm:$0xff] %v955_v26   ;;  %987 = vst [vmem:[%s1213_s24 + $0x30] sm:$0xff] %v975_v16  }
 0x105 PF: > { %s14_s17 = sadd.s32 1, %s1115_s17   ;;  %s1237_s15 = smov %s1111_s16 }
 0x106   : > { %p11_p5 = scmp.ge.s32.totalorder %s14_s17, 6   ;;  %s1238_s16 = smov %s1240_s18 }
 0x108   :  { %13 = sbr.rel (!%p11_p5) target bundleno = 2 (0x2), region = 83 }

// kernel: deeplabv3plus_forward.16
= control target key start
LH: loop header
LB: loop body
LE: loop exit
PB: predicated region body
PF: predicated region fallthrough
CT: control target
= control target key end

     0   :  { %s1863_s0 = inlined_call_operand.vmem [shape: bf16[128,640], index: 0, kind: input, shape index: {}]   ;;  %s1864_s1 = inlined_call_operand.vmem [shape: bf16[640,256], index: 1, kind: input, shape index: {}]   ;;  %s1865_s2 = inlined_call_operand.vmem [shape: f32[1,256], index: 2, kind: input, shape index: {}]   ;;  %s1866_s3 = inlined_call_operand.vmem [shape: f32[1,256], index: 3, kind: input, shape index: {}]   ;;  %s1867_s4 = inlined_call_operand.vmem [shape: bf16[128,256], index: 4, kind: output, shape index: {}]  }
   0x1   :  { %1871 = sst [smem:[#allocation9_spill]] %s1863_s0 }
   0x2   :  { %1872 = sst [smem:[#allocation10_spill]] %s1864_s1 }
   0x3   :  { %s1563_s15 = smov 0   ;;  %s1565_s16 = smov 0  }
   0x4   :  { %s1567_s17 = smov 0   ;;  %s1569_s18 = smov 0  }
   0x5   :  { %s1571_s19 = smov 0   ;;  %s1573_s20 = smov 0  }
   0x6   :  { %s1575_s21 = smov 0   ;;  %s1577_s22 = smov 0  }
   0x7   :  { %s1579_s23 = smov 0   ;;  %s1581_s24 = smov 0  }
   0x8   :  { %s1583_s25 = smov 0  }
   0x9 LB: > { %1873 = sst [smem:[#allocation6_spill]] %s1531_s24  ;;  %s1162_s26 = sadd.s32 4294967295, %s1535_s25   ;;  %s1535_s25 = sphi %s1583_s25, %s14_s25   ;;  %s1531_s24 = sphi %s1581_s24, %s1883_s24   ;;  %s1527_s23 = sphi %s1579_s23, %s1891_s23   ;;  %s1523_s22 = sphi %s1577_s22, %s1881_s22   ;;  %s1519_s21 = sphi %s1575_s21, %s1890_s21   ;;  %s1515_s20 = sphi %s1573_s20, %s1889_s20   ;;  %s1511_s19 = sphi %s1571_s19, %s1888_s19   ;;  %s1507_s18 = sphi %s1569_s18, %s1887_s18   ;;  %s1503_s17 = sphi %s1567_s17, %s1886_s17   ;;  %s1499_s16 = sphi %s1565_s16, %s1885_s16   ;;  %s1495_s15 = sphi %s1563_s15, %s1884_s15  }
   0xa   : > { %s26_s27 = sadd.s32 1, %s1527_s23  ;;  %s29_s28 = sadd.s32 1, %s1531_s24 }
   0xb   : > { %p27_p0 = scmp.ge.s32.totalorder %s26_s27, 5  ;;  %s42_s29 = sadd.s32 1, %s1515_s20 }
   0xc   : > { %p49_p1 = scmp.ne.s32.totalorder %s1515_s20, %s1511_s19  ;;  %p50_p2 = scmp.eq.s32.totalorder %s1535_s25, 0 }
   0xd   : > { %s1893_s27 = smov (%p27_p0, %s26_s27), 0  ;;  %s1895_s28 = smov (!%p27_p0, %s29_s28), %s1531_s24 }
   0xe   : > { %1874 = sst [smem:[#allocation7_spill]] %s1893_s27  ;;  %s38_s30 = ssub.s32 %s1527_s23, %s1893_s27 }
   0xf   : > { %p31_p3 = scmp.ge.s32.totalorder %s1895_s28, 2  ;;  %p40_p4 = scmp.eq.s32.totalorder %s38_s30, 0 }
  0x10   : > { %p1630_p5 = por %p50_p2, %p49_p1  ;;  %s70_s6 = sadd.s32 1, %s1507_s18 }
  0x11   : > { %s1897_s28 = smov (%p31_p3, %s1895_s28), 0  ;;  %p77_p6 = scmp.ne.s32.totalorder %s1507_s18, %s1503_s17 }
  0x12   : > { %1876 = sst [smem:[#allocation8_spill]] %s1897_s28  ;;  %s66_s8 = ssub.s32 %s1531_s24, %s1897_s28 }
  0x13   : > { %s1638_s7 = scalar_select %p40_p4, %s1515_s20, %s42_s29  }
  0x14   : > { %s67_s9 = sor.u32 %s66_s8, %s38_s30  ;;  %p148_p7 = scmp.eq.s32.totalorder %s66_s8, 0 }
  0x15   : > { %p68_p8 = scmp.eq.s32.totalorder %s67_s9, 0  ;;  %p1644_p9 = por %p77_p6, %p50_p2 }
  0x16   : > { %s150_s11 = sadd.s32 1, %s1499_s16  ;;  %p160_p10 = scmp.ne.s32.totalorder %s1499_s16, %s1495_s15 }
  0x17   : > { %s1652_s12 = scalar_select %p68_p8, %s1507_s18, %s70_s6  }
  0x18   : > { %s1655_s13 = scalar_select %p148_p7, %s1499_s16, %s150_s11  }
  0x19   : > { %p161_p11 = scmp.eq.s32.totalorder %s1162_s26, 9  ;;  %p1165_p13 = scmp.ge.s32.totalorder %s1535_s25, 10 }
  0x1b   : > { %p1657_p12 = por %p161_p11, %p160_p10  ;;  %183 = sbr.rel (%p1165_p13) target bundleno = 72 (0x48), region = 16 }
  0x20   : > { %186 = sbr.rel (!%p1630_p5) target bundleno = 52 (0x34), region = 20  ;;  %s188_s29 = sand.u32 (%p1630_p5), 1, %s1515_s20  }
  0x21   : > { %s1167_s30 = sshll.u32 (%p1630_p5), %s1527_s23, 2  ;;  %s1166_s8 = sshll.u32 (%p1630_p5), %s188_s29, 6 }
  0x22   : > { %s1879_s0 = sld [smem:[#allocation9_spill]] (%p1630_p5)  ;;  %s190_s26 = scalar_lea.vmem (%p1630_p5), [#allocation3], %s1166_s8 }
  0x28   : > { %s1669_s11 = scalar_lea.vmem %s1879_s0, %s1167_s30 }
  0x29   : > { %v212_v0 = vld [vmem:[%s1669_s11] sm:$0xf]  ;;  %v214_v1 = vld [vmem:[%s1669_s11 + $0x14] sm:$0xf]  ;;  %v216_v2 = vld [vmem:[%s1669_s11 + $0x28] sm:$0xf] }
  0x2a   : > { %213 = vst [vmem:[%s190_s26] sm:$0xf] %v212_v0  ;;  %215 = vst [vmem:[%s190_s26 + $0x4] sm:$0xf] %v214_v1  ;;  %v218_v3 = vld [vmem:[%s1669_s11 + $0x3c] sm:$0xf] }
  0x2b   : > { %v220_v4 = vld [vmem:[%s1669_s11 + $0x50] sm:$0xf]  ;;  %217 = vst [vmem:[%s190_s26 + $0x8] sm:$0xf] %v216_v2  ;;  %219 = vst [vmem:[%s190_s26 + $0xc] sm:$0xf] %v218_v3 }
  0x2c   : > { %221 = vst [vmem:[%s190_s26 + $0x10] sm:$0xf] %v220_v4  ;;  %v222_v5 = vld [vmem:[%s1669_s11 + $0x64] sm:$0xf]  ;;  %v224_v6 = vld [vmem:[%s1669_s11 + $0x78] sm:$0xf] }
  0x2d   : > { %v226_v7 = vld [vmem:[%s1669_s11 + $0x8c] sm:$0xf]  ;;  %223 = vst [vmem:[%s190_s26 + $0x14] sm:$0xf] %v222_v5  ;;  %225 = vst [vmem:[%s190_s26 + $0x18] sm:$0xf] %v224_v6 }
  0x2e   : > { %227 = vst [vmem:[%s190_s26 + $0x1c] sm:$0xf] %v226_v7  ;;  %v228_v8 = vld [vmem:[%s1669_s11 + $0xa0] sm:$0xf]  ;;  %v230_v9 = vld [vmem:[%s1669_s11 + $0xb4] sm:$0xf] }
  0x2f   : > { %v232_v10 = vld [vmem:[%s1669_s11 + $0xc8] sm:$0xf]  ;;  %229 = vst [vmem:[%s190_s26 + $0x20] sm:$0xf] %v228_v8  ;;  %231 = vst [vmem:[%s190_s26 + $0x24] sm:$0xf] %v230_v9 }
  0x30   : > { %233 = vst [vmem:[%s190_s26 + $0x28] sm:$0xf] %v232_v10  ;;  %v234_v11 = vld [vmem:[%s1669_s11 + $0xdc] sm:$0xf]  ;;  %v236_v12 = vld [vmem:[%s1669_s11 + $0xf0] sm:$0xf] }
  0x31   : > { %v238_v13 = vld [vmem:[%s1669_s11 + $0x104] sm:$0xf]  ;;  %235 = vst [vmem:[%s190_s26 + $0x2c] sm:$0xf] %v234_v11  ;;  %237 = vst [vmem:[%s190_s26 + $0x30] sm:$0xf] %v236_v12 }
  0x32   : > { %239 = vst [vmem:[%s190_s26 + $0x34] sm:$0xf] %v238_v13  ;;  %v240_v14 = vld [vmem:[%s1669_s11 + $0x118] sm:$0xf]  ;;  %v242_v15 = vld [vmem:[%s1669_s11 + $0x12c] sm:$0xf] }
  0x33   : > { %241 = vst [vmem:[%s190_s26 + $0x38] sm:$0xf] %v240_v14  ;;  %243 = vst [vmem:[%s190_s26 + $0x3c] sm:$0xf] %v242_v15 }
  0x34 PF: > { %299 = sbr.rel (!%p1644_p9) target bundleno = 72 (0x48), region = 61  ;;  %s301_s5 = sand.u32 (%p1644_p9), 1, %s1507_s18  }
  0x35   : > { %s1216_s29 = sshll.u32 (%p1644_p9), %s1527_s23, 5  ;;  %s1168_s30 = sshll.u32 (%p1644_p9), %s301_s5, 6 }
  0x36   : > { %s306_s8 = sadd.s32 (%p1644_p9), %s1531_s24, %s1216_s29  ;;  %s1880_s1 = sld [smem:[#allocation10_spill]] (%p1644_p9) }
  0x37   : > { %s1171_s6 = sshll.u32 (%p1644_p9), %s306_s8, 2  ;;  %s303_s10 = scalar_lea.vmem (%p1644_p9), [#allocation4], %s1168_s30 }
  0x3c   : > { %s1695_s28 = scalar_lea.vmem %s1880_s1, %s1171_s6 }
  0x3d   : > { %v325_v16 = vld [vmem:[%s1695_s28] sm:$0xf]  ;;  %v327_v17 = vld [vmem:[%s1695_s28 + $0x8] sm:$0xf]  ;;  %v329_v18 = vld [vmem:[%s1695_s28 + $0x10] sm:$0xf] }
  0x3e   : > { %326 = vst [vmem:[%s303_s10] sm:$0xf] %v325_v16  ;;  %328 = vst [vmem:[%s303_s10 + $0x4] sm:$0xf] %v327_v17  ;;  %v331_v19 = vld [vmem:[%s1695_s28 + $0x18] sm:$0xf] }
  0x3f   : > { %330 = vst [vmem:[%s303_s10 + $0x8] sm:$0xf] %v329_v18  ;;  %v333_v20 = vld [vmem:[%s1695_s28 + $0x20] sm:$0xf]  ;;  %v335_v21 = vld [vmem:[%s1695_s28 + $0x28] sm:$0xf] }
  0x40   : > { %332 = vst [vmem:[%s303_s10 + $0xc] sm:$0xf] %v331_v19  ;;  %334 = vst [vmem:[%s303_s10 + $0x10] sm:$0xf] %v333_v20  ;;  %v337_v22 = vld [vmem:[%s1695_s28 + $0x30] sm:$0xf] }
  0x41   : > { %336 = vst [vmem:[%s303_s10 + $0x14] sm:$0xf] %v335_v21  ;;  %v339_v23 = vld [vmem:[%s1695_s28 + $0x38] sm:$0xf]  ;;  %v341_v24 = vld [vmem:[%s1695_s28 + $0x40] sm:$0xf] }
  0x42   : > { %338 = vst [vmem:[%s303_s10 + $0x18] sm:$0xf] %v337_v22  ;;  %340 = vst [vmem:[%s303_s10 + $0x1c] sm:$0xf] %v339_v23  ;;  %v343_v25 = vld [vmem:[%s1695_s28 + $0x48] sm:$0xf] }
  0x43   : > { %342 = vst [vmem:[%s303_s10 + $0x20] sm:$0xf] %v341_v24  ;;  %v345_v26 = vld [vmem:[%s1695_s28 + $0x50] sm:$0xf]  ;;  %v347_v27 = vld [vmem:[%s1695_s28 + $0x58] sm:$0xf] }
  0x44   : > { %344 = vst [vmem:[%s303_s10 + $0x24] sm:$0xf] %v343_v25  ;;  %346 = vst [vmem:[%s303_s10 + $0x28] sm:$0xf] %v345_v26  ;;  %v349_v28 = vld [vmem:[%s1695_s28 + $0x60] sm:$0xf] }
  0x45   : > { %348 = vst [vmem:[%s303_s10 + $0x2c] sm:$0xf] %v347_v27  ;;  %v351_v29 = vld [vmem:[%s1695_s28 + $0x68] sm:$0xf]  ;;  %v353_v30 = vld [vmem:[%s1695_s28 + $0x70] sm:$0xf] }
  0x46   : > { %350 = vst [vmem:[%s303_s10 + $0x30] sm:$0xf] %v349_v28  ;;  %352 = vst [vmem:[%s303_s10 + $0x34] sm:$0xf] %v351_v29  ;;  %v355_v31 = vld [vmem:[%s1695_s28 + $0x78] sm:$0xf] }
  0x47   : > { %354 = vst [vmem:[%s303_s10 + $0x38] sm:$0xf] %v353_v30  ;;  %356 = vst [vmem:[%s303_s10 + $0x3c] sm:$0xf] %v355_v31 }
  0x48 PF: > { %p1172_p0 = scmp.ge.s32.totalorder %s1535_s25, 1  ;;  %p423_p1 = scmp.lt.s32.totalorder %s1535_s25, 11 }
  0x4a   : > { %p424_p2 = pnand %p1172_p0, %p423_p1 }
  0x4b   : > { %s430_s0 = sand.u32 (!%p424_p2), 1, %s1511_s19   ;;  %s437_s11 = sand.u32 (!%p424_p2), 1, %s1503_s17  }
  0x4c   : > { %427 = sbr.rel (%p424_p2) target bundleno = 372 (0x174), region = 110  ;;  %s1173_s26 = sshll.u32 (!%p424_p2), %s430_s0, 6 }
  0x4d   : > { %s1174_s5 = sshll.u32 (!%p424_p2), %s437_s11, 6  ;;  %s468_s29 = sand.u32 (!%p424_p2), 1, %s1495_s15  }
  0x4e   : > { %p473_p3 = scmp.lt.s32.totalorder (!%p424_p2), %s1523_s22, 1  ;;  %s1175_s28 = sshll.u32 (!%p424_p2), %s468_s29, 6 }
  0x4f   : > { %s1730_s24 = scalar_lea.vmem (!%p424_p2), [#allocation3], %s1173_s26  ;;  %s1732_s17 = scalar_lea.vmem (!%p424_p2), [#allocation4], %s1174_s5 }
  0x50   : > { %s1734_s19 = scalar_lea.vmem (!%p424_p2), [#allocation5], %s1175_s28  ;;  %p1176_p4 = scmp.ne.s32.totalorder (!%p424_p2), %s1519_s21, 0 }
  0x51   : > { %s1720_s30 = scalar_select %p473_p3, %s1523_s22, 1 }
  0x52   : > { %484 = sbr.rel (%p1176_p4) target bundleno = 96 (0x60), region = 122 }
  0x53   : > { %s475_s9 = scalar_lea.vmem %s1865_s2, %s1720_s30  ;;  %s478_s27 = scalar_lea.vmem %s1866_s3, %s1720_s30 }
  0x57   : > { %v1537_v32 = vmov 0.0  }
  0x58   : > { %485 = vst [vmem:[#allocation2 + $0x30] sm:$0xff] %v1537_v32  ;;  %486 = vst [vmem:[#allocation2] sm:$0xff] %v1537_v32 }
  0x59   : > { %487 = vst [vmem:[#allocation2 + $0x58] sm:$0xff] %v1537_v32  ;;  %488 = vst [vmem:[#allocation2 + $0x18] sm:$0xff] %v1537_v32 }
  0x5a   : > { %489 = vst [vmem:[#allocation2 + $0x50] sm:$0xff] %v1537_v32  ;;  %490 = vst [vmem:[#allocation2 + $0x68] sm:$0xff] %v1537_v32 }
  0x5b   : > { %491 = vst [vmem:[#allocation2 + $0x8] sm:$0xff] %v1537_v32  ;;  %492 = vst [vmem:[#allocation2 + $0x48] sm:$0xff] %v1537_v32 }
  0x5c   : > { %493 = vst [vmem:[#allocation2 + $0x40] sm:$0xff] %v1537_v32  ;;  %494 = vst [vmem:[#allocation2 + $0x20] sm:$0xff] %v1537_v32 }
  0x5d   : > { %495 = vst [vmem:[#allocation2 + $0x10] sm:$0xff] %v1537_v32  ;;  %496 = vst [vmem:[#allocation2 + $0x38] sm:$0xff] %v1537_v32 }
  0x5e   : > { %497 = vst [vmem:[#allocation2 + $0x60] sm:$0xff] %v1537_v32  ;;  %498 = vst [vmem:[#allocation2 + $0x70] sm:$0xff] %v1537_v32 }
  0x5f   : > { %499 = vst [vmem:[#allocation2 + $0x78] sm:$0xff] %v1537_v32  ;;  %500 = vst [vmem:[#allocation2 + $0x28] sm:$0xff] %v1537_v32 }
  0x60 PF: > { %v1433_v33 = vld [vmem:[%s1732_s17 + $0x38] sm:$0xff]   ;;  %v1434_v34 = vld [vmem:[%s1732_s17 + $0x30] sm:$0xff]   ;;  %v1435_v35 = vld [vmem:[%s1732_s17 + $0x28] sm:$0xff]   ;;  %p1193_p5 = scmp.ne.s32.totalorder %s1519_s21, 4 }
  0x61   : > { %1296 = vmatprep.subr.bf16.mxu0 %v1433_v33  ;;  %1328 = vmatprep.subr.bf16.mxu1 %v1433_v33  ;;  %v1436_v36 = vld [vmem:[%s1732_s17 + $0x20] sm:$0xff]   ;;  %v1437_v39 = vld [vmem:[%s1732_s17 + $0x18] sm:$0xff]   ;;  %v1438_v40 = vld [vmem:[%s1732_s17 + $0x10] sm:$0xff]  }
  0x62   : > { %1297 = vmatpush3.bf16.msra.mxu0 %v1433_v33  ;;  %1336 = vmatpush3.bf16.msra.mxu1 %v1433_v33  ;;  %v1441_v37 = vld [vmem:[%s1730_s24] sm:$0xff]   ;;  %v1439_v41 = vld [vmem:[%s1732_s17 + $0x8] sm:$0xff]   ;;  %v1445_v45 = vld [vmem:[%s1730_s24 + $0x10] sm:$0xff]  }
  0x63   : > { %1298 = vmatprep.subr.bf16.mxu0 %v1434_v34  ;;  %1329 = vmatprep.subr.bf16.mxu1 %v1434_v34  ;;  %v1442_v38 = vld [vmem:[%s1730_s24 + $0x20] sm:$0xff]   ;;  %v1443_v43 = vld [vmem:[%s1730_s24 + $0x8] sm:$0xff]   ;;  %v1446_v46 = vld [vmem:[%s1730_s24 + $0x30] sm:$0xff]  }
  0x64   : > { %1312 = vmatprep.mubr.bf16.mxu0 %v1441_v37  ;;  %1320 = vmatprep.mubr.bf16.mxu1 %v1442_v38  ;;  %v1440_v42 = vld [vmem:[%s1732_s17] sm:$0xff]   ;;  %v1444_v44 = vld [vmem:[%s1730_s24 + $0x28] sm:$0xff]   ;;  %v1447_v47 = vld [vmem:[%s1730_s24 + $0x18] sm:$0xff]  }
  0x65   : > { %v1448_v48 = vld [vmem:[%s1730_s24 + $0x38] sm:$0xff]   ;;  %v511_v50 = vld [vmem:[#allocation2 + $0x10] sm:$0xff]  ;;  %v509_v54 = vld [vmem:[#allocation2 + $0x40] sm:$0xff] }
  0x66   : > { %1299 = vmatpush3.bf16.msra.mxu0 %v1434_v34  ;;  %1337 = vmatpush3.bf16.msra.mxu1 %v1434_v34  ;;  %v503_v49 = vld [vmem:[#allocation2 + $0x58] sm:$0xff]  ;;  %v501_v53 = vld [vmem:[#allocation2 + $0x30] sm:$0xff]  ;;  %v502_v1 = vld [vmem:[#allocation2] sm:$0xff] }
  0x67   : > { %1300 = vmatprep.subr.bf16.mxu0 %v1435_v35  ;;  %1330 = vmatprep.subr.bf16.mxu1 %v1435_v35  ;;  %v504_v59 = vld [vmem:[#allocation2 + $0x18] sm:$0xff]  ;;  %v510_v2 = vld [vmem:[#allocation2 + $0x20] sm:$0xff]  ;;  %v507_v7 = vld [vmem:[#allocation2 + $0x8] sm:$0xff] }
  0x68   : > { %v512_v60 = vld [vmem:[#allocation2 + $0x38] sm:$0xff]  ;;  %v505_v13 = vld [vmem:[#allocation2 + $0x50] sm:$0xff]  ;;  %v513_v14 = vld [vmem:[#allocation2 + $0x60] sm:$0xff] }
  0x69   : > { %v515_v8 = vld [vmem:[#allocation2 + $0x78] sm:$0xff]  ;;  %v508_v19 = vld [vmem:[#allocation2 + $0x48] sm:$0xff]  ;;  %v514_v26 = vld [vmem:[#allocation2 + $0x70] sm:$0xff] }
  0x6a   : > { %1301 = vmatpush3.bf16.msra.mxu0 %v1435_v35  ;;  %1338 = vmatpush3.bf16.msra.mxu1 %v1435_v35  ;;  %v516_v20 = vld [vmem:[#allocation2 + $0x28] sm:$0xff] }
  0x6b   : > { %1302 = vmatprep.subr.bf16.mxu0 %v1436_v36  ;;  %1331 = vmatprep.subr.bf16.mxu1 %v1436_v36  ;;  %v506_v25 = vld [vmem:[#allocation2 + $0x68] sm:$0xff] }
  0x6e   : > { %1303 = vmatpush3.bf16.msra.mxu0 %v1436_v36  ;;  %1339 = vmatpush3.bf16.msra.mxu1 %v1436_v36 }
  0x6f   : > { %1304 = vmatprep.subr.bf16.mxu0 %v1437_v39  ;;  %1332 = vmatprep.subr.bf16.mxu1 %v1437_v39 }
  0x72   : > { %1305 = vmatpush3.bf16.msra.mxu0 %v1437_v39  ;;  %1340 = vmatpush3.bf16.msra.mxu1 %v1437_v39 }
  0x73   : > { %1306 = vmatprep.subr.bf16.mxu0 %v1438_v40  ;;  %1333 = vmatprep.subr.bf16.mxu1 %v1438_v40 }
  0x76   : > { %1307 = vmatpush3.bf16.msra.mxu0 %v1438_v40  ;;  %1341 = vmatpush3.bf16.msra.mxu1 %v1438_v40 }
  0x77   : > { %1308 = vmatprep.subr.bf16.mxu0 %v1439_v41  ;;  %1334 = vmatprep.subr.bf16.mxu1 %v1439_v41 }
  0x7a   : > { %1309 = vmatpush3.bf16.msra.mxu0 %v1439_v41  ;;  %1342 = vmatpush3.bf16.msra.mxu1 %v1439_v41 }
  0x7b   : > { %1310 = vmatprep.subr.bf16.mxu0 %v1440_v42  ;;  %1335 = vmatprep.subr.bf16.mxu1 %v1440_v42 }
  0x7e   : > { %1311 = vmatpush3.bf16.msra.mxu0 %v1440_v42  ;;  %1343 = vmatpush3.bf16.msra.mxu1 %v1440_v42 }
  0x81   : > { %1313 = vmatmul.mubr.bf16.vlgmr.msra.gmra.mxu0 %v1443_v43  ;;  %1321 = vmatmul.mubr.bf16.vlgmr.msra.gmra.mxu1 %v1444_v44 }
  0x82   : > { %1316 = vmatprep.mubr.bf16.mxu0 %v1445_v45  ;;  %1324 = vmatprep.mubr.bf16.mxu1 %v1446_v46 }
  0x89   : > { %1317 = vmatmul.mubr.bf16.gmra.mxu0 %v1447_v47  ;;  %1325 = vmatmul.mubr.bf16.gmra.mxu1 %v1448_v48 }
 0x141   : > { %v1314_v51 = vpop.f32.mrf.mxu0  ;;  %v1322_v52 = vpop.f32.mrf.mxu1 }
 0x142   : > { %v744_v55 = vadd.f32 %v1314_v51, %v503_v49  ;;  %v752_v56 = vadd.f32 %v1322_v52, %v511_v50 }
 0x143   : > { %v679_v57 = vpop.f32.mrf.mxu0  ;;  %v711_v58 = vpop.f32.mrf.mxu1 }
 0x144   : > { %760 = vst [vmem:[#allocation2 + $0x58] sm:$0xff] %v744_v55  ;;  %768 = vst [vmem:[#allocation2 + $0x10] sm:$0xff] %v752_v56  ;;  %v742_v61 = vadd.f32 %v679_v57, %v501_v53  ;;  %v750_v62 = vadd.f32 %v711_v58, %v509_v54 }
 0x145   : > { %v1315_v63 = vpop.f32.mrf.mxu0  ;;  %v1323_v0 = vpop.f32.mrf.mxu1 }
 0x146   : > { %758 = vst [vmem:[#allocation2 + $0x30] sm:$0xff] %v742_v61  ;;  %766 = vst [vmem:[#allocation2 + $0x40] sm:$0xff] %v750_v62  ;;  %v745_v3 = vadd.f32 %v1315_v63, %v504_v59  ;;  %v753_v4 = vadd.f32 %v1323_v0, %v512_v60 }
 0x147   : > { %v682_v5 = vpop.f32.mrf.mxu0  ;;  %v714_v6 = vpop.f32.mrf.mxu1 }
 0x148   : > { %761 = vst [vmem:[#allocation2 + $0x18] sm:$0xff] %v745_v3  ;;  %769 = vst [vmem:[#allocation2 + $0x38] sm:$0xff] %v753_v4  ;;  %v743_v9 = vadd.f32 %v682_v5, %v502_v1  ;;  %v751_v10 = vadd.f32 %v714_v6, %v510_v2 }
 0x149   : > { %v1318_v11 = vpop.f32.mrf.mxu0  ;;  %v1326_v12 = vpop.f32.mrf.mxu1 }
 0x14a   : > { %759 = vst [vmem:[#allocation2] sm:$0xff] %v743_v9  ;;  %767 = vst [vmem:[#allocation2 + $0x20] sm:$0xff] %v751_v10  ;;  %v748_v15 = vadd.f32 %v1318_v11, %v507_v7  ;;  %v756_v16 = vadd.f32 %v1326_v12, %v515_v8 }
 0x14b   : > { %v695_v17 = vpop.f32.mrf.mxu0  ;;  %v727_v18 = vpop.f32.mrf.mxu1 }
 0x14c   : > { %764 = vst [vmem:[#allocation2 + $0x8] sm:$0xff] %v748_v15  ;;  %772 = vst [vmem:[#allocation2 + $0x78] sm:$0xff] %v756_v16  ;;  %v746_v21 = vadd.f32 %v695_v17, %v505_v13  ;;  %v754_v22 = vadd.f32 %v727_v18, %v513_v14 }
 0x14d   : > { %v1319_v23 = vpop.f32.mrf.mxu0  ;;  %v1327_v24 = vpop.f32.mrf.mxu1 }
 0x14e   : > { %762 = vst [vmem:[#allocation2 + $0x50] sm:$0xff] %v746_v21  ;;  %770 = vst [vmem:[#allocation2 + $0x60] sm:$0xff] %v754_v22  ;;  %v749_v27 = vadd.f32 %v1319_v23, %v508_v19  ;;  %v757_v28 = vadd.f32 %v1327_v24, %v516_v20  ;;  %777 = sbr.rel (%p1193_p5) target bundleno = 360 (0x168), region = 126 }
 0x14f   : > { %v698_v29 = vpop.f32.mrf.mxu0  ;;  %v730_v30 = vpop.f32.mrf.mxu1 }
 0x150   : > { %765 = vst [vmem:[#allocation2 + $0x48] sm:$0xff] %v749_v27  ;;  %773 = vst [vmem:[#allocation2 + $0x28] sm:$0xff] %v757_v28  ;;  %v747_v31 = vadd.f32 %v698_v29, %v506_v25  ;;  %v755_v32 = vadd.f32 %v730_v30, %v514_v26 }
 0x152   : > { %763 = vst [vmem:[#allocation2 + $0x68] sm:$0xff] %v747_v31  ;;  %771 = vst [vmem:[#allocation2 + $0x70] sm:$0xff] %v755_v32 }
 0x153   : > { %v778_v33 = vld [vmem:[#allocation2 + $0x30] sm:$0xff]  ;;  %v779_v34 = vld [vmem:[#allocation2] sm:$0xff]  ;;  %v780_v39 = vld [vmem:[#allocation2 + $0x58] sm:$0xff] }
 0x154   : > { %v1759_v35 = vld [vmem:[%s475_s9] ss:$0 sm:$0xff]  ;;  %v781_v40 = vld [vmem:[#allocation2 + $0x18] sm:$0xff]  ;;  %v784_v45 = vld [vmem:[#allocation2 + $0x8] sm:$0xff] }
 0x155   : > { %v801_v36 = vmul.f32 %v1759_v35, %v778_v33  ;;  %v802_v37 = vmul.f32 %v1759_v35, %v779_v34  ;;  %v1768_v38 = vld [vmem:[%s478_s27] ss:$0 sm:$0xff]  ;;  %v803_v41 = vmul.f32 %v1759_v35, %v780_v39  ;;  %v804_v42 = vmul.f32 %v1759_v35, %v781_v40  ;;  %v782_v43 = vld [vmem:[#allocation2 + $0x50] sm:$0xff]  ;;  %v789_v2 = vld [vmem:[#allocation2 + $0x38] sm:$0xff] }
 0x156   : > { %v805_v48 = vmul.f32 %v1759_v35, %v782_v43  ;;  %v807_v53 = vmul.f32 %v1759_v35, %v784_v45  ;;  %v786_v55 = vld [vmem:[#allocation2 + $0x40] sm:$0xff]  ;;  %v788_v1 = vld [vmem:[#allocation2 + $0x10] sm:$0xff]  ;;  %v792_v13 = vld [vmem:[#allocation2 + $0x78] sm:$0xff]  ;;  %v812_v17 = vmul.f32 %v1759_v35, %v789_v2 }
 0x157   : > { %v824_v46 = vadd.f32 %v1768_v38, %v801_v36  ;;  %v825_v47 = vadd.f32 %v1768_v38, %v802_v37  ;;  %v785_v50 = vld [vmem:[#allocation2 + $0x48] sm:$0xff]  ;;  %v826_v51 = vadd.f32 %v1768_v38, %v803_v41  ;;  %v827_v52 = vadd.f32 %v1768_v38, %v804_v42  ;;  %v787_v60 = vld [vmem:[#allocation2 + $0x20] sm:$0xff] }
 0x158   : > { %v808_v54 = vmul.f32 %v1759_v35, %v785_v50  ;;  %v828_v58 = vadd.f32 %v1768_v38, %v805_v48  ;;  %v830_v63 = vadd.f32 %v1768_v38, %v807_v53  ;;  %v809_v6 = vmul.f32 %v1759_v35, %v786_v55  ;;  %v790_v7 = vld [vmem:[#allocation2 + $0x60] sm:$0xff]  ;;  %v793_v18 = vld [vmem:[#allocation2 + $0x28] sm:$0xff] }
 0x159   : > { %v783_v44 = vld [vmem:[#allocation2 + $0x68] sm:$0xff]  ;;  %v840_v56 = vmax.f32 %v824_v46, 0.0  ;;  %v841_v57 = vmax.f32 %v825_v47, 0.0  ;;  %v842_v61 = vmax.f32 %v826_v51, 0.0  ;;  %v843_v62 = vmax.f32 %v827_v52, 0.0  ;;  %v791_v8 = vld [vmem:[#allocation2 + $0x70] sm:$0xff] }
 0x15a   : > { %v806_v49 = vmul.f32 %v1759_v35, %v783_v44  ;;  %v831_v0 = vadd.f32 %v1768_v38, %v808_v54  ;;  %v844_v4 = vmax.f32 %v828_v58, 0.0  ;;  %v846_v10 = vmax.f32 %v830_v63, 0.0 }
 0x15b   : > { %v1236_v3 = vpack.c.bf16 %v841_v57, %v840_v56  ;;  %v1241_v9 = vpack.c.bf16 %v843_v62, %v842_v61  ;;  %v810_v12 = vmul.f32 %v1759_v35, %v787_v60  ;;  %v832_v15 = vadd.f32 %v1768_v38, %v809_v6 }
 0x15c   : > { %v829_v59 = vadd.f32 %v1768_v38, %v806_v49  ;;  %v847_v11 = vmax.f32 %v831_v0, 0.0  ;;  %v811_v16 = vmul.f32 %v1759_v35, %v788_v1  ;;  %v813_v21 = vmul.f32 %v1759_v35, %v790_v7 }
 0x15d   : > { %1237 = vst [vmem:[%s1734_s19] sm:$0xff] %v1236_v3   ;;  %1273 = vst [vmem:[%s1734_s19 + $0x8] sm:$0xff] %v1241_v9   ;;  %v833_v20 = vadd.f32 %v1768_v38, %v810_v12  ;;  %v814_v22 = vmul.f32 %v1759_v35, %v791_v8  ;;  %v848_v23 = vmax.f32 %v832_v15, 0.0  ;;  %v835_v25 = vadd.f32 %v1768_v38, %v812_v17 }
 0x15e   : > { %v845_v5 = vmax.f32 %v829_v59, 0.0  ;;  %v1251_v19 = vpack.c.bf16 %v847_v11, %v846_v10  ;;  %v834_v24 = vadd.f32 %v1768_v38, %v811_v16  ;;  %v815_v26 = vmul.f32 %v1759_v35, %v792_v13 }
 0x15f   : > { %v849_v27 = vmax.f32 %v833_v20, 0.0  ;;  %v836_v28 = vadd.f32 %v1768_v38, %v813_v21  ;;  %v837_v29 = vadd.f32 %v1768_v38, %v814_v22  ;;  %v816_v30 = vmul.f32 %v1759_v35, %v793_v18 }
 0x160   : > { %v1246_v14 = vpack.c.bf16 %v845_v5, %v844_v4  ;;  %1275 = vst [vmem:[%s1734_s19 + $0x18] sm:$0xff] %v1251_v19   ;;  %v850_v31 = vmax.f32 %v834_v24, 0.0  ;;  %v851_v32 = vmax.f32 %v835_v25, 0.0  ;;  %v838_v33 = vadd.f32 %v1768_v38, %v815_v26 }
 0x161   : > { %v1256_v34 = vpack.c.bf16 %v849_v27, %v848_v23  ;;  %v852_v36 = vmax.f32 %v836_v28, 0.0  ;;  %v853_v37 = vmax.f32 %v837_v29, 0.0  ;;  %v839_v39 = vadd.f32 %v1768_v38, %v816_v30 }
 0x162   : > { %1274 = vst [vmem:[%s1734_s19 + $0x10] sm:$0xff] %v1246_v14   ;;  %v1261_v40 = vpack.c.bf16 %v851_v32, %v850_v31  ;;  %v854_v41 = vmax.f32 %v838_v33, 0.0 }
 0x163   : > { %1276 = vst [vmem:[%s1734_s19 + $0x20] sm:$0xff] %v1256_v34   ;;  %v1266_v42 = vpack.c.bf16 %v853_v37, %v852_v36  ;;  %v855_v43 = vmax.f32 %v839_v39, 0.0 }
 0x164   : > { %1277 = vst [vmem:[%s1734_s19 + $0x28] sm:$0xff] %v1261_v40  }
 0x165   : > { %1278 = vst [vmem:[%s1734_s19 + $0x30] sm:$0xff] %v1266_v42   ;;  %v1271_v44 = vpack.c.bf16 %v855_v43, %v854_v41 }
 0x167   : > { %1279 = vst [vmem:[%s1734_s19 + $0x38] sm:$0xff] %v1271_v44  }
 0x168 PF: > { %942 = sbr.rel (!%p1657_p12) target bundleno = 372 (0x174), region = 130  ;;  %s1213_s21 = sshll.u32 (%p1657_p12), %s1523_s22, 2  ;;  %v964_v35 = vld [vmem:[%s1734_s19] sm:$0xf] (%p1657_p12)  ;;  %v966_v38 = vld [vmem:[%s1734_s19 + $0x4] sm:$0xf] (%p1657_p12) }
 0x169   : > { %s947_s26 = scalar_lea.vmem (%p1657_p12), %s1867_s4, %s1213_s21  ;;  %v968_v45 = vld [vmem:[%s1734_s19 + $0x8] sm:$0xf] (%p1657_p12)  ;;  %v970_v46 = vld [vmem:[%s1734_s19 + $0xc] sm:$0xf] (%p1657_p12)  ;;  %v972_v47 = vld [vmem:[%s1734_s19 + $0x10] sm:$0xf] (%p1657_p12) }
 0x16a   : > { %965 = vst [vmem:[%s947_s26] sm:$0xf] (%p1657_p12), %v964_v35  ;;  %967 = vst [vmem:[%s947_s26 + $0x8] sm:$0xf] (%p1657_p12), %v966_v38  ;;  %v974_v48 = vld [vmem:[%s1734_s19 + $0x14] sm:$0xf] (%p1657_p12) }
 0x16b   : > { %969 = vst [vmem:[%s947_s26 + $0x10] sm:$0xf] (%p1657_p12), %v968_v45  ;;  %971 = vst [vmem:[%s947_s26 + $0x18] sm:$0xf] (%p1657_p12), %v970_v46  ;;  %v976_v49 = vld [vmem:[%s1734_s19 + $0x18] sm:$0xf] (%p1657_p12) }
 0x16c   : > { %973 = vst [vmem:[%s947_s26 + $0x20] sm:$0xf] (%p1657_p12), %v972_v47  ;;  %v978_v50 = vld [vmem:[%s1734_s19 + $0x1c] sm:$0xf] (%p1657_p12)  ;;  %975 = vst [vmem:[%s947_s26 + $0x28] sm:$0xf] (%p1657_p12), %v974_v48 }
 0x16d   : > { %977 = vst [vmem:[%s947_s26 + $0x30] sm:$0xf] %v976_v49  ;;  %979 = vst [vmem:[%s947_s26 + $0x38] sm:$0xf] %v978_v50  ;;  %v980_v51 = vld [vmem:[%s1734_s19 + $0x20] sm:$0xf] }
 0x16e   : > { %v982_v52 = vld [vmem:[%s1734_s19 + $0x24] sm:$0xf]  ;;  %v984_v53 = vld [vmem:[%s1734_s19 + $0x28] sm:$0xf]  ;;  %981 = vst [vmem:[%s947_s26 + $0x40] sm:$0xf] %v980_v51 }
 0x16f   : > { %983 = vst [vmem:[%s947_s26 + $0x48] sm:$0xf] %v982_v52  ;;  %985 = vst [vmem:[%s947_s26 + $0x50] sm:$0xf] %v984_v53  ;;  %v986_v54 = vld [vmem:[%s1734_s19 + $0x2c] sm:$0xf] }
 0x170   : > { %v988_v55 = vld [vmem:[%s1734_s19 + $0x30] sm:$0xf]  ;;  %v990_v56 = vld [vmem:[%s1734_s19 + $0x34] sm:$0xf]  ;;  %987 = vst [vmem:[%s947_s26 + $0x58] sm:$0xf] %v986_v54 }
 0x171   : > { %989 = vst [vmem:[%s947_s26 + $0x60] sm:$0xf] %v988_v55  ;;  %991 = vst [vmem:[%s947_s26 + $0x68] sm:$0xf] %v990_v56  ;;  %v992_v57 = vld [vmem:[%s1734_s19 + $0x38] sm:$0xf] }
 0x172   : > { %v994_v58 = vld [vmem:[%s1734_s19 + $0x3c] sm:$0xf]  ;;  %993 = vst [vmem:[%s947_s26 + $0x70] sm:$0xf] %v992_v57 }
 0x173   : > { %995 = vst [vmem:[%s947_s26 + $0x78] sm:$0xf] %v994_v58 }
 0x174 PF: > { %s14_s25 = sadd.s32 1, %s1535_s25   ;;  %s1881_s22 = sld [smem:[#allocation6_spill]] }
 0x175   : > { %p11_p6 = scmp.ge.s32.totalorder %s14_s25, 12   ;;  %s1882_s14 = sld [smem:[#allocation7_spill]] }
 0x176   : > { %s1883_s24 = sld [smem:[#allocation8_spill]]  ;;  %s1884_s15 = smov %s1499_s16 }
 0x177   : > { %s1885_s16 = smov %s1655_s13  ;;  %s1886_s17 = smov %s1507_s18 }
 0x178   : > { %s1887_s18 = smov %s1652_s12  ;;  %s1888_s19 = smov %s1515_s20 }
 0x179   : > { %s1889_s20 = smov %s1638_s7  ;;  %s1890_s21 = smov %s1527_s23 }
 0x17a   :  { %13 = sbr.rel (!%p11_p6) target bundleno = 9 (0x9), region = 216 }
 0x17b   : > { %s1891_s23 = smov %s1882_s14 }

// kernel: deeplabv3plus_forward.17
= control target key start
LH: loop header
LB: loop body
LE: loop exit
PB: predicated region body
PF: predicated region fallthrough
CT: control target
= control target key end

     0   :  { %s1428_s0 = inlined_call_operand.vmem [shape: bf16[32,2304], index: 0, kind: input, shape index: {}]   ;;  %s1429_s1 = inlined_call_operand.hbm [shape: bf16[2304,2048], index: 1, kind: input, shape index: {}]   ;;  %s1430_s2 = inlined_call_operand.vmem [shape: f32[1,2048], index: 2, kind: input, shape index: {}]   ;;  %s1431_s3 = inlined_call_operand.vmem [shape: f32[1,2048], index: 3, kind: input, shape index: {}]   ;;  %s1432_s4 = inlined_call_operand.vmem [shape: bf16[32,2048], index: 4, kind: output, shape index: {}]  }
   0x1   :  { %1437 = sst [smem:[#allocation15_spill]] %s1428_s0 }
   0x2   :  { %9 = vsyncpa [#allocation5], 0 }
   0x3   :  { %11 = vsyncpa [#allocation5 + $0x1], 0  ;;  %s1190_s15 = smov 0   ;;  %s1192_s16 = smov 0  }
   0x4   :  { %s1194_s17 = smov 0   ;;  %s1196_s18 = smov 0  }
   0x5   :  { %s1198_s19 = smov 0   ;;  %s1200_s20 = smov 0  }
   0x6   :  { %s1202_s21 = smov 0   ;;  %s1204_s22 = smov 0  }
   0x7   :  { %s1206_s23 = smov 0   ;;  %s1208_s24 = smov 0  }
   0x8   :  { %s1210_s25 = smov 0   ;;  %s1212_s26 = smov 0  }
   0x9 LB: > { %1438 = sst [smem:[#allocation8_spill]] %s1138_s21  ;;  %s802_s27 = sadd.s32 4294967295, %s1158_s26   ;;  %s1158_s26 = sphi %s1212_s26, %s17_s26   ;;  %s1154_s25 = sphi %s1210_s25, %s1463_s25   ;;  %s1150_s24 = sphi %s1208_s24, %s1455_s24   ;;  %s1146_s23 = sphi %s1206_s23, %s1462_s23   ;;  %s1142_s22 = sphi %s1204_s22, %s1454_s22   ;;  %s1138_s21 = sphi %s1202_s21, %s1453_s21   ;;  %s1134_s20 = sphi %s1200_s20, %s1452_s20   ;;  %s1130_s19 = sphi %s1198_s19, %s1461_s19   ;;  %s1126_s18 = sphi %s1196_s18, %s1460_s18   ;;  %s1122_s17 = sphi %s1194_s17, %s1459_s17   ;;  %s1118_s16 = sphi %s1192_s16, %s1458_s16   ;;  %s1114_s15 = sphi %s1190_s15, %s1457_s15  }
   0xa   : > { %1439 = sst [smem:[#allocation9_spill]] %s1150_s24  ;;  %s29_s28 = sadd.s32 1, %s1150_s24 }
   0xb   : > { %p30_p0 = scmp.ge.s32.totalorder %s29_s28, 9  ;;  %s32_s29 = sadd.s32 1, %s1154_s25 }
   0xc   : > { %s45_s30 = sadd.s32 1, %s1138_s21  ;;  %p52_p1 = scmp.ne.s32.totalorder %s1138_s21, %s1134_s20 }
   0xd   : > { %s1465_s28 = smov (%p30_p0, %s29_s28), 0  ;;  %s1467_s29 = smov (!%p30_p0, %s32_s29), %s1154_s25 }
   0xe   : > { %1440 = sst [smem:[#allocation10_spill]] %s1465_s28  ;;  %s41_s5 = ssub.s32 %s1150_s24, %s1465_s28 }
   0xf   : > { %p53_p2 = scmp.eq.s32.totalorder %s1158_s26, 0  ;;  %p34_p3 = scmp.ge.s32.totalorder %s1467_s29, 16 }
  0x10   : > { %p43_p4 = scmp.eq.s32.totalorder %s41_s5, 0  ;;  %s73_s7 = sadd.s32 1, %s1130_s19 }
  0x11   : > { %p1262_p5 = por %p53_p2, %p52_p1  ;;  %s1469_s29 = smov (%p34_p3, %s1467_s29), 0 }
  0x12   : > { %1442 = sst [smem:[#allocation11_spill]] %s1469_s29  ;;  %s69_s9 = ssub.s32 %s1154_s25, %s1469_s29 }
  0x13   : > { %s1270_s8 = scalar_select %p43_p4, %s1138_s21, %s45_s30  }
  0x14   : > { %p80_p6 = scmp.ne.s32.totalorder %s1130_s19, %s1126_s18  ;;  %s70_s10 = sor.u32 %s69_s9, %s41_s5 }
  0x15   : > { %1443 = sst [smem:[#allocation12_spill]] %s1270_s8  ;;  %p86_p7 = scmp.ne.s32.totalorder %s1126_s18, %s1122_s17 }
  0x16   : > { %p71_p8 = scmp.eq.s32.totalorder %s70_s10, 0  ;;  %p1278_p9 = por %p80_p6, %p53_p2 }
  0x17   : > { %p87_p10 = scmp.eq.s32.totalorder %s802_s27, 0  ;;  %p151_p11 = scmp.eq.s32.totalorder %s69_s9, 0 }
  0x18   : > { %s1285_s12 = scalar_select %p71_p8, %s1130_s19, %s73_s7  }
  0x19   : > { %p1287_p12 = por %p87_p10, %p86_p7  ;;  %s153_s14 = sadd.s32 1, %s1118_s16 }
  0x1a   : > { %1445 = sst [smem:[#allocation13_spill]] %s1285_s12  ;;  %p163_p13 = scmp.ne.s32.totalorder %s1118_s16, %s1114_s15 }
  0x1b   : > { %s1293_s30 = scalar_select %p151_p11, %s1118_s16, %s153_s14  }
  0x1c   : > { %p164_p0 = scmp.eq.s32.totalorder %s802_s27, 143  ;;  %p805_p2 = scmp.ge.s32.totalorder %s1158_s26, 144 }
  0x1d   : > { %1447 = sst [smem:[#allocation14_spill]] %s1293_s30 }
  0x1e   : > { %p1299_p1 = por %p164_p0, %p163_p13  ;;  %186 = sbr.rel (%p805_p2) target bundleno = 65 (0x41), region = 16 }
  0x23   : > { %189 = sbr.rel (!%p1262_p5) target bundleno = 47 (0x2f), region = 20  ;;  %s191_s5 = sand.u32 (%p1262_p5), 1, %s1138_s21  }
  0x24   : > { %s849_s7 = sshll.u32 (%p1262_p5), %s1150_s24, 3  ;;  %s806_s9 = sshll.u32 (%p1262_p5), %s191_s5, 5 }
  0x25   : > { %s1449_s0 = sld [smem:[#allocation15_spill]] (%p1262_p5)  ;;  %s193_s27 = scalar_lea.vmem (%p1262_p5), [#allocation3], %s806_s9 }
  0x2b   : > { %s199_s29 = scalar_lea.vmem %s1449_s0, %s849_s7 }
  0x2c   : > { %v234_v0 = vld [vmem:[%s199_s29] sm:$0xff]  ;;  %v236_v1 = vld [vmem:[%s199_s29 + $0x48] sm:$0xff]  ;;  %v238_v2 = vld [vmem:[%s199_s29 + $0x90] sm:$0xff] }
  0x2d   : > { %235 = vst [vmem:[%s193_s27] sm:$0xff] %v234_v0  ;;  %237 = vst [vmem:[%s193_s27 + $0x8] sm:$0xff] %v236_v1  ;;  %v240_v3 = vld [vmem:[%s199_s29 + $0xd8] sm:$0xff] }
  0x2e   : > { %239 = vst [vmem:[%s193_s27 + $0x10] sm:$0xff] %v238_v2  ;;  %241 = vst [vmem:[%s193_s27 + $0x18] sm:$0xff] %v240_v3 }
  0x2f PF: > { %s248_s6 = sand.u32 1, %s1130_s19   ;;  %s850_s5 = sshll.u32 %s1150_s24, 9 }
  0x30   : > { %s809_s28 = sshll.u32 %s248_s6, 7  ;;  %s258_s8 = sadd.s32 %s1154_s25, %s850_s5 }
  0x31   : > { %s812_s10 = sshll.u32 %s258_s8, 6  ;;  %s252_s7 = scalar_lea.vmem [#allocation4], %s809_s28 }
  0x32   : > { %s261_s14 = sshll.u32 %s252_s7, 4  ;;  %s260_s9 = scalar_lea.hbm %s1429_s1, %s812_s10  ;;  %s262_s14 = int_to_ptr.vmem [resolvable:$true] %s261_s14 }
  0x33   : > { %s249_s12 = scalar_lea.sflag [#allocation5], %s248_s6  ;;  %s1046_s29 = scalar_lea.vmem %s262_s14, 2048 }
  0x34   : > { %p1047_p3 = scmp.ne.s32.totalorder %s262_s14, %s1046_s29  ;;  %s1160_s27 = smov [#allocation4]  }
  0x35   : > { %s1050_s30 = sshll.u32 %s1160_s27, 4  ;;  %s1051_s30 = int_to_ptr.vmem [resolvable:$false] %s1050_s30 }
  0x36   : > { %p1048_p4 = pnand %p1047_p3, %p1278_p9  ;;  %s1052_s24 = scalar_lea.vmem %s1051_s30, 4096 }
  0x37   : > { %p1053_p6 = scmp.lt.s32.totalorder %s262_s14, %s1051_s30  ;;  %p1054_p7 = scmp.lt.s32.totalorder %s1052_s24, %s1046_s29 }
  0x38   : > { %p1049_p5 = pneg %p1048_p4 }
  0x39   : > { %p1055_p8 = por %p1054_p7, %p1053_p6 }
  0x3b   : > { %p1056_p10 = pnand %p1055_p8, %p1049_p5 }
  0x3d   : > { %1059 = shalt.err (!%p1056_p10)
}
  0x3e   : > { %s1161_s28 = smov 1024   ;;  %s1162_s0 = smov 64  }
  0x3f   : > { %s1163_s21 = smov 4  }
  0x40   : > { %910 = dma.hbm_to_vmem [thread:$0]  (%p1278_p9), %s260_s9, 2048, %s262_s14, %s249_s12, %s1161_s28, %s1162_s0, %s1163_s21  }
  0x41 PF: > { %p813_p11 = scmp.ge.s32.totalorder %s1158_s26, 1  ;;  %p281_p13 = scmp.lt.s32.totalorder %s1158_s26, 145 }
  0x43   : > { %p282_p0 = pnand %p813_p11, %p281_p13 }
  0x44   : > { %s288_s24 = sand.u32 (!%p282_p0), 1, %s1134_s20   ;;  %s294_s8 = sand.u32 (!%p282_p0), 1, %s1126_s18  }
  0x45   : > { %285 = sbr.rel (%p282_p0) target bundleno = 348 (0x15c), region = 70  ;;  %s814_s30 = sshll.u32 (!%p282_p0), %s288_s24, 5 }
  0x46   : > { %s815_s6 = sshll.u32 (!%p282_p0), %s294_s8, 7  ;;  %s1325_s5 = scalar_lea.vmem (!%p282_p0), [#allocation3], %s814_s30 }
  0x47   : > { %s295_s10 = scalar_lea.sflag (!%p282_p0), [#allocation5], %s294_s8  ;;  %s1327_s7 = scalar_lea.vmem (!%p282_p0), [#allocation4], %s815_s6 }
  0x4a   : > { %1109 = dma.done.wait (%p1287_p12), %s295_s10, 2048  }
  0x4b   : > { %1111 = vsyncadd (%p1287_p12), %s295_s10, 4294965248  ;;  %s329_s11 = sand.u32 1, %s1114_s15   ;;  %p335_p9 = scmp.lt.s32.totalorder %s1146_s23, 15 }
  0x4c   : > { %s816_s12 = sshll.u32 %s329_s11, 4  ;;  %p817_p12 = scmp.ne.s32.totalorder %s1142_s22, 0 }
  0x4d   : > { %s1336_s20 = scalar_select %p335_p9, %s1146_s23, 15 }
  0x4e   : > { %s1346_s13 = scalar_lea.vmem [#allocation6], %s816_s12  ;;  %346 = sbr.rel (%p817_p12) target bundleno = 86 (0x56), region = 82 }
  0x4f   : > { %s337_s29 = scalar_lea.vmem %s1430_s2, %s1336_s20  ;;  %s340_s0 = scalar_lea.vmem %s1431_s3, %s1336_s20 }
  0x53   : > { %v1164_v4 = vmov 0.0  }
  0x54   : > { %347 = vst [vmem:[#allocation2 + $0x10] sm:$0xff] %v1164_v4  ;;  %348 = vst [vmem:[#allocation2] sm:$0xff] %v1164_v4 }
  0x55   : > { %349 = vst [vmem:[#allocation2 + $0x18] sm:$0xff] %v1164_v4  ;;  %350 = vst [vmem:[#allocation2 + $0x8] sm:$0xff] %v1164_v4 }
  0x56 PF: > { %v1012_v5 = vld [vmem:[%s1327_s7 + $0x78] sm:$0xff]   ;;  %v1014_v7 = vld [vmem:[%s1327_s7 + $0x70] sm:$0xff]   ;;  %v1016_v9 = vld [vmem:[%s1327_s7 + $0x68] sm:$0xff]   ;;  %p838_p2 = scmp.ne.s32.totalorder %s1142_s22, 8 }
  0x57   : > { %v1013_v6 = vld [vmem:[%s1327_s7 + $0x38] sm:$0xff]   ;;  %866 = vmatprep.subr.bf16.mxu0 %v1012_v5  ;;  %894 = vmatprep.subr.bf16.mxu1 %v1012_v5  ;;  %v1015_v8 = vld [vmem:[%s1327_s7 + $0x30] sm:$0xff]   ;;  %v1017_v10 = vld [vmem:[%s1327_s7 + $0x28] sm:$0xff]  }
  0x58   : > { %867 = vmatpush3.bf16.msra.mxu0 %v1013_v6  ;;  %902 = vmatpush3.bf16.msra.mxu1 %v1013_v6  ;;  %v1018_v11 = vld [vmem:[%s1327_s7 + $0x60] sm:$0xff]   ;;  %v1020_v13 = vld [vmem:[%s1327_s7 + $0x58] sm:$0xff]   ;;  %v1022_v15 = vld [vmem:[%s1327_s7 + $0x50] sm:$0xff]  }
  0x59   : > { %868 = vmatprep.subr.bf16.mxu0 %v1014_v7  ;;  %895 = vmatprep.subr.bf16.mxu1 %v1014_v7  ;;  %v1019_v12 = vld [vmem:[%s1327_s7 + $0x20] sm:$0xff]   ;;  %v1021_v14 = vld [vmem:[%s1327_s7 + $0x18] sm:$0xff]   ;;  %v1023_v18 = vld [vmem:[%s1327_s7 + $0x10] sm:$0xff]  }
  0x5a   : > { %v1030_v16 = vld [vmem:[%s1325_s5 + $0x4] ss:$8 sps:$4 sm:$0xff]   ;;  %v1033_v17 = vld [vmem:[%s1325_s5 + $0x14] ss:$8 sps:$4 sm:$0xff]   ;;  %v1028_v23 = vld [vmem:[%s1325_s5] ss:$8 sps:$4 sm:$0xff]  }
  0x5b   : > { %v1024_v19 = vld [vmem:[%s1327_s7 + $0x48] sm:$0xff]   ;;  %539 = vmatprep.mubr.bf16.mxu0 %v1030_v16  ;;  %547 = vmatprep.mubr.bf16.mxu1 %v1033_v17  ;;  %v1026_v21 = vld [vmem:[%s1327_s7 + $0x40] sm:$0xff]   ;;  %v1031_v24 = vld [vmem:[%s1325_s5 + $0x10] ss:$8 sps:$4 sm:$0xff]  }
  0x5c   : > { %869 = vmatpush3.bf16.msra.mxu0 %v1015_v8  ;;  %903 = vmatpush3.bf16.msra.mxu1 %v1015_v8  ;;  %v1025_v20 = vld [vmem:[%s1327_s7 + $0x8] sm:$0xff]   ;;  %v1027_v22 = vld [vmem:[%s1327_s7] sm:$0xff]   ;;  %v351_v27 = vld [vmem:[#allocation2 + $0x10] sm:$0xff] }
  0x5d   : > { %870 = vmatprep.subr.bf16.mxu0 %v1016_v9  ;;  %896 = vmatprep.subr.bf16.mxu1 %v1016_v9  ;;  %v353_v29 = vld [vmem:[#allocation2 + $0x18] sm:$0xff]  ;;  %v352_v37 = vld [vmem:[#allocation2] sm:$0xff]  ;;  %v354_v39 = vld [vmem:[#allocation2 + $0x8] sm:$0xff] }
  0x60   : > { %871 = vmatpush3.bf16.msra.mxu0 %v1017_v10  ;;  %904 = vmatpush3.bf16.msra.mxu1 %v1017_v10 }
  0x61   : > { %872 = vmatprep.subr.bf16.mxu0 %v1018_v11  ;;  %897 = vmatprep.subr.bf16.mxu1 %v1018_v11 }
  0x64   : > { %873 = vmatpush3.bf16.msra.mxu0 %v1019_v12  ;;  %905 = vmatpush3.bf16.msra.mxu1 %v1019_v12 }
  0x65   : > { %874 = vmatprep.subr.bf16.mxu0 %v1020_v13  ;;  %898 = vmatprep.subr.bf16.mxu1 %v1020_v13 }
  0x68   : > { %875 = vmatpush3.bf16.msra.mxu0 %v1021_v14  ;;  %906 = vmatpush3.bf16.msra.mxu1 %v1021_v14 }
  0x69   : > { %876 = vmatprep.subr.bf16.mxu0 %v1022_v15  ;;  %899 = vmatprep.subr.bf16.mxu1 %v1022_v15 }
  0x6c   : > { %877 = vmatpush3.bf16.msra.mxu0 %v1023_v18  ;;  %907 = vmatpush3.bf16.msra.mxu1 %v1023_v18 }
  0x6d   : > { %878 = vmatprep.subr.bf16.mxu0 %v1024_v19  ;;  %900 = vmatprep.subr.bf16.mxu1 %v1024_v19 }
  0x70   : > { %879 = vmatpush3.bf16.msra.mxu0 %v1025_v20  ;;  %908 = vmatpush3.bf16.msra.mxu1 %v1025_v20 }
  0x71   : > { %880 = vmatprep.subr.bf16.mxu0 %v1026_v21  ;;  %901 = vmatprep.subr.bf16.mxu1 %v1026_v21 }
  0x74   : > { %881 = vmatpush3.bf16.msra.mxu0 %v1027_v22  ;;  %909 = vmatpush3.bf16.msra.mxu1 %v1027_v22 }
  0x77   : > { %540 = vmatmul.mubr.bf16.vlgmr.msra.gmra.mxu0 %v1028_v23  ;;  %548 = vmatmul.mubr.bf16.vlgmr.msra.gmra.mxu1 %v1031_v24 }
 0x137   : > { %v882_v25 = vpop.f32.mrf.mxu0  ;;  %v888_v26 = vpop.f32.mrf.mxu1 }
 0x139   : > { %v883_v28 = vpop.f32.mrf.mxu0  ;;  %v889_v30 = vpop.f32.mrf.mxu1 }
 0x13a   : > { %v884_v31 = vadd.f32 %v883_v28, %v882_v25  ;;  %v890_v32 = vadd.f32 %v889_v30, %v888_v26 }
 0x13b   : > { %v885_v33 = vpop.f32.mrf.mxu0  ;;  %v891_v34 = vpop.f32.mrf.mxu1 }
 0x13c   : > { %v556_v35 = vadd.f32 %v884_v31, %v351_v27  ;;  %v558_v36 = vadd.f32 %v890_v32, %v353_v29 }
 0x13d   : > { %v886_v38 = vpop.f32.mrf.mxu0  ;;  %v892_v40 = vpop.f32.mrf.mxu1 }
 0x13e   : > { %560 = vst [vmem:[#allocation2 + $0x10] sm:$0xff] %v556_v35  ;;  %562 = vst [vmem:[#allocation2 + $0x18] sm:$0xff] %v558_v36  ;;  %v887_v41 = vadd.f32 %v886_v38, %v885_v33  ;;  %v893_v42 = vadd.f32 %v892_v40, %v891_v34  ;;  %567 = sbr.rel (%p838_p2) target bundleno = 339 (0x153), region = 86 }
 0x140   : > { %v557_v43 = vadd.f32 %v887_v41, %v352_v37  ;;  %v559_v44 = vadd.f32 %v893_v42, %v354_v39 }
 0x142   : > { %561 = vst [vmem:[#allocation2] sm:$0xff] %v557_v43  ;;  %563 = vst [vmem:[#allocation2 + $0x8] sm:$0xff] %v559_v44 }
 0x143   : > { %v839_v47 = vld [vmem:[%s337_s29] ss:$0 sm:$0xff] }
 0x144   : > { %v840_v50 = vld [vmem:[%s340_s0] ss:$0 sm:$0xff] }
 0x145   : > { %v568_v45 = vld [vmem:[#allocation2 + $0x10] sm:$0xff]  ;;  %v570_v51 = vld [vmem:[#allocation2 + $0x18] sm:$0xff] }
 0x146   : > { %v579_v48 = vmul.f32 %v839_v47, %v568_v45  ;;  %v581_v53 = vmul.f32 %v839_v47, %v570_v51 }
 0x148   : > { %v590_v55 = vadd.f32 %v840_v50, %v579_v48  ;;  %v592_v57 = vadd.f32 %v840_v50, %v581_v53 }
 0x149   : > { %v569_v46 = vld [vmem:[#allocation2] sm:$0xff]  ;;  %v571_v52 = vld [vmem:[#allocation2 + $0x8] sm:$0xff] }
 0x14a   : > { %v580_v49 = vmul.f32 %v839_v47, %v569_v46  ;;  %v582_v54 = vmul.f32 %v839_v47, %v571_v52  ;;  %v594_v59 = vmax.f32 %v590_v55, 0.0  ;;  %v596_v61 = vmax.f32 %v592_v57, 0.0 }
 0x14c   : > { %v591_v56 = vadd.f32 %v840_v50, %v580_v49  ;;  %v593_v58 = vadd.f32 %v840_v50, %v582_v54 }
 0x14e   : > { %v595_v60 = vmax.f32 %v591_v56, 0.0  ;;  %v597_v62 = vmax.f32 %v593_v58, 0.0 }
 0x150   : > { %v858_v63 = vpack.c.bf16 %v595_v60, %v594_v59  ;;  %v863_v0 = vpack.c.bf16 %v597_v62, %v596_v61 }
 0x152   : > { %859 = vst [vmem:[%s1346_s13] sm:$0xff] %v858_v63   ;;  %865 = vst [vmem:[%s1346_s13 + $0x8] sm:$0xff] %v863_v0  }
 0x153 PF: > { %624 = sbr.rel (!%p1299_p1) target bundleno = 348 (0x15c), region = 90  ;;  %s846_s22 = sshll.u32 (%p1299_p1), %s1146_s23, 2 }
 0x154   : > { %s629_s5 = scalar_lea.vmem (%p1299_p1), %s1432_s4, %s846_s22 }
 0x159   : > { %v646_v1 = vld [vmem:[%s1346_s13] sm:$0xf]  ;;  %v648_v2 = vld [vmem:[%s1346_s13 + $0x4] sm:$0xf]  ;;  %v650_v3 = vld [vmem:[%s1346_s13 + $0x8] sm:$0xf] }
 0x15a   : > { %v652_v4 = vld [vmem:[%s1346_s13 + $0xc] sm:$0xf]  ;;  %647 = vst [vmem:[%s629_s5] sm:$0xf] %v646_v1  ;;  %649 = vst [vmem:[%s629_s5 + $0x40] sm:$0xf] %v648_v2 }
 0x15b   : > { %651 = vst [vmem:[%s629_s5 + $0x80] sm:$0xf] %v650_v3  ;;  %653 = vst [vmem:[%s629_s5 + $0xc0] sm:$0xf] %v652_v4 }
 0x15c PF: > { %s17_s26 = sadd.s32 1, %s1158_s26   ;;  %s1450_s17 = sld [smem:[#allocation14_spill]] }
 0x15d   : > { %p14_p1 = scmp.ge.s32.totalorder %s17_s26, 146   ;;  %s1451_s23 = sld [smem:[#allocation13_spill]] }
 0x15e   : > { %s1452_s20 = sld [smem:[#allocation8_spill]]  ;;  %s1457_s15 = smov %s1118_s16 }
 0x15f   : > { %s1453_s21 = sld [smem:[#allocation12_spill]] }
 0x160   : > { %s1454_s22 = sld [smem:[#allocation9_spill]] }
 0x161   : > { %s1455_s24 = sld [smem:[#allocation10_spill]] }
 0x162   : > { %s1456_s10 = sld [smem:[#allocation11_spill]]  ;;  %s1458_s16 = smov %s1450_s17 }
 0x163   : > { %s1459_s17 = smov %s1126_s18  ;;  %s1460_s18 = smov %s1130_s19 }
 0x164   : > { %s1461_s19 = smov %s1451_s23  ;;  %s1462_s23 = smov %s1154_s25 }
 0x165   :  { %16 = sbr.rel (!%p14_p1) target bundleno = 9 (0x9), region = 177 }
 0x168   : > { %s1463_s25 = smov %s1456_s10 }
 0x16a   :  { %695 = vsyncpa [#allocation5], 1 }
 0x16b   :  { %697 = vsyncpa [#allocation5 + $0x1], 1 }

// kernel: deeplabv3plus_forward.20
= control target key start
LH: loop header
LB: loop body
LE: loop exit
PB: predicated region body
PF: predicated region fallthrough
CT: control target
= control target key end

     0   :  { %s2989_s0 = inlined_call_operand.vmem [shape: bf16[32,18432], index: 0, kind: input, shape index: {}]   ;;  %s2990_s1 = inlined_call_operand.vmem [shape: bf16[18432,256], index: 1, kind: input, shape index: {}]   ;;  %s2991_s2 = inlined_call_operand.vmem [shape: f32[1,256], index: 2, kind: input, shape index: {}]   ;;  %s2992_s3 = inlined_call_operand.vmem [shape: f32[1,256], index: 3, kind: input, shape index: {}]   ;;  %s2993_s4 = inlined_call_operand.vmem [shape: bf16[32,256], index: 4, kind: output, shape index: {}]  }
   0x1   :  { %2997 = sst [smem:[#allocation9_spill]] %s2989_s0 }
   0x2   :  { %2998 = sst [smem:[#allocation10_spill]] %s2990_s1 }
   0x3   :  { %s2437_s15 = smov 0   ;;  %s2439_s16 = smov 0  }
   0x4   :  { %s2441_s17 = smov 0   ;;  %s2443_s18 = smov 0  }
   0x5   :  { %s2445_s19 = smov 0   ;;  %s2447_s20 = smov 0  }
   0x6   :  { %s2449_s21 = smov 0   ;;  %s2451_s22 = smov 0  }
   0x7   :  { %s2453_s23 = smov 0   ;;  %s2455_s24 = smov 0  }
   0x8   :  { %s2457_s25 = smov 0  }
   0x9 LB: > { %2999 = sst [smem:[#allocation6_spill]] %s2405_s24  ;;  %s1934_s26 = sadd.s32 4294967295, %s2409_s25   ;;  %s2409_s25 = sphi %s2457_s25, %s14_s25   ;;  %s2405_s24 = sphi %s2455_s24, %s3009_s24   ;;  %s2401_s23 = sphi %s2453_s23, %s3017_s23   ;;  %s2397_s22 = sphi %s2451_s22, %s3007_s22   ;;  %s2393_s21 = sphi %s2449_s21, %s3016_s21   ;;  %s2389_s20 = sphi %s2447_s20, %s3015_s20   ;;  %s2385_s19 = sphi %s2445_s19, %s3014_s19   ;;  %s2381_s18 = sphi %s2443_s18, %s3013_s18   ;;  %s2377_s17 = sphi %s2441_s17, %s3012_s17   ;;  %s2373_s16 = sphi %s2439_s16, %s3011_s16   ;;  %s2369_s15 = sphi %s2437_s15, %s3010_s15  }
   0xa   : > { %s26_s27 = sadd.s32 1, %s2401_s23  ;;  %s29_s28 = sadd.s32 1, %s2405_s24 }
   0xb   : > { %p27_p0 = scmp.ge.s32.totalorder %s26_s27, 18  ;;  %s42_s29 = sadd.s32 1, %s2389_s20 }
   0xc   : > { %p49_p1 = scmp.ne.s32.totalorder %s2389_s20, %s2385_s19  ;;  %p50_p2 = scmp.eq.s32.totalorder %s2409_s25, 0 }
   0xd   : > { %s3019_s27 = smov (%p27_p0, %s26_s27), 0  ;;  %s3021_s28 = smov (!%p27_p0, %s29_s28), %s2405_s24 }
   0xe   : > { %3000 = sst [smem:[#allocation7_spill]] %s3019_s27  ;;  %s38_s30 = ssub.s32 %s2401_s23, %s3019_s27 }
   0xf   : > { %p31_p3 = scmp.ge.s32.totalorder %s3021_s28, 2  ;;  %p40_p4 = scmp.eq.s32.totalorder %s38_s30, 0 }
  0x10   : > { %p2504_p5 = por %p50_p2, %p49_p1  ;;  %s70_s6 = sadd.s32 1, %s2381_s18 }
  0x11   : > { %s3023_s28 = smov (%p31_p3, %s3021_s28), 0  ;;  %p77_p6 = scmp.ne.s32.totalorder %s2381_s18, %s2377_s17 }
  0x12   : > { %3002 = sst [smem:[#allocation8_spill]] %s3023_s28  ;;  %s66_s8 = ssub.s32 %s2405_s24, %s3023_s28 }
  0x13   : > { %s2512_s7 = scalar_select %p40_p4, %s2389_s20, %s42_s29  }
  0x14   : > { %s67_s9 = sor.u32 %s66_s8, %s38_s30  ;;  %p148_p7 = scmp.eq.s32.totalorder %s66_s8, 0 }
  0x15   : > { %p68_p8 = scmp.eq.s32.totalorder %s67_s9, 0  ;;  %p2518_p9 = por %p77_p6, %p50_p2 }
  0x16   : > { %s150_s11 = sadd.s32 1, %s2373_s16  ;;  %p160_p10 = scmp.ne.s32.totalorder %s2373_s16, %s2369_s15 }
  0x17   : > { %s2526_s12 = scalar_select %p68_p8, %s2381_s18, %s70_s6  }
  0x18   : > { %s2529_s13 = scalar_select %p148_p7, %s2373_s16, %s150_s11  }
  0x19   : > { %p161_p11 = scmp.eq.s32.totalorder %s1934_s26, 35  ;;  %p1937_p13 = scmp.ge.s32.totalorder %s2409_s25, 36 }
  0x1b   : > { %p2531_p12 = por %p161_p11, %p160_p10  ;;  %183 = sbr.rel (%p1937_p13) target bundleno = 145 (0x91), region = 16 }
  0x20   : > { %186 = sbr.rel (!%p2504_p5) target bundleno = 50 (0x32), region = 20  ;;  %s188_s29 = sand.u32 (%p2504_p5), 1, %s2389_s20  }
  0x21   : > { %s2041_s30 = sshll.u32 (%p2504_p5), %s2401_s23, 5  ;;  %s1938_s8 = sshll.u32 (%p2504_p5), %s188_s29, 7 }
  0x22   : > { %s3005_s0 = sld [smem:[#allocation9_spill]] (%p2504_p5)  ;;  %s190_s26 = scalar_lea.vmem (%p2504_p5), [#allocation3], %s1938_s8 }
  0x28   : > { %s2543_s11 = scalar_lea.vmem %s3005_s0, %s2041_s30 }
  0x29   : > { %v209_v0 = vld [vmem:[%s2543_s11] sm:$0xff]  ;;  %v211_v1 = vld [vmem:[%s2543_s11 + $0x8] sm:$0xff]  ;;  %v213_v2 = vld [vmem:[%s2543_s11 + $0x10] sm:$0xff] }
  0x2a   : > { %210 = vst [vmem:[%s190_s26] sm:$0xff] %v209_v0  ;;  %212 = vst [vmem:[%s190_s26 + $0x8] sm:$0xff] %v211_v1  ;;  %v215_v3 = vld [vmem:[%s2543_s11 + $0x18] sm:$0xff]  ;;  %v217_v4 = vld [vmem:[%s2543_s11 + $0x240] sm:$0xff] }
  0x2b   : > { %214 = vst [vmem:[%s190_s26 + $0x10] sm:$0xff] %v213_v2  ;;  %v219_v5 = vld [vmem:[%s2543_s11 + $0x248] sm:$0xff]  ;;  %216 = vst [vmem:[%s190_s26 + $0x18] sm:$0xff] %v215_v3  ;;  %v221_v6 = vld [vmem:[%s2543_s11 + $0x250] sm:$0xff] }
  0x2c   : > { %218 = vst [vmem:[%s190_s26 + $0x20] sm:$0xff] %v217_v4  ;;  %220 = vst [vmem:[%s190_s26 + $0x28] sm:$0xff] %v219_v5  ;;  %v223_v7 = vld [vmem:[%s2543_s11 + $0x258] sm:$0xff]  ;;  %v225_v8 = vld [vmem:[%s2543_s11 + $0x480] sm:$0xff] }
  0x2d   : > { %222 = vst [vmem:[%s190_s26 + $0x30] sm:$0xff] %v221_v6  ;;  %224 = vst [vmem:[%s190_s26 + $0x38] sm:$0xff] %v223_v7  ;;  %v227_v9 = vld [vmem:[%s2543_s11 + $0x488] sm:$0xff]  ;;  %v229_v10 = vld [vmem:[%s2543_s11 + $0x490] sm:$0xff] }
  0x2e   : > { %226 = vst [vmem:[%s190_s26 + $0x40] sm:$0xff] %v225_v8  ;;  %v231_v11 = vld [vmem:[%s2543_s11 + $0x498] sm:$0xff]  ;;  %228 = vst [vmem:[%s190_s26 + $0x48] sm:$0xff] %v227_v9  ;;  %v233_v12 = vld [vmem:[%s2543_s11 + $0x6c0] sm:$0xff] }
  0x2f   : > { %230 = vst [vmem:[%s190_s26 + $0x50] sm:$0xff] %v229_v10  ;;  %232 = vst [vmem:[%s190_s26 + $0x58] sm:$0xff] %v231_v11  ;;  %v235_v13 = vld [vmem:[%s2543_s11 + $0x6c8] sm:$0xff]  ;;  %v237_v14 = vld [vmem:[%s2543_s11 + $0x6d0] sm:$0xff] }
  0x30   : > { %234 = vst [vmem:[%s190_s26 + $0x60] sm:$0xff] %v233_v12  ;;  %236 = vst [vmem:[%s190_s26 + $0x68] sm:$0xff] %v235_v13  ;;  %v239_v15 = vld [vmem:[%s2543_s11 + $0x6d8] sm:$0xff] }
  0x31   : > { %238 = vst [vmem:[%s190_s26 + $0x70] sm:$0xff] %v237_v14  ;;  %240 = vst [vmem:[%s190_s26 + $0x78] sm:$0xff] %v239_v15 }
  0x32 PF: > { %246 = sbr.rel (!%p2518_p9) target bundleno = 145 (0x91), region = 43  ;;  %s248_s5 = sand.u32 (%p2518_p9), 1, %s2381_s18  }
  0x33   : > { %s2042_s29 = sshll.u32 (%p2518_p9), %s2401_s23, 8  ;;  %s1941_s30 = sshll.u32 (%p2518_p9), %s248_s5, 9 }
  0x34   : > { %s253_s8 = sadd.s32 (%p2518_p9), %s2405_s24, %s2042_s29  ;;  %s3006_s1 = sld [smem:[#allocation10_spill]] (%p2518_p9) }
  0x35   : > { %s1944_s6 = sshll.u32 (%p2518_p9), %s253_s8, 2  ;;  %s2574_s10 = scalar_lea.vmem (%p2518_p9), [#allocation4], %s1941_s30 }
  0x3a   : > { %s2569_s28 = scalar_lea.vmem %s3006_s1, %s1944_s6 }
  0x3b   : > { %v272_v16 = vld [vmem:[%s2569_s28] sm:$0xf]  ;;  %v274_v17 = vld [vmem:[%s2569_s28 + $0x8] sm:$0xf]  ;;  %v276_v18 = vld [vmem:[%s2569_s28 + $0x10] sm:$0xf] }
  0x3c   : > { %273 = vst [vmem:[%s2574_s10] sm:$0xf] %v272_v16  ;;  %275 = vst [vmem:[%s2574_s10 + $0x4] sm:$0xf] %v274_v17  ;;  %v278_v19 = vld [vmem:[%s2569_s28 + $0x18] sm:$0xf] }
  0x3d   : > { %277 = vst [vmem:[%s2574_s10 + $0x8] sm:$0xf] %v276_v18  ;;  %v280_v20 = vld [vmem:[%s2569_s28 + $0x20] sm:$0xf]  ;;  %v282_v21 = vld [vmem:[%s2569_s28 + $0x28] sm:$0xf] }
  0x3e   : > { %279 = vst [vmem:[%s2574_s10 + $0xc] sm:$0xf] %v278_v19  ;;  %281 = vst [vmem:[%s2574_s10 + $0x10] sm:$0xf] %v280_v20  ;;  %v284_v22 = vld [vmem:[%s2569_s28 + $0x30] sm:$0xf] }
  0x3f   : > { %283 = vst [vmem:[%s2574_s10 + $0x14] sm:$0xf] %v282_v21  ;;  %v286_v23 = vld [vmem:[%s2569_s28 + $0x38] sm:$0xf]  ;;  %v288_v24 = vld [vmem:[%s2569_s28 + $0x40] sm:$0xf] }
  0x40   : > { %285 = vst [vmem:[%s2574_s10 + $0x18] sm:$0xf] %v284_v22  ;;  %287 = vst [vmem:[%s2574_s10 + $0x1c] sm:$0xf] %v286_v23  ;;  %v290_v25 = vld [vmem:[%s2569_s28 + $0x48] sm:$0xf] }
  0x41   : > { %289 = vst [vmem:[%s2574_s10 + $0x20] sm:$0xf] %v288_v24  ;;  %v292_v26 = vld [vmem:[%s2569_s28 + $0x50] sm:$0xf]  ;;  %v294_v27 = vld [vmem:[%s2569_s28 + $0x58] sm:$0xf] }
  0x42   : > { %291 = vst [vmem:[%s2574_s10 + $0x24] sm:$0xf] %v290_v25  ;;  %293 = vst [vmem:[%s2574_s10 + $0x28] sm:$0xf] %v292_v26  ;;  %v296_v28 = vld [vmem:[%s2569_s28 + $0x60] sm:$0xf] }
  0x43   : > { %295 = vst [vmem:[%s2574_s10 + $0x2c] sm:$0xf] %v294_v27  ;;  %v298_v29 = vld [vmem:[%s2569_s28 + $0x68] sm:$0xf]  ;;  %v300_v30 = vld [vmem:[%s2569_s28 + $0x70] sm:$0xf] }
  0x44   : > { %297 = vst [vmem:[%s2574_s10 + $0x30] sm:$0xf] %v296_v28  ;;  %299 = vst [vmem:[%s2574_s10 + $0x34] sm:$0xf] %v298_v29  ;;  %v302_v31 = vld [vmem:[%s2569_s28 + $0x78] sm:$0xf] }
  0x45   : > { %301 = vst [vmem:[%s2574_s10 + $0x38] sm:$0xf] %v300_v30  ;;  %v304_v32 = vld [vmem:[%s2569_s28 + $0x80] sm:$0xf]  ;;  %v306_v33 = vld [vmem:[%s2569_s28 + $0x88] sm:$0xf] }
  0x46   : > { %303 = vst [vmem:[%s2574_s10 + $0x3c] sm:$0xf] %v302_v31  ;;  %305 = vst [vmem:[%s2574_s10 + $0x40] sm:$0xf] %v304_v32  ;;  %v308_v34 = vld [vmem:[%s2569_s28 + $0x90] sm:$0xf] }
  0x47   : > { %307 = vst [vmem:[%s2574_s10 + $0x44] sm:$0xf] %v306_v33  ;;  %v310_v35 = vld [vmem:[%s2569_s28 + $0x98] sm:$0xf]  ;;  %v312_v36 = vld [vmem:[%s2569_s28 + $0xa0] sm:$0xf] }
  0x48   : > { %309 = vst [vmem:[%s2574_s10 + $0x48] sm:$0xf] %v308_v34  ;;  %311 = vst [vmem:[%s2574_s10 + $0x4c] sm:$0xf] %v310_v35  ;;  %v314_v37 = vld [vmem:[%s2569_s28 + $0xa8] sm:$0xf] }
  0x49   : > { %313 = vst [vmem:[%s2574_s10 + $0x50] sm:$0xf] %v312_v36  ;;  %v316_v38 = vld [vmem:[%s2569_s28 + $0xb0] sm:$0xf]  ;;  %v318_v39 = vld [vmem:[%s2569_s28 + $0xb8] sm:$0xf] }
  0x4a   : > { %315 = vst [vmem:[%s2574_s10 + $0x54] sm:$0xf] %v314_v37  ;;  %317 = vst [vmem:[%s2574_s10 + $0x58] sm:$0xf] %v316_v38  ;;  %v320_v40 = vld [vmem:[%s2569_s28 + $0xc0] sm:$0xf] }
  0x4b   : > { %319 = vst [vmem:[%s2574_s10 + $0x5c] sm:$0xf] %v318_v39  ;;  %v322_v41 = vld [vmem:[%s2569_s28 + $0xc8] sm:$0xf]  ;;  %v324_v42 = vld [vmem:[%s2569_s28 + $0xd0] sm:$0xf] }
  0x4c   : > { %321 = vst [vmem:[%s2574_s10 + $0x60] sm:$0xf] %v320_v40  ;;  %323 = vst [vmem:[%s2574_s10 + $0x64] sm:$0xf] %v322_v41  ;;  %v326_v43 = vld [vmem:[%s2569_s28 + $0xd8] sm:$0xf] }
  0x4d   : > { %325 = vst [vmem:[%s2574_s10 + $0x68] sm:$0xf] %v324_v42  ;;  %v328_v44 = vld [vmem:[%s2569_s28 + $0xe0] sm:$0xf]  ;;  %v330_v45 = vld [vmem:[%s2569_s28 + $0xe8] sm:$0xf] }
  0x4e   : > { %327 = vst [vmem:[%s2574_s10 + $0x6c] sm:$0xf] %v326_v43  ;;  %329 = vst [vmem:[%s2574_s10 + $0x70] sm:$0xf] %v328_v44  ;;  %v332_v46 = vld [vmem:[%s2569_s28 + $0xf0] sm:$0xf] }
  0x4f   : > { %331 = vst [vmem:[%s2574_s10 + $0x74] sm:$0xf] %v330_v45  ;;  %v334_v47 = vld [vmem:[%s2569_s28 + $0xf8] sm:$0xf]  ;;  %v336_v48 = vld [vmem:[%s2569_s28 + $0x100] sm:$0xf] }
  0x50   : > { %333 = vst [vmem:[%s2574_s10 + $0x78] sm:$0xf] %v332_v46  ;;  %335 = vst [vmem:[%s2574_s10 + $0x7c] sm:$0xf] %v334_v47  ;;  %v338_v49 = vld [vmem:[%s2569_s28 + $0x108] sm:$0xf] }
  0x51   : > { %337 = vst [vmem:[%s2574_s10 + $0x80] sm:$0xf] %v336_v48  ;;  %v340_v50 = vld [vmem:[%s2569_s28 + $0x110] sm:$0xf]  ;;  %v342_v51 = vld [vmem:[%s2569_s28 + $0x118] sm:$0xf] }
  0x52   : > { %339 = vst [vmem:[%s2574_s10 + $0x84] sm:$0xf] %v338_v49  ;;  %341 = vst [vmem:[%s2574_s10 + $0x88] sm:$0xf] %v340_v50  ;;  %v344_v52 = vld [vmem:[%s2569_s28 + $0x120] sm:$0xf] }
  0x53   : > { %343 = vst [vmem:[%s2574_s10 + $0x8c] sm:$0xf] %v342_v51  ;;  %v346_v53 = vld [vmem:[%s2569_s28 + $0x128] sm:$0xf]  ;;  %v348_v54 = vld [vmem:[%s2569_s28 + $0x130] sm:$0xf] }
  0x54   : > { %345 = vst [vmem:[%s2574_s10 + $0x90] sm:$0xf] %v344_v52  ;;  %347 = vst [vmem:[%s2574_s10 + $0x94] sm:$0xf] %v346_v53  ;;  %v350_v55 = vld [vmem:[%s2569_s28 + $0x138] sm:$0xf] }
  0x55   : > { %349 = vst [vmem:[%s2574_s10 + $0x98] sm:$0xf] %v348_v54  ;;  %v352_v56 = vld [vmem:[%s2569_s28 + $0x140] sm:$0xf]  ;;  %v354_v57 = vld [vmem:[%s2569_s28 + $0x148] sm:$0xf] }
  0x56   : > { %351 = vst [vmem:[%s2574_s10 + $0x9c] sm:$0xf] %v350_v55  ;;  %353 = vst [vmem:[%s2574_s10 + $0xa0] sm:$0xf] %v352_v56  ;;  %v356_v58 = vld [vmem:[%s2569_s28 + $0x150] sm:$0xf] }
  0x57   : > { %355 = vst [vmem:[%s2574_s10 + $0xa4] sm:$0xf] %v354_v57  ;;  %v358_v59 = vld [vmem:[%s2569_s28 + $0x158] sm:$0xf]  ;;  %v360_v60 = vld [vmem:[%s2569_s28 + $0x160] sm:$0xf] }
  0x58   : > { %357 = vst [vmem:[%s2574_s10 + $0xa8] sm:$0xf] %v356_v58  ;;  %359 = vst [vmem:[%s2574_s10 + $0xac] sm:$0xf] %v358_v59  ;;  %v362_v61 = vld [vmem:[%s2569_s28 + $0x168] sm:$0xf] }
  0x59   : > { %361 = vst [vmem:[%s2574_s10 + $0xb0] sm:$0xf] %v360_v60  ;;  %v364_v62 = vld [vmem:[%s2569_s28 + $0x170] sm:$0xf]  ;;  %v366_v63 = vld [vmem:[%s2569_s28 + $0x178] sm:$0xf] }
  0x5a   : > { %363 = vst [vmem:[%s2574_s10 + $0xb4] sm:$0xf] %v362_v61  ;;  %365 = vst [vmem:[%s2574_s10 + $0xb8] sm:$0xf] %v364_v62  ;;  %v368_v0 = vld [vmem:[%s2569_s28 + $0x180] sm:$0xf] }
  0x5b   : > { %367 = vst [vmem:[%s2574_s10 + $0xbc] sm:$0xf] %v366_v63  ;;  %v370_v1 = vld [vmem:[%s2569_s28 + $0x188] sm:$0xf]  ;;  %v372_v2 = vld [vmem:[%s2569_s28 + $0x190] sm:$0xf] }
  0x5c   : > { %369 = vst [vmem:[%s2574_s10 + $0xc0] sm:$0xf] %v368_v0  ;;  %371 = vst [vmem:[%s2574_s10 + $0xc4] sm:$0xf] %v370_v1  ;;  %v374_v3 = vld [vmem:[%s2569_s28 + $0x198] sm:$0xf] }
  0x5d   : > { %373 = vst [vmem:[%s2574_s10 + $0xc8] sm:$0xf] %v372_v2  ;;  %v376_v4 = vld [vmem:[%s2569_s28 + $0x1a0] sm:$0xf]  ;;  %v378_v5 = vld [vmem:[%s2569_s28 + $0x1a8] sm:$0xf] }
  0x5e   : > { %375 = vst [vmem:[%s2574_s10 + $0xcc] sm:$0xf] %v374_v3  ;;  %377 = vst [vmem:[%s2574_s10 + $0xd0] sm:$0xf] %v376_v4  ;;  %v380_v6 = vld [vmem:[%s2569_s28 + $0x1b0] sm:$0xf] }
  0x5f   : > { %379 = vst [vmem:[%s2574_s10 + $0xd4] sm:$0xf] %v378_v5  ;;  %v382_v7 = vld [vmem:[%s2569_s28 + $0x1b8] sm:$0xf]  ;;  %v384_v8 = vld [vmem:[%s2569_s28 + $0x1c0] sm:$0xf] }
  0x60   : > { %381 = vst [vmem:[%s2574_s10 + $0xd8] sm:$0xf] %v380_v6  ;;  %383 = vst [vmem:[%s2574_s10 + $0xdc] sm:$0xf] %v382_v7  ;;  %v386_v9 = vld [vmem:[%s2569_s28 + $0x1c8] sm:$0xf] }
  0x61   : > { %385 = vst [vmem:[%s2574_s10 + $0xe0] sm:$0xf] %v384_v8  ;;  %v388_v10 = vld [vmem:[%s2569_s28 + $0x1d0] sm:$0xf]  ;;  %v390_v11 = vld [vmem:[%s2569_s28 + $0x1d8] sm:$0xf] }
  0x62   : > { %387 = vst [vmem:[%s2574_s10 + $0xe4] sm:$0xf] %v386_v9  ;;  %389 = vst [vmem:[%s2574_s10 + $0xe8] sm:$0xf] %v388_v10  ;;  %v392_v12 = vld [vmem:[%s2569_s28 + $0x1e0] sm:$0xf] }
  0x63   : > { %391 = vst [vmem:[%s2574_s10 + $0xec] sm:$0xf] %v390_v11  ;;  %v394_v13 = vld [vmem:[%s2569_s28 + $0x1e8] sm:$0xf]  ;;  %v396_v14 = vld [vmem:[%s2569_s28 + $0x1f0] sm:$0xf] }
  0x64   : > { %393 = vst [vmem:[%s2574_s10 + $0xf0] sm:$0xf] %v392_v12  ;;  %395 = vst [vmem:[%s2574_s10 + $0xf4] sm:$0xf] %v394_v13  ;;  %v398_v15 = vld [vmem:[%s2569_s28 + $0x1f8] sm:$0xf] }
  0x65   : > { %397 = vst [vmem:[%s2574_s10 + $0xf8] sm:$0xf] %v396_v14  ;;  %v400_v16 = vld [vmem:[%s2569_s28 + $0x200] sm:$0xf]  ;;  %v402_v17 = vld [vmem:[%s2569_s28 + $0x208] sm:$0xf] }
  0x66   : > { %399 = vst [vmem:[%s2574_s10 + $0xfc] sm:$0xf] %v398_v15  ;;  %401 = vst [vmem:[%s2574_s10 + $0x100] sm:$0xf] %v400_v16  ;;  %v404_v18 = vld [vmem:[%s2569_s28 + $0x210] sm:$0xf] }
  0x67   : > { %403 = vst [vmem:[%s2574_s10 + $0x104] sm:$0xf] %v402_v17  ;;  %v406_v19 = vld [vmem:[%s2569_s28 + $0x218] sm:$0xf]  ;;  %v408_v20 = vld [vmem:[%s2569_s28 + $0x220] sm:$0xf] }
  0x68   : > { %405 = vst [vmem:[%s2574_s10 + $0x108] sm:$0xf] %v404_v18  ;;  %407 = vst [vmem:[%s2574_s10 + $0x10c] sm:$0xf] %v406_v19  ;;  %v410_v21 = vld [vmem:[%s2569_s28 + $0x228] sm:$0xf] }
  0x69   : > { %409 = vst [vmem:[%s2574_s10 + $0x110] sm:$0xf] %v408_v20  ;;  %v412_v22 = vld [vmem:[%s2569_s28 + $0x230] sm:$0xf]  ;;  %v414_v23 = vld [vmem:[%s2569_s28 + $0x238] sm:$0xf] }
  0x6a   : > { %411 = vst [vmem:[%s2574_s10 + $0x114] sm:$0xf] %v410_v21  ;;  %413 = vst [vmem:[%s2574_s10 + $0x118] sm:$0xf] %v412_v22  ;;  %v416_v24 = vld [vmem:[%s2569_s28 + $0x240] sm:$0xf] }
  0x6b   : > { %415 = vst [vmem:[%s2574_s10 + $0x11c] sm:$0xf] %v414_v23  ;;  %v418_v25 = vld [vmem:[%s2569_s28 + $0x248] sm:$0xf]  ;;  %v420_v26 = vld [vmem:[%s2569_s28 + $0x250] sm:$0xf] }
  0x6c   : > { %417 = vst [vmem:[%s2574_s10 + $0x120] sm:$0xf] %v416_v24  ;;  %419 = vst [vmem:[%s2574_s10 + $0x124] sm:$0xf] %v418_v25  ;;  %v422_v27 = vld [vmem:[%s2569_s28 + $0x258] sm:$0xf] }
  0x6d   : > { %421 = vst [vmem:[%s2574_s10 + $0x128] sm:$0xf] %v420_v26  ;;  %v424_v28 = vld [vmem:[%s2569_s28 + $0x260] sm:$0xf]  ;;  %v426_v29 = vld [vmem:[%s2569_s28 + $0x268] sm:$0xf] }
  0x6e   : > { %423 = vst [vmem:[%s2574_s10 + $0x12c] sm:$0xf] %v422_v27  ;;  %425 = vst [vmem:[%s2574_s10 + $0x130] sm:$0xf] %v424_v28  ;;  %v428_v30 = vld [vmem:[%s2569_s28 + $0x270] sm:$0xf] }
  0x6f   : > { %427 = vst [vmem:[%s2574_s10 + $0x134] sm:$0xf] %v426_v29  ;;  %v430_v31 = vld [vmem:[%s2569_s28 + $0x278] sm:$0xf]  ;;  %v432_v32 = vld [vmem:[%s2569_s28 + $0x280] sm:$0xf] }
  0x70   : > { %429 = vst [vmem:[%s2574_s10 + $0x138] sm:$0xf] %v428_v30  ;;  %431 = vst [vmem:[%s2574_s10 + $0x13c] sm:$0xf] %v430_v31  ;;  %v434_v33 = vld [vmem:[%s2569_s28 + $0x288] sm:$0xf] }
  0x71   : > { %433 = vst [vmem:[%s2574_s10 + $0x140] sm:$0xf] %v432_v32  ;;  %v436_v34 = vld [vmem:[%s2569_s28 + $0x290] sm:$0xf]  ;;  %v438_v35 = vld [vmem:[%s2569_s28 + $0x298] sm:$0xf] }
  0x72   : > { %435 = vst [vmem:[%s2574_s10 + $0x144] sm:$0xf] %v434_v33  ;;  %437 = vst [vmem:[%s2574_s10 + $0x148] sm:$0xf] %v436_v34  ;;  %v440_v36 = vld [vmem:[%s2569_s28 + $0x2a0] sm:$0xf] }
  0x73   : > { %439 = vst [vmem:[%s2574_s10 + $0x14c] sm:$0xf] %v438_v35  ;;  %v442_v37 = vld [vmem:[%s2569_s28 + $0x2a8] sm:$0xf]  ;;  %v444_v38 = vld [vmem:[%s2569_s28 + $0x2b0] sm:$0xf] }
  0x74   : > { %441 = vst [vmem:[%s2574_s10 + $0x150] sm:$0xf] %v440_v36  ;;  %443 = vst [vmem:[%s2574_s10 + $0x154] sm:$0xf] %v442_v37  ;;  %v446_v39 = vld [vmem:[%s2569_s28 + $0x2b8] sm:$0xf] }
  0x75   : > { %445 = vst [vmem:[%s2574_s10 + $0x158] sm:$0xf] %v444_v38  ;;  %v448_v40 = vld [vmem:[%s2569_s28 + $0x2c0] sm:$0xf]  ;;  %v450_v41 = vld [vmem:[%s2569_s28 + $0x2c8] sm:$0xf] }
  0x76   : > { %447 = vst [vmem:[%s2574_s10 + $0x15c] sm:$0xf] %v446_v39  ;;  %449 = vst [vmem:[%s2574_s10 + $0x160] sm:$0xf] %v448_v40  ;;  %v452_v42 = vld [vmem:[%s2569_s28 + $0x2d0] sm:$0xf] }
  0x77   : > { %451 = vst [vmem:[%s2574_s10 + $0x164] sm:$0xf] %v450_v41  ;;  %v454_v43 = vld [vmem:[%s2569_s28 + $0x2d8] sm:$0xf]  ;;  %v456_v44 = vld [vmem:[%s2569_s28 + $0x2e0] sm:$0xf] }
  0x78   : > { %453 = vst [vmem:[%s2574_s10 + $0x168] sm:$0xf] %v452_v42  ;;  %455 = vst [vmem:[%s2574_s10 + $0x16c] sm:$0xf] %v454_v43  ;;  %v458_v45 = vld [vmem:[%s2569_s28 + $0x2e8] sm:$0xf] }
  0x79   : > { %457 = vst [vmem:[%s2574_s10 + $0x170] sm:$0xf] %v456_v44  ;;  %v460_v46 = vld [vmem:[%s2569_s28 + $0x2f0] sm:$0xf]  ;;  %v462_v47 = vld [vmem:[%s2569_s28 + $0x2f8] sm:$0xf] }
  0x7a   : > { %459 = vst [vmem:[%s2574_s10 + $0x174] sm:$0xf] %v458_v45  ;;  %461 = vst [vmem:[%s2574_s10 + $0x178] sm:$0xf] %v460_v46  ;;  %v464_v48 = vld [vmem:[%s2569_s28 + $0x300] sm:$0xf] }
  0x7b   : > { %463 = vst [vmem:[%s2574_s10 + $0x17c] sm:$0xf] %v462_v47  ;;  %v466_v49 = vld [vmem:[%s2569_s28 + $0x308] sm:$0xf]  ;;  %v468_v50 = vld [vmem:[%s2569_s28 + $0x310] sm:$0xf] }
  0x7c   : > { %465 = vst [vmem:[%s2574_s10 + $0x180] sm:$0xf] %v464_v48  ;;  %467 = vst [vmem:[%s2574_s10 + $0x184] sm:$0xf] %v466_v49  ;;  %v470_v51 = vld [vmem:[%s2569_s28 + $0x318] sm:$0xf] }
  0x7d   : > { %469 = vst [vmem:[%s2574_s10 + $0x188] sm:$0xf] %v468_v50  ;;  %v472_v52 = vld [vmem:[%s2569_s28 + $0x320] sm:$0xf]  ;;  %v474_v53 = vld [vmem:[%s2569_s28 + $0x328] sm:$0xf] }
  0x7e   : > { %471 = vst [vmem:[%s2574_s10 + $0x18c] sm:$0xf] %v470_v51  ;;  %473 = vst [vmem:[%s2574_s10 + $0x190] sm:$0xf] %v472_v52  ;;  %v476_v54 = vld [vmem:[%s2569_s28 + $0x330] sm:$0xf] }
  0x7f   : > { %475 = vst [vmem:[%s2574_s10 + $0x194] sm:$0xf] %v474_v53  ;;  %v478_v55 = vld [vmem:[%s2569_s28 + $0x338] sm:$0xf]  ;;  %v480_v56 = vld [vmem:[%s2569_s28 + $0x340] sm:$0xf] }
  0x80   : > { %477 = vst [vmem:[%s2574_s10 + $0x198] sm:$0xf] %v476_v54  ;;  %479 = vst [vmem:[%s2574_s10 + $0x19c] sm:$0xf] %v478_v55  ;;  %v482_v57 = vld [vmem:[%s2569_s28 + $0x348] sm:$0xf] }
  0x81   : > { %481 = vst [vmem:[%s2574_s10 + $0x1a0] sm:$0xf] %v480_v56  ;;  %v484_v58 = vld [vmem:[%s2569_s28 + $0x350] sm:$0xf]  ;;  %v486_v59 = vld [vmem:[%s2569_s28 + $0x358] sm:$0xf] }
  0x82   : > { %483 = vst [vmem:[%s2574_s10 + $0x1a4] sm:$0xf] %v482_v57  ;;  %485 = vst [vmem:[%s2574_s10 + $0x1a8] sm:$0xf] %v484_v58  ;;  %v488_v60 = vld [vmem:[%s2569_s28 + $0x360] sm:$0xf] }
  0x83   : > { %487 = vst [vmem:[%s2574_s10 + $0x1ac] sm:$0xf] %v486_v59  ;;  %v490_v61 = vld [vmem:[%s2569_s28 + $0x368] sm:$0xf]  ;;  %v492_v62 = vld [vmem:[%s2569_s28 + $0x370] sm:$0xf] }
  0x84   : > { %489 = vst [vmem:[%s2574_s10 + $0x1b0] sm:$0xf] %v488_v60  ;;  %491 = vst [vmem:[%s2574_s10 + $0x1b4] sm:$0xf] %v490_v61  ;;  %v494_v63 = vld [vmem:[%s2569_s28 + $0x378] sm:$0xf] }
  0x85   : > { %493 = vst [vmem:[%s2574_s10 + $0x1b8] sm:$0xf] %v492_v62  ;;  %v496_v0 = vld [vmem:[%s2569_s28 + $0x380] sm:$0xf]  ;;  %v498_v1 = vld [vmem:[%s2569_s28 + $0x388] sm:$0xf] }
  0x86   : > { %495 = vst [vmem:[%s2574_s10 + $0x1bc] sm:$0xf] %v494_v63  ;;  %497 = vst [vmem:[%s2574_s10 + $0x1c0] sm:$0xf] %v496_v0  ;;  %v500_v2 = vld [vmem:[%s2569_s28 + $0x390] sm:$0xf] }
  0x87   : > { %499 = vst [vmem:[%s2574_s10 + $0x1c4] sm:$0xf] %v498_v1  ;;  %v502_v3 = vld [vmem:[%s2569_s28 + $0x398] sm:$0xf]  ;;  %v504_v4 = vld [vmem:[%s2569_s28 + $0x3a0] sm:$0xf] }
  0x88   : > { %501 = vst [vmem:[%s2574_s10 + $0x1c8] sm:$0xf] %v500_v2  ;;  %503 = vst [vmem:[%s2574_s10 + $0x1cc] sm:$0xf] %v502_v3  ;;  %v506_v5 = vld [vmem:[%s2569_s28 + $0x3a8] sm:$0xf] }
  0x89   : > { %505 = vst [vmem:[%s2574_s10 + $0x1d0] sm:$0xf] %v504_v4  ;;  %v508_v6 = vld [vmem:[%s2569_s28 + $0x3b0] sm:$0xf]  ;;  %v510_v7 = vld [vmem:[%s2569_s28 + $0x3b8] sm:$0xf] }
  0x8a   : > { %507 = vst [vmem:[%s2574_s10 + $0x1d4] sm:$0xf] %v506_v5  ;;  %509 = vst [vmem:[%s2574_s10 + $0x1d8] sm:$0xf] %v508_v6  ;;  %v512_v8 = vld [vmem:[%s2569_s28 + $0x3c0] sm:$0xf] }
  0x8b   : > { %511 = vst [vmem:[%s2574_s10 + $0x1dc] sm:$0xf] %v510_v7  ;;  %v514_v9 = vld [vmem:[%s2569_s28 + $0x3c8] sm:$0xf]  ;;  %v516_v10 = vld [vmem:[%s2569_s28 + $0x3d0] sm:$0xf] }
  0x8c   : > { %513 = vst [vmem:[%s2574_s10 + $0x1e0] sm:$0xf] %v512_v8  ;;  %515 = vst [vmem:[%s2574_s10 + $0x1e4] sm:$0xf] %v514_v9  ;;  %v518_v11 = vld [vmem:[%s2569_s28 + $0x3d8] sm:$0xf] }
  0x8d   : > { %517 = vst [vmem:[%s2574_s10 + $0x1e8] sm:$0xf] %v516_v10  ;;  %v520_v12 = vld [vmem:[%s2569_s28 + $0x3e0] sm:$0xf]  ;;  %v522_v13 = vld [vmem:[%s2569_s28 + $0x3e8] sm:$0xf] }
  0x8e   : > { %519 = vst [vmem:[%s2574_s10 + $0x1ec] sm:$0xf] %v518_v11  ;;  %521 = vst [vmem:[%s2574_s10 + $0x1f0] sm:$0xf] %v520_v12  ;;  %v524_v14 = vld [vmem:[%s2569_s28 + $0x3f0] sm:$0xf] }
  0x8f   : > { %523 = vst [vmem:[%s2574_s10 + $0x1f4] sm:$0xf] %v522_v13  ;;  %v526_v15 = vld [vmem:[%s2569_s28 + $0x3f8] sm:$0xf]  ;;  %525 = vst [vmem:[%s2574_s10 + $0x1f8] sm:$0xf] %v524_v14 }
  0x90   : > { %527 = vst [vmem:[%s2574_s10 + $0x1fc] sm:$0xf] %v526_v15 }
  0x91 PF: > { %p1945_p0 = scmp.ge.s32.totalorder %s2409_s25, 1  ;;  %p818_p1 = scmp.lt.s32.totalorder %s2409_s25, 37 }
  0x93   : > { %p819_p2 = pnand %p1945_p0, %p818_p1 }
  0x94   : > { %s825_s0 = sand.u32 (!%p819_p2), 1, %s2385_s19   ;;  %s832_s11 = sand.u32 (!%p819_p2), 1, %s2377_s17  }
  0x95   : > { %822 = sbr.rel (%p819_p2) target bundleno = 469 (0x1d5), region = 92  ;;  %s1946_s26 = sshll.u32 (!%p819_p2), %s825_s0, 7 }
  0x96   : > { %s1947_s5 = sshll.u32 (!%p819_p2), %s832_s11, 9  ;;  %s863_s28 = sand.u32 (!%p819_p2), 1, %s2369_s15  }
  0x97   : > { %p869_p3 = scmp.lt.s32.totalorder (!%p819_p2), %s2397_s22, 1  ;;  %s1948_s29 = sshll.u32 (!%p819_p2), %s863_s28, 4 }
  0x98   : > { %s2846_s24 = scalar_lea.vmem (!%p819_p2), [#allocation3], %s1946_s26  ;;  %s2848_s17 = scalar_lea.vmem (!%p819_p2), [#allocation4], %s1947_s5 }
  0x99   : > { %s2850_s19 = scalar_lea.vmem (!%p819_p2), [#allocation5], %s1948_s29  ;;  %p1949_p4 = scmp.ne.s32.totalorder (!%p819_p2), %s2393_s21, 0 }
  0x9a   : > { %s2836_s30 = scalar_select %p869_p3, %s2397_s22, 1 }
  0x9b   : > { %880 = sbr.rel (%p1949_p4) target bundleno = 163 (0xa3), region = 104 }
  0x9c   : > { %s871_s9 = scalar_lea.vmem %s2991_s2, %s2836_s30  ;;  %s874_s27 = scalar_lea.vmem %s2992_s3, %s2836_s30 }
  0xa0   : > { %v2411_v16 = vmov 0.0  }
  0xa1   : > { %881 = vst [vmem:[#allocation2 + $0x10] sm:$0xff] %v2411_v16  ;;  %882 = vst [vmem:[#allocation2] sm:$0xff] %v2411_v16 }
  0xa2   : > { %883 = vst [vmem:[#allocation2 + $0x18] sm:$0xff] %v2411_v16  ;;  %884 = vst [vmem:[#allocation2 + $0x8] sm:$0xff] %v2411_v16 }
  0xa3 PF: > { %v2259_v17 = vld [vmem:[%s2848_s17 + $0x78] sm:$0xff]   ;;  %v2263_v21 = vld [vmem:[%s2848_s17 + $0x70] sm:$0xff]   ;;  %v2267_v25 = vld [vmem:[%s2848_s17 + $0x68] sm:$0xff]   ;;  %p2030_p5 = scmp.ne.s32.totalorder %s2393_s21, 17 }
  0xa4   : > { %v2260_v18 = vld [vmem:[%s2848_s17 + $0xf8] sm:$0xff]   ;;  %2058 = vmatprep.subr.bf16.mxu0 %v2259_v17  ;;  %v2264_v22 = vld [vmem:[%s2848_s17 + $0xf0] sm:$0xff]   ;;  %v2268_v26 = vld [vmem:[%s2848_s17 + $0xe8] sm:$0xff]  }
  0xa5   : > { %v2261_v19 = vld [vmem:[%s2848_s17 + $0x38] sm:$0xff]   ;;  %2086 = vmatprep.subr.bf16.mxu1 %v2260_v18  ;;  %v2265_v23 = vld [vmem:[%s2848_s17 + $0x30] sm:$0xff]   ;;  %v2269_v27 = vld [vmem:[%s2848_s17 + $0x28] sm:$0xff]  }
  0xa6   : > { %v2262_v20 = vld [vmem:[%s2848_s17 + $0xb8] sm:$0xff]   ;;  %2059 = vmatpush3.bf16.msra.mxu0 %v2261_v19  ;;  %v2266_v24 = vld [vmem:[%s2848_s17 + $0xb0] sm:$0xff]   ;;  %v2270_v28 = vld [vmem:[%s2848_s17 + $0xa8] sm:$0xff]  }
  0xa7   : > { %2087 = vmatpush3.bf16.msra.mxu1 %v2262_v20  ;;  %2060 = vmatprep.subr.bf16.mxu0 %v2263_v21  ;;  %v2271_v29 = vld [vmem:[%s2848_s17 + $0x60] sm:$0xff]   ;;  %v2275_v33 = vld [vmem:[%s2848_s17 + $0x58] sm:$0xff]   ;;  %v2279_v37 = vld [vmem:[%s2848_s17 + $0x50] sm:$0xff]  }
  0xa8   : > { %2088 = vmatprep.subr.bf16.mxu1 %v2264_v22  ;;  %v2272_v30 = vld [vmem:[%s2848_s17 + $0xe0] sm:$0xff]   ;;  %v2276_v34 = vld [vmem:[%s2848_s17 + $0xd8] sm:$0xff]   ;;  %v2280_v38 = vld [vmem:[%s2848_s17 + $0xd0] sm:$0xff]  }
  0xa9   : > { %v2273_v31 = vld [vmem:[%s2848_s17 + $0x20] sm:$0xff]   ;;  %v2277_v35 = vld [vmem:[%s2848_s17 + $0x18] sm:$0xff]   ;;  %v2281_v39 = vld [vmem:[%s2848_s17 + $0x10] sm:$0xff]  }
  0xaa   : > { %2061 = vmatpush3.bf16.msra.mxu0 %v2265_v23  ;;  %v2274_v32 = vld [vmem:[%s2848_s17 + $0xa0] sm:$0xff]   ;;  %v2278_v36 = vld [vmem:[%s2848_s17 + $0x98] sm:$0xff]   ;;  %v2282_v40 = vld [vmem:[%s2848_s17 + $0x90] sm:$0xff]  }
  0xab   : > { %2089 = vmatpush3.bf16.msra.mxu1 %v2266_v24  ;;  %2062 = vmatprep.subr.bf16.mxu0 %v2267_v25  ;;  %v2283_v41 = vld [vmem:[%s2848_s17 + $0x48] sm:$0xff]   ;;  %v2287_v45 = vld [vmem:[%s2848_s17 + $0x40] sm:$0xff]   ;;  %v2291_v57 = vld [vmem:[%s2848_s17 + $0x178] sm:$0xff]  }
  0xac   : > { %2090 = vmatprep.subr.bf16.mxu1 %v2268_v26  ;;  %v2284_v42 = vld [vmem:[%s2848_s17 + $0xc8] sm:$0xff]   ;;  %v2288_v46 = vld [vmem:[%s2848_s17 + $0xc0] sm:$0xff]   ;;  %v2292_v58 = vld [vmem:[%s2848_s17 + $0x1f8] sm:$0xff]  }
  0xad   : > { %v2285_v43 = vld [vmem:[%s2848_s17 + $0x8] sm:$0xff]   ;;  %v2289_v47 = vld [vmem:[%s2848_s17] sm:$0xff]   ;;  %v2293_v59 = vld [vmem:[%s2848_s17 + $0x138] sm:$0xff]  }
  0xae   : > { %2063 = vmatpush3.bf16.msra.mxu0 %v2269_v27  ;;  %v2286_v44 = vld [vmem:[%s2848_s17 + $0x88] sm:$0xff]   ;;  %v2290_v48 = vld [vmem:[%s2848_s17 + $0x80] sm:$0xff]   ;;  %v2294_v60 = vld [vmem:[%s2848_s17 + $0x1b8] sm:$0xff]  }
  0xaf   : > { %2091 = vmatpush3.bf16.msra.mxu1 %v2270_v28  ;;  %2064 = vmatprep.subr.bf16.mxu0 %v2271_v29  ;;  %v889_v49 = vld [vmem:[%s2846_s24] sm:$0xff]  ;;  %v890_v51 = vld [vmem:[%s2846_s24 + $0x8] sm:$0xff]  ;;  %v2295_v61 = vld [vmem:[%s2848_s17 + $0x170] sm:$0xff]  }
  0xb0   : > { %2092 = vmatprep.subr.bf16.mxu1 %v2272_v30  ;;  %v893_v50 = vld [vmem:[%s2846_s24 + $0x20] sm:$0xff]  ;;  %v894_v54 = vld [vmem:[%s2846_s24 + $0x28] sm:$0xff]  ;;  %v2296_v62 = vld [vmem:[%s2848_s17 + $0x1f0] sm:$0xff]  }
  0xb1   : > { %v1950_v52 = vcombine.low %v889_v49, %v893_v50  ;;  %v1951_v53 = vcombine.high %v889_v49, %v893_v50  ;;  %v1952_v55 = vcombine.low %v890_v51, %v894_v54  ;;  %v1953_v56 = vcombine.high %v890_v51, %v894_v54  ;;  %v2297_v63 = vld [vmem:[%s2848_s17 + $0x130] sm:$0xff]   ;;  %v2299_v1 = vld [vmem:[%s2848_s17 + $0x168] sm:$0xff]   ;;  %v2303_v5 = vld [vmem:[%s2848_s17 + $0x160] sm:$0xff]  }
  0xb2   : > { %2065 = vmatpush3.bf16.msra.mxu0 %v2273_v31  ;;  %v2298_v0 = vld [vmem:[%s2848_s17 + $0x1b0] sm:$0xff]   ;;  %v2300_v2 = vld [vmem:[%s2848_s17 + $0x1e8] sm:$0xff]   ;;  %v2304_v6 = vld [vmem:[%s2848_s17 + $0x1e0] sm:$0xff]  }
  0xb3   : > { %2093 = vmatpush3.bf16.msra.mxu1 %v2274_v32  ;;  %2066 = vmatprep.subr.bf16.mxu0 %v2275_v33  ;;  %v2301_v3 = vld [vmem:[%s2848_s17 + $0x128] sm:$0xff]   ;;  %v2305_v7 = vld [vmem:[%s2848_s17 + $0x120] sm:$0xff]   ;;  %v2307_v9 = vld [vmem:[%s2848_s17 + $0x158] sm:$0xff]  }
  0xb4   : > { %2094 = vmatprep.subr.bf16.mxu1 %v2276_v34  ;;  %1529 = vmatprep.mubr.bf16.mxu0 %v1951_v53  ;;  %v2302_v4 = vld [vmem:[%s2848_s17 + $0x1a8] sm:$0xff]   ;;  %v2306_v8 = vld [vmem:[%s2848_s17 + $0x1a0] sm:$0xff]   ;;  %v2308_v10 = vld [vmem:[%s2848_s17 + $0x1d8] sm:$0xff]  }
  0xb5   : > { %1578 = vmatprep.mubr.bf16.mxu1 %v1953_v56  ;;  %v897_v11 = vld [vmem:[%s2846_s24 + $0x40] sm:$0xff]  ;;  %v898_v14 = vld [vmem:[%s2846_s24 + $0x48] sm:$0xff]  ;;  %v2309_v18 = vld [vmem:[%s2848_s17 + $0x118] sm:$0xff]  }
  0xb6   : > { %2067 = vmatpush3.bf16.msra.mxu0 %v2277_v35  ;;  %v901_v12 = vld [vmem:[%s2846_s24 + $0x60] sm:$0xff]  ;;  %v902_v15 = vld [vmem:[%s2846_s24 + $0x68] sm:$0xff]  ;;  %v2310_v20 = vld [vmem:[%s2848_s17 + $0x198] sm:$0xff]  }
  0xb7   : > { %2095 = vmatpush3.bf16.msra.mxu1 %v2278_v36  ;;  %2068 = vmatprep.subr.bf16.mxu0 %v2279_v37  ;;  %v1959_v13 = vcombine.high %v897_v11, %v901_v12  ;;  %v1958_v16 = vcombine.low %v897_v11, %v901_v12  ;;  %v1961_v17 = vcombine.high %v898_v14, %v902_v15  ;;  %v2311_v21 = vld [vmem:[%s2848_s17 + $0x150] sm:$0xff]   ;;  %v2315_v25 = vld [vmem:[%s2848_s17 + $0x148] sm:$0xff]   ;;  %v2319_v29 = vld [vmem:[%s2848_s17 + $0x140] sm:$0xff]  }
  0xb8   : > { %2096 = vmatprep.subr.bf16.mxu1 %v2280_v38  ;;  %v1960_v19 = vcombine.low %v898_v14, %v902_v15  ;;  %v2312_v22 = vld [vmem:[%s2848_s17 + $0x1d0] sm:$0xff]   ;;  %v2316_v26 = vld [vmem:[%s2848_s17 + $0x1c8] sm:$0xff]   ;;  %v2320_v30 = vld [vmem:[%s2848_s17 + $0x1c0] sm:$0xff]  }
  0xb9   : > { %v2313_v23 = vld [vmem:[%s2848_s17 + $0x110] sm:$0xff]   ;;  %v2317_v27 = vld [vmem:[%s2848_s17 + $0x108] sm:$0xff]   ;;  %v2321_v31 = vld [vmem:[%s2848_s17 + $0x100] sm:$0xff]  }
  0xba   : > { %2069 = vmatpush3.bf16.msra.mxu0 %v2281_v39  ;;  %v2314_v24 = vld [vmem:[%s2848_s17 + $0x190] sm:$0xff]   ;;  %v2318_v28 = vld [vmem:[%s2848_s17 + $0x188] sm:$0xff]   ;;  %v2322_v32 = vld [vmem:[%s2848_s17 + $0x180] sm:$0xff]  }
  0xbb   : > { %2097 = vmatpush3.bf16.msra.mxu1 %v2282_v40  ;;  %2070 = vmatprep.subr.bf16.mxu0 %v2283_v41  ;;  %v891_v33 = vld [vmem:[%s2846_s24 + $0x10] sm:$0xff]  ;;  %v892_v35 = vld [vmem:[%s2846_s24 + $0x18] sm:$0xff] }
  0xbc   : > { %2098 = vmatprep.subr.bf16.mxu1 %v2284_v42  ;;  %v895_v34 = vld [vmem:[%s2846_s24 + $0x30] sm:$0xff]  ;;  %v896_v36 = vld [vmem:[%s2846_s24 + $0x38] sm:$0xff] }
  0xbd   : > { %v1954_v37 = vcombine.low %v891_v33, %v895_v34  ;;  %v1955_v38 = vcombine.high %v891_v33, %v895_v34  ;;  %v1956_v39 = vcombine.low %v892_v35, %v896_v36  ;;  %v1957_v40 = vcombine.high %v892_v35, %v896_v36  ;;  %v899_v41 = vld [vmem:[%s2846_s24 + $0x50] sm:$0xff] }
  0xbe   : > { %2071 = vmatpush3.bf16.msra.mxu0 %v2285_v43  ;;  %v903_v42 = vld [vmem:[%s2846_s24 + $0x70] sm:$0xff]  ;;  %v900_v43 = vld [vmem:[%s2846_s24 + $0x58] sm:$0xff] }
  0xbf   : > { %2099 = vmatpush3.bf16.msra.mxu1 %v2286_v44  ;;  %2072 = vmatprep.subr.bf16.mxu0 %v2287_v45  ;;  %v1963_v44 = vcombine.high %v899_v41, %v903_v42  ;;  %v904_v45 = vld [vmem:[%s2846_s24 + $0x78] sm:$0xff] }
  0xc0   : > { %2100 = vmatprep.subr.bf16.mxu1 %v2288_v46  ;;  %v1965_v46 = vcombine.high %v900_v43, %v904_v45 }
  0xc2   : > { %2073 = vmatpush3.bf16.msra.mxu0 %v2289_v47  ;;  %v1962_v47 = vcombine.low %v899_v41, %v903_v42  ;;  %v887_v41 = vld [vmem:[#allocation2 + $0x18] sm:$0xff] }
  0xc3   : > { %2101 = vmatpush3.bf16.msra.mxu1 %v2290_v48  ;;  %2114 = vmatprep.subr.bf16.mxu0 %v2291_v57  ;;  %v1964_v48 = vcombine.low %v900_v43, %v904_v45 }
  0xc4   : > { %2142 = vmatprep.subr.bf16.mxu1 %v2292_v58 }
  0xc5   : > { %1530 = vmatmul.mubr.bf16.vlgmr.msra.gmra.mxu0 %v1950_v52 }
  0xc6   : > { %1579 = vmatmul.mubr.bf16.vlgmr.msra.gmra.mxu1 %v1952_v55  ;;  %2115 = vmatpush3.bf16.msra.mxu0 %v2293_v59 }
  0xc7   : > { %2143 = vmatpush3.bf16.msra.mxu1 %v2294_v60  ;;  %2116 = vmatprep.subr.bf16.mxu0 %v2295_v61 }
  0xc8   : > { %2144 = vmatprep.subr.bf16.mxu1 %v2296_v62  ;;  %1537 = vmatprep.mubr.bf16.mxu0 %v1959_v13 }
  0xc9   : > { %1586 = vmatprep.mubr.bf16.mxu1 %v1961_v17  ;;  %v885_v17 = vld [vmem:[#allocation2 + $0x10] sm:$0xff] }
  0xca   : > { %2117 = vmatpush3.bf16.msra.mxu0 %v2297_v63 }
  0xcb   : > { %2145 = vmatpush3.bf16.msra.mxu1 %v2298_v0  ;;  %2118 = vmatprep.subr.bf16.mxu0 %v2299_v1 }
  0xcc   : > { %2146 = vmatprep.subr.bf16.mxu1 %v2300_v2 }
  0xcd   : > { %1538 = vmatmul.mubr.bf16.gmra.mxu0 %v1958_v16 }
  0xce   : > { %2119 = vmatpush3.bf16.msra.mxu0 %v2301_v3  ;;  %1587 = vmatmul.mubr.bf16.gmra.mxu1 %v1960_v19 }
  0xcf   : > { %2147 = vmatpush3.bf16.msra.mxu1 %v2302_v4  ;;  %2120 = vmatprep.subr.bf16.mxu0 %v2303_v5 }
  0xd0   : > { %2148 = vmatprep.subr.bf16.mxu1 %v2304_v6  ;;  %1627 = vmatprep.mubr.bf16.mxu0 %v1955_v38 }
  0xd1   : > { %1676 = vmatprep.mubr.bf16.mxu1 %v1957_v40 }
  0xd2   : > { %2121 = vmatpush3.bf16.msra.mxu0 %v2305_v7 }
  0xd3   : > { %2149 = vmatpush3.bf16.msra.mxu1 %v2306_v8  ;;  %2122 = vmatprep.subr.bf16.mxu0 %v2307_v9 }
  0xd4   : > { %2150 = vmatprep.subr.bf16.mxu1 %v2308_v10 }
  0xd6   : > { %2123 = vmatpush3.bf16.msra.mxu0 %v2309_v18 }
  0xd7   : > { %2151 = vmatpush3.bf16.msra.mxu1 %v2310_v20  ;;  %2124 = vmatprep.subr.bf16.mxu0 %v2311_v21 }
  0xd8   : > { %2152 = vmatprep.subr.bf16.mxu1 %v2312_v22 }
  0xda   : > { %2125 = vmatpush3.bf16.msra.mxu0 %v2313_v23 }
  0xdb   : > { %2153 = vmatpush3.bf16.msra.mxu1 %v2314_v24  ;;  %2126 = vmatprep.subr.bf16.mxu0 %v2315_v25 }
  0xdc   : > { %2154 = vmatprep.subr.bf16.mxu1 %v2316_v26 }
  0xde   : > { %2127 = vmatpush3.bf16.msra.mxu0 %v2317_v27 }
  0xdf   : > { %2155 = vmatpush3.bf16.msra.mxu1 %v2318_v28  ;;  %2128 = vmatprep.subr.bf16.mxu0 %v2319_v29  ;;  %v886_v29 = vld [vmem:[#allocation2] sm:$0xff] }
  0xe0   : > { %2156 = vmatprep.subr.bf16.mxu1 %v2320_v30 }
  0xe2   : > { %2129 = vmatpush3.bf16.msra.mxu0 %v2321_v31 }
  0xe3   : > { %2157 = vmatpush3.bf16.msra.mxu1 %v2322_v32 }
  0xe5   : > { %1628 = vmatmul.mubr.bf16.vlgmr.msra.gmra.mxu0 %v1954_v37 }
  0xe6   : > { %1677 = vmatmul.mubr.bf16.vlgmr.msra.gmra.mxu1 %v1956_v39  ;;  %1635 = vmatprep.mubr.bf16.mxu0 %v1963_v44 }
  0xe7   : > { %1684 = vmatprep.mubr.bf16.mxu1 %v1965_v46 }
  0xed   : > { %1636 = vmatmul.mubr.bf16.gmra.mxu0 %v1962_v47 }
  0xee   : > { %1685 = vmatmul.mubr.bf16.gmra.mxu1 %v1964_v48 }
 0x185   : > { %v2074_v49 = vpop.f32.mrf.mxu0 }
 0x186   : > { %v2102_v50 = vpop.f32.mrf.mxu1 }
 0x187   : > { %v2075_v51 = vpop.f32.mrf.mxu0 }
 0x188   : > { %v2103_v52 = vpop.f32.mrf.mxu1  ;;  %v2076_v1 = vadd.f32 %v2075_v51, %v2074_v49 }
 0x189   : > { %v2077_v53 = vpop.f32.mrf.mxu0  ;;  %v2104_v2 = vadd.f32 %v2103_v52, %v2102_v50  ;;  %v888_v50 = vld [vmem:[#allocation2 + $0x8] sm:$0xff] }
 0x18a   : > { %v2105_v54 = vpop.f32.mrf.mxu1 }
 0x18b   : > { %v2078_v55 = vpop.f32.mrf.mxu0  ;;  %v1581_v7 = vadd.f32 %v2104_v2, %v2076_v1 }
 0x18c   : > { %v2106_v56 = vpop.f32.mrf.mxu1  ;;  %v2079_v8 = vadd.f32 %v2078_v55, %v2077_v53 }
 0x18d   : > { %v2080_v57 = vpop.f32.mrf.mxu0  ;;  %v2107_v9 = vadd.f32 %v2106_v56, %v2105_v54 }
 0x18e   : > { %v2108_v58 = vpop.f32.mrf.mxu1 }
 0x18f   : > { %v2081_v59 = vpop.f32.mrf.mxu0  ;;  %v1584_v20 = vadd.f32 %v2107_v9, %v2079_v8 }
 0x190   : > { %v2109_v60 = vpop.f32.mrf.mxu1  ;;  %v2082_v15 = vadd.f32 %v2081_v59, %v2080_v57 }
 0x191   : > { %v2083_v61 = vpop.f32.mrf.mxu0  ;;  %v2110_v16 = vadd.f32 %v2109_v60, %v2108_v58 }
 0x192   : > { %v2111_v62 = vpop.f32.mrf.mxu1 }
 0x193   : > { %v2084_v63 = vpop.f32.mrf.mxu0  ;;  %v1589_v28 = vadd.f32 %v2110_v16, %v2082_v15 }
 0x194   : > { %v2112_v0 = vpop.f32.mrf.mxu1  ;;  %v2085_v32 = vadd.f32 %v2084_v63, %v2083_v61 }
 0x195   : > { %v2113_v33 = vadd.f32 %v2112_v0, %v2111_v62 }
 0x197   : > { %v1592_v44 = vadd.f32 %v2113_v33, %v2085_v32 }
 0x1a5   : > { %v2130_v3 = vpop.f32.mrf.mxu0 }
 0x1a6   : > { %v2158_v4 = vpop.f32.mrf.mxu1 }
 0x1a7   : > { %v2131_v5 = vpop.f32.mrf.mxu0 }
 0x1a8   : > { %v2159_v6 = vpop.f32.mrf.mxu1  ;;  %v2132_v10 = vadd.f32 %v2131_v5, %v2130_v3 }
 0x1a9   : > { %v2133_v11 = vpop.f32.mrf.mxu0  ;;  %v2160_v14 = vadd.f32 %v2159_v6, %v2158_v4 }
 0x1aa   : > { %v2161_v12 = vpop.f32.mrf.mxu1  ;;  %v1630_v13 = vadd.f32 %v2132_v10, %v1581_v7 }
 0x1ab   : > { %v2134_v18 = vpop.f32.mrf.mxu0 }
 0x1ac   : > { %v2162_v19 = vpop.f32.mrf.mxu1  ;;  %v1679_v21 = vadd.f32 %v2160_v14, %v1630_v13  ;;  %v2135_v22 = vadd.f32 %v2134_v18, %v2133_v11 }
 0x1ad   : > { %v2136_v23 = vpop.f32.mrf.mxu0  ;;  %v2163_v27 = vadd.f32 %v2162_v19, %v2161_v12 }
 0x1ae   : > { %v2164_v24 = vpop.f32.mrf.mxu1  ;;  %v1693_v25 = vadd.f32 %v1679_v21, %v885_v17  ;;  %v1633_v26 = vadd.f32 %v2135_v22, %v1584_v20 }
 0x1af   : > { %v2137_v30 = vpop.f32.mrf.mxu0 }
 0x1b0   : > { %v2165_v31 = vpop.f32.mrf.mxu1  ;;  %1697 = vst [vmem:[#allocation2 + $0x10] sm:$0xff] %v1693_v25  ;;  %v1682_v34 = vadd.f32 %v2163_v27, %v1633_v26  ;;  %v2138_v35 = vadd.f32 %v2137_v30, %v2136_v23 }
 0x1b1   : > { %v2139_v36 = vpop.f32.mrf.mxu0  ;;  %v2166_v40 = vadd.f32 %v2165_v31, %v2164_v24 }
 0x1b2   : > { %v2167_v37 = vpop.f32.mrf.mxu1  ;;  %v1694_v38 = vadd.f32 %v1682_v34, %v886_v29  ;;  %v1638_v39 = vadd.f32 %v2138_v35, %v1589_v28 }
 0x1b3   : > { %v2140_v42 = vpop.f32.mrf.mxu0 }
 0x1b4   : > { %v2168_v43 = vpop.f32.mrf.mxu1  ;;  %1698 = vst [vmem:[#allocation2] sm:$0xff] %v1694_v38  ;;  %v1687_v45 = vadd.f32 %v2166_v40, %v1638_v39  ;;  %v2141_v46 = vadd.f32 %v2140_v42, %v2139_v36 }
 0x1b5   : > { %v2169_v49 = vadd.f32 %v2168_v43, %v2167_v37 }
 0x1b6   : > { %v1695_v47 = vadd.f32 %v1687_v45, %v887_v41  ;;  %v1641_v48 = vadd.f32 %v2141_v46, %v1592_v44 }
 0x1b8   : > { %1699 = vst [vmem:[#allocation2 + $0x18] sm:$0xff] %v1695_v47  ;;  %v1690_v51 = vadd.f32 %v2169_v49, %v1641_v48  ;;  %1704 = sbr.rel (%p2030_p5) target bundleno = 461 (0x1cd), region = 108 }
 0x1ba   : > { %v1696_v52 = vadd.f32 %v1690_v51, %v888_v50 }
 0x1bc   : > { %1700 = vst [vmem:[#allocation2 + $0x8] sm:$0xff] %v1696_v52 }
 0x1bd   : > { %v1705_v53 = vld [vmem:[#allocation2 + $0x10] sm:$0xff]  ;;  %v1706_v54 = vld [vmem:[#allocation2] sm:$0xff] }
 0x1be   : > { %v2031_v55 = vld [vmem:[%s871_s9] ss:$0 sm:$0xff] }
 0x1bf   : > { %v1716_v56 = vmul.f32 %v2031_v55, %v1705_v53  ;;  %v1717_v57 = vmul.f32 %v2031_v55, %v1706_v54  ;;  %v2032_v58 = vld [vmem:[%s874_s27] ss:$0 sm:$0xff]  ;;  %v1707_v59 = vld [vmem:[#allocation2 + $0x18] sm:$0xff] }
 0x1c0   : > { %v1718_v61 = vmul.f32 %v2031_v55, %v1707_v59 }
 0x1c1   : > { %v1727_v63 = vadd.f32 %v2032_v58, %v1716_v56  ;;  %v1728_v0 = vadd.f32 %v2032_v58, %v1717_v57 }
 0x1c2   : > { %v1729_v1 = vadd.f32 %v2032_v58, %v1718_v61 }
 0x1c3   : > { %v1708_v60 = vld [vmem:[#allocation2 + $0x8] sm:$0xff]  ;;  %v1731_v3 = vmax.f32 %v1727_v63, 0.0  ;;  %v1732_v4 = vmax.f32 %v1728_v0, 0.0 }
 0x1c4   : > { %v1719_v62 = vmul.f32 %v2031_v55, %v1708_v60  ;;  %v1733_v5 = vmax.f32 %v1729_v1, 0.0 }
 0x1c5   : > { %v2050_v7 = vpack.c.bf16 %v1732_v4, %v1731_v3 }
 0x1c6   : > { %v1730_v2 = vadd.f32 %v2032_v58, %v1719_v62 }
 0x1c7   : > { %2051 = vst [vmem:[%s2850_s19] sm:$0xff] %v2050_v7  }
 0x1c8   : > { %v1734_v6 = vmax.f32 %v1730_v2, 0.0 }
 0x1ca   : > { %v2055_v8 = vpack.c.bf16 %v1734_v6, %v1733_v5 }
 0x1cc   : > { %2057 = vst [vmem:[%s2850_s19 + $0x8] sm:$0xff] %v2055_v8  }
 0x1cd PF: > { %1761 = sbr.rel (!%p2531_p12) target bundleno = 469 (0x1d5), region = 112  ;;  %s2038_s21 = sshll.u32 (%p2531_p12), %s2397_s22, 2 }
 0x1ce   : > { %v1783_v9 = vld [vmem:[%s2850_s19] sm:$0xf] (%p2531_p12)  ;;  %v1785_v10 = vld [vmem:[%s2850_s19 + $0x4] sm:$0xf] (%p2531_p12)  ;;  %s1766_s26 = scalar_lea.vmem (%p2531_p12), %s2993_s4, %s2038_s21 }
 0x1cf   : > { %1784 = vst [vmem:[%s1766_s26] sm:$0xf] (%p2531_p12), %v1783_v9  ;;  %1786 = vst [vmem:[%s1766_s26 + $0x8] sm:$0xf] (%p2531_p12), %v1785_v10 }
 0x1d3   : > { %v1787_v11 = vld [vmem:[%s2850_s19 + $0x8] sm:$0xf]  ;;  %v1789_v12 = vld [vmem:[%s2850_s19 + $0xc] sm:$0xf] }
 0x1d4   : > { %1788 = vst [vmem:[%s1766_s26 + $0x10] sm:$0xf] %v1787_v11  ;;  %1790 = vst [vmem:[%s1766_s26 + $0x18] sm:$0xf] %v1789_v12 }
 0x1d5 PF: > { %s14_s25 = sadd.s32 1, %s2409_s25   ;;  %s3007_s22 = sld [smem:[#allocation6_spill]] }
 0x1d6   : > { %p11_p6 = scmp.ge.s32.totalorder %s14_s25, 38   ;;  %s3008_s14 = sld [smem:[#allocation7_spill]] }
 0x1d7   : > { %s3009_s24 = sld [smem:[#allocation8_spill]]  ;;  %s3010_s15 = smov %s2373_s16 }
 0x1d8   : > { %s3011_s16 = smov %s2529_s13  ;;  %s3012_s17 = smov %s2381_s18 }
 0x1d9   : > { %s3013_s18 = smov %s2526_s12  ;;  %s3014_s19 = smov %s2389_s20 }
 0x1da   : > { %s3015_s20 = smov %s2512_s7  ;;  %s3016_s21 = smov %s2401_s23 }
 0x1db   :  { %13 = sbr.rel (!%p11_p6) target bundleno = 9 (0x9), region = 198 }
 0x1dc   : > { %s3017_s23 = smov %s3008_s14 }

// kernel: deeplabv3plus_forward.23
= control target key start
LH: loop header
LB: loop body
LE: loop exit
PB: predicated region body
PF: predicated region fallthrough
CT: control target
= control target key end

     0   :  { %s841_s6 = smov 0   ;;  %s843_s7 = smov 0   ;;  %s1087_s0 = inlined_call_operand.vmem [shape: bf16[2,16,2048], index: 0, kind: input, shape index: {}]   ;;  %s1088_s1 = inlined_call_operand.vmem [shape: bf16[2,1,2048], index: 1, kind: output, shape index: {}]  }
   0x1   :  { %s845_s8 = smov 0  }
   0x2 LB: > { %s23_s9 = sadd.s32 1, %s824_s7  ;;  %p766_p0 = scmp.ge.s32.totalorder %s828_s8, 1  ;;  %s828_s8 = sphi %s845_s8, %s11_s8   ;;  %s824_s7 = sphi %s843_s7, %s1104_s7   ;;  %s820_s6 = sphi %s841_s6, %s1103_s6  }
   0x3   : > { %p25_p1 = scmp.ge.s32.totalorder %s23_s9, 2  ;;  %p107_p2 = scmp.lt.s32.totalorder %s828_s8, 3 }
   0x5   : > { %s1106_s9 = smov (%p25_p1, %s23_s9), 0  ;;  %p108_p3 = pnand %p766_p0, %p107_p2 }
   0x6   : > { %p132_p4 = scmp.lt.s32.totalorder (!%p108_p3), %s820_s6, 1 }
   0x7   : > { %111 = sbr.rel (%p108_p3) target bundleno = 82 (0x52), region = 24 }
   0xc   : > { %v337_v0 = vlaneseq  ;;  %v830_v1 = vmov 1966171168   ;;  %s1108_s6 = smov (!%p132_p4, %s820_s6), 1  ;;  %vm655_vm0 = vcmask 1040384   ;;  %vm656_vm1 = vsmask.f32 256 }
   0xd   : > { %v335_v2 = vunpack.c.l.s4 %v830_v1  ;;  %s780_s10 = sshll.u32 %s1108_s6, 7  ;;  %vm658_vm2 = vcmask 1041409   ;;  %vm659_vm3 = vsmask.f32 1280  ;;  %vm662_vm4 = vcmask 1042434   ;;  %vm970_vm8 = vmand %vm655_vm0, %vm656_vm1  ;;  %s769_s14 = sshll.u32 %s1108_s6, 4 }
   0xe   : > { %v861_v3 = vshrl.u32 %v337_v0, 7  ;;  %s867_s13 = scalar_lea.vmem %s1087_s0, %s780_s10  ;;  %vm663_vm5 = vsmask.f32 2304  ;;  %vm666_vm6 = vcmask 1043459   ;;  %vm667_vm7 = vsmask.f32 3328  ;;  %vm976_vm9 = vmand %vm658_vm2, %vm659_vm3  ;;  %s145_s17 = scalar_lea.vmem %s1088_s1, %s769_s14 }
   0xf   : > { %v336_v4 = vunpack.c.0.s8 %v335_v2  ;;  %v154_v5 = vld [vmem:[%s867_s13] sm:$0xff]  ;;  %v155_v6 = vld [vmem:[%s867_s13 + $0x8] sm:$0xff]  ;;  %v156_v7 = vld [vmem:[%s867_s13 + $0x10] sm:$0xff]  ;;  %vm670_vm14 = vcmask 1044484   ;;  %vm671_vm15 = vsmask.f32 4352 }
  0x10   : > { %v157_v9 = vld [vmem:[%s867_s13 + $0x18] sm:$0xff]  ;;  %v877_v10 = vld [vmem:[%s867_s13 + $0x20] sm:$0xff]  ;;  %v880_v11 = vld [vmem:[%s867_s13 + $0x28] sm:$0xff]  ;;  %v170_v12 = vunpack.c.l.bf16 %v154_v5  ;;  %v171_v13 = vunpack.c.h.bf16 %v154_v5  ;;  %v172_v14 = vunpack.c.l.bf16 %v155_v6  ;;  %v173_v15 = vunpack.c.h.bf16 %v155_v6 }
  0x11   : > { %v873_v8 = vsub.s32 %v336_v4, %v861_v3  ;;  %v883_v16 = vld [vmem:[%s867_s13 + $0x30] sm:$0xff]  ;;  %v886_v17 = vld [vmem:[%s867_s13 + $0x38] sm:$0xff]  ;;  %v162_v18 = vld [vmem:[%s867_s13 + $0x40] sm:$0xff]  ;;  %v174_v19 = vunpack.c.l.bf16 %v156_v7  ;;  %v175_v20 = vunpack.c.h.bf16 %v156_v7  ;;  %v176_v21 = vunpack.c.l.bf16 %v157_v9 }
  0x12   : > { %v177_v22 = vunpack.c.h.bf16 %v157_v9  ;;  %v163_v23 = vld [vmem:[%s867_s13 + $0x48] sm:$0xff]  ;;  %v164_v24 = vld [vmem:[%s867_s13 + $0x50] sm:$0xff]  ;;  %v165_v25 = vld [vmem:[%s867_s13 + $0x58] sm:$0xff]  ;;  %v178_v26 = vunpack.c.l.bf16 %v877_v10  ;;  %v179_v27 = vunpack.c.h.bf16 %v877_v10  ;;  %v180_v28 = vunpack.c.l.bf16 %v880_v11 }
  0x13   : > { %v181_v29 = vunpack.c.h.bf16 %v880_v11  ;;  %v897_v30 = vld [vmem:[%s867_s13 + $0x60] sm:$0xff]  ;;  %v900_v31 = vld [vmem:[%s867_s13 + $0x68] sm:$0xff]  ;;  %v182_v32 = vunpack.c.l.bf16 %v883_v16  ;;  %v183_v33 = vunpack.c.h.bf16 %v883_v16  ;;  %v184_v34 = vunpack.c.l.bf16 %v886_v17  ;;  %v907_v36 = vld [vmem:[%s867_s13 + $0x70] sm:$0xff] }
  0x14   : > { %v185_v35 = vunpack.c.h.bf16 %v886_v17  ;;  %v910_v37 = vld [vmem:[%s867_s13 + $0x78] sm:$0xff]  ;;  %v186_v38 = vunpack.c.l.bf16 %v162_v18  ;;  %v187_v39 = vunpack.c.h.bf16 %v162_v18  ;;  %v188_v40 = vunpack.c.l.bf16 %v163_v23  ;;  %vm661_vm10 = vmor %vm976_vm9, %vm970_vm8 }
  0x15   : > { %v189_v41 = vunpack.c.h.bf16 %v163_v23  ;;  %v190_v42 = vunpack.c.l.bf16 %v164_v24  ;;  %v191_v43 = vunpack.c.h.bf16 %v164_v24  ;;  %v192_v44 = vunpack.c.l.bf16 %v165_v25  ;;  %vm664_vm11 = vmand %vm662_vm4, %vm663_vm5 }
  0x16   : > { %v193_v45 = vunpack.c.h.bf16 %v165_v25  ;;  %v194_v46 = vunpack.c.l.bf16 %v897_v30  ;;  %v195_v47 = vunpack.c.h.bf16 %v897_v30  ;;  %v196_v48 = vunpack.c.l.bf16 %v900_v31  ;;  %vm1007_vm12 = vmor %vm664_vm11, %vm661_vm10 }
  0x17   : > { %v197_v49 = vunpack.c.h.bf16 %v900_v31  ;;  %v198_v50 = vunpack.c.l.bf16 %v907_v36  ;;  %v199_v51 = vunpack.c.h.bf16 %v907_v36  ;;  %v200_v52 = vunpack.c.l.bf16 %v910_v37  ;;  %vm1013_vm13 = vmand %vm666_vm6, %vm667_vm7 }
  0x18   : > { %v201_v53 = vunpack.c.h.bf16 %v910_v37  ;;  %v202_v54 = vadd.f32 %v186_v38, %v170_v12  ;;  %v209_v55 = vadd.f32 %v187_v39, %v171_v13  ;;  %v216_v56 = vadd.f32 %v188_v40, %v172_v14  ;;  %vm669_vm1 = vmor %vm1013_vm13, %vm1007_vm12 }
  0x19   : > { %v223_v57 = vadd.f32 %v189_v41, %v173_v15  ;;  %v230_v58 = vadd.f32 %v190_v42, %v174_v19  ;;  %v237_v59 = vadd.f32 %v191_v43, %v175_v20  ;;  %v244_v60 = vadd.f32 %v192_v44, %v176_v21  ;;  %vm672_vm2 = vmand %vm670_vm14, %vm671_vm15 }
  0x1a   : > { %v251_v61 = vadd.f32 %v193_v45, %v177_v22  ;;  %v203_v62 = vrot.slane %v202_v54, 4  ;;  %v210_v63 = vrot.slane %v209_v55, 4  ;;  %v217_v0 = vrot.slane %v216_v56, 4  ;;  %vm1034_vm5 = vmor %vm672_vm2, %vm669_vm1 }
  0x1b   : > { %v224_v1 = vrot.slane %v223_v57, 4  ;;  %v231_v2 = vrot.slane %v230_v58, 4  ;;  %v238_v4 = vrot.slane %v237_v59, 4  ;;  %v245_v5 = vrot.slane %v244_v60, 4 }
  0x1c   : > { %v252_v6 = vrot.slane %v251_v61, 4  ;;  %v204_v7 = vadd.f32 %v203_v62, %v202_v54  ;;  %v211_v9 = vadd.f32 %v210_v63, %v209_v55  ;;  %v218_v18 = vadd.f32 %v217_v0, %v216_v56 }
  0x1d   : > { %v225_v23 = vadd.f32 %v224_v1, %v223_v57  ;;  %v232_v12 = vadd.f32 %v231_v2, %v230_v58  ;;  %v239_v13 = vadd.f32 %v238_v4, %v237_v59  ;;  %v246_v14 = vadd.f32 %v245_v5, %v244_v60 }
  0x1e   : > { %v253_v15 = vadd.f32 %v252_v6, %v251_v61  ;;  %v205_v19 = vrot.slane %v204_v7, 2  ;;  %v212_v20 = vrot.slane %v211_v9, 2  ;;  %v219_v21 = vrot.slane %v218_v18, 2 }
  0x1f   : > { %v226_v22 = vrot.slane %v225_v23, 2  ;;  %v233_v24 = vrot.slane %v232_v12, 2  ;;  %v240_v25 = vrot.slane %v239_v13, 2  ;;  %v247_v38 = vrot.slane %v246_v14, 2 }
  0x20   : > { %v254_v39 = vrot.slane %v253_v15, 2  ;;  %v206_v40 = vadd.f32 %v205_v19, %v204_v7  ;;  %v213_v41 = vadd.f32 %v212_v20, %v211_v9  ;;  %v220_v42 = vadd.f32 %v219_v21, %v218_v18 }
  0x21   : > { %v227_v43 = vadd.f32 %v226_v22, %v225_v23  ;;  %v234_v44 = vadd.f32 %v233_v24, %v232_v12  ;;  %v241_v45 = vadd.f32 %v240_v25, %v239_v13  ;;  %v248_v54 = vadd.f32 %v247_v38, %v246_v14 }
  0x22   : > { %v255_v55 = vadd.f32 %v254_v39, %v253_v15  ;;  %v207_v56 = vrot.slane %v206_v40, 1  ;;  %v214_v57 = vrot.slane %v213_v41, 1  ;;  %v221_v58 = vrot.slane %v220_v42, 1 }
  0x23   : > { %v228_v59 = vrot.slane %v227_v43, 1  ;;  %v235_v60 = vrot.slane %v234_v44, 1  ;;  %v242_v61 = vrot.slane %v241_v45, 1  ;;  %v249_v62 = vrot.slane %v248_v54, 1 }
  0x24   : > { %v256_v63 = vrot.slane %v255_v55, 1  ;;  %v920_v0 = vadd.f32 %v207_v56, %v206_v40  ;;  %v922_v1 = vadd.f32 %v214_v57, %v213_v41  ;;  %v924_v2 = vadd.f32 %v221_v58, %v220_v42 }
  0x25   : > { %v926_v4 = vadd.f32 %v228_v59, %v227_v43  ;;  %v928_v5 = vadd.f32 %v235_v60, %v234_v44  ;;  %v930_v6 = vadd.f32 %v242_v61, %v241_v45  ;;  %v932_v7 = vadd.f32 %v249_v62, %v248_v54 }
  0x26   : > { %v934_v9 = vadd.f32 %v256_v63, %v255_v55  ;;  %v258_v18 = vadd.f32 %v194_v46, %v178_v26  ;;  %v265_v23 = vadd.f32 %v195_v47, %v179_v27  ;;  %v272_v12 = vadd.f32 %v196_v48, %v180_v28 }
  0x27   : > { %v279_v13 = vadd.f32 %v197_v49, %v181_v29  ;;  %v286_v26 = vadd.f32 %v198_v50, %v182_v32  ;;  %v293_v10 = vadd.f32 %v199_v51, %v183_v33  ;;  %v300_v27 = vadd.f32 %v200_v52, %v184_v34 }
  0x28   : > { %v307_v11 = vadd.f32 %v201_v53, %v185_v35  ;;  %v259_v28 = vrot.slane %v258_v18, 4  ;;  %v266_v29 = vrot.slane %v265_v23, 4  ;;  %v273_v30 = vrot.slane %v272_v12, 4 }
  0x29   : > { %v280_v31 = vrot.slane %v279_v13, 4  ;;  %v287_v32 = vrot.slane %v286_v26, 4  ;;  %v294_v46 = vrot.slane %v293_v10, 4  ;;  %v301_v16 = vrot.slane %v300_v27, 4 }
  0x2a   : > { %v308_v47 = vrot.slane %v307_v11, 4  ;;  %v260_v33 = vadd.f32 %v259_v28, %v258_v18  ;;  %v267_v36 = vadd.f32 %v266_v29, %v265_v23  ;;  %v274_v48 = vadd.f32 %v273_v30, %v272_v12 }
  0x2b   : > { %v281_v49 = vadd.f32 %v280_v31, %v279_v13  ;;  %v288_v34 = vadd.f32 %v287_v32, %v286_v26  ;;  %v295_v50 = vadd.f32 %v294_v46, %v293_v10  ;;  %v302_v17 = vadd.f32 %v301_v16, %v300_v27 }
  0x2c   : > { %v309_v51 = vadd.f32 %v308_v47, %v307_v11  ;;  %v261_v37 = vrot.slane %v260_v33, 2  ;;  %v268_v35 = vrot.slane %v267_v36, 2  ;;  %v275_v52 = vrot.slane %v274_v48, 2 }
  0x2d   : > { %v282_v53 = vrot.slane %v281_v49, 2  ;;  %v289_v14 = vrot.slane %v288_v34, 2  ;;  %v296_v15 = vrot.slane %v295_v50, 2  ;;  %v303_v19 = vrot.slane %v302_v17, 2 }
  0x2e   : > { %v310_v20 = vrot.slane %v309_v51, 2  ;;  %v262_v21 = vadd.f32 %v261_v37, %v260_v33  ;;  %v269_v22 = vadd.f32 %v268_v35, %v267_v36  ;;  %v276_v24 = vadd.f32 %v275_v52, %v274_v48 }
  0x2f   : > { %v283_v25 = vadd.f32 %v282_v53, %v281_v49  ;;  %v290_v38 = vadd.f32 %v289_v14, %v288_v34  ;;  %v297_v39 = vadd.f32 %v296_v15, %v295_v50  ;;  %v304_v40 = vadd.f32 %v303_v19, %v302_v17 }
  0x30   : > { %v311_v41 = vadd.f32 %v310_v20, %v309_v51  ;;  %v263_v43 = vrot.slane %v262_v21, 1  ;;  %v270_v44 = vrot.slane %v269_v22, 1  ;;  %v277_v45 = vrot.slane %v276_v24, 1 }
  0x31   : > { %v284_v54 = vrot.slane %v283_v25, 1  ;;  %v291_v56 = vrot.slane %v290_v38, 1  ;;  %v298_v57 = vrot.slane %v297_v39, 1  ;;  %v305_v58 = vrot.slane %v304_v40, 1 }
  0x32   : > { %v312_v59 = vrot.slane %v311_v41, 1  ;;  %v264_v60 = vadd.f32 %v263_v43, %v262_v21  ;;  %v271_v61 = vadd.f32 %v270_v44, %v269_v22  ;;  %v278_v62 = vadd.f32 %v277_v45, %v276_v24 }
  0x33   : > { %v285_v63 = vadd.f32 %v284_v54, %v283_v25  ;;  %v292_v18 = vadd.f32 %v291_v56, %v290_v38  ;;  %v299_v23 = vadd.f32 %v298_v57, %v297_v39  ;;  %v306_v12 = vadd.f32 %v305_v58, %v304_v40 }
  0x34   : > { %v313_v13 = vadd.f32 %v312_v59, %v311_v41  ;;  %v330_v26 = vcombine.low %v920_v0, %v922_v1  ;;  %v331_v10 = vcombine.low %v924_v2, %v926_v4  ;;  %v332_v27 = vcombine.low %v928_v5, %v930_v6 }
  0x35   : > { %v333_v11 = vcombine.low %v932_v7, %v934_v9  ;;  %v379_v28 = vcombine.low %v264_v60, %v271_v61  ;;  %v380_v29 = vcombine.low %v278_v62, %v285_v63  ;;  %v381_v30 = vcombine.low %v292_v18, %v299_v23 }
  0x36   : > { %v382_v31 = vcombine.low %v306_v12, %v313_v13  ;;  %v340_v32 = vrot.slane %v330_v26, %v873_v8  ;;  %v347_v0 = vrot.slane %v331_v10, %v873_v8  ;;  %v354_v1 = vrot.slane %v332_v27, %v873_v8 }
  0x37   : > { %v361_v2 = vrot.slane %v333_v11, %v873_v8  ;;  %v389_v4 = vrot.slane %v379_v28, %v873_v8  ;;  %v396_v5 = vrot.slane %v380_v29, %v873_v8  ;;  %v403_v6 = vrot.slane %v381_v30, %v873_v8 }
  0x38   : > { %v410_v7 = vrot.slane %v382_v31, %v873_v8  ;;  %v362_v46 = vcombine.low %v340_v32, %v347_v0  ;;  %v445_v34 = vsub.s32 0, %v861_v3  ;;  %vm674_vm0 = vcmask 1045509  }
  0x39   : > { %v363_v16 = vcombine.low %v354_v1, %v361_v2  ;;  %v411_v33 = vcombine.low %v389_v4, %v396_v5  ;;  %v449_v51 = vsub.s32 1, %v861_v3  ;;  %v453_v37 = vsub.s32 2, %v861_v3 }
  0x3a   : > { %v412_v36 = vcombine.low %v403_v6, %v410_v7  ;;  %v370_v48 = vrot.slane %v362_v46, %v873_v8  ;;  %v457_v52 = vsub.s32 3, %v861_v3  ;;  %v461_v53 = vsub.s32 4, %v861_v3 }
  0x3b   : > { %v377_v49 = vrot.slane %v363_v16, %v873_v8  ;;  %v419_v50 = vrot.slane %v411_v33, %v873_v8  ;;  %v465_v14 = vsub.s32 5, %v861_v3  ;;  %v469_v19 = vsub.s32 6, %v861_v3  ;;  %v686_v16 = vld [vmem:[%s145_s17] sm:$0xff]  ;;  %v689_v33 = vld [vmem:[%s145_s17 + $0x8] sm:$0xff] }
  0x3c   : > { %v426_v17 = vrot.slane %v412_v36, %v873_v8  ;;  %v473_v20 = vsub.s32 7, %v861_v3  ;;  %vm675_vm3 = vsmask.f32 5376  ;;  %vm678_vm4 = vcmask 1046534  }
  0x3d   : > { %v378_v35 = vcombine.low %v370_v48, %v377_v49  ;;  %vm679_vm6 = vsmask.f32 6400  ;;  %vm682_vm7 = vcmask 1047559   ;;  %vm683_vm8 = vsmask.f32 7424  ;;  %vm1039_vm9 = vmand %vm674_vm0, %vm675_vm3 }
  0x3e   : > { %v427_v15 = vcombine.low %v419_v50, %v426_v17  ;;  %vm677_vm10 = vmor %vm1039_vm9, %vm1034_vm5 }
  0x3f   : > { %v439_v21 = vmul.f32 0.0625, %v378_v35  ;;  %vm680_vm11 = vmand %vm678_vm4, %vm679_vm6 }
  0x40   : > { %v440_v22 = vmul.f32 0.0625, %v427_v15  ;;  %vm1063_vm12 = vmor %vm680_vm11, %vm677_vm10 }
  0x41   : > { %v446_v25 = vrot.slane %v439_v21, %v445_v34  ;;  %v450_v38 = vrot.slane %v439_v21, %v449_v51  ;;  %v454_v39 = vrot.slane %v439_v21, %v453_v37  ;;  %v458_v40 = vrot.slane %v439_v21, %v457_v52  ;;  %vm684_vm13 = vmand %vm682_vm7, %vm683_vm8 }
  0x42   : > { %v462_v3 = vrot.slane %v439_v21, %v461_v53  ;;  %v466_v42 = vrot.slane %v439_v21, %v465_v14  ;;  %v470_v43 = vrot.slane %v439_v21, %v469_v19  ;;  %v474_v44 = vrot.slane %v439_v21, %v473_v20  ;;  %vm685_vm14 = vmor %vm684_vm13, %vm1063_vm12 }
  0x43   : > { %v478_v45 = vrot.slane %v440_v22, %v445_v34  ;;  %v482_v54 = vrot.slane %v440_v22, %v449_v51  ;;  %v486_v55 = vrot.slane %v440_v22, %v453_v37  ;;  %v490_v56 = vrot.slane %v440_v22, %v457_v52 }
  0x44   : > { %v494_v57 = vrot.slane %v440_v22, %v461_v53  ;;  %v498_v58 = vrot.slane %v440_v22, %v465_v14  ;;  %v502_v59 = vrot.slane %v440_v22, %v469_v19  ;;  %v506_v60 = vrot.slane %v440_v22, %v473_v20 }
  0x45   : > { %v770_v61 = vpack.c.bf16 %v450_v38, %v446_v25  ;;  %v771_v62 = vpack.c.bf16 %v458_v40, %v454_v39  ;;  %v772_v63 = vpack.c.bf16 %v466_v42, %v462_v3  ;;  %v773_v18 = vpack.c.bf16 %v474_v44, %v470_v43 }
  0x46   : > { %v774_v23 = vpack.c.bf16 %v482_v54, %v478_v45  ;;  %v775_v12 = vpack.c.bf16 %v490_v56, %v486_v55  ;;  %v776_v13 = vpack.c.bf16 %v498_v58, %v494_v57  ;;  %v777_v26 = vpack.c.bf16 %v506_v60, %v502_v59 }
  0x47   : > { %v565_v10 = vrot.slane %v770_v61, %v873_v8  ;;  %v572_v27 = vrot.slane %v771_v62, %v873_v8  ;;  %v579_v11 = vrot.slane %v772_v63, %v873_v8  ;;  %v586_v28 = vrot.slane %v773_v18, %v873_v8 }
  0x48   : > { %v614_v29 = vrot.slane %v774_v23, %v873_v8  ;;  %v621_v30 = vrot.slane %v775_v12, %v873_v8  ;;  %v628_v31 = vrot.slane %v776_v13, %v873_v8  ;;  %v635_v32 = vrot.slane %v777_v26, %v873_v8 }
  0x49   : > { %v587_v1 = vcombine.low %v565_v10, %v572_v27  ;;  %v588_v2 = vcombine.low %v579_v11, %v586_v28 }
  0x4a   : > { %v636_v4 = vcombine.low %v614_v29, %v621_v30  ;;  %v637_v5 = vcombine.low %v628_v31, %v635_v32 }
  0x4b   : > { %v595_v6 = vrot.slane %v587_v1, %v873_v8  ;;  %v602_v7 = vrot.slane %v588_v2, %v873_v8 }
  0x4c   : > { %v644_v9 = vrot.slane %v636_v4, %v873_v8  ;;  %v651_v46 = vrot.slane %v637_v5, %v873_v8 }
  0x4d   : > { %v603_v47 = vcombine.low %v595_v6, %v602_v7 }
  0x4e   : > { %v652_v36 = vcombine.low %v644_v9, %v651_v46 }
  0x4f   : > { %v687_v48 = vsel %vm685_vm14, %v603_v47, %v686_v16 }
  0x50   : > { %688 = vst [vmem:[%s145_s17] sm:$0xff] %v687_v48  ;;  %v690_v49 = vsel %vm685_vm14, %v652_v36, %v689_v33 }
  0x51   : > { %691 = vst [vmem:[%s145_s17 + $0x8] sm:$0xff] %v690_v49 }
  0x52 PF: > { %s11_s8 = sadd.s32 1, %s828_s8   ;;  %s1103_s6 = smov %s824_s7 }
  0x53   : > { %p8_p5 = scmp.ge.s32.totalorder %s11_s8, 4   ;;  %s1104_s7 = smov %s1106_s9 }
  0x55   :  { %10 = sbr.rel (!%p8_p5) target bundleno = 2 (0x2), region = 62 }

// kernel: deeplabv3plus_forward.19
= control target key start
LH: loop header
LB: loop body
LE: loop exit
PB: predicated region body
PF: predicated region fallthrough
CT: control target
= control target key end

     0   :  { %s2989_s0 = inlined_call_operand.vmem [shape: bf16[32,2048], index: 0, kind: input, shape index: {}]   ;;  %s2990_s1 = inlined_call_operand.vmem [shape: bf16[2048,256], index: 1, kind: input, shape index: {}]   ;;  %s2991_s2 = inlined_call_operand.vmem [shape: f32[1,256], index: 2, kind: input, shape index: {}]   ;;  %s2992_s3 = inlined_call_operand.vmem [shape: f32[1,256], index: 3, kind: input, shape index: {}]   ;;  %s2993_s4 = inlined_call_operand.vmem [shape: bf16[32,256], index: 4, kind: output, shape index: {}]  }
   0x1   :  { %2997 = sst [smem:[#allocation9_spill]] %s2989_s0 }
   0x2   :  { %2998 = sst [smem:[#allocation10_spill]] %s2990_s1 }
   0x3   :  { %s2437_s15 = smov 0   ;;  %s2439_s16 = smov 0  }
   0x4   :  { %s2441_s17 = smov 0   ;;  %s2443_s18 = smov 0  }
   0x5   :  { %s2445_s19 = smov 0   ;;  %s2447_s20 = smov 0  }
   0x6   :  { %s2449_s21 = smov 0   ;;  %s2451_s22 = smov 0  }
   0x7   :  { %s2453_s23 = smov 0   ;;  %s2455_s24 = smov 0  }
   0x8   :  { %s2457_s25 = smov 0  }
   0x9 LB: > { %2999 = sst [smem:[#allocation6_spill]] %s2405_s24  ;;  %s1934_s26 = sadd.s32 4294967295, %s2409_s25   ;;  %s2409_s25 = sphi %s2457_s25, %s14_s25   ;;  %s2405_s24 = sphi %s2455_s24, %s3009_s24   ;;  %s2401_s23 = sphi %s2453_s23, %s3017_s23   ;;  %s2397_s22 = sphi %s2451_s22, %s3007_s22   ;;  %s2393_s21 = sphi %s2449_s21, %s3016_s21   ;;  %s2389_s20 = sphi %s2447_s20, %s3015_s20   ;;  %s2385_s19 = sphi %s2445_s19, %s3014_s19   ;;  %s2381_s18 = sphi %s2443_s18, %s3013_s18   ;;  %s2377_s17 = sphi %s2441_s17, %s3012_s17   ;;  %s2373_s16 = sphi %s2439_s16, %s3011_s16   ;;  %s2369_s15 = sphi %s2437_s15, %s3010_s15  }
   0xa   : > { %s26_s27 = sadd.s32 1, %s2401_s23  ;;  %s29_s28 = sadd.s32 1, %s2405_s24 }
   0xb   : > { %p27_p0 = scmp.ge.s32.totalorder %s26_s27, 2  ;;  %s42_s29 = sadd.s32 1, %s2389_s20 }
   0xc   : > { %p49_p1 = scmp.ne.s32.totalorder %s2389_s20, %s2385_s19  ;;  %p50_p2 = scmp.eq.s32.totalorder %s2409_s25, 0 }
   0xd   : > { %s3019_s27 = smov (%p27_p0, %s26_s27), 0  ;;  %s3021_s28 = smov (!%p27_p0, %s29_s28), %s2405_s24 }
   0xe   : > { %3000 = sst [smem:[#allocation7_spill]] %s3019_s27  ;;  %s38_s30 = ssub.s32 %s2401_s23, %s3019_s27 }
   0xf   : > { %p31_p3 = scmp.ge.s32.totalorder %s3021_s28, 2  ;;  %p40_p4 = scmp.eq.s32.totalorder %s38_s30, 0 }
  0x10   : > { %p2504_p5 = por %p50_p2, %p49_p1  ;;  %s70_s6 = sadd.s32 1, %s2381_s18 }
  0x11   : > { %s3023_s28 = smov (%p31_p3, %s3021_s28), 0  ;;  %p77_p6 = scmp.ne.s32.totalorder %s2381_s18, %s2377_s17 }
  0x12   : > { %3002 = sst [smem:[#allocation8_spill]] %s3023_s28  ;;  %s66_s8 = ssub.s32 %s2405_s24, %s3023_s28 }
  0x13   : > { %s2512_s7 = scalar_select %p40_p4, %s2389_s20, %s42_s29  }
  0x14   : > { %s67_s9 = sor.u32 %s66_s8, %s38_s30  ;;  %p148_p7 = scmp.eq.s32.totalorder %s66_s8, 0 }
  0x15   : > { %p68_p8 = scmp.eq.s32.totalorder %s67_s9, 0  ;;  %p2518_p9 = por %p77_p6, %p50_p2 }
  0x16   : > { %s150_s11 = sadd.s32 1, %s2373_s16  ;;  %p160_p10 = scmp.ne.s32.totalorder %s2373_s16, %s2369_s15 }
  0x17   : > { %s2526_s12 = scalar_select %p68_p8, %s2381_s18, %s70_s6  }
  0x18   : > { %s2529_s13 = scalar_select %p148_p7, %s2373_s16, %s150_s11  }
  0x19   : > { %p161_p11 = scmp.eq.s32.totalorder %s1934_s26, 3  ;;  %p1937_p13 = scmp.ge.s32.totalorder %s2409_s25, 4 }
  0x1b   : > { %p2531_p12 = por %p161_p11, %p160_p10  ;;  %183 = sbr.rel (%p1937_p13) target bundleno = 145 (0x91), region = 16 }
  0x20   : > { %186 = sbr.rel (!%p2504_p5) target bundleno = 50 (0x32), region = 20  ;;  %s188_s29 = sand.u32 (%p2504_p5), 1, %s2389_s20  }
  0x21   : > { %s2041_s30 = sshll.u32 (%p2504_p5), %s2401_s23, 5  ;;  %s1938_s8 = sshll.u32 (%p2504_p5), %s188_s29, 7 }
  0x22   : > { %s3005_s0 = sld [smem:[#allocation9_spill]] (%p2504_p5)  ;;  %s190_s26 = scalar_lea.vmem (%p2504_p5), [#allocation3], %s1938_s8 }
  0x28   : > { %s2543_s11 = scalar_lea.vmem %s3005_s0, %s2041_s30 }
  0x29   : > { %v209_v0 = vld [vmem:[%s2543_s11] sm:$0xff]  ;;  %v211_v1 = vld [vmem:[%s2543_s11 + $0x8] sm:$0xff]  ;;  %v213_v2 = vld [vmem:[%s2543_s11 + $0x10] sm:$0xff] }
  0x2a   : > { %210 = vst [vmem:[%s190_s26] sm:$0xff] %v209_v0  ;;  %212 = vst [vmem:[%s190_s26 + $0x8] sm:$0xff] %v211_v1  ;;  %v215_v3 = vld [vmem:[%s2543_s11 + $0x18] sm:$0xff]  ;;  %v217_v4 = vld [vmem:[%s2543_s11 + $0x40] sm:$0xff] }
  0x2b   : > { %214 = vst [vmem:[%s190_s26 + $0x10] sm:$0xff] %v213_v2  ;;  %v219_v5 = vld [vmem:[%s2543_s11 + $0x48] sm:$0xff]  ;;  %216 = vst [vmem:[%s190_s26 + $0x18] sm:$0xff] %v215_v3  ;;  %v221_v6 = vld [vmem:[%s2543_s11 + $0x50] sm:$0xff] }
  0x2c   : > { %218 = vst [vmem:[%s190_s26 + $0x20] sm:$0xff] %v217_v4  ;;  %220 = vst [vmem:[%s190_s26 + $0x28] sm:$0xff] %v219_v5  ;;  %v223_v7 = vld [vmem:[%s2543_s11 + $0x58] sm:$0xff]  ;;  %v225_v8 = vld [vmem:[%s2543_s11 + $0x80] sm:$0xff] }
  0x2d   : > { %222 = vst [vmem:[%s190_s26 + $0x30] sm:$0xff] %v221_v6  ;;  %224 = vst [vmem:[%s190_s26 + $0x38] sm:$0xff] %v223_v7  ;;  %v227_v9 = vld [vmem:[%s2543_s11 + $0x88] sm:$0xff]  ;;  %v229_v10 = vld [vmem:[%s2543_s11 + $0x90] sm:$0xff] }
  0x2e   : > { %226 = vst [vmem:[%s190_s26 + $0x40] sm:$0xff] %v225_v8  ;;  %v231_v11 = vld [vmem:[%s2543_s11 + $0x98] sm:$0xff]  ;;  %228 = vst [vmem:[%s190_s26 + $0x48] sm:$0xff] %v227_v9  ;;  %v233_v12 = vld [vmem:[%s2543_s11 + $0xc0] sm:$0xff] }
  0x2f   : > { %230 = vst [vmem:[%s190_s26 + $0x50] sm:$0xff] %v229_v10  ;;  %232 = vst [vmem:[%s190_s26 + $0x58] sm:$0xff] %v231_v11  ;;  %v235_v13 = vld [vmem:[%s2543_s11 + $0xc8] sm:$0xff]  ;;  %v237_v14 = vld [vmem:[%s2543_s11 + $0xd0] sm:$0xff] }
  0x30   : > { %234 = vst [vmem:[%s190_s26 + $0x60] sm:$0xff] %v233_v12  ;;  %236 = vst [vmem:[%s190_s26 + $0x68] sm:$0xff] %v235_v13  ;;  %v239_v15 = vld [vmem:[%s2543_s11 + $0xd8] sm:$0xff] }
  0x31   : > { %238 = vst [vmem:[%s190_s26 + $0x70] sm:$0xff] %v237_v14  ;;  %240 = vst [vmem:[%s190_s26 + $0x78] sm:$0xff] %v239_v15 }
  0x32 PF: > { %246 = sbr.rel (!%p2518_p9) target bundleno = 145 (0x91), region = 43  ;;  %s248_s5 = sand.u32 (%p2518_p9), 1, %s2381_s18  }
  0x33   : > { %s2042_s29 = sshll.u32 (%p2518_p9), %s2401_s23, 8  ;;  %s1941_s30 = sshll.u32 (%p2518_p9), %s248_s5, 9 }
  0x34   : > { %s253_s8 = sadd.s32 (%p2518_p9), %s2405_s24, %s2042_s29  ;;  %s3006_s1 = sld [smem:[#allocation10_spill]] (%p2518_p9) }
  0x35   : > { %s1944_s6 = sshll.u32 (%p2518_p9), %s253_s8, 2  ;;  %s2574_s10 = scalar_lea.vmem (%p2518_p9), [#allocation4], %s1941_s30 }
  0x3a   : > { %s2569_s28 = scalar_lea.vmem %s3006_s1, %s1944_s6 }
  0x3b   : > { %v272_v16 = vld [vmem:[%s2569_s28] sm:$0xf]  ;;  %v274_v17 = vld [vmem:[%s2569_s28 + $0x8] sm:$0xf]  ;;  %v276_v18 = vld [vmem:[%s2569_s28 + $0x10] sm:$0xf] }
  0x3c   : > { %273 = vst [vmem:[%s2574_s10] sm:$0xf] %v272_v16  ;;  %275 = vst [vmem:[%s2574_s10 + $0x4] sm:$0xf] %v274_v17  ;;  %v278_v19 = vld [vmem:[%s2569_s28 + $0x18] sm:$0xf] }
  0x3d   : > { %277 = vst [vmem:[%s2574_s10 + $0x8] sm:$0xf] %v276_v18  ;;  %v280_v20 = vld [vmem:[%s2569_s28 + $0x20] sm:$0xf]  ;;  %v282_v21 = vld [vmem:[%s2569_s28 + $0x28] sm:$0xf] }
  0x3e   : > { %279 = vst [vmem:[%s2574_s10 + $0xc] sm:$0xf] %v278_v19  ;;  %281 = vst [vmem:[%s2574_s10 + $0x10] sm:$0xf] %v280_v20  ;;  %v284_v22 = vld [vmem:[%s2569_s28 + $0x30] sm:$0xf] }
  0x3f   : > { %283 = vst [vmem:[%s2574_s10 + $0x14] sm:$0xf] %v282_v21  ;;  %v286_v23 = vld [vmem:[%s2569_s28 + $0x38] sm:$0xf]  ;;  %v288_v24 = vld [vmem:[%s2569_s28 + $0x40] sm:$0xf] }
  0x40   : > { %285 = vst [vmem:[%s2574_s10 + $0x18] sm:$0xf] %v284_v22  ;;  %287 = vst [vmem:[%s2574_s10 + $0x1c] sm:$0xf] %v286_v23  ;;  %v290_v25 = vld [vmem:[%s2569_s28 + $0x48] sm:$0xf] }
  0x41   : > { %289 = vst [vmem:[%s2574_s10 + $0x20] sm:$0xf] %v288_v24  ;;  %v292_v26 = vld [vmem:[%s2569_s28 + $0x50] sm:$0xf]  ;;  %v294_v27 = vld [vmem:[%s2569_s28 + $0x58] sm:$0xf] }
  0x42   : > { %291 = vst [vmem:[%s2574_s10 + $0x24] sm:$0xf] %v290_v25  ;;  %293 = vst [vmem:[%s2574_s10 + $0x28] sm:$0xf] %v292_v26  ;;  %v296_v28 = vld [vmem:[%s2569_s28 + $0x60] sm:$0xf] }
  0x43   : > { %295 = vst [vmem:[%s2574_s10 + $0x2c] sm:$0xf] %v294_v27  ;;  %v298_v29 = vld [vmem:[%s2569_s28 + $0x68] sm:$0xf]  ;;  %v300_v30 = vld [vmem:[%s2569_s28 + $0x70] sm:$0xf] }
  0x44   : > { %297 = vst [vmem:[%s2574_s10 + $0x30] sm:$0xf] %v296_v28  ;;  %299 = vst [vmem:[%s2574_s10 + $0x34] sm:$0xf] %v298_v29  ;;  %v302_v31 = vld [vmem:[%s2569_s28 + $0x78] sm:$0xf] }
  0x45   : > { %301 = vst [vmem:[%s2574_s10 + $0x38] sm:$0xf] %v300_v30  ;;  %v304_v32 = vld [vmem:[%s2569_s28 + $0x80] sm:$0xf]  ;;  %v306_v33 = vld [vmem:[%s2569_s28 + $0x88] sm:$0xf] }
  0x46   : > { %303 = vst [vmem:[%s2574_s10 + $0x3c] sm:$0xf] %v302_v31  ;;  %305 = vst [vmem:[%s2574_s10 + $0x40] sm:$0xf] %v304_v32  ;;  %v308_v34 = vld [vmem:[%s2569_s28 + $0x90] sm:$0xf] }
  0x47   : > { %307 = vst [vmem:[%s2574_s10 + $0x44] sm:$0xf] %v306_v33  ;;  %v310_v35 = vld [vmem:[%s2569_s28 + $0x98] sm:$0xf]  ;;  %v312_v36 = vld [vmem:[%s2569_s28 + $0xa0] sm:$0xf] }
  0x48   : > { %309 = vst [vmem:[%s2574_s10 + $0x48] sm:$0xf] %v308_v34  ;;  %311 = vst [vmem:[%s2574_s10 + $0x4c] sm:$0xf] %v310_v35  ;;  %v314_v37 = vld [vmem:[%s2569_s28 + $0xa8] sm:$0xf] }
  0x49   : > { %313 = vst [vmem:[%s2574_s10 + $0x50] sm:$0xf] %v312_v36  ;;  %v316_v38 = vld [vmem:[%s2569_s28 + $0xb0] sm:$0xf]  ;;  %v318_v39 = vld [vmem:[%s2569_s28 + $0xb8] sm:$0xf] }
  0x4a   : > { %315 = vst [vmem:[%s2574_s10 + $0x54] sm:$0xf] %v314_v37  ;;  %317 = vst [vmem:[%s2574_s10 + $0x58] sm:$0xf] %v316_v38  ;;  %v320_v40 = vld [vmem:[%s2569_s28 + $0xc0] sm:$0xf] }
  0x4b   : > { %319 = vst [vmem:[%s2574_s10 + $0x5c] sm:$0xf] %v318_v39  ;;  %v322_v41 = vld [vmem:[%s2569_s28 + $0xc8] sm:$0xf]  ;;  %v324_v42 = vld [vmem:[%s2569_s28 + $0xd0] sm:$0xf] }
  0x4c   : > { %321 = vst [vmem:[%s2574_s10 + $0x60] sm:$0xf] %v320_v40  ;;  %323 = vst [vmem:[%s2574_s10 + $0x64] sm:$0xf] %v322_v41  ;;  %v326_v43 = vld [vmem:[%s2569_s28 + $0xd8] sm:$0xf] }
  0x4d   : > { %325 = vst [vmem:[%s2574_s10 + $0x68] sm:$0xf] %v324_v42  ;;  %v328_v44 = vld [vmem:[%s2569_s28 + $0xe0] sm:$0xf]  ;;  %v330_v45 = vld [vmem:[%s2569_s28 + $0xe8] sm:$0xf] }
  0x4e   : > { %327 = vst [vmem:[%s2574_s10 + $0x6c] sm:$0xf] %v326_v43  ;;  %329 = vst [vmem:[%s2574_s10 + $0x70] sm:$0xf] %v328_v44  ;;  %v332_v46 = vld [vmem:[%s2569_s28 + $0xf0] sm:$0xf] }
  0x4f   : > { %331 = vst [vmem:[%s2574_s10 + $0x74] sm:$0xf] %v330_v45  ;;  %v334_v47 = vld [vmem:[%s2569_s28 + $0xf8] sm:$0xf]  ;;  %v336_v48 = vld [vmem:[%s2569_s28 + $0x100] sm:$0xf] }
  0x50   : > { %333 = vst [vmem:[%s2574_s10 + $0x78] sm:$0xf] %v332_v46  ;;  %335 = vst [vmem:[%s2574_s10 + $0x7c] sm:$0xf] %v334_v47  ;;  %v338_v49 = vld [vmem:[%s2569_s28 + $0x108] sm:$0xf] }
  0x51   : > { %337 = vst [vmem:[%s2574_s10 + $0x80] sm:$0xf] %v336_v48  ;;  %v340_v50 = vld [vmem:[%s2569_s28 + $0x110] sm:$0xf]  ;;  %v342_v51 = vld [vmem:[%s2569_s28 + $0x118] sm:$0xf] }
  0x52   : > { %339 = vst [vmem:[%s2574_s10 + $0x84] sm:$0xf] %v338_v49  ;;  %341 = vst [vmem:[%s2574_s10 + $0x88] sm:$0xf] %v340_v50  ;;  %v344_v52 = vld [vmem:[%s2569_s28 + $0x120] sm:$0xf] }
  0x53   : > { %343 = vst [vmem:[%s2574_s10 + $0x8c] sm:$0xf] %v342_v51  ;;  %v346_v53 = vld [vmem:[%s2569_s28 + $0x128] sm:$0xf]  ;;  %v348_v54 = vld [vmem:[%s2569_s28 + $0x130] sm:$0xf] }
  0x54   : > { %345 = vst [vmem:[%s2574_s10 + $0x90] sm:$0xf] %v344_v52  ;;  %347 = vst [vmem:[%s2574_s10 + $0x94] sm:$0xf] %v346_v53  ;;  %v350_v55 = vld [vmem:[%s2569_s28 + $0x138] sm:$0xf] }
  0x55   : > { %349 = vst [vmem:[%s2574_s10 + $0x98] sm:$0xf] %v348_v54  ;;  %v352_v56 = vld [vmem:[%s2569_s28 + $0x140] sm:$0xf]  ;;  %v354_v57 = vld [vmem:[%s2569_s28 + $0x148] sm:$0xf] }
  0x56   : > { %351 = vst [vmem:[%s2574_s10 + $0x9c] sm:$0xf] %v350_v55  ;;  %353 = vst [vmem:[%s2574_s10 + $0xa0] sm:$0xf] %v352_v56  ;;  %v356_v58 = vld [vmem:[%s2569_s28 + $0x150] sm:$0xf] }
  0x57   : > { %355 = vst [vmem:[%s2574_s10 + $0xa4] sm:$0xf] %v354_v57  ;;  %v358_v59 = vld [vmem:[%s2569_s28 + $0x158] sm:$0xf]  ;;  %v360_v60 = vld [vmem:[%s2569_s28 + $0x160] sm:$0xf] }
  0x58   : > { %357 = vst [vmem:[%s2574_s10 + $0xa8] sm:$0xf] %v356_v58  ;;  %359 = vst [vmem:[%s2574_s10 + $0xac] sm:$0xf] %v358_v59  ;;  %v362_v61 = vld [vmem:[%s2569_s28 + $0x168] sm:$0xf] }
  0x59   : > { %361 = vst [vmem:[%s2574_s10 + $0xb0] sm:$0xf] %v360_v60  ;;  %v364_v62 = vld [vmem:[%s2569_s28 + $0x170] sm:$0xf]  ;;  %v366_v63 = vld [vmem:[%s2569_s28 + $0x178] sm:$0xf] }
  0x5a   : > { %363 = vst [vmem:[%s2574_s10 + $0xb4] sm:$0xf] %v362_v61  ;;  %365 = vst [vmem:[%s2574_s10 + $0xb8] sm:$0xf] %v364_v62  ;;  %v368_v0 = vld [vmem:[%s2569_s28 + $0x180] sm:$0xf] }
  0x5b   : > { %367 = vst [vmem:[%s2574_s10 + $0xbc] sm:$0xf] %v366_v63  ;;  %v370_v1 = vld [vmem:[%s2569_s28 + $0x188] sm:$0xf]  ;;  %v372_v2 = vld [vmem:[%s2569_s28 + $0x190] sm:$0xf] }
  0x5c   : > { %369 = vst [vmem:[%s2574_s10 + $0xc0] sm:$0xf] %v368_v0  ;;  %371 = vst [vmem:[%s2574_s10 + $0xc4] sm:$0xf] %v370_v1  ;;  %v374_v3 = vld [vmem:[%s2569_s28 + $0x198] sm:$0xf] }
  0x5d   : > { %373 = vst [vmem:[%s2574_s10 + $0xc8] sm:$0xf] %v372_v2  ;;  %v376_v4 = vld [vmem:[%s2569_s28 + $0x1a0] sm:$0xf]  ;;  %v378_v5 = vld [vmem:[%s2569_s28 + $0x1a8] sm:$0xf] }
  0x5e   : > { %375 = vst [vmem:[%s2574_s10 + $0xcc] sm:$0xf] %v374_v3  ;;  %377 = vst [vmem:[%s2574_s10 + $0xd0] sm:$0xf] %v376_v4  ;;  %v380_v6 = vld [vmem:[%s2569_s28 + $0x1b0] sm:$0xf] }
  0x5f   : > { %379 = vst [vmem:[%s2574_s10 + $0xd4] sm:$0xf] %v378_v5  ;;  %v382_v7 = vld [vmem:[%s2569_s28 + $0x1b8] sm:$0xf]  ;;  %v384_v8 = vld [vmem:[%s2569_s28 + $0x1c0] sm:$0xf] }
  0x60   : > { %381 = vst [vmem:[%s2574_s10 + $0xd8] sm:$0xf] %v380_v6  ;;  %383 = vst [vmem:[%s2574_s10 + $0xdc] sm:$0xf] %v382_v7  ;;  %v386_v9 = vld [vmem:[%s2569_s28 + $0x1c8] sm:$0xf] }
  0x61   : > { %385 = vst [vmem:[%s2574_s10 + $0xe0] sm:$0xf] %v384_v8  ;;  %v388_v10 = vld [vmem:[%s2569_s28 + $0x1d0] sm:$0xf]  ;;  %v390_v11 = vld [vmem:[%s2569_s28 + $0x1d8] sm:$0xf] }
  0x62   : > { %387 = vst [vmem:[%s2574_s10 + $0xe4] sm:$0xf] %v386_v9  ;;  %389 = vst [vmem:[%s2574_s10 + $0xe8] sm:$0xf] %v388_v10  ;;  %v392_v12 = vld [vmem:[%s2569_s28 + $0x1e0] sm:$0xf] }
  0x63   : > { %391 = vst [vmem:[%s2574_s10 + $0xec] sm:$0xf] %v390_v11  ;;  %v394_v13 = vld [vmem:[%s2569_s28 + $0x1e8] sm:$0xf]  ;;  %v396_v14 = vld [vmem:[%s2569_s28 + $0x1f0] sm:$0xf] }
  0x64   : > { %393 = vst [vmem:[%s2574_s10 + $0xf0] sm:$0xf] %v392_v12  ;;  %395 = vst [vmem:[%s2574_s10 + $0xf4] sm:$0xf] %v394_v13  ;;  %v398_v15 = vld [vmem:[%s2569_s28 + $0x1f8] sm:$0xf] }
  0x65   : > { %397 = vst [vmem:[%s2574_s10 + $0xf8] sm:$0xf] %v396_v14  ;;  %v400_v16 = vld [vmem:[%s2569_s28 + $0x200] sm:$0xf]  ;;  %v402_v17 = vld [vmem:[%s2569_s28 + $0x208] sm:$0xf] }
  0x66   : > { %399 = vst [vmem:[%s2574_s10 + $0xfc] sm:$0xf] %v398_v15  ;;  %401 = vst [vmem:[%s2574_s10 + $0x100] sm:$0xf] %v400_v16  ;;  %v404_v18 = vld [vmem:[%s2569_s28 + $0x210] sm:$0xf] }
  0x67   : > { %403 = vst [vmem:[%s2574_s10 + $0x104] sm:$0xf] %v402_v17  ;;  %v406_v19 = vld [vmem:[%s2569_s28 + $0x218] sm:$0xf]  ;;  %v408_v20 = vld [vmem:[%s2569_s28 + $0x220] sm:$0xf] }
  0x68   : > { %405 = vst [vmem:[%s2574_s10 + $0x108] sm:$0xf] %v404_v18  ;;  %407 = vst [vmem:[%s2574_s10 + $0x10c] sm:$0xf] %v406_v19  ;;  %v410_v21 = vld [vmem:[%s2569_s28 + $0x228] sm:$0xf] }
  0x69   : > { %409 = vst [vmem:[%s2574_s10 + $0x110] sm:$0xf] %v408_v20  ;;  %v412_v22 = vld [vmem:[%s2569_s28 + $0x230] sm:$0xf]  ;;  %v414_v23 = vld [vmem:[%s2569_s28 + $0x238] sm:$0xf] }
  0x6a   : > { %411 = vst [vmem:[%s2574_s10 + $0x114] sm:$0xf] %v410_v21  ;;  %413 = vst [vmem:[%s2574_s10 + $0x118] sm:$0xf] %v412_v22  ;;  %v416_v24 = vld [vmem:[%s2569_s28 + $0x240] sm:$0xf] }
  0x6b   : > { %415 = vst [vmem:[%s2574_s10 + $0x11c] sm:$0xf] %v414_v23  ;;  %v418_v25 = vld [vmem:[%s2569_s28 + $0x248] sm:$0xf]  ;;  %v420_v26 = vld [vmem:[%s2569_s28 + $0x250] sm:$0xf] }
  0x6c   : > { %417 = vst [vmem:[%s2574_s10 + $0x120] sm:$0xf] %v416_v24  ;;  %419 = vst [vmem:[%s2574_s10 + $0x124] sm:$0xf] %v418_v25  ;;  %v422_v27 = vld [vmem:[%s2569_s28 + $0x258] sm:$0xf] }
  0x6d   : > { %421 = vst [vmem:[%s2574_s10 + $0x128] sm:$0xf] %v420_v26  ;;  %v424_v28 = vld [vmem:[%s2569_s28 + $0x260] sm:$0xf]  ;;  %v426_v29 = vld [vmem:[%s2569_s28 + $0x268] sm:$0xf] }
  0x6e   : > { %423 = vst [vmem:[%s2574_s10 + $0x12c] sm:$0xf] %v422_v27  ;;  %425 = vst [vmem:[%s2574_s10 + $0x130] sm:$0xf] %v424_v28  ;;  %v428_v30 = vld [vmem:[%s2569_s28 + $0x270] sm:$0xf] }
  0x6f   : > { %427 = vst [vmem:[%s2574_s10 + $0x134] sm:$0xf] %v426_v29  ;;  %v430_v31 = vld [vmem:[%s2569_s28 + $0x278] sm:$0xf]  ;;  %v432_v32 = vld [vmem:[%s2569_s28 + $0x280] sm:$0xf] }
  0x70   : > { %429 = vst [vmem:[%s2574_s10 + $0x138] sm:$0xf] %v428_v30  ;;  %431 = vst [vmem:[%s2574_s10 + $0x13c] sm:$0xf] %v430_v31  ;;  %v434_v33 = vld [vmem:[%s2569_s28 + $0x288] sm:$0xf] }
  0x71   : > { %433 = vst [vmem:[%s2574_s10 + $0x140] sm:$0xf] %v432_v32  ;;  %v436_v34 = vld [vmem:[%s2569_s28 + $0x290] sm:$0xf]  ;;  %v438_v35 = vld [vmem:[%s2569_s28 + $0x298] sm:$0xf] }
  0x72   : > { %435 = vst [vmem:[%s2574_s10 + $0x144] sm:$0xf] %v434_v33  ;;  %437 = vst [vmem:[%s2574_s10 + $0x148] sm:$0xf] %v436_v34  ;;  %v440_v36 = vld [vmem:[%s2569_s28 + $0x2a0] sm:$0xf] }
  0x73   : > { %439 = vst [vmem:[%s2574_s10 + $0x14c] sm:$0xf] %v438_v35  ;;  %v442_v37 = vld [vmem:[%s2569_s28 + $0x2a8] sm:$0xf]  ;;  %v444_v38 = vld [vmem:[%s2569_s28 + $0x2b0] sm:$0xf] }
  0x74   : > { %441 = vst [vmem:[%s2574_s10 + $0x150] sm:$0xf] %v440_v36  ;;  %443 = vst [vmem:[%s2574_s10 + $0x154] sm:$0xf] %v442_v37  ;;  %v446_v39 = vld [vmem:[%s2569_s28 + $0x2b8] sm:$0xf] }
  0x75   : > { %445 = vst [vmem:[%s2574_s10 + $0x158] sm:$0xf] %v444_v38  ;;  %v448_v40 = vld [vmem:[%s2569_s28 + $0x2c0] sm:$0xf]  ;;  %v450_v41 = vld [vmem:[%s2569_s28 + $0x2c8] sm:$0xf] }
  0x76   : > { %447 = vst [vmem:[%s2574_s10 + $0x15c] sm:$0xf] %v446_v39  ;;  %449 = vst [vmem:[%s2574_s10 + $0x160] sm:$0xf] %v448_v40  ;;  %v452_v42 = vld [vmem:[%s2569_s28 + $0x2d0] sm:$0xf] }
  0x77   : > { %451 = vst [vmem:[%s2574_s10 + $0x164] sm:$0xf] %v450_v41  ;;  %v454_v43 = vld [vmem:[%s2569_s28 + $0x2d8] sm:$0xf]  ;;  %v456_v44 = vld [vmem:[%s2569_s28 + $0x2e0] sm:$0xf] }
  0x78   : > { %453 = vst [vmem:[%s2574_s10 + $0x168] sm:$0xf] %v452_v42  ;;  %455 = vst [vmem:[%s2574_s10 + $0x16c] sm:$0xf] %v454_v43  ;;  %v458_v45 = vld [vmem:[%s2569_s28 + $0x2e8] sm:$0xf] }
  0x79   : > { %457 = vst [vmem:[%s2574_s10 + $0x170] sm:$0xf] %v456_v44  ;;  %v460_v46 = vld [vmem:[%s2569_s28 + $0x2f0] sm:$0xf]  ;;  %v462_v47 = vld [vmem:[%s2569_s28 + $0x2f8] sm:$0xf] }
  0x7a   : > { %459 = vst [vmem:[%s2574_s10 + $0x174] sm:$0xf] %v458_v45  ;;  %461 = vst [vmem:[%s2574_s10 + $0x178] sm:$0xf] %v460_v46  ;;  %v464_v48 = vld [vmem:[%s2569_s28 + $0x300] sm:$0xf] }
  0x7b   : > { %463 = vst [vmem:[%s2574_s10 + $0x17c] sm:$0xf] %v462_v47  ;;  %v466_v49 = vld [vmem:[%s2569_s28 + $0x308] sm:$0xf]  ;;  %v468_v50 = vld [vmem:[%s2569_s28 + $0x310] sm:$0xf] }
  0x7c   : > { %465 = vst [vmem:[%s2574_s10 + $0x180] sm:$0xf] %v464_v48  ;;  %467 = vst [vmem:[%s2574_s10 + $0x184] sm:$0xf] %v466_v49  ;;  %v470_v51 = vld [vmem:[%s2569_s28 + $0x318] sm:$0xf] }
  0x7d   : > { %469 = vst [vmem:[%s2574_s10 + $0x188] sm:$0xf] %v468_v50  ;;  %v472_v52 = vld [vmem:[%s2569_s28 + $0x320] sm:$0xf]  ;;  %v474_v53 = vld [vmem:[%s2569_s28 + $0x328] sm:$0xf] }
  0x7e   : > { %471 = vst [vmem:[%s2574_s10 + $0x18c] sm:$0xf] %v470_v51  ;;  %473 = vst [vmem:[%s2574_s10 + $0x190] sm:$0xf] %v472_v52  ;;  %v476_v54 = vld [vmem:[%s2569_s28 + $0x330] sm:$0xf] }
  0x7f   : > { %475 = vst [vmem:[%s2574_s10 + $0x194] sm:$0xf] %v474_v53  ;;  %v478_v55 = vld [vmem:[%s2569_s28 + $0x338] sm:$0xf]  ;;  %v480_v56 = vld [vmem:[%s2569_s28 + $0x340] sm:$0xf] }
  0x80   : > { %477 = vst [vmem:[%s2574_s10 + $0x198] sm:$0xf] %v476_v54  ;;  %479 = vst [vmem:[%s2574_s10 + $0x19c] sm:$0xf] %v478_v55  ;;  %v482_v57 = vld [vmem:[%s2569_s28 + $0x348] sm:$0xf] }
  0x81   : > { %481 = vst [vmem:[%s2574_s10 + $0x1a0] sm:$0xf] %v480_v56  ;;  %v484_v58 = vld [vmem:[%s2569_s28 + $0x350] sm:$0xf]  ;;  %v486_v59 = vld [vmem:[%s2569_s28 + $0x358] sm:$0xf] }
  0x82   : > { %483 = vst [vmem:[%s2574_s10 + $0x1a4] sm:$0xf] %v482_v57  ;;  %485 = vst [vmem:[%s2574_s10 + $0x1a8] sm:$0xf] %v484_v58  ;;  %v488_v60 = vld [vmem:[%s2569_s28 + $0x360] sm:$0xf] }
  0x83   : > { %487 = vst [vmem:[%s2574_s10 + $0x1ac] sm:$0xf] %v486_v59  ;;  %v490_v61 = vld [vmem:[%s2569_s28 + $0x368] sm:$0xf]  ;;  %v492_v62 = vld [vmem:[%s2569_s28 + $0x370] sm:$0xf] }
  0x84   : > { %489 = vst [vmem:[%s2574_s10 + $0x1b0] sm:$0xf] %v488_v60  ;;  %491 = vst [vmem:[%s2574_s10 + $0x1b4] sm:$0xf] %v490_v61  ;;  %v494_v63 = vld [vmem:[%s2569_s28 + $0x378] sm:$0xf] }
  0x85   : > { %493 = vst [vmem:[%s2574_s10 + $0x1b8] sm:$0xf] %v492_v62  ;;  %v496_v0 = vld [vmem:[%s2569_s28 + $0x380] sm:$0xf]  ;;  %v498_v1 = vld [vmem:[%s2569_s28 + $0x388] sm:$0xf] }
  0x86   : > { %495 = vst [vmem:[%s2574_s10 + $0x1bc] sm:$0xf] %v494_v63  ;;  %497 = vst [vmem:[%s2574_s10 + $0x1c0] sm:$0xf] %v496_v0  ;;  %v500_v2 = vld [vmem:[%s2569_s28 + $0x390] sm:$0xf] }
  0x87   : > { %499 = vst [vmem:[%s2574_s10 + $0x1c4] sm:$0xf] %v498_v1  ;;  %v502_v3 = vld [vmem:[%s2569_s28 + $0x398] sm:$0xf]  ;;  %v504_v4 = vld [vmem:[%s2569_s28 + $0x3a0] sm:$0xf] }
  0x88   : > { %501 = vst [vmem:[%s2574_s10 + $0x1c8] sm:$0xf] %v500_v2  ;;  %503 = vst [vmem:[%s2574_s10 + $0x1cc] sm:$0xf] %v502_v3  ;;  %v506_v5 = vld [vmem:[%s2569_s28 + $0x3a8] sm:$0xf] }
  0x89   : > { %505 = vst [vmem:[%s2574_s10 + $0x1d0] sm:$0xf] %v504_v4  ;;  %v508_v6 = vld [vmem:[%s2569_s28 + $0x3b0] sm:$0xf]  ;;  %v510_v7 = vld [vmem:[%s2569_s28 + $0x3b8] sm:$0xf] }
  0x8a   : > { %507 = vst [vmem:[%s2574_s10 + $0x1d4] sm:$0xf] %v506_v5  ;;  %509 = vst [vmem:[%s2574_s10 + $0x1d8] sm:$0xf] %v508_v6  ;;  %v512_v8 = vld [vmem:[%s2569_s28 + $0x3c0] sm:$0xf] }
  0x8b   : > { %511 = vst [vmem:[%s2574_s10 + $0x1dc] sm:$0xf] %v510_v7  ;;  %v514_v9 = vld [vmem:[%s2569_s28 + $0x3c8] sm:$0xf]  ;;  %v516_v10 = vld [vmem:[%s2569_s28 + $0x3d0] sm:$0xf] }
  0x8c   : > { %513 = vst [vmem:[%s2574_s10 + $0x1e0] sm:$0xf] %v512_v8  ;;  %515 = vst [vmem:[%s2574_s10 + $0x1e4] sm:$0xf] %v514_v9  ;;  %v518_v11 = vld [vmem:[%s2569_s28 + $0x3d8] sm:$0xf] }
  0x8d   : > { %517 = vst [vmem:[%s2574_s10 + $0x1e8] sm:$0xf] %v516_v10  ;;  %v520_v12 = vld [vmem:[%s2569_s28 + $0x3e0] sm:$0xf]  ;;  %v522_v13 = vld [vmem:[%s2569_s28 + $0x3e8] sm:$0xf] }
  0x8e   : > { %519 = vst [vmem:[%s2574_s10 + $0x1ec] sm:$0xf] %v518_v11  ;;  %521 = vst [vmem:[%s2574_s10 + $0x1f0] sm:$0xf] %v520_v12  ;;  %v524_v14 = vld [vmem:[%s2569_s28 + $0x3f0] sm:$0xf] }
  0x8f   : > { %523 = vst [vmem:[%s2574_s10 + $0x1f4] sm:$0xf] %v522_v13  ;;  %v526_v15 = vld [vmem:[%s2569_s28 + $0x3f8] sm:$0xf]  ;;  %525 = vst [vmem:[%s2574_s10 + $0x1f8] sm:$0xf] %v524_v14 }
  0x90   : > { %527 = vst [vmem:[%s2574_s10 + $0x1fc] sm:$0xf] %v526_v15 }
  0x91 PF: > { %p1945_p0 = scmp.ge.s32.totalorder %s2409_s25, 1  ;;  %p818_p1 = scmp.lt.s32.totalorder %s2409_s25, 5 }
  0x93   : > { %p819_p2 = pnand %p1945_p0, %p818_p1 }
  0x94   : > { %s825_s0 = sand.u32 (!%p819_p2), 1, %s2385_s19   ;;  %s832_s11 = sand.u32 (!%p819_p2), 1, %s2377_s17  }
  0x95   : > { %822 = sbr.rel (%p819_p2) target bundleno = 469 (0x1d5), region = 92  ;;  %s1946_s26 = sshll.u32 (!%p819_p2), %s825_s0, 7 }
  0x96   : > { %s1947_s5 = sshll.u32 (!%p819_p2), %s832_s11, 9  ;;  %s863_s28 = sand.u32 (!%p819_p2), 1, %s2369_s15  }
  0x97   : > { %p869_p3 = scmp.lt.s32.totalorder (!%p819_p2), %s2397_s22, 1  ;;  %s1948_s29 = sshll.u32 (!%p819_p2), %s863_s28, 4 }
  0x98   : > { %s2846_s24 = scalar_lea.vmem (!%p819_p2), [#allocation3], %s1946_s26  ;;  %s2848_s17 = scalar_lea.vmem (!%p819_p2), [#allocation4], %s1947_s5 }
  0x99   : > { %s2850_s19 = scalar_lea.vmem (!%p819_p2), [#allocation5], %s1948_s29  ;;  %p1949_p4 = scmp.ne.s32.totalorder (!%p819_p2), %s2393_s21, 0 }
  0x9a   : > { %s2836_s30 = scalar_select %p869_p3, %s2397_s22, 1 }
  0x9b   : > { %880 = sbr.rel (%p1949_p4) target bundleno = 163 (0xa3), region = 104 }
  0x9c   : > { %s871_s9 = scalar_lea.vmem %s2991_s2, %s2836_s30  ;;  %s874_s27 = scalar_lea.vmem %s2992_s3, %s2836_s30 }
  0xa0   : > { %v2411_v16 = vmov 0.0  }
  0xa1   : > { %881 = vst [vmem:[#allocation2 + $0x10] sm:$0xff] %v2411_v16  ;;  %882 = vst [vmem:[#allocation2] sm:$0xff] %v2411_v16 }
  0xa2   : > { %883 = vst [vmem:[#allocation2 + $0x18] sm:$0xff] %v2411_v16  ;;  %884 = vst [vmem:[#allocation2 + $0x8] sm:$0xff] %v2411_v16 }
  0xa3 PF: > { %v2259_v17 = vld [vmem:[%s2848_s17 + $0x78] sm:$0xff]   ;;  %v2263_v21 = vld [vmem:[%s2848_s17 + $0x70] sm:$0xff]   ;;  %v2267_v25 = vld [vmem:[%s2848_s17 + $0x68] sm:$0xff]   ;;  %p2030_p5 = scmp.ne.s32.totalorder %s2393_s21, 1 }
  0xa4   : > { %v2260_v18 = vld [vmem:[%s2848_s17 + $0xf8] sm:$0xff]   ;;  %2058 = vmatprep.subr.bf16.mxu0 %v2259_v17  ;;  %v2264_v22 = vld [vmem:[%s2848_s17 + $0xf0] sm:$0xff]   ;;  %v2268_v26 = vld [vmem:[%s2848_s17 + $0xe8] sm:$0xff]  }
  0xa5   : > { %v2261_v19 = vld [vmem:[%s2848_s17 + $0x38] sm:$0xff]   ;;  %2086 = vmatprep.subr.bf16.mxu1 %v2260_v18  ;;  %v2265_v23 = vld [vmem:[%s2848_s17 + $0x30] sm:$0xff]   ;;  %v2269_v27 = vld [vmem:[%s2848_s17 + $0x28] sm:$0xff]  }
  0xa6   : > { %v2262_v20 = vld [vmem:[%s2848_s17 + $0xb8] sm:$0xff]   ;;  %2059 = vmatpush3.bf16.msra.mxu0 %v2261_v19  ;;  %v2266_v24 = vld [vmem:[%s2848_s17 + $0xb0] sm:$0xff]   ;;  %v2270_v28 = vld [vmem:[%s2848_s17 + $0xa8] sm:$0xff]  }
  0xa7   : > { %2087 = vmatpush3.bf16.msra.mxu1 %v2262_v20  ;;  %2060 = vmatprep.subr.bf16.mxu0 %v2263_v21  ;;  %v2271_v29 = vld [vmem:[%s2848_s17 + $0x60] sm:$0xff]   ;;  %v2275_v33 = vld [vmem:[%s2848_s17 + $0x58] sm:$0xff]   ;;  %v2279_v37 = vld [vmem:[%s2848_s17 + $0x50] sm:$0xff]  }
  0xa8   : > { %2088 = vmatprep.subr.bf16.mxu1 %v2264_v22  ;;  %v2272_v30 = vld [vmem:[%s2848_s17 + $0xe0] sm:$0xff]   ;;  %v2276_v34 = vld [vmem:[%s2848_s17 + $0xd8] sm:$0xff]   ;;  %v2280_v38 = vld [vmem:[%s2848_s17 + $0xd0] sm:$0xff]  }
  0xa9   : > { %v2273_v31 = vld [vmem:[%s2848_s17 + $0x20] sm:$0xff]   ;;  %v2277_v35 = vld [vmem:[%s2848_s17 + $0x18] sm:$0xff]   ;;  %v2281_v39 = vld [vmem:[%s2848_s17 + $0x10] sm:$0xff]  }
  0xaa   : > { %2061 = vmatpush3.bf16.msra.mxu0 %v2265_v23  ;;  %v2274_v32 = vld [vmem:[%s2848_s17 + $0xa0] sm:$0xff]   ;;  %v2278_v36 = vld [vmem:[%s2848_s17 + $0x98] sm:$0xff]   ;;  %v2282_v40 = vld [vmem:[%s2848_s17 + $0x90] sm:$0xff]  }
  0xab   : > { %2089 = vmatpush3.bf16.msra.mxu1 %v2266_v24  ;;  %2062 = vmatprep.subr.bf16.mxu0 %v2267_v25  ;;  %v2283_v41 = vld [vmem:[%s2848_s17 + $0x48] sm:$0xff]   ;;  %v2287_v45 = vld [vmem:[%s2848_s17 + $0x40] sm:$0xff]   ;;  %v2291_v57 = vld [vmem:[%s2848_s17 + $0x178] sm:$0xff]  }
  0xac   : > { %2090 = vmatprep.subr.bf16.mxu1 %v2268_v26  ;;  %v2284_v42 = vld [vmem:[%s2848_s17 + $0xc8] sm:$0xff]   ;;  %v2288_v46 = vld [vmem:[%s2848_s17 + $0xc0] sm:$0xff]   ;;  %v2292_v58 = vld [vmem:[%s2848_s17 + $0x1f8] sm:$0xff]  }
  0xad   : > { %v2285_v43 = vld [vmem:[%s2848_s17 + $0x8] sm:$0xff]   ;;  %v2289_v47 = vld [vmem:[%s2848_s17] sm:$0xff]   ;;  %v2293_v59 = vld [vmem:[%s2848_s17 + $0x138] sm:$0xff]  }
  0xae   : > { %2063 = vmatpush3.bf16.msra.mxu0 %v2269_v27  ;;  %v2286_v44 = vld [vmem:[%s2848_s17 + $0x88] sm:$0xff]   ;;  %v2290_v48 = vld [vmem:[%s2848_s17 + $0x80] sm:$0xff]   ;;  %v2294_v60 = vld [vmem:[%s2848_s17 + $0x1b8] sm:$0xff]  }
  0xaf   : > { %2091 = vmatpush3.bf16.msra.mxu1 %v2270_v28  ;;  %2064 = vmatprep.subr.bf16.mxu0 %v2271_v29  ;;  %v889_v49 = vld [vmem:[%s2846_s24] sm:$0xff]  ;;  %v890_v51 = vld [vmem:[%s2846_s24 + $0x8] sm:$0xff]  ;;  %v2295_v61 = vld [vmem:[%s2848_s17 + $0x170] sm:$0xff]  }
  0xb0   : > { %2092 = vmatprep.subr.bf16.mxu1 %v2272_v30  ;;  %v893_v50 = vld [vmem:[%s2846_s24 + $0x20] sm:$0xff]  ;;  %v894_v54 = vld [vmem:[%s2846_s24 + $0x28] sm:$0xff]  ;;  %v2296_v62 = vld [vmem:[%s2848_s17 + $0x1f0] sm:$0xff]  }
  0xb1   : > { %v1950_v52 = vcombine.low %v889_v49, %v893_v50  ;;  %v1951_v53 = vcombine.high %v889_v49, %v893_v50  ;;  %v1952_v55 = vcombine.low %v890_v51, %v894_v54  ;;  %v1953_v56 = vcombine.high %v890_v51, %v894_v54  ;;  %v2297_v63 = vld [vmem:[%s2848_s17 + $0x130] sm:$0xff]   ;;  %v2299_v1 = vld [vmem:[%s2848_s17 + $0x168] sm:$0xff]   ;;  %v2303_v5 = vld [vmem:[%s2848_s17 + $0x160] sm:$0xff]  }
  0xb2   : > { %2065 = vmatpush3.bf16.msra.mxu0 %v2273_v31  ;;  %v2298_v0 = vld [vmem:[%s2848_s17 + $0x1b0] sm:$0xff]   ;;  %v2300_v2 = vld [vmem:[%s2848_s17 + $0x1e8] sm:$0xff]   ;;  %v2304_v6 = vld [vmem:[%s2848_s17 + $0x1e0] sm:$0xff]  }
  0xb3   : > { %2093 = vmatpush3.bf16.msra.mxu1 %v2274_v32  ;;  %2066 = vmatprep.subr.bf16.mxu0 %v2275_v33  ;;  %v2301_v3 = vld [vmem:[%s2848_s17 + $0x128] sm:$0xff]   ;;  %v2305_v7 = vld [vmem:[%s2848_s17 + $0x120] sm:$0xff]   ;;  %v2307_v9 = vld [vmem:[%s2848_s17 + $0x158] sm:$0xff]  }
  0xb4   : > { %2094 = vmatprep.subr.bf16.mxu1 %v2276_v34  ;;  %1529 = vmatprep.mubr.bf16.mxu0 %v1951_v53  ;;  %v2302_v4 = vld [vmem:[%s2848_s17 + $0x1a8] sm:$0xff]   ;;  %v2306_v8 = vld [vmem:[%s2848_s17 + $0x1a0] sm:$0xff]   ;;  %v2308_v10 = vld [vmem:[%s2848_s17 + $0x1d8] sm:$0xff]  }
  0xb5   : > { %1578 = vmatprep.mubr.bf16.mxu1 %v1953_v56  ;;  %v897_v11 = vld [vmem:[%s2846_s24 + $0x40] sm:$0xff]  ;;  %v898_v14 = vld [vmem:[%s2846_s24 + $0x48] sm:$0xff]  ;;  %v2309_v18 = vld [vmem:[%s2848_s17 + $0x118] sm:$0xff]  }
  0xb6   : > { %2067 = vmatpush3.bf16.msra.mxu0 %v2277_v35  ;;  %v901_v12 = vld [vmem:[%s2846_s24 + $0x60] sm:$0xff]  ;;  %v902_v15 = vld [vmem:[%s2846_s24 + $0x68] sm:$0xff]  ;;  %v2310_v20 = vld [vmem:[%s2848_s17 + $0x198] sm:$0xff]  }
  0xb7   : > { %2095 = vmatpush3.bf16.msra.mxu1 %v2278_v36  ;;  %2068 = vmatprep.subr.bf16.mxu0 %v2279_v37  ;;  %v1959_v13 = vcombine.high %v897_v11, %v901_v12  ;;  %v1958_v16 = vcombine.low %v897_v11, %v901_v12  ;;  %v1961_v17 = vcombine.high %v898_v14, %v902_v15  ;;  %v2311_v21 = vld [vmem:[%s2848_s17 + $0x150] sm:$0xff]   ;;  %v2315_v25 = vld [vmem:[%s2848_s17 + $0x148] sm:$0xff]   ;;  %v2319_v29 = vld [vmem:[%s2848_s17 + $0x140] sm:$0xff]  }
  0xb8   : > { %2096 = vmatprep.subr.bf16.mxu1 %v2280_v38  ;;  %v1960_v19 = vcombine.low %v898_v14, %v902_v15  ;;  %v2312_v22 = vld [vmem:[%s2848_s17 + $0x1d0] sm:$0xff]   ;;  %v2316_v26 = vld [vmem:[%s2848_s17 + $0x1c8] sm:$0xff]   ;;  %v2320_v30 = vld [vmem:[%s2848_s17 + $0x1c0] sm:$0xff]  }
  0xb9   : > { %v2313_v23 = vld [vmem:[%s2848_s17 + $0x110] sm:$0xff]   ;;  %v2317_v27 = vld [vmem:[%s2848_s17 + $0x108] sm:$0xff]   ;;  %v2321_v31 = vld [vmem:[%s2848_s17 + $0x100] sm:$0xff]  }
  0xba   : > { %2069 = vmatpush3.bf16.msra.mxu0 %v2281_v39  ;;  %v2314_v24 = vld [vmem:[%s2848_s17 + $0x190] sm:$0xff]   ;;  %v2318_v28 = vld [vmem:[%s2848_s17 + $0x188] sm:$0xff]   ;;  %v2322_v32 = vld [vmem:[%s2848_s17 + $0x180] sm:$0xff]  }
  0xbb   : > { %2097 = vmatpush3.bf16.msra.mxu1 %v2282_v40  ;;  %2070 = vmatprep.subr.bf16.mxu0 %v2283_v41  ;;  %v891_v33 = vld [vmem:[%s2846_s24 + $0x10] sm:$0xff]  ;;  %v892_v35 = vld [vmem:[%s2846_s24 + $0x18] sm:$0xff] }
  0xbc   : > { %2098 = vmatprep.subr.bf16.mxu1 %v2284_v42  ;;  %v895_v34 = vld [vmem:[%s2846_s24 + $0x30] sm:$0xff]  ;;  %v896_v36 = vld [vmem:[%s2846_s24 + $0x38] sm:$0xff] }
  0xbd   : > { %v1954_v37 = vcombine.low %v891_v33, %v895_v34  ;;  %v1955_v38 = vcombine.high %v891_v33, %v895_v34  ;;  %v1956_v39 = vcombine.low %v892_v35, %v896_v36  ;;  %v1957_v40 = vcombine.high %v892_v35, %v896_v36  ;;  %v899_v41 = vld [vmem:[%s2846_s24 + $0x50] sm:$0xff] }
  0xbe   : > { %2071 = vmatpush3.bf16.msra.mxu0 %v2285_v43  ;;  %v903_v42 = vld [vmem:[%s2846_s24 + $0x70] sm:$0xff]  ;;  %v900_v43 = vld [vmem:[%s2846_s24 + $0x58] sm:$0xff] }
  0xbf   : > { %2099 = vmatpush3.bf16.msra.mxu1 %v2286_v44  ;;  %2072 = vmatprep.subr.bf16.mxu0 %v2287_v45  ;;  %v1963_v44 = vcombine.high %v899_v41, %v903_v42  ;;  %v904_v45 = vld [vmem:[%s2846_s24 + $0x78] sm:$0xff] }
  0xc0   : > { %2100 = vmatprep.subr.bf16.mxu1 %v2288_v46  ;;  %v1965_v46 = vcombine.high %v900_v43, %v904_v45 }
  0xc2   : > { %2073 = vmatpush3.bf16.msra.mxu0 %v2289_v47  ;;  %v1962_v47 = vcombine.low %v899_v41, %v903_v42  ;;  %v887_v41 = vld [vmem:[#allocation2 + $0x18] sm:$0xff] }
  0xc3   : > { %2101 = vmatpush3.bf16.msra.mxu1 %v2290_v48  ;;  %2114 = vmatprep.subr.bf16.mxu0 %v2291_v57  ;;  %v1964_v48 = vcombine.low %v900_v43, %v904_v45 }
  0xc4   : > { %2142 = vmatprep.subr.bf16.mxu1 %v2292_v58 }
  0xc5   : > { %1530 = vmatmul.mubr.bf16.vlgmr.msra.gmra.mxu0 %v1950_v52 }
  0xc6   : > { %1579 = vmatmul.mubr.bf16.vlgmr.msra.gmra.mxu1 %v1952_v55  ;;  %2115 = vmatpush3.bf16.msra.mxu0 %v2293_v59 }
  0xc7   : > { %2143 = vmatpush3.bf16.msra.mxu1 %v2294_v60  ;;  %2116 = vmatprep.subr.bf16.mxu0 %v2295_v61 }
  0xc8   : > { %2144 = vmatprep.subr.bf16.mxu1 %v2296_v62  ;;  %1537 = vmatprep.mubr.bf16.mxu0 %v1959_v13 }
  0xc9   : > { %1586 = vmatprep.mubr.bf16.mxu1 %v1961_v17  ;;  %v885_v17 = vld [vmem:[#allocation2 + $0x10] sm:$0xff] }
  0xca   : > { %2117 = vmatpush3.bf16.msra.mxu0 %v2297_v63 }
  0xcb   : > { %2145 = vmatpush3.bf16.msra.mxu1 %v2298_v0  ;;  %2118 = vmatprep.subr.bf16.mxu0 %v2299_v1 }
  0xcc   : > { %2146 = vmatprep.subr.bf16.mxu1 %v2300_v2 }
  0xcd   : > { %1538 = vmatmul.mubr.bf16.gmra.mxu0 %v1958_v16 }
  0xce   : > { %2119 = vmatpush3.bf16.msra.mxu0 %v2301_v3  ;;  %1587 = vmatmul.mubr.bf16.gmra.mxu1 %v1960_v19 }
  0xcf   : > { %2147 = vmatpush3.bf16.msra.mxu1 %v2302_v4  ;;  %2120 = vmatprep.subr.bf16.mxu0 %v2303_v5 }
  0xd0   : > { %2148 = vmatprep.subr.bf16.mxu1 %v2304_v6  ;;  %1627 = vmatprep.mubr.bf16.mxu0 %v1955_v38 }
  0xd1   : > { %1676 = vmatprep.mubr.bf16.mxu1 %v1957_v40 }
  0xd2   : > { %2121 = vmatpush3.bf16.msra.mxu0 %v2305_v7 }
  0xd3   : > { %2149 = vmatpush3.bf16.msra.mxu1 %v2306_v8  ;;  %2122 = vmatprep.subr.bf16.mxu0 %v2307_v9 }
  0xd4   : > { %2150 = vmatprep.subr.bf16.mxu1 %v2308_v10 }
  0xd6   : > { %2123 = vmatpush3.bf16.msra.mxu0 %v2309_v18 }
  0xd7   : > { %2151 = vmatpush3.bf16.msra.mxu1 %v2310_v20  ;;  %2124 = vmatprep.subr.bf16.mxu0 %v2311_v21 }
  0xd8   : > { %2152 = vmatprep.subr.bf16.mxu1 %v2312_v22 }
  0xda   : > { %2125 = vmatpush3.bf16.msra.mxu0 %v2313_v23 }
  0xdb   : > { %2153 = vmatpush3.bf16.msra.mxu1 %v2314_v24  ;;  %2126 = vmatprep.subr.bf16.mxu0 %v2315_v25 }
  0xdc   : > { %2154 = vmatprep.subr.bf16.mxu1 %v2316_v26 }
  0xde   : > { %2127 = vmatpush3.bf16.msra.mxu0 %v2317_v27 }
  0xdf   : > { %2155 = vmatpush3.bf16.msra.mxu1 %v2318_v28  ;;  %2128 = vmatprep.subr.bf16.mxu0 %v2319_v29  ;;  %v886_v29 = vld [vmem:[#allocation2] sm:$0xff] }
  0xe0   : > { %2156 = vmatprep.subr.bf16.mxu1 %v2320_v30 }
  0xe2   : > { %2129 = vmatpush3.bf16.msra.mxu0 %v2321_v31 }
  0xe3   : > { %2157 = vmatpush3.bf16.msra.mxu1 %v2322_v32 }
  0xe5   : > { %1628 = vmatmul.mubr.bf16.vlgmr.msra.gmra.mxu0 %v1954_v37 }
  0xe6   : > { %1677 = vmatmul.mubr.bf16.vlgmr.msra.gmra.mxu1 %v1956_v39  ;;  %1635 = vmatprep.mubr.bf16.mxu0 %v1963_v44 }
  0xe7   : > { %1684 = vmatprep.mubr.bf16.mxu1 %v1965_v46 }
  0xed   : > { %1636 = vmatmul.mubr.bf16.gmra.mxu0 %v1962_v47 }
  0xee   : > { %1685 = vmatmul.mubr.bf16.gmra.mxu1 %v1964_v48 }
 0x185   : > { %v2074_v49 = vpop.f32.mrf.mxu0 }
 0x186   : > { %v2102_v50 = vpop.f32.mrf.mxu1 }
 0x187   : > { %v2075_v51 = vpop.f32.mrf.mxu0 }
 0x188   : > { %v2103_v52 = vpop.f32.mrf.mxu1  ;;  %v2076_v1 = vadd.f32 %v2075_v51, %v2074_v49 }
 0x189   : > { %v2077_v53 = vpop.f32.mrf.mxu0  ;;  %v2104_v2 = vadd.f32 %v2103_v52, %v2102_v50  ;;  %v888_v50 = vld [vmem:[#allocation2 + $0x8] sm:$0xff] }
 0x18a   : > { %v2105_v54 = vpop.f32.mrf.mxu1 }
 0x18b   : > { %v2078_v55 = vpop.f32.mrf.mxu0  ;;  %v1581_v7 = vadd.f32 %v2104_v2, %v2076_v1 }
 0x18c   : > { %v2106_v56 = vpop.f32.mrf.mxu1  ;;  %v2079_v8 = vadd.f32 %v2078_v55, %v2077_v53 }
 0x18d   : > { %v2080_v57 = vpop.f32.mrf.mxu0  ;;  %v2107_v9 = vadd.f32 %v2106_v56, %v2105_v54 }
 0x18e   : > { %v2108_v58 = vpop.f32.mrf.mxu1 }
 0x18f   : > { %v2081_v59 = vpop.f32.mrf.mxu0  ;;  %v1584_v20 = vadd.f32 %v2107_v9, %v2079_v8 }
 0x190   : > { %v2109_v60 = vpop.f32.mrf.mxu1  ;;  %v2082_v15 = vadd.f32 %v2081_v59, %v2080_v57 }
 0x191   : > { %v2083_v61 = vpop.f32.mrf.mxu0  ;;  %v2110_v16 = vadd.f32 %v2109_v60, %v2108_v58 }
 0x192   : > { %v2111_v62 = vpop.f32.mrf.mxu1 }
 0x193   : > { %v2084_v63 = vpop.f32.mrf.mxu0  ;;  %v1589_v28 = vadd.f32 %v2110_v16, %v2082_v15 }
 0x194   : > { %v2112_v0 = vpop.f32.mrf.mxu1  ;;  %v2085_v32 = vadd.f32 %v2084_v63, %v2083_v61 }
 0x195   : > { %v2113_v33 = vadd.f32 %v2112_v0, %v2111_v62 }
 0x197   : > { %v1592_v44 = vadd.f32 %v2113_v33, %v2085_v32 }
 0x1a5   : > { %v2130_v3 = vpop.f32.mrf.mxu0 }
 0x1a6   : > { %v2158_v4 = vpop.f32.mrf.mxu1 }
 0x1a7   : > { %v2131_v5 = vpop.f32.mrf.mxu0 }
 0x1a8   : > { %v2159_v6 = vpop.f32.mrf.mxu1  ;;  %v2132_v10 = vadd.f32 %v2131_v5, %v2130_v3 }
 0x1a9   : > { %v2133_v11 = vpop.f32.mrf.mxu0  ;;  %v2160_v14 = vadd.f32 %v2159_v6, %v2158_v4 }
 0x1aa   : > { %v2161_v12 = vpop.f32.mrf.mxu1  ;;  %v1630_v13 = vadd.f32 %v2132_v10, %v1581_v7 }
 0x1ab   : > { %v2134_v18 = vpop.f32.mrf.mxu0 }
 0x1ac   : > { %v2162_v19 = vpop.f32.mrf.mxu1  ;;  %v1679_v21 = vadd.f32 %v2160_v14, %v1630_v13  ;;  %v2135_v22 = vadd.f32 %v2134_v18, %v2133_v11 }
 0x1ad   : > { %v2136_v23 = vpop.f32.mrf.mxu0  ;;  %v2163_v27 = vadd.f32 %v2162_v19, %v2161_v12 }
 0x1ae   : > { %v2164_v24 = vpop.f32.mrf.mxu1  ;;  %v1693_v25 = vadd.f32 %v1679_v21, %v885_v17  ;;  %v1633_v26 = vadd.f32 %v2135_v22, %v1584_v20 }
 0x1af   : > { %v2137_v30 = vpop.f32.mrf.mxu0 }
 0x1b0   : > { %v2165_v31 = vpop.f32.mrf.mxu1  ;;  %1697 = vst [vmem:[#allocation2 + $0x10] sm:$0xff] %v1693_v25  ;;  %v1682_v34 = vadd.f32 %v2163_v27, %v1633_v26  ;;  %v2138_v35 = vadd.f32 %v2137_v30, %v2136_v23 }
 0x1b1   : > { %v2139_v36 = vpop.f32.mrf.mxu0  ;;  %v2166_v40 = vadd.f32 %v2165_v31, %v2164_v24 }
 0x1b2   : > { %v2167_v37 = vpop.f32.mrf.mxu1  ;;  %v1694_v38 = vadd.f32 %v1682_v34, %v886_v29  ;;  %v1638_v39 = vadd.f32 %v2138_v35, %v1589_v28 }
 0x1b3   : > { %v2140_v42 = vpop.f32.mrf.mxu0 }
 0x1b4   : > { %v2168_v43 = vpop.f32.mrf.mxu1  ;;  %1698 = vst [vmem:[#allocation2] sm:$0xff] %v1694_v38  ;;  %v1687_v45 = vadd.f32 %v2166_v40, %v1638_v39  ;;  %v2141_v46 = vadd.f32 %v2140_v42, %v2139_v36 }
 0x1b5   : > { %v2169_v49 = vadd.f32 %v2168_v43, %v2167_v37 }
 0x1b6   : > { %v1695_v47 = vadd.f32 %v1687_v45, %v887_v41  ;;  %v1641_v48 = vadd.f32 %v2141_v46, %v1592_v44 }
 0x1b8   : > { %1699 = vst [vmem:[#allocation2 + $0x18] sm:$0xff] %v1695_v47  ;;  %v1690_v51 = vadd.f32 %v2169_v49, %v1641_v48  ;;  %1704 = sbr.rel (%p2030_p5) target bundleno = 461 (0x1cd), region = 108 }
 0x1ba   : > { %v1696_v52 = vadd.f32 %v1690_v51, %v888_v50 }
 0x1bc   : > { %1700 = vst [vmem:[#allocation2 + $0x8] sm:$0xff] %v1696_v52 }
 0x1bd   : > { %v1705_v53 = vld [vmem:[#allocation2 + $0x10] sm:$0xff]  ;;  %v1706_v54 = vld [vmem:[#allocation2] sm:$0xff] }
 0x1be   : > { %v2031_v55 = vld [vmem:[%s871_s9] ss:$0 sm:$0xff] }
 0x1bf   : > { %v1716_v56 = vmul.f32 %v2031_v55, %v1705_v53  ;;  %v1717_v57 = vmul.f32 %v2031_v55, %v1706_v54  ;;  %v2032_v58 = vld [vmem:[%s874_s27] ss:$0 sm:$0xff]  ;;  %v1707_v59 = vld [vmem:[#allocation2 + $0x18] sm:$0xff] }
 0x1c0   : > { %v1718_v61 = vmul.f32 %v2031_v55, %v1707_v59 }
 0x1c1   : > { %v1727_v63 = vadd.f32 %v2032_v58, %v1716_v56  ;;  %v1728_v0 = vadd.f32 %v2032_v58, %v1717_v57 }
 0x1c2   : > { %v1729_v1 = vadd.f32 %v2032_v58, %v1718_v61 }
 0x1c3   : > { %v1708_v60 = vld [vmem:[#allocation2 + $0x8] sm:$0xff]  ;;  %v1731_v3 = vmax.f32 %v1727_v63, 0.0  ;;  %v1732_v4 = vmax.f32 %v1728_v0, 0.0 }
 0x1c4   : > { %v1719_v62 = vmul.f32 %v2031_v55, %v1708_v60  ;;  %v1733_v5 = vmax.f32 %v1729_v1, 0.0 }
 0x1c5   : > { %v2050_v7 = vpack.c.bf16 %v1732_v4, %v1731_v3 }
 0x1c6   : > { %v1730_v2 = vadd.f32 %v2032_v58, %v1719_v62 }
 0x1c7   : > { %2051 = vst [vmem:[%s2850_s19] sm:$0xff] %v2050_v7  }
 0x1c8   : > { %v1734_v6 = vmax.f32 %v1730_v2, 0.0 }
 0x1ca   : > { %v2055_v8 = vpack.c.bf16 %v1734_v6, %v1733_v5 }
 0x1cc   : > { %2057 = vst [vmem:[%s2850_s19 + $0x8] sm:$0xff] %v2055_v8  }
 0x1cd PF: > { %1761 = sbr.rel (!%p2531_p12) target bundleno = 469 (0x1d5), region = 112  ;;  %s2038_s21 = sshll.u32 (%p2531_p12), %s2397_s22, 2 }
 0x1ce   : > { %v1783_v9 = vld [vmem:[%s2850_s19] sm:$0xf] (%p2531_p12)  ;;  %v1785_v10 = vld [vmem:[%s2850_s19 + $0x4] sm:$0xf] (%p2531_p12)  ;;  %s1766_s26 = scalar_lea.vmem (%p2531_p12), %s2993_s4, %s2038_s21 }
 0x1cf   : > { %1784 = vst [vmem:[%s1766_s26] sm:$0xf] (%p2531_p12), %v1783_v9  ;;  %1786 = vst [vmem:[%s1766_s26 + $0x8] sm:$0xf] (%p2531_p12), %v1785_v10 }
 0x1d3   : > { %v1787_v11 = vld [vmem:[%s2850_s19 + $0x8] sm:$0xf]  ;;  %v1789_v12 = vld [vmem:[%s2850_s19 + $0xc] sm:$0xf] }
 0x1d4   : > { %1788 = vst [vmem:[%s1766_s26 + $0x10] sm:$0xf] %v1787_v11  ;;  %1790 = vst [vmem:[%s1766_s26 + $0x18] sm:$0xf] %v1789_v12 }
 0x1d5 PF: > { %s14_s25 = sadd.s32 1, %s2409_s25   ;;  %s3007_s22 = sld [smem:[#allocation6_spill]] }
 0x1d6   : > { %p11_p6 = scmp.ge.s32.totalorder %s14_s25, 6   ;;  %s3008_s14 = sld [smem:[#allocation7_spill]] }
 0x1d7   : > { %s3009_s24 = sld [smem:[#allocation8_spill]]  ;;  %s3010_s15 = smov %s2373_s16 }
 0x1d8   : > { %s3011_s16 = smov %s2529_s13  ;;  %s3012_s17 = smov %s2381_s18 }
 0x1d9   : > { %s3013_s18 = smov %s2526_s12  ;;  %s3014_s19 = smov %s2389_s20 }
 0x1da   : > { %s3015_s20 = smov %s2512_s7  ;;  %s3016_s21 = smov %s2401_s23 }
 0x1db   :  { %13 = sbr.rel (!%p11_p6) target bundleno = 9 (0x9), region = 198 }
 0x1dc   : > { %s3017_s23 = smov %s3008_s14 }

// kernel: deeplabv3plus_forward.24
= control target key start
LH: loop header
LB: loop body
LE: loop exit
PB: predicated region body
PF: predicated region fallthrough
CT: control target
= control target key end

     0   :  { %s2101_s15 = smov 0   ;;  %s2103_s16 = smov 0   ;;  %s2552_s0 = inlined_call_operand.vmem [shape: bf16[8,2048], index: 0, kind: input, shape index: {}]   ;;  %s2553_s1 = inlined_call_operand.vmem [shape: bf16[2048,256], index: 1, kind: input, shape index: {}]   ;;  %s2554_s2 = inlined_call_operand.vmem [shape: f32[1,256], index: 2, kind: input, shape index: {}]   ;;  %s2555_s3 = inlined_call_operand.vmem [shape: f32[1,256], index: 3, kind: input, shape index: {}]   ;;  %s2556_s4 = inlined_call_operand.vmem [shape: bf16[8,256], index: 4, kind: output, shape index: {}]  }
   0x1   :  { %s2105_s17 = smov 0   ;;  %s2107_s18 = smov 0  }
   0x2   :  { %s2109_s19 = smov 0   ;;  %s2111_s20 = smov 0  }
   0x3   :  { %s2113_s21 = smov 0  }
   0x4 LB: > { %s26_s22 = sadd.s32 1, %s2065_s19  ;;  %s29_s23 = sadd.s32 1, %s2069_s20  ;;  %s2073_s21 = sphi %s2113_s21, %s14_s21   ;;  %s2069_s20 = sphi %s2111_s20, %s2562_s20   ;;  %s2065_s19 = sphi %s2109_s19, %s2561_s19   ;;  %s2061_s18 = sphi %s2107_s18, %s2560_s18   ;;  %s2057_s17 = sphi %s2105_s17, %s2559_s17   ;;  %s2053_s16 = sphi %s2103_s16, %s2558_s16   ;;  %s2049_s15 = sphi %s2101_s15, %s2557_s15  }
   0x5   : > { %p27_p0 = scmp.ge.s32.totalorder %s26_s22, 2  ;;  %p77_p1 = scmp.ne.s32.totalorder %s2053_s16, %s2049_s15 }
   0x6   : > { %p78_p2 = scmp.eq.s32.totalorder %s2073_s21, 0  ;;  %s70_s27 = sadd.s32 1, %s2053_s16 }
   0x7   : > { %s2564_s22 = smov (%p27_p0, %s26_s22), 0  ;;  %s2566_s23 = smov (!%p27_p0, %s29_s23), %s2069_s20 }
   0x8   : > { %p79_p3 = por %p78_p2, %p77_p1  ;;  %p31_p4 = scmp.ge.s32.totalorder %s2566_s23, 2 }
   0x9   : > { %s65_s24 = ssub.s32 %s2065_s19, %s2564_s22  ;;  %p1713_p6 = scmp.ge.s32.totalorder %s2073_s21, 4 }
   0xa   : > { %s2568_s23 = smov (%p31_p4, %s2566_s23), 0 }
   0xb   : > { %s66_s25 = ssub.s32 %s2069_s20, %s2568_s23  ;;  %183 = sbr.rel (%p1713_p6) target bundleno = 107 (0x6b), region = 16 }
   0xc   : > { %s67_s26 = sor.u32 %s66_s25, %s65_s24 }
   0xd   : > { %p68_p5 = scmp.eq.s32.totalorder %s67_s26, 0 }
   0xf   : > { %s2152_s28 = scalar_select %p68_p5, %s2053_s16, %s70_s27  }
  0x10   : > { %199 = sbr.rel (!%p79_p3) target bundleno = 107 (0x6b), region = 24  ;;  %s201_s29 = sand.u32 (%p79_p3), 1, %s2053_s16  }
  0x11   : > { %s1801_s30 = sshll.u32 (%p79_p3), %s2065_s19, 8  ;;  %s1714_s5 = sshll.u32 (%p79_p3), %s201_s29, 9 }
  0x12   : > { %s206_s6 = sadd.s32 (%p79_p3), %s2069_s20, %s1801_s30  ;;  %s2166_s11 = scalar_lea.vmem (%p79_p3), [#allocation3], %s1714_s5 }
  0x13   : > { %s1717_s7 = sshll.u32 (%p79_p3), %s206_s6, 2 }
  0x14   : > { %s2161_s10 = scalar_lea.vmem (%p79_p3), %s2553_s1, %s1717_s7 }
  0x15   : > { %v225_v0 = vld [vmem:[%s2161_s10] sm:$0xf]  ;;  %v227_v1 = vld [vmem:[%s2161_s10 + $0x8] sm:$0xf]  ;;  %v229_v2 = vld [vmem:[%s2161_s10 + $0x10] sm:$0xf] }
  0x16   : > { %226 = vst [vmem:[%s2166_s11] sm:$0xf] %v225_v0  ;;  %228 = vst [vmem:[%s2166_s11 + $0x4] sm:$0xf] %v227_v1  ;;  %v231_v3 = vld [vmem:[%s2161_s10 + $0x18] sm:$0xf] }
  0x17   : > { %230 = vst [vmem:[%s2166_s11 + $0x8] sm:$0xf] %v229_v2  ;;  %v233_v4 = vld [vmem:[%s2161_s10 + $0x20] sm:$0xf]  ;;  %v235_v5 = vld [vmem:[%s2161_s10 + $0x28] sm:$0xf] }
  0x18   : > { %232 = vst [vmem:[%s2166_s11 + $0xc] sm:$0xf] %v231_v3  ;;  %234 = vst [vmem:[%s2166_s11 + $0x10] sm:$0xf] %v233_v4  ;;  %v237_v6 = vld [vmem:[%s2161_s10 + $0x30] sm:$0xf] }
  0x19   : > { %236 = vst [vmem:[%s2166_s11 + $0x14] sm:$0xf] %v235_v5  ;;  %v239_v7 = vld [vmem:[%s2161_s10 + $0x38] sm:$0xf]  ;;  %v241_v8 = vld [vmem:[%s2161_s10 + $0x40] sm:$0xf] }
  0x1a   : > { %238 = vst [vmem:[%s2166_s11 + $0x18] sm:$0xf] %v237_v6  ;;  %240 = vst [vmem:[%s2166_s11 + $0x1c] sm:$0xf] %v239_v7  ;;  %v243_v9 = vld [vmem:[%s2161_s10 + $0x48] sm:$0xf] }
  0x1b   : > { %242 = vst [vmem:[%s2166_s11 + $0x20] sm:$0xf] %v241_v8  ;;  %v245_v10 = vld [vmem:[%s2161_s10 + $0x50] sm:$0xf]  ;;  %v247_v11 = vld [vmem:[%s2161_s10 + $0x58] sm:$0xf] }
  0x1c   : > { %244 = vst [vmem:[%s2166_s11 + $0x24] sm:$0xf] %v243_v9  ;;  %246 = vst [vmem:[%s2166_s11 + $0x28] sm:$0xf] %v245_v10  ;;  %v249_v12 = vld [vmem:[%s2161_s10 + $0x60] sm:$0xf] }
  0x1d   : > { %248 = vst [vmem:[%s2166_s11 + $0x2c] sm:$0xf] %v247_v11  ;;  %v251_v13 = vld [vmem:[%s2161_s10 + $0x68] sm:$0xf]  ;;  %v253_v14 = vld [vmem:[%s2161_s10 + $0x70] sm:$0xf] }
  0x1e   : > { %250 = vst [vmem:[%s2166_s11 + $0x30] sm:$0xf] %v249_v12  ;;  %252 = vst [vmem:[%s2166_s11 + $0x34] sm:$0xf] %v251_v13  ;;  %v255_v15 = vld [vmem:[%s2161_s10 + $0x78] sm:$0xf] }
  0x1f   : > { %254 = vst [vmem:[%s2166_s11 + $0x38] sm:$0xf] %v253_v14  ;;  %v257_v16 = vld [vmem:[%s2161_s10 + $0x80] sm:$0xf]  ;;  %v259_v17 = vld [vmem:[%s2161_s10 + $0x88] sm:$0xf] }
  0x20   : > { %256 = vst [vmem:[%s2166_s11 + $0x3c] sm:$0xf] %v255_v15  ;;  %258 = vst [vmem:[%s2166_s11 + $0x40] sm:$0xf] %v257_v16  ;;  %v261_v18 = vld [vmem:[%s2161_s10 + $0x90] sm:$0xf] }
  0x21   : > { %260 = vst [vmem:[%s2166_s11 + $0x44] sm:$0xf] %v259_v17  ;;  %v263_v19 = vld [vmem:[%s2161_s10 + $0x98] sm:$0xf]  ;;  %v265_v20 = vld [vmem:[%s2161_s10 + $0xa0] sm:$0xf] }
  0x22   : > { %262 = vst [vmem:[%s2166_s11 + $0x48] sm:$0xf] %v261_v18  ;;  %264 = vst [vmem:[%s2166_s11 + $0x4c] sm:$0xf] %v263_v19  ;;  %v267_v21 = vld [vmem:[%s2161_s10 + $0xa8] sm:$0xf] }
  0x23   : > { %266 = vst [vmem:[%s2166_s11 + $0x50] sm:$0xf] %v265_v20  ;;  %v269_v22 = vld [vmem:[%s2161_s10 + $0xb0] sm:$0xf]  ;;  %v271_v23 = vld [vmem:[%s2161_s10 + $0xb8] sm:$0xf] }
  0x24   : > { %268 = vst [vmem:[%s2166_s11 + $0x54] sm:$0xf] %v267_v21  ;;  %270 = vst [vmem:[%s2166_s11 + $0x58] sm:$0xf] %v269_v22  ;;  %v273_v24 = vld [vmem:[%s2161_s10 + $0xc0] sm:$0xf] }
  0x25   : > { %272 = vst [vmem:[%s2166_s11 + $0x5c] sm:$0xf] %v271_v23  ;;  %v275_v25 = vld [vmem:[%s2161_s10 + $0xc8] sm:$0xf]  ;;  %v277_v26 = vld [vmem:[%s2161_s10 + $0xd0] sm:$0xf] }
  0x26   : > { %274 = vst [vmem:[%s2166_s11 + $0x60] sm:$0xf] %v273_v24  ;;  %276 = vst [vmem:[%s2166_s11 + $0x64] sm:$0xf] %v275_v25  ;;  %v279_v27 = vld [vmem:[%s2161_s10 + $0xd8] sm:$0xf] }
  0x27   : > { %278 = vst [vmem:[%s2166_s11 + $0x68] sm:$0xf] %v277_v26  ;;  %v281_v28 = vld [vmem:[%s2161_s10 + $0xe0] sm:$0xf]  ;;  %v283_v29 = vld [vmem:[%s2161_s10 + $0xe8] sm:$0xf] }
  0x28   : > { %280 = vst [vmem:[%s2166_s11 + $0x6c] sm:$0xf] %v279_v27  ;;  %282 = vst [vmem:[%s2166_s11 + $0x70] sm:$0xf] %v281_v28  ;;  %v285_v30 = vld [vmem:[%s2161_s10 + $0xf0] sm:$0xf] }
  0x29   : > { %284 = vst [vmem:[%s2166_s11 + $0x74] sm:$0xf] %v283_v29  ;;  %v287_v31 = vld [vmem:[%s2161_s10 + $0xf8] sm:$0xf]  ;;  %v289_v32 = vld [vmem:[%s2161_s10 + $0x100] sm:$0xf] }
  0x2a   : > { %286 = vst [vmem:[%s2166_s11 + $0x78] sm:$0xf] %v285_v30  ;;  %288 = vst [vmem:[%s2166_s11 + $0x7c] sm:$0xf] %v287_v31  ;;  %v291_v33 = vld [vmem:[%s2161_s10 + $0x108] sm:$0xf] }
  0x2b   : > { %290 = vst [vmem:[%s2166_s11 + $0x80] sm:$0xf] %v289_v32  ;;  %v293_v34 = vld [vmem:[%s2161_s10 + $0x110] sm:$0xf]  ;;  %v295_v35 = vld [vmem:[%s2161_s10 + $0x118] sm:$0xf] }
  0x2c   : > { %292 = vst [vmem:[%s2166_s11 + $0x84] sm:$0xf] %v291_v33  ;;  %294 = vst [vmem:[%s2166_s11 + $0x88] sm:$0xf] %v293_v34  ;;  %v297_v36 = vld [vmem:[%s2161_s10 + $0x120] sm:$0xf] }
  0x2d   : > { %296 = vst [vmem:[%s2166_s11 + $0x8c] sm:$0xf] %v295_v35  ;;  %v299_v37 = vld [vmem:[%s2161_s10 + $0x128] sm:$0xf]  ;;  %v301_v38 = vld [vmem:[%s2161_s10 + $0x130] sm:$0xf] }
  0x2e   : > { %298 = vst [vmem:[%s2166_s11 + $0x90] sm:$0xf] %v297_v36  ;;  %300 = vst [vmem:[%s2166_s11 + $0x94] sm:$0xf] %v299_v37  ;;  %v303_v39 = vld [vmem:[%s2161_s10 + $0x138] sm:$0xf] }
  0x2f   : > { %302 = vst [vmem:[%s2166_s11 + $0x98] sm:$0xf] %v301_v38  ;;  %v305_v40 = vld [vmem:[%s2161_s10 + $0x140] sm:$0xf]  ;;  %v307_v41 = vld [vmem:[%s2161_s10 + $0x148] sm:$0xf] }
  0x30   : > { %304 = vst [vmem:[%s2166_s11 + $0x9c] sm:$0xf] %v303_v39  ;;  %306 = vst [vmem:[%s2166_s11 + $0xa0] sm:$0xf] %v305_v40  ;;  %v309_v42 = vld [vmem:[%s2161_s10 + $0x150] sm:$0xf] }
  0x31   : > { %308 = vst [vmem:[%s2166_s11 + $0xa4] sm:$0xf] %v307_v41  ;;  %v311_v43 = vld [vmem:[%s2161_s10 + $0x158] sm:$0xf]  ;;  %v313_v44 = vld [vmem:[%s2161_s10 + $0x160] sm:$0xf] }
  0x32   : > { %310 = vst [vmem:[%s2166_s11 + $0xa8] sm:$0xf] %v309_v42  ;;  %312 = vst [vmem:[%s2166_s11 + $0xac] sm:$0xf] %v311_v43  ;;  %v315_v45 = vld [vmem:[%s2161_s10 + $0x168] sm:$0xf] }
  0x33   : > { %314 = vst [vmem:[%s2166_s11 + $0xb0] sm:$0xf] %v313_v44  ;;  %v317_v46 = vld [vmem:[%s2161_s10 + $0x170] sm:$0xf]  ;;  %v319_v47 = vld [vmem:[%s2161_s10 + $0x178] sm:$0xf] }
  0x34   : > { %316 = vst [vmem:[%s2166_s11 + $0xb4] sm:$0xf] %v315_v45  ;;  %318 = vst [vmem:[%s2166_s11 + $0xb8] sm:$0xf] %v317_v46  ;;  %v321_v48 = vld [vmem:[%s2161_s10 + $0x180] sm:$0xf] }
  0x35   : > { %320 = vst [vmem:[%s2166_s11 + $0xbc] sm:$0xf] %v319_v47  ;;  %v323_v49 = vld [vmem:[%s2161_s10 + $0x188] sm:$0xf]  ;;  %v325_v50 = vld [vmem:[%s2161_s10 + $0x190] sm:$0xf] }
  0x36   : > { %322 = vst [vmem:[%s2166_s11 + $0xc0] sm:$0xf] %v321_v48  ;;  %324 = vst [vmem:[%s2166_s11 + $0xc4] sm:$0xf] %v323_v49  ;;  %v327_v51 = vld [vmem:[%s2161_s10 + $0x198] sm:$0xf] }
  0x37   : > { %326 = vst [vmem:[%s2166_s11 + $0xc8] sm:$0xf] %v325_v50  ;;  %v329_v52 = vld [vmem:[%s2161_s10 + $0x1a0] sm:$0xf]  ;;  %v331_v53 = vld [vmem:[%s2161_s10 + $0x1a8] sm:$0xf] }
  0x38   : > { %328 = vst [vmem:[%s2166_s11 + $0xcc] sm:$0xf] %v327_v51  ;;  %330 = vst [vmem:[%s2166_s11 + $0xd0] sm:$0xf] %v329_v52  ;;  %v333_v54 = vld [vmem:[%s2161_s10 + $0x1b0] sm:$0xf] }
  0x39   : > { %332 = vst [vmem:[%s2166_s11 + $0xd4] sm:$0xf] %v331_v53  ;;  %v335_v55 = vld [vmem:[%s2161_s10 + $0x1b8] sm:$0xf]  ;;  %v337_v56 = vld [vmem:[%s2161_s10 + $0x1c0] sm:$0xf] }
  0x3a   : > { %334 = vst [vmem:[%s2166_s11 + $0xd8] sm:$0xf] %v333_v54  ;;  %336 = vst [vmem:[%s2166_s11 + $0xdc] sm:$0xf] %v335_v55  ;;  %v339_v57 = vld [vmem:[%s2161_s10 + $0x1c8] sm:$0xf] }
  0x3b   : > { %338 = vst [vmem:[%s2166_s11 + $0xe0] sm:$0xf] %v337_v56  ;;  %v341_v58 = vld [vmem:[%s2161_s10 + $0x1d0] sm:$0xf]  ;;  %v343_v59 = vld [vmem:[%s2161_s10 + $0x1d8] sm:$0xf] }
  0x3c   : > { %340 = vst [vmem:[%s2166_s11 + $0xe4] sm:$0xf] %v339_v57  ;;  %342 = vst [vmem:[%s2166_s11 + $0xe8] sm:$0xf] %v341_v58  ;;  %v345_v60 = vld [vmem:[%s2161_s10 + $0x1e0] sm:$0xf] }
  0x3d   : > { %344 = vst [vmem:[%s2166_s11 + $0xec] sm:$0xf] %v343_v59  ;;  %v347_v61 = vld [vmem:[%s2161_s10 + $0x1e8] sm:$0xf]  ;;  %v349_v62 = vld [vmem:[%s2161_s10 + $0x1f0] sm:$0xf] }
  0x3e   : > { %346 = vst [vmem:[%s2166_s11 + $0xf0] sm:$0xf] %v345_v60  ;;  %348 = vst [vmem:[%s2166_s11 + $0xf4] sm:$0xf] %v347_v61  ;;  %v351_v63 = vld [vmem:[%s2161_s10 + $0x1f8] sm:$0xf] }
  0x3f   : > { %350 = vst [vmem:[%s2166_s11 + $0xf8] sm:$0xf] %v349_v62  ;;  %v353_v0 = vld [vmem:[%s2161_s10 + $0x200] sm:$0xf]  ;;  %v355_v1 = vld [vmem:[%s2161_s10 + $0x208] sm:$0xf] }
  0x40   : > { %352 = vst [vmem:[%s2166_s11 + $0xfc] sm:$0xf] %v351_v63  ;;  %354 = vst [vmem:[%s2166_s11 + $0x100] sm:$0xf] %v353_v0  ;;  %v357_v2 = vld [vmem:[%s2161_s10 + $0x210] sm:$0xf] }
  0x41   : > { %356 = vst [vmem:[%s2166_s11 + $0x104] sm:$0xf] %v355_v1  ;;  %v359_v3 = vld [vmem:[%s2161_s10 + $0x218] sm:$0xf]  ;;  %v361_v4 = vld [vmem:[%s2161_s10 + $0x220] sm:$0xf] }
  0x42   : > { %358 = vst [vmem:[%s2166_s11 + $0x108] sm:$0xf] %v357_v2  ;;  %360 = vst [vmem:[%s2166_s11 + $0x10c] sm:$0xf] %v359_v3  ;;  %v363_v5 = vld [vmem:[%s2161_s10 + $0x228] sm:$0xf] }
  0x43   : > { %362 = vst [vmem:[%s2166_s11 + $0x110] sm:$0xf] %v361_v4  ;;  %v365_v6 = vld [vmem:[%s2161_s10 + $0x230] sm:$0xf]  ;;  %v367_v7 = vld [vmem:[%s2161_s10 + $0x238] sm:$0xf] }
  0x44   : > { %364 = vst [vmem:[%s2166_s11 + $0x114] sm:$0xf] %v363_v5  ;;  %366 = vst [vmem:[%s2166_s11 + $0x118] sm:$0xf] %v365_v6  ;;  %v369_v8 = vld [vmem:[%s2161_s10 + $0x240] sm:$0xf] }
  0x45   : > { %368 = vst [vmem:[%s2166_s11 + $0x11c] sm:$0xf] %v367_v7  ;;  %v371_v9 = vld [vmem:[%s2161_s10 + $0x248] sm:$0xf]  ;;  %v373_v10 = vld [vmem:[%s2161_s10 + $0x250] sm:$0xf] }
  0x46   : > { %370 = vst [vmem:[%s2166_s11 + $0x120] sm:$0xf] %v369_v8  ;;  %372 = vst [vmem:[%s2166_s11 + $0x124] sm:$0xf] %v371_v9  ;;  %v375_v11 = vld [vmem:[%s2161_s10 + $0x258] sm:$0xf] }
  0x47   : > { %374 = vst [vmem:[%s2166_s11 + $0x128] sm:$0xf] %v373_v10  ;;  %v377_v12 = vld [vmem:[%s2161_s10 + $0x260] sm:$0xf]  ;;  %v379_v13 = vld [vmem:[%s2161_s10 + $0x268] sm:$0xf] }
  0x48   : > { %376 = vst [vmem:[%s2166_s11 + $0x12c] sm:$0xf] %v375_v11  ;;  %378 = vst [vmem:[%s2166_s11 + $0x130] sm:$0xf] %v377_v12  ;;  %v381_v14 = vld [vmem:[%s2161_s10 + $0x270] sm:$0xf] }
  0x49   : > { %380 = vst [vmem:[%s2166_s11 + $0x134] sm:$0xf] %v379_v13  ;;  %v383_v15 = vld [vmem:[%s2161_s10 + $0x278] sm:$0xf]  ;;  %v385_v16 = vld [vmem:[%s2161_s10 + $0x280] sm:$0xf] }
  0x4a   : > { %382 = vst [vmem:[%s2166_s11 + $0x138] sm:$0xf] %v381_v14  ;;  %384 = vst [vmem:[%s2166_s11 + $0x13c] sm:$0xf] %v383_v15  ;;  %v387_v17 = vld [vmem:[%s2161_s10 + $0x288] sm:$0xf] }
  0x4b   : > { %386 = vst [vmem:[%s2166_s11 + $0x140] sm:$0xf] %v385_v16  ;;  %v389_v18 = vld [vmem:[%s2161_s10 + $0x290] sm:$0xf]  ;;  %v391_v19 = vld [vmem:[%s2161_s10 + $0x298] sm:$0xf] }
  0x4c   : > { %388 = vst [vmem:[%s2166_s11 + $0x144] sm:$0xf] %v387_v17  ;;  %390 = vst [vmem:[%s2166_s11 + $0x148] sm:$0xf] %v389_v18  ;;  %v393_v20 = vld [vmem:[%s2161_s10 + $0x2a0] sm:$0xf] }
  0x4d   : > { %392 = vst [vmem:[%s2166_s11 + $0x14c] sm:$0xf] %v391_v19  ;;  %v395_v21 = vld [vmem:[%s2161_s10 + $0x2a8] sm:$0xf]  ;;  %v397_v22 = vld [vmem:[%s2161_s10 + $0x2b0] sm:$0xf] }
  0x4e   : > { %394 = vst [vmem:[%s2166_s11 + $0x150] sm:$0xf] %v393_v20  ;;  %396 = vst [vmem:[%s2166_s11 + $0x154] sm:$0xf] %v395_v21  ;;  %v399_v23 = vld [vmem:[%s2161_s10 + $0x2b8] sm:$0xf] }
  0x4f   : > { %398 = vst [vmem:[%s2166_s11 + $0x158] sm:$0xf] %v397_v22  ;;  %v401_v24 = vld [vmem:[%s2161_s10 + $0x2c0] sm:$0xf]  ;;  %v403_v25 = vld [vmem:[%s2161_s10 + $0x2c8] sm:$0xf] }
  0x50   : > { %400 = vst [vmem:[%s2166_s11 + $0x15c] sm:$0xf] %v399_v23  ;;  %402 = vst [vmem:[%s2166_s11 + $0x160] sm:$0xf] %v401_v24  ;;  %v405_v26 = vld [vmem:[%s2161_s10 + $0x2d0] sm:$0xf] }
  0x51   : > { %404 = vst [vmem:[%s2166_s11 + $0x164] sm:$0xf] %v403_v25  ;;  %v407_v27 = vld [vmem:[%s2161_s10 + $0x2d8] sm:$0xf]  ;;  %v409_v28 = vld [vmem:[%s2161_s10 + $0x2e0] sm:$0xf] }
  0x52   : > { %406 = vst [vmem:[%s2166_s11 + $0x168] sm:$0xf] %v405_v26  ;;  %408 = vst [vmem:[%s2166_s11 + $0x16c] sm:$0xf] %v407_v27  ;;  %v411_v29 = vld [vmem:[%s2161_s10 + $0x2e8] sm:$0xf] }
  0x53   : > { %410 = vst [vmem:[%s2166_s11 + $0x170] sm:$0xf] %v409_v28  ;;  %v413_v30 = vld [vmem:[%s2161_s10 + $0x2f0] sm:$0xf]  ;;  %v415_v31 = vld [vmem:[%s2161_s10 + $0x2f8] sm:$0xf] }
  0x54   : > { %412 = vst [vmem:[%s2166_s11 + $0x174] sm:$0xf] %v411_v29  ;;  %414 = vst [vmem:[%s2166_s11 + $0x178] sm:$0xf] %v413_v30  ;;  %v417_v32 = vld [vmem:[%s2161_s10 + $0x300] sm:$0xf] }
  0x55   : > { %416 = vst [vmem:[%s2166_s11 + $0x17c] sm:$0xf] %v415_v31  ;;  %v419_v33 = vld [vmem:[%s2161_s10 + $0x308] sm:$0xf]  ;;  %v421_v34 = vld [vmem:[%s2161_s10 + $0x310] sm:$0xf] }
  0x56   : > { %418 = vst [vmem:[%s2166_s11 + $0x180] sm:$0xf] %v417_v32  ;;  %420 = vst [vmem:[%s2166_s11 + $0x184] sm:$0xf] %v419_v33  ;;  %v423_v35 = vld [vmem:[%s2161_s10 + $0x318] sm:$0xf] }
  0x57   : > { %422 = vst [vmem:[%s2166_s11 + $0x188] sm:$0xf] %v421_v34  ;;  %v425_v36 = vld [vmem:[%s2161_s10 + $0x320] sm:$0xf]  ;;  %v427_v37 = vld [vmem:[%s2161_s10 + $0x328] sm:$0xf] }
  0x58   : > { %424 = vst [vmem:[%s2166_s11 + $0x18c] sm:$0xf] %v423_v35  ;;  %426 = vst [vmem:[%s2166_s11 + $0x190] sm:$0xf] %v425_v36  ;;  %v429_v38 = vld [vmem:[%s2161_s10 + $0x330] sm:$0xf] }
  0x59   : > { %428 = vst [vmem:[%s2166_s11 + $0x194] sm:$0xf] %v427_v37  ;;  %v431_v39 = vld [vmem:[%s2161_s10 + $0x338] sm:$0xf]  ;;  %v433_v40 = vld [vmem:[%s2161_s10 + $0x340] sm:$0xf] }
  0x5a   : > { %430 = vst [vmem:[%s2166_s11 + $0x198] sm:$0xf] %v429_v38  ;;  %432 = vst [vmem:[%s2166_s11 + $0x19c] sm:$0xf] %v431_v39  ;;  %v435_v41 = vld [vmem:[%s2161_s10 + $0x348] sm:$0xf] }
  0x5b   : > { %434 = vst [vmem:[%s2166_s11 + $0x1a0] sm:$0xf] %v433_v40  ;;  %v437_v42 = vld [vmem:[%s2161_s10 + $0x350] sm:$0xf]  ;;  %v439_v43 = vld [vmem:[%s2161_s10 + $0x358] sm:$0xf] }
  0x5c   : > { %436 = vst [vmem:[%s2166_s11 + $0x1a4] sm:$0xf] %v435_v41  ;;  %438 = vst [vmem:[%s2166_s11 + $0x1a8] sm:$0xf] %v437_v42  ;;  %v441_v44 = vld [vmem:[%s2161_s10 + $0x360] sm:$0xf] }
  0x5d   : > { %440 = vst [vmem:[%s2166_s11 + $0x1ac] sm:$0xf] %v439_v43  ;;  %v443_v45 = vld [vmem:[%s2161_s10 + $0x368] sm:$0xf]  ;;  %v445_v46 = vld [vmem:[%s2161_s10 + $0x370] sm:$0xf] }
  0x5e   : > { %442 = vst [vmem:[%s2166_s11 + $0x1b0] sm:$0xf] %v441_v44  ;;  %444 = vst [vmem:[%s2166_s11 + $0x1b4] sm:$0xf] %v443_v45  ;;  %v447_v47 = vld [vmem:[%s2161_s10 + $0x378] sm:$0xf] }
  0x5f   : > { %446 = vst [vmem:[%s2166_s11 + $0x1b8] sm:$0xf] %v445_v46  ;;  %v449_v48 = vld [vmem:[%s2161_s10 + $0x380] sm:$0xf]  ;;  %v451_v49 = vld [vmem:[%s2161_s10 + $0x388] sm:$0xf] }
  0x60   : > { %448 = vst [vmem:[%s2166_s11 + $0x1bc] sm:$0xf] %v447_v47  ;;  %450 = vst [vmem:[%s2166_s11 + $0x1c0] sm:$0xf] %v449_v48  ;;  %v453_v50 = vld [vmem:[%s2161_s10 + $0x390] sm:$0xf] }
  0x61   : > { %452 = vst [vmem:[%s2166_s11 + $0x1c4] sm:$0xf] %v451_v49  ;;  %v455_v51 = vld [vmem:[%s2161_s10 + $0x398] sm:$0xf]  ;;  %v457_v52 = vld [vmem:[%s2161_s10 + $0x3a0] sm:$0xf] }
  0x62   : > { %454 = vst [vmem:[%s2166_s11 + $0x1c8] sm:$0xf] %v453_v50  ;;  %456 = vst [vmem:[%s2166_s11 + $0x1cc] sm:$0xf] %v455_v51  ;;  %v459_v53 = vld [vmem:[%s2161_s10 + $0x3a8] sm:$0xf] }
  0x63   : > { %458 = vst [vmem:[%s2166_s11 + $0x1d0] sm:$0xf] %v457_v52  ;;  %v461_v54 = vld [vmem:[%s2161_s10 + $0x3b0] sm:$0xf]  ;;  %v463_v55 = vld [vmem:[%s2161_s10 + $0x3b8] sm:$0xf] }
  0x64   : > { %460 = vst [vmem:[%s2166_s11 + $0x1d4] sm:$0xf] %v459_v53  ;;  %462 = vst [vmem:[%s2166_s11 + $0x1d8] sm:$0xf] %v461_v54  ;;  %v465_v56 = vld [vmem:[%s2161_s10 + $0x3c0] sm:$0xf] }
  0x65   : > { %464 = vst [vmem:[%s2166_s11 + $0x1dc] sm:$0xf] %v463_v55  ;;  %v467_v57 = vld [vmem:[%s2161_s10 + $0x3c8] sm:$0xf]  ;;  %v469_v58 = vld [vmem:[%s2161_s10 + $0x3d0] sm:$0xf] }
  0x66   : > { %466 = vst [vmem:[%s2166_s11 + $0x1e0] sm:$0xf] %v465_v56  ;;  %468 = vst [vmem:[%s2166_s11 + $0x1e4] sm:$0xf] %v467_v57  ;;  %v471_v59 = vld [vmem:[%s2161_s10 + $0x3d8] sm:$0xf] }
  0x67   : > { %470 = vst [vmem:[%s2166_s11 + $0x1e8] sm:$0xf] %v469_v58  ;;  %v473_v60 = vld [vmem:[%s2161_s10 + $0x3e0] sm:$0xf]  ;;  %v475_v61 = vld [vmem:[%s2161_s10 + $0x3e8] sm:$0xf] }
  0x68   : > { %472 = vst [vmem:[%s2166_s11 + $0x1ec] sm:$0xf] %v471_v59  ;;  %474 = vst [vmem:[%s2166_s11 + $0x1f0] sm:$0xf] %v473_v60  ;;  %v477_v62 = vld [vmem:[%s2161_s10 + $0x3f0] sm:$0xf] }
  0x69   : > { %476 = vst [vmem:[%s2166_s11 + $0x1f4] sm:$0xf] %v475_v61  ;;  %v479_v63 = vld [vmem:[%s2161_s10 + $0x3f8] sm:$0xf]  ;;  %478 = vst [vmem:[%s2166_s11 + $0x1f8] sm:$0xf] %v477_v62 }
  0x6a   : > { %480 = vst [vmem:[%s2166_s11 + $0x1fc] sm:$0xf] %v479_v63 }
  0x6b PF: > { %p1718_p7 = scmp.ge.s32.totalorder %s2073_s21, 1  ;;  %p771_p8 = scmp.lt.s32.totalorder %s2073_s21, 5 }
  0x6d   : > { %p772_p9 = pnand %p1718_p7, %p771_p8 }
  0x6e   : > { %s778_s12 = sand.u32 (!%p772_p9), 1, %s2049_s15   ;;  %s1720_s13 = sshll.u32 (!%p772_p9), %s2057_s17, 3 }
  0x6f   : > { %775 = sbr.rel (%p772_p9) target bundleno = 412 (0x19c), region = 73  ;;  %s1719_s14 = sshll.u32 (!%p772_p9), %s778_s12, 9 }
  0x70   : > { %p824_p10 = scmp.lt.s32.totalorder (!%p772_p9), %s1720_s13, 15  ;;  %p832_p11 = scmp.lt.s32.totalorder (!%p772_p9), %s2061_s18, 1 }
  0x71   : > { %s2448_s12 = scalar_lea.vmem (!%p772_p9), [#allocation3], %s1719_s14  ;;  %p1723_p12 = scmp.ne.s32.totalorder (!%p772_p9), %s2057_s17, 0 }
  0x74   : > { %s2570_s13 = smov (!%p824_p10, %s1720_s13), 15  ;;  %s2572_s18 = smov (!%p832_p11, %s2061_s18), 1 }
  0x75   : > { %s1721_s24 = sshll.u32 %s2570_s13, 2  ;;  %s834_s15 = scalar_lea.vmem %s2554_s2, %s2572_s18 }
  0x76   : > { %s2432_s27 = scalar_lea.vmem %s2552_s0, %s1721_s24  ;;  %s837_s7 = scalar_lea.vmem %s2555_s3, %s2572_s18 }
  0x77   : > { %s1722_s8 = sshll.u32 %s2572_s18, 2  ;;  %850 = sbr.rel (%p1723_p12) target bundleno = 126 (0x7e), region = 81 }
  0x78   : > { %s2446_s11 = scalar_lea.vmem %s2556_s4, %s1722_s8 }
  0x7c   : > { %v2075_v0 = vmov 0.0  }
  0x7d   : > { %851 = vst [vmem:[#allocation2] sm:$0xff] %v2075_v0 }
  0x7e PF: > { %v1947_v1 = vld [vmem:[%s2448_s12 + $0x78] sm:$0xff]   ;;  %v1951_v5 = vld [vmem:[%s2448_s12 + $0x70] sm:$0xff]   ;;  %v1955_v9 = vld [vmem:[%s2448_s12 + $0x68] sm:$0xff]   ;;  %p1796_p13 = scmp.ne.s32.totalorder %s2057_s17, 1 }
  0x7f   : > { %v1948_v2 = vld [vmem:[%s2448_s12 + $0xf8] sm:$0xff]   ;;  %1802 = vmatprep.subr.bf16.mxu0 %v1947_v1  ;;  %v1952_v6 = vld [vmem:[%s2448_s12 + $0xf0] sm:$0xff]   ;;  %v1956_v10 = vld [vmem:[%s2448_s12 + $0xe8] sm:$0xff]  }
  0x80   : > { %v1949_v3 = vld [vmem:[%s2448_s12 + $0x38] sm:$0xff]   ;;  %1824 = vmatprep.subr.bf16.mxu1 %v1948_v2  ;;  %v1953_v7 = vld [vmem:[%s2448_s12 + $0x30] sm:$0xff]   ;;  %v1957_v11 = vld [vmem:[%s2448_s12 + $0x28] sm:$0xff]  }
  0x81   : > { %v1950_v4 = vld [vmem:[%s2448_s12 + $0xb8] sm:$0xff]   ;;  %1803 = vmatpush3.bf16.msra.mxu0 %v1949_v3  ;;  %v1954_v8 = vld [vmem:[%s2448_s12 + $0xb0] sm:$0xff]   ;;  %v1958_v12 = vld [vmem:[%s2448_s12 + $0xa8] sm:$0xff]  }
  0x82   : > { %1825 = vmatpush3.bf16.msra.mxu1 %v1950_v4  ;;  %1804 = vmatprep.subr.bf16.mxu0 %v1951_v5  ;;  %v1959_v13 = vld [vmem:[%s2448_s12 + $0x60] sm:$0xff]   ;;  %v1963_v17 = vld [vmem:[%s2448_s12 + $0x58] sm:$0xff]   ;;  %v1967_v21 = vld [vmem:[%s2448_s12 + $0x50] sm:$0xff]  }
  0x83   : > { %1826 = vmatprep.subr.bf16.mxu1 %v1952_v6  ;;  %v1960_v14 = vld [vmem:[%s2448_s12 + $0xe0] sm:$0xff]   ;;  %v1964_v18 = vld [vmem:[%s2448_s12 + $0xd8] sm:$0xff]   ;;  %v1968_v22 = vld [vmem:[%s2448_s12 + $0xd0] sm:$0xff]  }
  0x84   : > { %v1961_v15 = vld [vmem:[%s2448_s12 + $0x20] sm:$0xff]   ;;  %v1965_v19 = vld [vmem:[%s2448_s12 + $0x18] sm:$0xff]   ;;  %v1969_v23 = vld [vmem:[%s2448_s12 + $0x10] sm:$0xff]  }
  0x85   : > { %1805 = vmatpush3.bf16.msra.mxu0 %v1953_v7  ;;  %v1962_v16 = vld [vmem:[%s2448_s12 + $0xa0] sm:$0xff]   ;;  %v1966_v20 = vld [vmem:[%s2448_s12 + $0x98] sm:$0xff]   ;;  %v1970_v24 = vld [vmem:[%s2448_s12 + $0x90] sm:$0xff]  }
  0x86   : > { %1827 = vmatpush3.bf16.msra.mxu1 %v1954_v8  ;;  %1806 = vmatprep.subr.bf16.mxu0 %v1955_v9  ;;  %v1971_v25 = vld [vmem:[%s2448_s12 + $0x48] sm:$0xff]   ;;  %v1975_v29 = vld [vmem:[%s2448_s12 + $0x40] sm:$0xff]   ;;  %v853_v33 = vld [vmem:[%s2432_s27] sm:$0xff] }
  0x87   : > { %1828 = vmatprep.subr.bf16.mxu1 %v1956_v10  ;;  %v1972_v26 = vld [vmem:[%s2448_s12 + $0xc8] sm:$0xff]   ;;  %v1976_v30 = vld [vmem:[%s2448_s12 + $0xc0] sm:$0xff]   ;;  %v1724_v35 = vcombine.low %v853_v33, %v853_v33  ;;  %v1725_v36 = vcombine.high %v853_v33, %v853_v33  ;;  %v1983_v39 = vld [vmem:[%s2448_s12 + $0x178] sm:$0xff]  }
  0x88   : > { %v1973_v27 = vld [vmem:[%s2448_s12 + $0x8] sm:$0xff]   ;;  %v1977_v31 = vld [vmem:[%s2448_s12] sm:$0xff]   ;;  %v1984_v40 = vld [vmem:[%s2448_s12 + $0x1f8] sm:$0xff]  }
  0x89   : > { %1807 = vmatpush3.bf16.msra.mxu0 %v1957_v11  ;;  %v1974_v28 = vld [vmem:[%s2448_s12 + $0x88] sm:$0xff]   ;;  %v1978_v32 = vld [vmem:[%s2448_s12 + $0x80] sm:$0xff]   ;;  %1429 = vmatprep.mubr.bf16.mxu0 %v1725_v36  ;;  %v1985_v41 = vld [vmem:[%s2448_s12 + $0x138] sm:$0xff]  }
  0x8a   : > { %1829 = vmatpush3.bf16.msra.mxu1 %v1958_v12  ;;  %1808 = vmatprep.subr.bf16.mxu0 %v1959_v13  ;;  %v854_v34 = vld [vmem:[%s2432_s27 + $0x8] sm:$0xff]  ;;  %v1986_v42 = vld [vmem:[%s2448_s12 + $0x1b8] sm:$0xff]   ;;  %v1987_v43 = vld [vmem:[%s2448_s12 + $0x170] sm:$0xff]  }
  0x8b   : > { %1830 = vmatprep.subr.bf16.mxu1 %v1960_v14  ;;  %v1726_v37 = vcombine.low %v854_v34, %v854_v34  ;;  %v1727_v38 = vcombine.high %v854_v34, %v854_v34  ;;  %v1988_v44 = vld [vmem:[%s2448_s12 + $0x1f0] sm:$0xff]   ;;  %v1991_v47 = vld [vmem:[%s2448_s12 + $0x168] sm:$0xff]   ;;  %v1995_v51 = vld [vmem:[%s2448_s12 + $0x160] sm:$0xff]  }
  0x8c   : > { %v1989_v45 = vld [vmem:[%s2448_s12 + $0x130] sm:$0xff]   ;;  %v1992_v48 = vld [vmem:[%s2448_s12 + $0x1e8] sm:$0xff]   ;;  %v1996_v52 = vld [vmem:[%s2448_s12 + $0x1e0] sm:$0xff]  }
  0x8d   : > { %1809 = vmatpush3.bf16.msra.mxu0 %v1961_v15  ;;  %1469 = vmatprep.mubr.bf16.mxu1 %v1727_v38  ;;  %v1990_v46 = vld [vmem:[%s2448_s12 + $0x1b0] sm:$0xff]   ;;  %v1993_v49 = vld [vmem:[%s2448_s12 + $0x128] sm:$0xff]   ;;  %v1997_v53 = vld [vmem:[%s2448_s12 + $0x120] sm:$0xff]  }
  0x8e   : > { %1831 = vmatpush3.bf16.msra.mxu1 %v1962_v16  ;;  %1810 = vmatprep.subr.bf16.mxu0 %v1963_v17  ;;  %v1994_v50 = vld [vmem:[%s2448_s12 + $0x1a8] sm:$0xff]   ;;  %v1998_v54 = vld [vmem:[%s2448_s12 + $0x1a0] sm:$0xff]   ;;  %v1999_v55 = vld [vmem:[%s2448_s12 + $0x158] sm:$0xff]  }
  0x8f   : > { %1832 = vmatprep.subr.bf16.mxu1 %v1964_v18  ;;  %v2000_v56 = vld [vmem:[%s2448_s12 + $0x1d8] sm:$0xff]   ;;  %v2003_v59 = vld [vmem:[%s2448_s12 + $0x150] sm:$0xff]   ;;  %v2007_v63 = vld [vmem:[%s2448_s12 + $0x148] sm:$0xff]  }
  0x90   : > { %v2001_v57 = vld [vmem:[%s2448_s12 + $0x118] sm:$0xff]   ;;  %v2004_v60 = vld [vmem:[%s2448_s12 + $0x1d0] sm:$0xff]   ;;  %v2008_v0 = vld [vmem:[%s2448_s12 + $0x1c8] sm:$0xff]  }
  0x91   : > { %1811 = vmatpush3.bf16.msra.mxu0 %v1965_v19  ;;  %v2002_v58 = vld [vmem:[%s2448_s12 + $0x198] sm:$0xff]   ;;  %v2005_v61 = vld [vmem:[%s2448_s12 + $0x110] sm:$0xff]   ;;  %v2009_v1 = vld [vmem:[%s2448_s12 + $0x108] sm:$0xff]  }
  0x92   : > { %1833 = vmatpush3.bf16.msra.mxu1 %v1966_v20  ;;  %1812 = vmatprep.subr.bf16.mxu0 %v1967_v21  ;;  %v2006_v62 = vld [vmem:[%s2448_s12 + $0x190] sm:$0xff]   ;;  %v2010_v2 = vld [vmem:[%s2448_s12 + $0x188] sm:$0xff]   ;;  %v2011_v3 = vld [vmem:[%s2448_s12 + $0x140] sm:$0xff]  }
  0x93   : > { %1834 = vmatprep.subr.bf16.mxu1 %v1968_v22  ;;  %v2012_v4 = vld [vmem:[%s2448_s12 + $0x1c0] sm:$0xff]   ;;  %v855_v7 = vld [vmem:[%s2432_s27 + $0x10] sm:$0xff]  ;;  %v856_v10 = vld [vmem:[%s2432_s27 + $0x18] sm:$0xff] }
  0x94   : > { %v2013_v5 = vld [vmem:[%s2448_s12 + $0x100] sm:$0xff]   ;;  %v1728_v8 = vcombine.low %v855_v7, %v855_v7  ;;  %v1729_v9 = vcombine.high %v855_v7, %v855_v7  ;;  %v1730_v11 = vcombine.low %v856_v10, %v856_v10  ;;  %v1731_v12 = vcombine.high %v856_v10, %v856_v10  ;;  %v852_v33 = vld [vmem:[#allocation2] sm:$0xff] }
  0x95   : > { %1813 = vmatpush3.bf16.msra.mxu0 %v1969_v23  ;;  %v2014_v6 = vld [vmem:[%s2448_s12 + $0x180] sm:$0xff]  }
  0x96   : > { %1835 = vmatpush3.bf16.msra.mxu1 %v1970_v24  ;;  %1814 = vmatprep.subr.bf16.mxu0 %v1971_v25 }
  0x97   : > { %1836 = vmatprep.subr.bf16.mxu1 %v1972_v26 }
  0x99   : > { %1815 = vmatpush3.bf16.msra.mxu0 %v1973_v27 }
  0x9a   : > { %1837 = vmatpush3.bf16.msra.mxu1 %v1974_v28  ;;  %1816 = vmatprep.subr.bf16.mxu0 %v1975_v29 }
  0x9b   : > { %1838 = vmatprep.subr.bf16.mxu1 %v1976_v30 }
  0x9d   : > { %1817 = vmatpush3.bf16.msra.mxu0 %v1977_v31 }
  0x9e   : > { %1839 = vmatpush3.bf16.msra.mxu1 %v1978_v32  ;;  %1846 = vmatprep.subr.bf16.mxu0 %v1983_v39 }
  0x9f   : > { %1868 = vmatprep.subr.bf16.mxu1 %v1984_v40 }
  0xa0   : > { %1430 = vmatmul.mubr.bf16.vlgmr.msra.gmra.mxu0 %v1724_v35 }
  0xa1   : > { %1470 = vmatmul.mubr.bf16.vlgmr.msra.gmra.mxu1 %v1726_v37  ;;  %1847 = vmatpush3.bf16.msra.mxu0 %v1985_v41 }
  0xa2   : > { %1869 = vmatpush3.bf16.msra.mxu1 %v1986_v42  ;;  %1848 = vmatprep.subr.bf16.mxu0 %v1987_v43 }
  0xa3   : > { %1870 = vmatprep.subr.bf16.mxu1 %v1988_v44  ;;  %1509 = vmatprep.mubr.bf16.mxu0 %v1729_v9 }
  0xa4   : > { %1549 = vmatprep.mubr.bf16.mxu1 %v1731_v12 }
  0xa5   : > { %1849 = vmatpush3.bf16.msra.mxu0 %v1989_v45 }
  0xa6   : > { %1871 = vmatpush3.bf16.msra.mxu1 %v1990_v46  ;;  %1850 = vmatprep.subr.bf16.mxu0 %v1991_v47 }
  0xa7   : > { %1872 = vmatprep.subr.bf16.mxu1 %v1992_v48 }
  0xa9   : > { %1851 = vmatpush3.bf16.msra.mxu0 %v1993_v49 }
  0xaa   : > { %1873 = vmatpush3.bf16.msra.mxu1 %v1994_v50  ;;  %1852 = vmatprep.subr.bf16.mxu0 %v1995_v51 }
  0xab   : > { %1874 = vmatprep.subr.bf16.mxu1 %v1996_v52 }
  0xad   : > { %1853 = vmatpush3.bf16.msra.mxu0 %v1997_v53 }
  0xae   : > { %1875 = vmatpush3.bf16.msra.mxu1 %v1998_v54  ;;  %1854 = vmatprep.subr.bf16.mxu0 %v1999_v55 }
  0xaf   : > { %1876 = vmatprep.subr.bf16.mxu1 %v2000_v56 }
  0xb1   : > { %1855 = vmatpush3.bf16.msra.mxu0 %v2001_v57 }
  0xb2   : > { %1877 = vmatpush3.bf16.msra.mxu1 %v2002_v58  ;;  %1856 = vmatprep.subr.bf16.mxu0 %v2003_v59 }
  0xb3   : > { %1878 = vmatprep.subr.bf16.mxu1 %v2004_v60 }
  0xb5   : > { %1857 = vmatpush3.bf16.msra.mxu0 %v2005_v61 }
  0xb6   : > { %1879 = vmatpush3.bf16.msra.mxu1 %v2006_v62  ;;  %1858 = vmatprep.subr.bf16.mxu0 %v2007_v63 }
  0xb7   : > { %1880 = vmatprep.subr.bf16.mxu1 %v2008_v0 }
  0xb9   : > { %1859 = vmatpush3.bf16.msra.mxu0 %v2009_v1 }
  0xba   : > { %1881 = vmatpush3.bf16.msra.mxu1 %v2010_v2  ;;  %1860 = vmatprep.subr.bf16.mxu0 %v2011_v3 }
  0xbb   : > { %1882 = vmatprep.subr.bf16.mxu1 %v2012_v4 }
  0xbd   : > { %1861 = vmatpush3.bf16.msra.mxu0 %v2013_v5 }
  0xbe   : > { %1883 = vmatpush3.bf16.msra.mxu1 %v2014_v6 }
  0xc0   : > { %1510 = vmatmul.mubr.bf16.vlgmr.msra.gmra.mxu0 %v1728_v8 }
  0xc1   : > { %1550 = vmatmul.mubr.bf16.vlgmr.msra.gmra.mxu1 %v1730_v11 }
 0x160   : > { %v1818_v13 = vpop.f32.mrf.mxu0 }
 0x161   : > { %v1840_v14 = vpop.f32.mrf.mxu1 }
 0x162   : > { %v1819_v15 = vpop.f32.mrf.mxu0 }
 0x163   : > { %v1841_v16 = vpop.f32.mrf.mxu1  ;;  %v1820_v21 = vadd.f32 %v1819_v15, %v1818_v13 }
 0x164   : > { %v1821_v17 = vpop.f32.mrf.mxu0  ;;  %v1842_v22 = vadd.f32 %v1841_v16, %v1840_v14 }
 0x165   : > { %v1843_v18 = vpop.f32.mrf.mxu1 }
 0x166   : > { %v1822_v19 = vpop.f32.mrf.mxu0  ;;  %v1472_v27 = vadd.f32 %v1842_v22, %v1820_v21 }
 0x167   : > { %v1844_v20 = vpop.f32.mrf.mxu1 }
 0x180   : > { %v1862_v23 = vpop.f32.mrf.mxu0 }
 0x181   : > { %v1884_v24 = vpop.f32.mrf.mxu1 }
 0x182   : > { %v1863_v25 = vpop.f32.mrf.mxu0 }
 0x183   : > { %v1885_v26 = vpop.f32.mrf.mxu1  ;;  %v1864_v28 = vadd.f32 %v1863_v25, %v1862_v23 }
 0x184   : > { %v1865_v29 = vpop.f32.mrf.mxu0  ;;  %v1886_v32 = vadd.f32 %v1885_v26, %v1884_v24 }
 0x185   : > { %v1887_v30 = vpop.f32.mrf.mxu1  ;;  %v1512_v31 = vadd.f32 %v1864_v28, %v1472_v27 }
 0x186   : > { %v1866_v34 = vpop.f32.mrf.mxu0 }
 0x187   : > { %v1888_v35 = vpop.f32.mrf.mxu1  ;;  %v1552_v36 = vadd.f32 %v1886_v32, %v1512_v31  ;;  %1562 = sbr.rel (%p1796_p13) target bundleno = 412 (0x19c), region = 85 }
 0x189   : > { %v1557_v37 = vadd.f32 %v1552_v36, %v852_v33 }
 0x18b   : > { %1558 = vst [vmem:[#allocation2] sm:$0xff] %v1557_v37 }
 0x18c   : > { %v1797_v39 = vld [vmem:[%s834_s15] ss:$0 sm:$0xff] }
 0x18d   : > { %v1798_v40 = vld [vmem:[%s837_s7] ss:$0 sm:$0xff] }
 0x192   : > { %v1563_v38 = vld [vmem:[#allocation2] sm:$0xff] }
 0x193   : > { %v1571_v41 = vmul.f32 %v1797_v39, %v1563_v38 }
 0x195   : > { %v1579_v42 = vadd.f32 %v1798_v40, %v1571_v41 }
 0x197   : > { %v1580_v43 = vmax.f32 %v1579_v42, 0.0 }
 0x199   : > { %v1581_v44 = vpack.c.bf16 %v1580_v43, %v1580_v43 }
 0x19b   : > { %1582 = vst [vmem:[%s2446_s11] sm:$0xf] %v1581_v44 }
 0x19c PF: > { %s14_s21 = sadd.s32 1, %s2073_s21   ;;  %s2557_s15 = smov %s2053_s16 }
 0x19d   : > { %p11_p0 = scmp.ge.s32.totalorder %s14_s21, 6   ;;  %s2558_s16 = smov %s2152_s28 }
 0x19e   : > { %s2559_s17 = smov %s2065_s19  ;;  %s2560_s18 = smov %s2069_s20 }
 0x19f   : > { %s2561_s19 = smov %s2564_s22  ;;  %s2562_s20 = smov %s2568_s23 }
 0x1a0   :  { %13 = sbr.rel (!%p11_p0) target bundleno = 4 (0x4), region = 129 }

// kernel: deeplabv3plus_forward.25
= control target key start
LH: loop header
LB: loop body
LE: loop exit
PB: predicated region body
PF: predicated region fallthrough
CT: control target
= control target key end

     0   :  { %s1560_s0 = inlined_call_operand.vmem [shape: bf16[32,1280], index: 0, kind: input, shape index: {}]   ;;  %s1561_s1 = inlined_call_operand.vmem [shape: bf16[1280,256], index: 1, kind: input, shape index: {}]   ;;  %s1562_s2 = inlined_call_operand.vmem [shape: f32[1,256], index: 2, kind: input, shape index: {}]   ;;  %s1563_s3 = inlined_call_operand.vmem [shape: f32[1,256], index: 3, kind: input, shape index: {}]   ;;  %s1564_s4 = inlined_call_operand.vmem [shape: bf16[32,256], index: 4, kind: output, shape index: {}]  }
   0x1   :  { %1568 = sst [smem:[#allocation9_spill]] %s1560_s0 }
   0x2   :  { %1569 = sst [smem:[#allocation10_spill]] %s1561_s1 }
   0x3   :  { %s1278_s15 = smov 0   ;;  %s1280_s16 = smov 0  }
   0x4   :  { %s1282_s17 = smov 0   ;;  %s1284_s18 = smov 0  }
   0x5   :  { %s1286_s19 = smov 0   ;;  %s1288_s20 = smov 0  }
   0x6   :  { %s1290_s21 = smov 0   ;;  %s1292_s22 = smov 0  }
   0x7   :  { %s1294_s23 = smov 0   ;;  %s1296_s24 = smov 0  }
   0x8   :  { %s1298_s25 = smov 0  }
   0x9 LB: > { %1570 = sst [smem:[#allocation6_spill]] %s1246_s24  ;;  %s945_s26 = sadd.s32 4294967295, %s1250_s25   ;;  %s1250_s25 = sphi %s1298_s25, %s14_s25   ;;  %s1246_s24 = sphi %s1296_s24, %s1580_s24   ;;  %s1242_s23 = sphi %s1294_s23, %s1588_s23   ;;  %s1238_s22 = sphi %s1292_s22, %s1578_s22   ;;  %s1234_s21 = sphi %s1290_s21, %s1587_s21   ;;  %s1230_s20 = sphi %s1288_s20, %s1586_s20   ;;  %s1226_s19 = sphi %s1286_s19, %s1585_s19   ;;  %s1222_s18 = sphi %s1284_s18, %s1584_s18   ;;  %s1218_s17 = sphi %s1282_s17, %s1583_s17   ;;  %s1214_s16 = sphi %s1280_s16, %s1582_s16   ;;  %s1210_s15 = sphi %s1278_s15, %s1581_s15  }
   0xa   : > { %s26_s27 = sadd.s32 1, %s1242_s23  ;;  %s29_s28 = sadd.s32 1, %s1246_s24 }
   0xb   : > { %p27_p0 = scmp.ge.s32.totalorder %s26_s27, 5  ;;  %s42_s29 = sadd.s32 1, %s1230_s20 }
   0xc   : > { %p49_p1 = scmp.ne.s32.totalorder %s1230_s20, %s1226_s19  ;;  %p50_p2 = scmp.eq.s32.totalorder %s1250_s25, 0 }
   0xd   : > { %s1590_s27 = smov (%p27_p0, %s26_s27), 0  ;;  %s1592_s28 = smov (!%p27_p0, %s29_s28), %s1246_s24 }
   0xe   : > { %1571 = sst [smem:[#allocation7_spill]] %s1590_s27  ;;  %s38_s30 = ssub.s32 %s1242_s23, %s1590_s27 }
   0xf   : > { %p31_p3 = scmp.ge.s32.totalorder %s1592_s28, 2  ;;  %p40_p4 = scmp.eq.s32.totalorder %s38_s30, 0 }
  0x10   : > { %p1345_p5 = por %p50_p2, %p49_p1  ;;  %s70_s6 = sadd.s32 1, %s1222_s18 }
  0x11   : > { %s1594_s28 = smov (%p31_p3, %s1592_s28), 0  ;;  %p77_p6 = scmp.ne.s32.totalorder %s1222_s18, %s1218_s17 }
  0x12   : > { %1573 = sst [smem:[#allocation8_spill]] %s1594_s28  ;;  %s66_s8 = ssub.s32 %s1246_s24, %s1594_s28 }
  0x13   : > { %s1353_s7 = scalar_select %p40_p4, %s1230_s20, %s42_s29  }
  0x14   : > { %s67_s9 = sor.u32 %s66_s8, %s38_s30  ;;  %p148_p7 = scmp.eq.s32.totalorder %s66_s8, 0 }
  0x15   : > { %p68_p8 = scmp.eq.s32.totalorder %s67_s9, 0  ;;  %p1359_p9 = por %p77_p6, %p50_p2 }
  0x16   : > { %s150_s11 = sadd.s32 1, %s1214_s16  ;;  %p160_p10 = scmp.ne.s32.totalorder %s1214_s16, %s1210_s15 }
  0x17   : > { %s1367_s12 = scalar_select %p68_p8, %s1222_s18, %s70_s6  }
  0x18   : > { %s1370_s13 = scalar_select %p148_p7, %s1214_s16, %s150_s11  }
  0x19   : > { %p161_p11 = scmp.eq.s32.totalorder %s945_s26, 9  ;;  %p948_p13 = scmp.ge.s32.totalorder %s1250_s25, 10 }
  0x1b   : > { %p1372_p12 = por %p161_p11, %p160_p10  ;;  %183 = sbr.rel (%p948_p13) target bundleno = 75 (0x4b), region = 16 }
  0x20   : > { %186 = sbr.rel (!%p1345_p5) target bundleno = 44 (0x2c), region = 20  ;;  %s188_s29 = sand.u32 (%p1345_p5), 1, %s1230_s20  }
  0x21   : > { %s992_s30 = sshll.u32 (%p1345_p5), %s1242_s23, 3  ;;  %s949_s8 = sshll.u32 (%p1345_p5), %s188_s29, 5 }
  0x22   : > { %s1576_s0 = sld [smem:[#allocation9_spill]] (%p1345_p5)  ;;  %s190_s26 = scalar_lea.vmem (%p1345_p5), [#allocation3], %s949_s8 }
  0x28   : > { %s196_s11 = scalar_lea.vmem %s1576_s0, %s992_s30 }
  0x29   : > { %v231_v0 = vld [vmem:[%s196_s11] sm:$0xff]  ;;  %v233_v1 = vld [vmem:[%s196_s11 + $0x28] sm:$0xff]  ;;  %v235_v2 = vld [vmem:[%s196_s11 + $0x50] sm:$0xff] }
  0x2a   : > { %232 = vst [vmem:[%s190_s26] sm:$0xff] %v231_v0  ;;  %234 = vst [vmem:[%s190_s26 + $0x8] sm:$0xff] %v233_v1  ;;  %v237_v3 = vld [vmem:[%s196_s11 + $0x78] sm:$0xff] }
  0x2b   : > { %236 = vst [vmem:[%s190_s26 + $0x10] sm:$0xff] %v235_v2  ;;  %238 = vst [vmem:[%s190_s26 + $0x18] sm:$0xff] %v237_v3 }
  0x2c PF: > { %244 = sbr.rel (!%p1359_p9) target bundleno = 75 (0x4b), region = 58  ;;  %s246_s5 = sand.u32 (%p1359_p9), 1, %s1222_s18  }
  0x2d   : > { %s993_s29 = sshll.u32 (%p1359_p9), %s1242_s23, 6  ;;  %s952_s6 = sshll.u32 (%p1359_p9), %s246_s5, 7 }
  0x2e   : > { %s251_s30 = sadd.s32 (%p1359_p9), %s1246_s24, %s993_s29  ;;  %s1577_s1 = sld [smem:[#allocation10_spill]] (%p1359_p9) }
  0x2f   : > { %s955_s9 = sshll.u32 (%p1359_p9), %s251_s30, 2  ;;  %s1397_s10 = scalar_lea.vmem (%p1359_p9), [#allocation4], %s952_s6 }
  0x34   : > { %s1392_s8 = scalar_lea.vmem %s1577_s1, %s955_s9 }
  0x35   : > { %v270_v4 = vld [vmem:[%s1392_s8] sm:$0xf]  ;;  %v272_v5 = vld [vmem:[%s1392_s8 + $0x8] sm:$0xf]  ;;  %v274_v6 = vld [vmem:[%s1392_s8 + $0x10] sm:$0xf] }
  0x36   : > { %271 = vst [vmem:[%s1397_s10] sm:$0xf] %v270_v4  ;;  %273 = vst [vmem:[%s1397_s10 + $0x4] sm:$0xf] %v272_v5  ;;  %v276_v7 = vld [vmem:[%s1392_s8 + $0x18] sm:$0xf] }
  0x37   : > { %275 = vst [vmem:[%s1397_s10 + $0x8] sm:$0xf] %v274_v6  ;;  %v278_v8 = vld [vmem:[%s1392_s8 + $0x20] sm:$0xf]  ;;  %v280_v9 = vld [vmem:[%s1392_s8 + $0x28] sm:$0xf] }
  0x38   : > { %277 = vst [vmem:[%s1397_s10 + $0xc] sm:$0xf] %v276_v7  ;;  %279 = vst [vmem:[%s1397_s10 + $0x10] sm:$0xf] %v278_v8  ;;  %v282_v10 = vld [vmem:[%s1392_s8 + $0x30] sm:$0xf] }
  0x39   : > { %281 = vst [vmem:[%s1397_s10 + $0x14] sm:$0xf] %v280_v9  ;;  %v284_v11 = vld [vmem:[%s1392_s8 + $0x38] sm:$0xf]  ;;  %v286_v12 = vld [vmem:[%s1392_s8 + $0x40] sm:$0xf] }
  0x3a   : > { %283 = vst [vmem:[%s1397_s10 + $0x18] sm:$0xf] %v282_v10  ;;  %285 = vst [vmem:[%s1397_s10 + $0x1c] sm:$0xf] %v284_v11  ;;  %v288_v13 = vld [vmem:[%s1392_s8 + $0x48] sm:$0xf] }
  0x3b   : > { %287 = vst [vmem:[%s1397_s10 + $0x20] sm:$0xf] %v286_v12  ;;  %v290_v14 = vld [vmem:[%s1392_s8 + $0x50] sm:$0xf]  ;;  %v292_v15 = vld [vmem:[%s1392_s8 + $0x58] sm:$0xf] }
  0x3c   : > { %289 = vst [vmem:[%s1397_s10 + $0x24] sm:$0xf] %v288_v13  ;;  %291 = vst [vmem:[%s1397_s10 + $0x28] sm:$0xf] %v290_v14  ;;  %v294_v16 = vld [vmem:[%s1392_s8 + $0x60] sm:$0xf] }
  0x3d   : > { %293 = vst [vmem:[%s1397_s10 + $0x2c] sm:$0xf] %v292_v15  ;;  %v296_v17 = vld [vmem:[%s1392_s8 + $0x68] sm:$0xf]  ;;  %v298_v18 = vld [vmem:[%s1392_s8 + $0x70] sm:$0xf] }
  0x3e   : > { %295 = vst [vmem:[%s1397_s10 + $0x30] sm:$0xf] %v294_v16  ;;  %297 = vst [vmem:[%s1397_s10 + $0x34] sm:$0xf] %v296_v17  ;;  %v300_v19 = vld [vmem:[%s1392_s8 + $0x78] sm:$0xf] }
  0x3f   : > { %299 = vst [vmem:[%s1397_s10 + $0x38] sm:$0xf] %v298_v18  ;;  %v302_v20 = vld [vmem:[%s1392_s8 + $0x80] sm:$0xf]  ;;  %v304_v21 = vld [vmem:[%s1392_s8 + $0x88] sm:$0xf] }
  0x40   : > { %301 = vst [vmem:[%s1397_s10 + $0x3c] sm:$0xf] %v300_v19  ;;  %303 = vst [vmem:[%s1397_s10 + $0x40] sm:$0xf] %v302_v20  ;;  %v306_v22 = vld [vmem:[%s1392_s8 + $0x90] sm:$0xf] }
  0x41   : > { %305 = vst [vmem:[%s1397_s10 + $0x44] sm:$0xf] %v304_v21  ;;  %v308_v23 = vld [vmem:[%s1392_s8 + $0x98] sm:$0xf]  ;;  %v310_v24 = vld [vmem:[%s1392_s8 + $0xa0] sm:$0xf] }
  0x42   : > { %307 = vst [vmem:[%s1397_s10 + $0x48] sm:$0xf] %v306_v22  ;;  %309 = vst [vmem:[%s1397_s10 + $0x4c] sm:$0xf] %v308_v23  ;;  %v312_v25 = vld [vmem:[%s1392_s8 + $0xa8] sm:$0xf] }
  0x43   : > { %311 = vst [vmem:[%s1397_s10 + $0x50] sm:$0xf] %v310_v24  ;;  %v314_v26 = vld [vmem:[%s1392_s8 + $0xb0] sm:$0xf]  ;;  %v316_v27 = vld [vmem:[%s1392_s8 + $0xb8] sm:$0xf] }
  0x44   : > { %313 = vst [vmem:[%s1397_s10 + $0x54] sm:$0xf] %v312_v25  ;;  %315 = vst [vmem:[%s1397_s10 + $0x58] sm:$0xf] %v314_v26  ;;  %v318_v28 = vld [vmem:[%s1392_s8 + $0xc0] sm:$0xf] }
  0x45   : > { %317 = vst [vmem:[%s1397_s10 + $0x5c] sm:$0xf] %v316_v27  ;;  %v320_v29 = vld [vmem:[%s1392_s8 + $0xc8] sm:$0xf]  ;;  %v322_v30 = vld [vmem:[%s1392_s8 + $0xd0] sm:$0xf] }
  0x46   : > { %319 = vst [vmem:[%s1397_s10 + $0x60] sm:$0xf] %v318_v28  ;;  %321 = vst [vmem:[%s1397_s10 + $0x64] sm:$0xf] %v320_v29  ;;  %v324_v31 = vld [vmem:[%s1392_s8 + $0xd8] sm:$0xf] }
  0x47   : > { %323 = vst [vmem:[%s1397_s10 + $0x68] sm:$0xf] %v322_v30  ;;  %v326_v32 = vld [vmem:[%s1392_s8 + $0xe0] sm:$0xf]  ;;  %v328_v33 = vld [vmem:[%s1392_s8 + $0xe8] sm:$0xf] }
  0x48   : > { %325 = vst [vmem:[%s1397_s10 + $0x6c] sm:$0xf] %v324_v31  ;;  %327 = vst [vmem:[%s1397_s10 + $0x70] sm:$0xf] %v326_v32  ;;  %v330_v34 = vld [vmem:[%s1392_s8 + $0xf0] sm:$0xf] }
  0x49   : > { %329 = vst [vmem:[%s1397_s10 + $0x74] sm:$0xf] %v328_v33  ;;  %v332_v35 = vld [vmem:[%s1392_s8 + $0xf8] sm:$0xf]  ;;  %331 = vst [vmem:[%s1397_s10 + $0x78] sm:$0xf] %v330_v34 }
  0x4a   : > { %333 = vst [vmem:[%s1397_s10 + $0x7c] sm:$0xf] %v332_v35 }
  0x4b PF: > { %p956_p0 = scmp.ge.s32.totalorder %s1250_s25, 1  ;;  %p432_p1 = scmp.lt.s32.totalorder %s1250_s25, 11 }
  0x4d   : > { %p433_p2 = pnand %p956_p0, %p432_p1 }
  0x4e   : > { %s439_s0 = sand.u32 (!%p433_p2), 1, %s1226_s19   ;;  %s446_s28 = sand.u32 (!%p433_p2), 1, %s1218_s17  }
  0x4f   : > { %436 = sbr.rel (%p433_p2) target bundleno = 355 (0x163), region = 107  ;;  %s957_s11 = sshll.u32 (!%p433_p2), %s439_s0, 5 }
  0x50   : > { %s958_s26 = sshll.u32 (!%p433_p2), %s446_s28, 7  ;;  %s477_s5 = sand.u32 (!%p433_p2), 1, %s1210_s15  }
  0x51   : > { %p483_p3 = scmp.lt.s32.totalorder (!%p433_p2), %s1238_s22, 1  ;;  %s959_s29 = sshll.u32 (!%p433_p2), %s477_s5, 4 }
  0x52   : > { %s1477_s24 = scalar_lea.vmem (!%p433_p2), [#allocation3], %s957_s11  ;;  %s1479_s17 = scalar_lea.vmem (!%p433_p2), [#allocation4], %s958_s26 }
  0x53   : > { %s1481_s19 = scalar_lea.vmem (!%p433_p2), [#allocation5], %s959_s29  ;;  %p960_p4 = scmp.ne.s32.totalorder (!%p433_p2), %s1234_s21, 0 }
  0x54   : > { %s1467_s6 = scalar_select %p483_p3, %s1238_s22, 1 }
  0x55   : > { %494 = sbr.rel (%p960_p4) target bundleno = 93 (0x5d), region = 119 }
  0x56   : > { %s485_s8 = scalar_lea.vmem %s1562_s2, %s1467_s6  ;;  %s488_s27 = scalar_lea.vmem %s1563_s3, %s1467_s6 }
  0x5a   : > { %v1252_v36 = vmov 0.0  }
  0x5b   : > { %495 = vst [vmem:[#allocation2 + $0x10] sm:$0xff] %v1252_v36  ;;  %496 = vst [vmem:[#allocation2] sm:$0xff] %v1252_v36 }
  0x5c   : > { %497 = vst [vmem:[#allocation2 + $0x18] sm:$0xff] %v1252_v36  ;;  %498 = vst [vmem:[#allocation2 + $0x8] sm:$0xff] %v1252_v36 }
  0x5d PF: > { %v1142_v37 = vld [vmem:[%s1479_s17 + $0x78] sm:$0xff]   ;;  %v1144_v39 = vld [vmem:[%s1479_s17 + $0x70] sm:$0xff]   ;;  %v1146_v41 = vld [vmem:[%s1479_s17 + $0x68] sm:$0xff]   ;;  %p981_p5 = scmp.ne.s32.totalorder %s1234_s21, 4 }
  0x5e   : > { %v1143_v38 = vld [vmem:[%s1479_s17 + $0x38] sm:$0xff]   ;;  %1009 = vmatprep.subr.bf16.mxu0 %v1142_v37  ;;  %1037 = vmatprep.subr.bf16.mxu1 %v1142_v37  ;;  %v1145_v40 = vld [vmem:[%s1479_s17 + $0x30] sm:$0xff]   ;;  %v1147_v42 = vld [vmem:[%s1479_s17 + $0x28] sm:$0xff]  }
  0x5f   : > { %1010 = vmatpush3.bf16.msra.mxu0 %v1143_v38  ;;  %1045 = vmatpush3.bf16.msra.mxu1 %v1143_v38  ;;  %v1148_v43 = vld [vmem:[%s1479_s17 + $0x60] sm:$0xff]   ;;  %v1150_v45 = vld [vmem:[%s1479_s17 + $0x58] sm:$0xff]   ;;  %v1152_v47 = vld [vmem:[%s1479_s17 + $0x50] sm:$0xff]  }
  0x60   : > { %1011 = vmatprep.subr.bf16.mxu0 %v1144_v39  ;;  %1038 = vmatprep.subr.bf16.mxu1 %v1144_v39  ;;  %v1149_v44 = vld [vmem:[%s1479_s17 + $0x20] sm:$0xff]   ;;  %v1151_v46 = vld [vmem:[%s1479_s17 + $0x18] sm:$0xff]   ;;  %v1153_v50 = vld [vmem:[%s1479_s17 + $0x10] sm:$0xff]  }
  0x61   : > { %v1160_v48 = vld [vmem:[%s1477_s24 + $0x4] ss:$8 sps:$4 sm:$0xff]   ;;  %v1163_v49 = vld [vmem:[%s1477_s24 + $0x14] ss:$8 sps:$4 sm:$0xff]   ;;  %v1158_v55 = vld [vmem:[%s1477_s24] ss:$8 sps:$4 sm:$0xff]  }
  0x62   : > { %v1154_v51 = vld [vmem:[%s1479_s17 + $0x48] sm:$0xff]   ;;  %687 = vmatprep.mubr.bf16.mxu0 %v1160_v48  ;;  %695 = vmatprep.mubr.bf16.mxu1 %v1163_v49  ;;  %v1156_v53 = vld [vmem:[%s1479_s17 + $0x40] sm:$0xff]   ;;  %v1161_v56 = vld [vmem:[%s1477_s24 + $0x10] ss:$8 sps:$4 sm:$0xff]  }
  0x63   : > { %1012 = vmatpush3.bf16.msra.mxu0 %v1145_v40  ;;  %1046 = vmatpush3.bf16.msra.mxu1 %v1145_v40  ;;  %v1155_v52 = vld [vmem:[%s1479_s17 + $0x8] sm:$0xff]   ;;  %v1157_v54 = vld [vmem:[%s1479_s17] sm:$0xff]   ;;  %v499_v59 = vld [vmem:[#allocation2 + $0x10] sm:$0xff] }
  0x64   : > { %1013 = vmatprep.subr.bf16.mxu0 %v1146_v41  ;;  %1039 = vmatprep.subr.bf16.mxu1 %v1146_v41  ;;  %v501_v61 = vld [vmem:[#allocation2 + $0x18] sm:$0xff]  ;;  %v500_v5 = vld [vmem:[#allocation2] sm:$0xff]  ;;  %v502_v7 = vld [vmem:[#allocation2 + $0x8] sm:$0xff] }
  0x67   : > { %1014 = vmatpush3.bf16.msra.mxu0 %v1147_v42  ;;  %1047 = vmatpush3.bf16.msra.mxu1 %v1147_v42 }
  0x68   : > { %1015 = vmatprep.subr.bf16.mxu0 %v1148_v43  ;;  %1040 = vmatprep.subr.bf16.mxu1 %v1148_v43 }
  0x6b   : > { %1016 = vmatpush3.bf16.msra.mxu0 %v1149_v44  ;;  %1048 = vmatpush3.bf16.msra.mxu1 %v1149_v44 }
  0x6c   : > { %1017 = vmatprep.subr.bf16.mxu0 %v1150_v45  ;;  %1041 = vmatprep.subr.bf16.mxu1 %v1150_v45 }
  0x6f   : > { %1018 = vmatpush3.bf16.msra.mxu0 %v1151_v46  ;;  %1049 = vmatpush3.bf16.msra.mxu1 %v1151_v46 }
  0x70   : > { %1019 = vmatprep.subr.bf16.mxu0 %v1152_v47  ;;  %1042 = vmatprep.subr.bf16.mxu1 %v1152_v47 }
  0x73   : > { %1020 = vmatpush3.bf16.msra.mxu0 %v1153_v50  ;;  %1050 = vmatpush3.bf16.msra.mxu1 %v1153_v50 }
  0x74   : > { %1021 = vmatprep.subr.bf16.mxu0 %v1154_v51  ;;  %1043 = vmatprep.subr.bf16.mxu1 %v1154_v51 }
  0x77   : > { %1022 = vmatpush3.bf16.msra.mxu0 %v1155_v52  ;;  %1051 = vmatpush3.bf16.msra.mxu1 %v1155_v52 }
  0x78   : > { %1023 = vmatprep.subr.bf16.mxu0 %v1156_v53  ;;  %1044 = vmatprep.subr.bf16.mxu1 %v1156_v53 }
  0x7b   : > { %1024 = vmatpush3.bf16.msra.mxu0 %v1157_v54  ;;  %1052 = vmatpush3.bf16.msra.mxu1 %v1157_v54 }
  0x7e   : > { %688 = vmatmul.mubr.bf16.vlgmr.msra.gmra.mxu0 %v1158_v55  ;;  %696 = vmatmul.mubr.bf16.vlgmr.msra.gmra.mxu1 %v1161_v56 }
 0x13e   : > { %v1025_v57 = vpop.f32.mrf.mxu0  ;;  %v1031_v58 = vpop.f32.mrf.mxu1 }
 0x140   : > { %v1026_v60 = vpop.f32.mrf.mxu0  ;;  %v1032_v62 = vpop.f32.mrf.mxu1 }
 0x141   : > { %v1027_v63 = vadd.f32 %v1026_v60, %v1025_v57  ;;  %v1033_v0 = vadd.f32 %v1032_v62, %v1031_v58 }
 0x142   : > { %v1028_v1 = vpop.f32.mrf.mxu0  ;;  %v1034_v2 = vpop.f32.mrf.mxu1 }
 0x143   : > { %v704_v3 = vadd.f32 %v1027_v63, %v499_v59  ;;  %v706_v4 = vadd.f32 %v1033_v0, %v501_v61 }
 0x144   : > { %v1029_v6 = vpop.f32.mrf.mxu0  ;;  %v1035_v8 = vpop.f32.mrf.mxu1 }
 0x145   : > { %708 = vst [vmem:[#allocation2 + $0x10] sm:$0xff] %v704_v3  ;;  %710 = vst [vmem:[#allocation2 + $0x18] sm:$0xff] %v706_v4  ;;  %v1030_v9 = vadd.f32 %v1029_v6, %v1028_v1  ;;  %v1036_v10 = vadd.f32 %v1035_v8, %v1034_v2  ;;  %715 = sbr.rel (%p981_p5) target bundleno = 346 (0x15a), region = 123 }
 0x147   : > { %v705_v11 = vadd.f32 %v1030_v9, %v500_v5  ;;  %v707_v12 = vadd.f32 %v1036_v10, %v502_v7 }
 0x149   : > { %709 = vst [vmem:[#allocation2] sm:$0xff] %v705_v11  ;;  %711 = vst [vmem:[#allocation2 + $0x8] sm:$0xff] %v707_v12 }
 0x14a   : > { %v982_v15 = vld [vmem:[%s485_s8] ss:$0 sm:$0xff] }
 0x14b   : > { %v983_v18 = vld [vmem:[%s488_s27] ss:$0 sm:$0xff] }
 0x14c   : > { %v716_v13 = vld [vmem:[#allocation2 + $0x10] sm:$0xff]  ;;  %v718_v19 = vld [vmem:[#allocation2 + $0x18] sm:$0xff] }
 0x14d   : > { %v727_v16 = vmul.f32 %v982_v15, %v716_v13  ;;  %v729_v21 = vmul.f32 %v982_v15, %v718_v19 }
 0x14f   : > { %v738_v23 = vadd.f32 %v983_v18, %v727_v16  ;;  %v740_v25 = vadd.f32 %v983_v18, %v729_v21 }
 0x150   : > { %v717_v14 = vld [vmem:[#allocation2] sm:$0xff]  ;;  %v719_v20 = vld [vmem:[#allocation2 + $0x8] sm:$0xff] }
 0x151   : > { %v728_v17 = vmul.f32 %v982_v15, %v717_v14  ;;  %v730_v22 = vmul.f32 %v982_v15, %v719_v20  ;;  %v742_v27 = vmax.f32 %v738_v23, 0.0  ;;  %v744_v29 = vmax.f32 %v740_v25, 0.0 }
 0x153   : > { %v739_v24 = vadd.f32 %v983_v18, %v728_v17  ;;  %v741_v26 = vadd.f32 %v983_v18, %v730_v22 }
 0x155   : > { %v743_v28 = vmax.f32 %v739_v24, 0.0  ;;  %v745_v30 = vmax.f32 %v741_v26, 0.0 }
 0x157   : > { %v1001_v31 = vpack.c.bf16 %v743_v28, %v742_v27  ;;  %v1006_v32 = vpack.c.bf16 %v745_v30, %v744_v29 }
 0x159   : > { %1002 = vst [vmem:[%s1481_s19] sm:$0xff] %v1001_v31   ;;  %1008 = vst [vmem:[%s1481_s19 + $0x8] sm:$0xff] %v1006_v32  }
 0x15a PF: > { %772 = sbr.rel (!%p1372_p12) target bundleno = 355 (0x163), region = 127  ;;  %s989_s21 = sshll.u32 (%p1372_p12), %s1238_s22, 2 }
 0x15b   : > { %s777_s11 = scalar_lea.vmem (%p1372_p12), %s1564_s4, %s989_s21 }
 0x160   : > { %v794_v33 = vld [vmem:[%s1481_s19] sm:$0xf]  ;;  %v796_v34 = vld [vmem:[%s1481_s19 + $0x4] sm:$0xf]  ;;  %v798_v35 = vld [vmem:[%s1481_s19 + $0x8] sm:$0xf] }
 0x161   : > { %v800_v36 = vld [vmem:[%s1481_s19 + $0xc] sm:$0xf]  ;;  %795 = vst [vmem:[%s777_s11] sm:$0xf] %v794_v33  ;;  %797 = vst [vmem:[%s777_s11 + $0x8] sm:$0xf] %v796_v34 }
 0x162   : > { %799 = vst [vmem:[%s777_s11 + $0x10] sm:$0xf] %v798_v35  ;;  %801 = vst [vmem:[%s777_s11 + $0x18] sm:$0xf] %v800_v36 }
 0x163 PF: > { %s14_s25 = sadd.s32 1, %s1250_s25   ;;  %s1578_s22 = sld [smem:[#allocation6_spill]] }
 0x164   : > { %p11_p6 = scmp.ge.s32.totalorder %s14_s25, 12   ;;  %s1579_s14 = sld [smem:[#allocation7_spill]] }
 0x165   : > { %s1580_s24 = sld [smem:[#allocation8_spill]]  ;;  %s1581_s15 = smov %s1214_s16 }
 0x166   : > { %s1582_s16 = smov %s1370_s13  ;;  %s1583_s17 = smov %s1222_s18 }
 0x167   : > { %s1584_s18 = smov %s1367_s12  ;;  %s1585_s19 = smov %s1230_s20 }
 0x168   : > { %s1586_s20 = smov %s1353_s7  ;;  %s1587_s21 = smov %s1242_s23 }
 0x169   :  { %13 = sbr.rel (!%p11_p6) target bundleno = 9 (0x9), region = 213 }
 0x16a   : > { %s1588_s23 = smov %s1579_s14 }

// kernel: deeplabv3plus_forward.26
= control target key start
LH: loop header
LB: loop body
LE: loop exit
PB: predicated region body
PF: predicated region fallthrough
CT: control target
= control target key end

     0   :  { %s750_s0 = inlined_call_operand.vmem [shape: s32[8], index: 0, kind: input, shape index: {}]   ;;  %s751_s3 = inlined_call_operand.vmem [shape: bf16[2,4,4,256], index: 3, kind: input, shape index: {}, may-alias: {3,4}]   ;;  %s752_s4 = inlined_call_operand.vmem [shape: bf16[2,4,4,256], index: 4, kind: input, shape index: {}, may-alias: {3,4}]   ;;  %s753_s5 = inlined_call_operand.vmem [shape: f32[8,4], index: 5, kind: input, shape index: {}]   ;;  %s754_s6 = inlined_call_operand.vmem [shape: bf16[2,8,8,256], index: 6, kind: output, shape index: {}]   ;;  %s755_s1 = inlined_call_operand.vmem [shape: s32[8], index: 1, kind: input, shape index: {}]   ;;  %s756_s2 = inlined_call_operand.vmem [shape: s32[8], index: 2, kind: input, shape index: {}]  }
   0x1   :  { %s11_s23 = sshll.u32 %s750_s0, 4  ;;  %s15_s26 = sshll.u32 %s755_s1, 4  ;;  %s12_s23 = int_to_ptr.vmem [resolvable:$true] %s11_s23  ;;  %s16_s26 = int_to_ptr.vmem [resolvable:$true] %s15_s26 }
   0x2   :  { %s556_s27 = scalar_lea.vmem %s12_s23, 16  ;;  %p561_p1 = scmp.lt.s32.totalorder %s12_s23, %s12_s23 }
   0x3   :  { %p557_p0 = scmp.ne.s32.totalorder %s12_s23, %s556_s27  ;;  %p562_p2 = scmp.lt.s32.totalorder %s556_s27, %s556_s27 }
   0x5   :  { %p563_p3 = por %p562_p2, %p561_p1 }
   0x7   :  { %p564_p4 = pnand %p563_p3, %p557_p0 }
   0x9   :  { %567 = shalt.err (!%p564_p4)  }
   0xa   :  { %s634_s28 = smov [#allocation3]   ;;  %s568_s29 = scalar_lea.vmem %s16_s26, 16 }
   0xb   :  { %14 = dma.vmem_to_smem %s12_s23, 16, %s634_s28, [#allocation2] }
   0xc   :  { %p569_p5 = scmp.ne.s32.totalorder %s16_s26, %s568_s29  ;;  %p573_p6 = scmp.lt.s32.totalorder %s16_s26, %s16_s26 }
   0xd   :  { %p574_p7 = scmp.lt.s32.totalorder %s568_s29, %s568_s29 }
   0xf   :  { %p575_p8 = por %p574_p7, %p573_p6 }
  0x11   :  { %p576_p9 = pnand %p575_p8, %p569_p5 }
  0x13   :  { %579 = shalt.err (!%p576_p9)  }
  0x14   :  { %s635_s0 = smov [#allocation4]   ;;  %s19_s7 = sshll.u32 %s756_s2, 4  ;;  %s20_s7 = int_to_ptr.vmem [resolvable:$true] %s19_s7 }
  0x15   :  { %18 = dma.vmem_to_smem %s16_s26, 16, %s635_s0, [#allocation2] }
  0x16   :  { %s580_s8 = scalar_lea.vmem %s20_s7, 16  ;;  %p585_p11 = scmp.lt.s32.totalorder %s20_s7, %s20_s7 }
  0x17   :  { %p581_p10 = scmp.ne.s32.totalorder %s20_s7, %s580_s8  ;;  %p586_p12 = scmp.lt.s32.totalorder %s580_s8, %s580_s8 }
  0x19   :  { %p587_p13 = por %p586_p12, %p585_p11 }
  0x1b   :  { %p588_p0 = pnand %p587_p13, %p581_p10 }
  0x1d   :  { %591 = shalt.err (!%p588_p0)  }
  0x1e   :  { %s636_s9 = smov [#allocation5]  }
  0x1f   :  { %22 = dma.vmem_to_smem %s20_s7, 16, %s636_s9, [#allocation2] }
  0x20   :  { %612 = dma.done.wait [#allocation2], 48 }
  0x21   :  { %613 = vsyncadd [#allocation2], 4294967248 }
  0x22   :  { %24 = sfence }
  0x23   :  { %s682_s10 = smov 0   ;;  %s684_s11 = smov 0  }
  0x24   :  { %s686_s12 = smov 0   ;;  %s688_s2 = smov 0  }
  0x25   :  { %s690_s13 = smov 0  }
  0x26 LB: > { %s39_s14 = sadd.s32 1, %s624_s12  ;;  %s42_s15 = sadd.s32 1, %s628_s2  ;;  %s632_s13 = sphi %s690_s13, %s30_s13   ;;  %s628_s2 = sphi %s688_s2, %s760_s2   ;;  %s624_s12 = sphi %s686_s12, %s759_s12   ;;  %s620_s11 = sphi %s684_s11, %s758_s11   ;;  %s616_s10 = sphi %s682_s10, %s757_s10  }
  0x27   : > { %p40_p1 = scmp.ge.s32.totalorder %s39_s14, 8  ;;  %p495_p2 = scmp.ge.s32.totalorder %s632_s13, 1 }
  0x28   : > { %p198_p3 = scmp.lt.s32.totalorder %s632_s13, 17 }
  0x29   : > { %s762_s14 = smov (%p40_p1, %s39_s14), 0  ;;  %s764_s15 = smov (!%p40_p1, %s42_s15), %s628_s2 }
  0x2a   : > { %p199_p4 = pnand %p495_p2, %p198_p3  ;;  %p44_p5 = scmp.ge.s32.totalorder %s764_s15, 2 }
  0x2b   : > { %s241_s16 = sld [smem:[#allocation3 + %s616_s10]] (!%p199_p4)  ;;  %p242_p6 = scmp.lt.s32.totalorder (!%p199_p4), %s620_s11, 1 }
  0x2c   : > { %s766_s15 = smov (%p44_p5, %s764_s15), 0  ;;  %202 = sbr.rel (%p199_p4) target bundleno = 269 (0x10d), region = 32 }
  0x2d   : > { %s252_s17 = sld [smem:[#allocation4 + %s616_s10]] (!%p199_p4)  ;;  %p265_p9 = scmp.lt.s32.totalorder (!%p199_p4), %s616_s10, 7 }
  0x2e   : > { %s272_s18 = sld [smem:[#allocation5 + %s616_s10]] (!%p199_p4) }
  0x31   : > { %v637_v0 = vmov 0.0   ;;  %s768_s11 = smov (!%p242_p6, %s620_s11), 1  ;;  %p244_p7 = scmp.lt.s32.totalorder %s241_s16, 3  ;;  %vm290_vm0 = vcmask 1043456   ;;  %v283_v10 = vld [vmem:[%s753_s5] sm:$0xff]  ;;  %vm286_vm1 = vcmask 31744  }
  0x32   : > { %359 = vmatprep.mubr.f32.mxu0 %v637_v0  ;;  %s497_s19 = sshll.u32 %s768_s11, 3  ;;  %s774_s10 = smov (!%p265_p9, %s616_s10), 7 }
  0x33   : > { %p255_p8 = scmp.lt.s32.totalorder %s252_s17, 3  ;;  %s770_s16 = smov (!%p244_p7, %s241_s16), 3 }
  0x34   : > { %s496_s20 = sshll.u32 %s770_s16, 1  ;;  %s273_s21 = scvt.s32.f32 %s272_s18 }
  0x35   : > { %s772_s17 = smov (!%p255_p8, %s252_s17), 3  ;;  %s248_s22 = sadd.s32 %s497_s19, %s496_s20 }
  0x36   : > { %s499_s23 = sshll.u32 %s772_s17, 1  ;;  %s498_s24 = sshll.u32 %s248_s22, 1 }
  0x37   : > { %s259_s25 = sadd.s32 %s499_s23, %s497_s19  ;;  %s250_s28 = scalar_lea.vmem %s751_s3, %s498_s24 }
  0x38   : > { %s501_s29 = sshll.u32 %s259_s25, 1  ;;  %s274_s7 = smul.f32 1.5258789e-05, %s273_s21  ;;  %v275_v1 = vld [vmem:[%s250_s28] sm:$0xf] }
  0x39   : > { %s261_s30 = scalar_lea.vmem %s752_s4, %s501_s29  ;;  %v276_v2 = vunpack.c.l.bf16 %v275_v1  ;;  %s502_s16 = sshll.u32 %s774_s10, 1 }
  0x3a   : > { %v277_v3 = vld [vmem:[%s261_s30] sm:$0xf]  ;;  %v280_v5 = vstv %s274_s7  ;;  %s503_s17 = sshll.u32 %s768_s11, 4 }
  0x3b   : > { %v278_v4 = vunpack.c.l.bf16 %v277_v3  ;;  %s269_s18 = sadd.s32 %s503_s17, %s502_s16 }
  0x3c   : > { %s504_s19 = sshll.u32 %s269_s18, 2 }
  0x3d   : > { %v279_v6 = vsub.f32 %v278_v4, %v276_v2  ;;  %s271_s22 = scalar_lea.vmem %s754_s6, %s504_s19 }
  0x3f   : > { %v281_v7 = vmul.f32 %v280_v5, %v279_v6 }
  0x41   : > { %v282_v8 = vadd.f32 %v281_v7, %v276_v2 }
  0x43   : > { %v285_v9 = vcombine.high %v282_v8, %v282_v8 }
  0x45   : > { %505 = vmatprep.subr.msk.mxu0 %vm290_vm0, %v285_v9 }
  0x46   : > { %506 = vmatpush1.msk.msra.mxu0 %vm290_vm0, %v282_v8 }
  0x47   : > { %507 = vmatmul.mubr.msk.f32.vlgmr.msra.gmra.mxu0 %vm286_vm1, %v283_v10 }
 0x107   : > { %v361_v11 = vpop.f32.mrf.mxu0 }
 0x109   : > { %v363_v12 = vpop.f32.mrf.mxu0 }
 0x10a   : > { %v511_v13 = vpack.c.bf16 %v363_v12, %v361_v11 }
 0x10c   : > { %374 = vst [vmem:[%s271_s22] sm:$0xff] %v511_v13 }
 0x10d PF: > { %s30_s13 = sadd.s32 1, %s632_s13   ;;  %s757_s10 = smov %s624_s12 }
 0x10e   : > { %p27_p10 = scmp.ge.s32.totalorder %s30_s13, 18   ;;  %s758_s11 = smov %s628_s2 }
 0x10f   : > { %s759_s12 = smov %s762_s14  ;;  %s760_s2 = smov %s766_s15 }
 0x110   :  { %29 = sbr.rel (!%p27_p10) target bundleno = 38 (0x26), region = 65 }

// kernel: deeplabv3plus_forward.18
= control target key start
LH: loop header
LB: loop body
LE: loop exit
PB: predicated region body
PF: predicated region fallthrough
CT: control target
= control target key end

     0   :  { %s992_s1 = inlined_call_operand.vmem [shape: bf16[256,128], index: 1, kind: input, shape index: {}]   ;;  %s993_s0 = inlined_call_operand.vmem [shape: bf16[128,256], index: 0, kind: input, shape index: {}]   ;;  %s994_s2 = inlined_call_operand.vmem [shape: f32[1,128], index: 2, kind: input, shape index: {}]   ;;  %s995_s3 = inlined_call_operand.vmem [shape: f32[1,128], index: 3, kind: input, shape index: {}]   ;;  %s996_s4 = inlined_call_operand.vmem [shape: bf16[128,128], index: 4, kind: output, shape index: {}]  }
   0x1   :  { %v765_v0 = vld [vmem:[%s992_s1 + $0x78] sm:$0xff]   ;;  %v767_v2 = vld [vmem:[%s992_s1 + $0x70] sm:$0xff]   ;;  %v769_v4 = vld [vmem:[%s992_s1 + $0x68] sm:$0xff]  }
   0x2   :  { %v766_v1 = vld [vmem:[%s992_s1 + $0x38] sm:$0xff]   ;;  %685 = vmatprep.subr.bf16.mxu0 %v765_v0  ;;  %749 = vmatprep.subr.bf16.mxu1 %v765_v0  ;;  %v768_v3 = vld [vmem:[%s992_s1 + $0x30] sm:$0xff]   ;;  %v770_v5 = vld [vmem:[%s992_s1 + $0x28] sm:$0xff]  }
   0x3   :  { %686 = vmatpush3.bf16.msra.mxu0 %v766_v1  ;;  %757 = vmatpush3.bf16.msra.mxu1 %v766_v1  ;;  %v771_v6 = vld [vmem:[%s992_s1 + $0x60] sm:$0xff]   ;;  %v773_v8 = vld [vmem:[%s992_s1 + $0x58] sm:$0xff]   ;;  %v775_v10 = vld [vmem:[%s992_s1 + $0x50] sm:$0xff]  }
   0x4   :  { %687 = vmatprep.subr.bf16.mxu0 %v767_v2  ;;  %750 = vmatprep.subr.bf16.mxu1 %v767_v2  ;;  %v772_v7 = vld [vmem:[%s992_s1 + $0x20] sm:$0xff]   ;;  %v774_v9 = vld [vmem:[%s992_s1 + $0x18] sm:$0xff]   ;;  %v776_v13 = vld [vmem:[%s992_s1 + $0x10] sm:$0xff]  }
   0x5   :  { %v783_v11 = vld [vmem:[%s993_s0 + $0x4] ss:$8 sps:$4 sm:$0xff]   ;;  %v781_v18 = vld [vmem:[%s993_s0] ss:$8 sps:$4 sm:$0xff]   ;;  %v787_v20 = vld [vmem:[%s993_s0 + $0x14] ss:$8 sps:$4 sm:$0xff]  }
   0x6   :  { %v786_v12 = vld [vmem:[%s993_s0 + $0x44] ss:$8 sps:$4 sm:$0xff]   ;;  %310 = vmatprep.mubr.bf16.mxu0 %v783_v11  ;;  %v784_v19 = vld [vmem:[%s993_s0 + $0x40] ss:$8 sps:$4 sm:$0xff]   ;;  %v789_v21 = vld [vmem:[%s993_s0 + $0x54] ss:$8 sps:$4 sm:$0xff]  }
   0x7   :  { %688 = vmatpush3.bf16.msra.mxu0 %v768_v3  ;;  %758 = vmatpush3.bf16.msra.mxu1 %v768_v3  ;;  %v777_v14 = vld [vmem:[%s992_s1 + $0x48] sm:$0xff]   ;;  %v779_v16 = vld [vmem:[%s992_s1 + $0x40] sm:$0xff]   ;;  %v791_v22 = vld [vmem:[%s993_s0 + $0x10] ss:$8 sps:$4 sm:$0xff]  }
   0x8   :  { %689 = vmatprep.subr.bf16.mxu0 %v769_v4  ;;  %751 = vmatprep.subr.bf16.mxu1 %v769_v4  ;;  %v778_v15 = vld [vmem:[%s992_s1 + $0x8] sm:$0xff]   ;;  %v780_v17 = vld [vmem:[%s992_s1] sm:$0xff]   ;;  %v792_v23 = vld [vmem:[%s993_s0 + $0x50] ss:$8 sps:$4 sm:$0xff]  }
   0x9   :  { %342 = vmatprep.mubr.bf16.mxu1 %v786_v12  ;;  %v793_v24 = vld [vmem:[%s993_s0 + $0x24] ss:$8 sps:$4 sm:$0xff]   ;;  %v797_v26 = vld [vmem:[%s993_s0 + $0x20] ss:$8 sps:$4 sm:$0xff]   ;;  %v799_v28 = vld [vmem:[%s993_s0 + $0x34] ss:$8 sps:$4 sm:$0xff]  }
   0xa   :  { %v795_v25 = vld [vmem:[%s993_s0 + $0x64] ss:$8 sps:$4 sm:$0xff]   ;;  %v798_v27 = vld [vmem:[%s993_s0 + $0x60] ss:$8 sps:$4 sm:$0xff]   ;;  %v801_v29 = vld [vmem:[%s993_s0 + $0x74] ss:$8 sps:$4 sm:$0xff]  }
   0xb   :  { %690 = vmatpush3.bf16.msra.mxu0 %v770_v5  ;;  %759 = vmatpush3.bf16.msra.mxu1 %v770_v5  ;;  %v803_v30 = vld [vmem:[%s993_s0 + $0x30] ss:$8 sps:$4 sm:$0xff]   ;;  %v929_v35 = vld [vmem:[%s994_s2] ss:$0 sm:$0xff] }
   0xc   :  { %691 = vmatprep.subr.bf16.mxu0 %v771_v6  ;;  %752 = vmatprep.subr.bf16.mxu1 %v771_v6  ;;  %v804_v31 = vld [vmem:[%s993_s0 + $0x70] ss:$8 sps:$4 sm:$0xff]   ;;  %v936_v43 = vld [vmem:[%s995_s3] ss:$0 sm:$0xff] }
   0xf   :  { %692 = vmatpush3.bf16.msra.mxu0 %v772_v7  ;;  %760 = vmatpush3.bf16.msra.mxu1 %v772_v7 }
  0x10   :  { %693 = vmatprep.subr.bf16.mxu0 %v773_v8  ;;  %753 = vmatprep.subr.bf16.mxu1 %v773_v8 }
  0x13   :  { %694 = vmatpush3.bf16.msra.mxu0 %v774_v9  ;;  %761 = vmatpush3.bf16.msra.mxu1 %v774_v9 }
  0x14   :  { %695 = vmatprep.subr.bf16.mxu0 %v775_v10  ;;  %754 = vmatprep.subr.bf16.mxu1 %v775_v10 }
  0x17   :  { %696 = vmatpush3.bf16.msra.mxu0 %v776_v13  ;;  %762 = vmatpush3.bf16.msra.mxu1 %v776_v13 }
  0x18   :  { %697 = vmatprep.subr.bf16.mxu0 %v777_v14  ;;  %755 = vmatprep.subr.bf16.mxu1 %v777_v14 }
  0x1b   :  { %698 = vmatpush3.bf16.msra.mxu0 %v778_v15  ;;  %763 = vmatpush3.bf16.msra.mxu1 %v778_v15 }
  0x1c   :  { %699 = vmatprep.subr.bf16.mxu0 %v779_v16  ;;  %756 = vmatprep.subr.bf16.mxu1 %v779_v16 }
  0x1f   :  { %700 = vmatpush3.bf16.msra.mxu0 %v780_v17  ;;  %764 = vmatpush3.bf16.msra.mxu1 %v780_v17 }
  0x22   :  { %311 = vmatmul.mubr.bf16.vlgmr.msra.gmra.mxu0 %v781_v18  ;;  %343 = vmatmul.mubr.bf16.vlgmr.msra.gmra.mxu1 %v784_v19 }
  0x23   :  { %318 = vmatprep.mubr.bf16.mxu0 %v787_v20  ;;  %350 = vmatprep.mubr.bf16.mxu1 %v789_v21 }
  0x2a   :  { %319 = vmatmul.mubr.bf16.gmra.mxu0 %v791_v22  ;;  %351 = vmatmul.mubr.bf16.gmra.mxu1 %v792_v23 }
  0x2b   :  { %326 = vmatprep.mubr.bf16.mxu0 %v793_v24  ;;  %358 = vmatprep.mubr.bf16.mxu1 %v795_v25 }
  0x32   :  { %327 = vmatmul.mubr.bf16.gmra.mxu0 %v797_v26  ;;  %359 = vmatmul.mubr.bf16.gmra.mxu1 %v798_v27 }
  0x33   :  { %334 = vmatprep.mubr.bf16.mxu0 %v799_v28  ;;  %366 = vmatprep.mubr.bf16.mxu1 %v801_v29 }
  0x3a   :  { %335 = vmatmul.mubr.bf16.gmra.mxu0 %v803_v30  ;;  %367 = vmatmul.mubr.bf16.gmra.mxu1 %v804_v31 }
  0xe2   :  { %v701_v32 = vpop.f32.mrf.mxu0  ;;  %v725_v33 = vpop.f32.mrf.mxu1 }
  0xe4   :  { %v702_v34 = vpop.f32.mrf.mxu0  ;;  %v726_v36 = vpop.f32.mrf.mxu1 }
  0xe5   :  { %v703_v37 = vadd.f32 %v702_v34, %v701_v32  ;;  %v727_v38 = vadd.f32 %v726_v36, %v725_v33 }
  0xe6   :  { %v704_v39 = vpop.f32.mrf.mxu0  ;;  %v728_v40 = vpop.f32.mrf.mxu1 }
  0xe7   :  { %v433_v41 = vmul.f32 %v703_v37, %v929_v35  ;;  %v441_v42 = vmul.f32 %v727_v38, %v929_v35 }
  0xe8   :  { %v705_v44 = vpop.f32.mrf.mxu0  ;;  %v729_v45 = vpop.f32.mrf.mxu1 }
  0xe9   :  { %v706_v46 = vadd.f32 %v705_v44, %v704_v39  ;;  %v730_v47 = vadd.f32 %v729_v45, %v728_v40  ;;  %v456_v50 = vadd.f32 %v936_v43, %v433_v41  ;;  %v464_v51 = vadd.f32 %v936_v43, %v441_v42 }
  0xea   :  { %v707_v48 = vpop.f32.mrf.mxu0  ;;  %v731_v49 = vpop.f32.mrf.mxu1 }
  0xeb   :  { %v434_v52 = vmul.f32 %v706_v46, %v929_v35  ;;  %v442_v53 = vmul.f32 %v730_v47, %v929_v35  ;;  %v472_v62 = vmax.f32 %v456_v50, 0.0  ;;  %v480_v63 = vmax.f32 %v464_v51, 0.0 }
  0xec   :  { %v708_v54 = vpop.f32.mrf.mxu0  ;;  %v732_v55 = vpop.f32.mrf.mxu1 }
  0xed   :  { %v457_v56 = vadd.f32 %v936_v43, %v434_v52  ;;  %v465_v57 = vadd.f32 %v936_v43, %v442_v53  ;;  %v709_v58 = vadd.f32 %v708_v54, %v707_v48  ;;  %v733_v59 = vadd.f32 %v732_v55, %v731_v49 }
  0xee   :  { %v710_v60 = vpop.f32.mrf.mxu0  ;;  %v734_v61 = vpop.f32.mrf.mxu1 }
  0xef   :  { %v473_v0 = vmax.f32 %v457_v56, 0.0  ;;  %v481_v1 = vmax.f32 %v465_v57, 0.0  ;;  %v435_v2 = vmul.f32 %v709_v58, %v929_v35  ;;  %v443_v3 = vmul.f32 %v733_v59, %v929_v35 }
  0xf0   :  { %v711_v4 = vpop.f32.mrf.mxu0  ;;  %v735_v5 = vpop.f32.mrf.mxu1 }
  0xf1   :  { %v641_v6 = vpack.c.bf16 %v473_v0, %v472_v62  ;;  %v661_v7 = vpack.c.bf16 %v481_v1, %v480_v63  ;;  %v712_v8 = vadd.f32 %v711_v4, %v710_v60  ;;  %v736_v9 = vadd.f32 %v735_v5, %v734_v61 }
  0xf2   :  { %v713_v10 = vpop.f32.mrf.mxu0  ;;  %v737_v11 = vpop.f32.mrf.mxu1  ;;  %v458_v12 = vadd.f32 %v936_v43, %v435_v2  ;;  %v466_v13 = vadd.f32 %v936_v43, %v443_v3 }
  0xf3   :  { %642 = vst [vmem:[%s996_s4] sm:$0xff] %v641_v6   ;;  %681 = vst [vmem:[%s996_s4 + $0x20] sm:$0xff] %v661_v7   ;;  %v436_v14 = vmul.f32 %v712_v8, %v929_v35  ;;  %v444_v15 = vmul.f32 %v736_v9, %v929_v35 }
  0xf4   :  { %v714_v16 = vpop.f32.mrf.mxu0  ;;  %v738_v17 = vpop.f32.mrf.mxu1  ;;  %v474_v26 = vmax.f32 %v458_v12, 0.0  ;;  %v482_v27 = vmax.f32 %v466_v13, 0.0 }
  0xf5   :  { %v715_v18 = vadd.f32 %v714_v16, %v713_v10  ;;  %v739_v19 = vadd.f32 %v738_v17, %v737_v11  ;;  %v459_v20 = vadd.f32 %v936_v43, %v436_v14  ;;  %v467_v21 = vadd.f32 %v936_v43, %v444_v15 }
  0xf6   :  { %v716_v22 = vpop.f32.mrf.mxu0  ;;  %v740_v23 = vpop.f32.mrf.mxu1 }
  0xf7   :  { %v437_v24 = vmul.f32 %v715_v18, %v929_v35  ;;  %v445_v25 = vmul.f32 %v739_v19, %v929_v35  ;;  %v475_v28 = vmax.f32 %v459_v20, 0.0  ;;  %v483_v29 = vmax.f32 %v467_v21, 0.0 }
  0xf8   :  { %v717_v30 = vpop.f32.mrf.mxu0  ;;  %v741_v31 = vpop.f32.mrf.mxu1 }
  0xf9   :  { %v718_v32 = vadd.f32 %v717_v30, %v716_v22  ;;  %v742_v33 = vadd.f32 %v741_v31, %v740_v23  ;;  %v646_v34 = vpack.c.bf16 %v475_v28, %v474_v26  ;;  %v666_v36 = vpack.c.bf16 %v483_v29, %v482_v27 }
  0xfa   :  { %v719_v37 = vpop.f32.mrf.mxu0  ;;  %v743_v38 = vpop.f32.mrf.mxu1  ;;  %v460_v39 = vadd.f32 %v936_v43, %v437_v24  ;;  %v468_v40 = vadd.f32 %v936_v43, %v445_v25 }
  0xfb   :  { %v438_v41 = vmul.f32 %v718_v32, %v929_v35  ;;  %v446_v42 = vmul.f32 %v742_v33, %v929_v35  ;;  %678 = vst [vmem:[%s996_s4 + $0x8] sm:$0xff] %v646_v34   ;;  %682 = vst [vmem:[%s996_s4 + $0x28] sm:$0xff] %v666_v36  }
  0xfc   :  { %v720_v44 = vpop.f32.mrf.mxu0  ;;  %v744_v45 = vpop.f32.mrf.mxu1  ;;  %v476_v52 = vmax.f32 %v460_v39, 0.0  ;;  %v484_v53 = vmax.f32 %v468_v40, 0.0 }
  0xfd   :  { %v461_v46 = vadd.f32 %v936_v43, %v438_v41  ;;  %v469_v47 = vadd.f32 %v936_v43, %v446_v42  ;;  %v721_v48 = vadd.f32 %v720_v44, %v719_v37  ;;  %v745_v49 = vadd.f32 %v744_v45, %v743_v38 }
  0xfe   :  { %v722_v50 = vpop.f32.mrf.mxu0  ;;  %v746_v51 = vpop.f32.mrf.mxu1 }
  0xff   :  { %v477_v54 = vmax.f32 %v461_v46, 0.0  ;;  %v485_v55 = vmax.f32 %v469_v47, 0.0  ;;  %v439_v56 = vmul.f32 %v721_v48, %v929_v35  ;;  %v447_v57 = vmul.f32 %v745_v49, %v929_v35 }
 0x100   :  { %v723_v58 = vpop.f32.mrf.mxu0  ;;  %v747_v59 = vpop.f32.mrf.mxu1 }
 0x101   :  { %v651_v60 = vpack.c.bf16 %v477_v54, %v476_v52  ;;  %v671_v61 = vpack.c.bf16 %v485_v55, %v484_v53  ;;  %v724_v62 = vadd.f32 %v723_v58, %v722_v50  ;;  %v748_v63 = vadd.f32 %v747_v59, %v746_v51 }
 0x102   :  { %v462_v0 = vadd.f32 %v936_v43, %v439_v56  ;;  %v470_v1 = vadd.f32 %v936_v43, %v447_v57 }
 0x103   :  { %679 = vst [vmem:[%s996_s4 + $0x10] sm:$0xff] %v651_v60   ;;  %683 = vst [vmem:[%s996_s4 + $0x30] sm:$0xff] %v671_v61   ;;  %v440_v2 = vmul.f32 %v724_v62, %v929_v35  ;;  %v448_v3 = vmul.f32 %v748_v63, %v929_v35 }
 0x104   :  { %v478_v6 = vmax.f32 %v462_v0, 0.0  ;;  %v486_v7 = vmax.f32 %v470_v1, 0.0 }
 0x105   :  { %v463_v4 = vadd.f32 %v936_v43, %v440_v2  ;;  %v471_v5 = vadd.f32 %v936_v43, %v448_v3 }
 0x107   :  { %v479_v8 = vmax.f32 %v463_v4, 0.0  ;;  %v487_v9 = vmax.f32 %v471_v5, 0.0 }
 0x109   :  { %v656_v10 = vpack.c.bf16 %v479_v8, %v478_v6  ;;  %v676_v11 = vpack.c.bf16 %v487_v9, %v486_v7 }
 0x10b   :  { %680 = vst [vmem:[%s996_s4 + $0x18] sm:$0xff] %v656_v10   ;;  %684 = vst [vmem:[%s996_s4 + $0x38] sm:$0xff] %v676_v11  }

// kernel: deeplabv3plus_forward.27
= control target key start
LH: loop header
LB: loop body
LE: loop exit
PB: predicated region body
PF: predicated region fallthrough
CT: control target
= control target key end

     0   :  { %s2142_s0 = inlined_call_operand.vmem [shape: bf16[128,2816], index: 0, kind: input, shape index: {}]   ;;  %s2143_s1 = inlined_call_operand.vmem [shape: bf16[2816,256], index: 1, kind: input, shape index: {}]   ;;  %s2144_s2 = inlined_call_operand.vmem [shape: f32[1,256], index: 2, kind: input, shape index: {}]   ;;  %s2145_s3 = inlined_call_operand.vmem [shape: f32[1,256], index: 3, kind: input, shape index: {}]   ;;  %s2146_s4 = inlined_call_operand.vmem [shape: bf16[128,256], index: 4, kind: output, shape index: {}]  }
   0x1   :  { %2150 = sst [smem:[#allocation9_spill]] %s2142_s0 }
   0x2   :  { %2151 = sst [smem:[#allocation10_spill]] %s2143_s1 }
   0x3   :  { %s1776_s15 = smov 0   ;;  %s1778_s16 = smov 0  }
   0x4   :  { %s1780_s17 = smov 0   ;;  %s1782_s18 = smov 0  }
   0x5   :  { %s1784_s19 = smov 0   ;;  %s1786_s20 = smov 0  }
   0x6   :  { %s1788_s21 = smov 0   ;;  %s1790_s22 = smov 0  }
   0x7   :  { %s1792_s23 = smov 0   ;;  %s1794_s24 = smov 0  }
   0x8   :  { %s1796_s25 = smov 0  }
   0x9 LB: > { %2152 = sst [smem:[#allocation6_spill]] %s1744_s24  ;;  %s1317_s26 = sadd.s32 4294967295, %s1748_s25   ;;  %s1748_s25 = sphi %s1796_s25, %s14_s25   ;;  %s1744_s24 = sphi %s1794_s24, %s2162_s24   ;;  %s1740_s23 = sphi %s1792_s23, %s2170_s23   ;;  %s1736_s22 = sphi %s1790_s22, %s2160_s22   ;;  %s1732_s21 = sphi %s1788_s21, %s2169_s21   ;;  %s1728_s20 = sphi %s1786_s20, %s2168_s20   ;;  %s1724_s19 = sphi %s1784_s19, %s2167_s19   ;;  %s1720_s18 = sphi %s1782_s18, %s2166_s18   ;;  %s1716_s17 = sphi %s1780_s17, %s2165_s17   ;;  %s1712_s16 = sphi %s1778_s16, %s2164_s16   ;;  %s1708_s15 = sphi %s1776_s15, %s2163_s15  }
   0xa   : > { %s26_s27 = sadd.s32 1, %s1740_s23  ;;  %s29_s28 = sadd.s32 1, %s1744_s24 }
   0xb   : > { %p27_p0 = scmp.ge.s32.totalorder %s26_s27, 11  ;;  %s42_s29 = sadd.s32 1, %s1728_s20 }
   0xc   : > { %p49_p1 = scmp.ne.s32.totalorder %s1728_s20, %s1724_s19  ;;  %p50_p2 = scmp.eq.s32.totalorder %s1748_s25, 0 }
   0xd   : > { %s2172_s27 = smov (%p27_p0, %s26_s27), 0  ;;  %s2174_s28 = smov (!%p27_p0, %s29_s28), %s1744_s24 }
   0xe   : > { %2153 = sst [smem:[#allocation7_spill]] %s2172_s27  ;;  %s38_s30 = ssub.s32 %s1740_s23, %s2172_s27 }
   0xf   : > { %p31_p3 = scmp.ge.s32.totalorder %s2174_s28, 2  ;;  %p40_p4 = scmp.eq.s32.totalorder %s38_s30, 0 }
  0x10   : > { %p1843_p5 = por %p50_p2, %p49_p1  ;;  %s70_s6 = sadd.s32 1, %s1720_s18 }
  0x11   : > { %s2176_s28 = smov (%p31_p3, %s2174_s28), 0  ;;  %p77_p6 = scmp.ne.s32.totalorder %s1720_s18, %s1716_s17 }
  0x12   : > { %2155 = sst [smem:[#allocation8_spill]] %s2176_s28  ;;  %s66_s8 = ssub.s32 %s1744_s24, %s2176_s28 }
  0x13   : > { %s1851_s7 = scalar_select %p40_p4, %s1728_s20, %s42_s29  }
  0x14   : > { %s67_s9 = sor.u32 %s66_s8, %s38_s30  ;;  %p148_p7 = scmp.eq.s32.totalorder %s66_s8, 0 }
  0x15   : > { %p68_p8 = scmp.eq.s32.totalorder %s67_s9, 0  ;;  %p1857_p9 = por %p77_p6, %p50_p2 }
  0x16   : > { %s150_s11 = sadd.s32 1, %s1712_s16  ;;  %p160_p10 = scmp.ne.s32.totalorder %s1712_s16, %s1708_s15 }
  0x17   : > { %s1865_s12 = scalar_select %p68_p8, %s1720_s18, %s70_s6  }
  0x18   : > { %s1868_s13 = scalar_select %p148_p7, %s1712_s16, %s150_s11  }
  0x19   : > { %p161_p11 = scmp.eq.s32.totalorder %s1317_s26, 21  ;;  %p1320_p13 = scmp.ge.s32.totalorder %s1748_s25, 22 }
  0x1b   : > { %p1870_p12 = por %p161_p11, %p160_p10  ;;  %183 = sbr.rel (%p1320_p13) target bundleno = 81 (0x51), region = 16 }
  0x20   : > { %186 = sbr.rel (!%p1843_p5) target bundleno = 50 (0x32), region = 20  ;;  %s188_s29 = sand.u32 (%p1843_p5), 1, %s1728_s20  }
  0x21   : > { %s1388_s30 = sshll.u32 (%p1843_p5), %s1740_s23, 3  ;;  %s1321_s8 = sshll.u32 (%p1843_p5), %s188_s29, 7 }
  0x22   : > { %s2158_s0 = sld [smem:[#allocation9_spill]] (%p1843_p5)  ;;  %s190_s26 = scalar_lea.vmem (%p1843_p5), [#allocation3], %s1321_s8 }
  0x28   : > { %s1882_s11 = scalar_lea.vmem %s2158_s0, %s1388_s30 }
  0x29   : > { %v255_v0 = vld [vmem:[%s1882_s11] sm:$0xff]  ;;  %v257_v1 = vld [vmem:[%s1882_s11 + $0x58] sm:$0xff]  ;;  %v259_v2 = vld [vmem:[%s1882_s11 + $0xb0] sm:$0xff] }
  0x2a   : > { %256 = vst [vmem:[%s190_s26] sm:$0xff] %v255_v0  ;;  %258 = vst [vmem:[%s190_s26 + $0x8] sm:$0xff] %v257_v1  ;;  %v261_v3 = vld [vmem:[%s1882_s11 + $0x108] sm:$0xff]  ;;  %v263_v4 = vld [vmem:[%s1882_s11 + $0x160] sm:$0xff] }
  0x2b   : > { %260 = vst [vmem:[%s190_s26 + $0x10] sm:$0xff] %v259_v2  ;;  %v265_v5 = vld [vmem:[%s1882_s11 + $0x1b8] sm:$0xff]  ;;  %262 = vst [vmem:[%s190_s26 + $0x18] sm:$0xff] %v261_v3  ;;  %v267_v6 = vld [vmem:[%s1882_s11 + $0x210] sm:$0xff] }
  0x2c   : > { %264 = vst [vmem:[%s190_s26 + $0x20] sm:$0xff] %v263_v4  ;;  %266 = vst [vmem:[%s190_s26 + $0x28] sm:$0xff] %v265_v5  ;;  %v269_v7 = vld [vmem:[%s1882_s11 + $0x268] sm:$0xff]  ;;  %v271_v8 = vld [vmem:[%s1882_s11 + $0x2c0] sm:$0xff] }
  0x2d   : > { %268 = vst [vmem:[%s190_s26 + $0x30] sm:$0xff] %v267_v6  ;;  %270 = vst [vmem:[%s190_s26 + $0x38] sm:$0xff] %v269_v7  ;;  %v273_v9 = vld [vmem:[%s1882_s11 + $0x318] sm:$0xff]  ;;  %v275_v10 = vld [vmem:[%s1882_s11 + $0x370] sm:$0xff] }
  0x2e   : > { %272 = vst [vmem:[%s190_s26 + $0x40] sm:$0xff] %v271_v8  ;;  %v277_v11 = vld [vmem:[%s1882_s11 + $0x3c8] sm:$0xff]  ;;  %274 = vst [vmem:[%s190_s26 + $0x48] sm:$0xff] %v273_v9  ;;  %v279_v12 = vld [vmem:[%s1882_s11 + $0x420] sm:$0xff] }
  0x2f   : > { %276 = vst [vmem:[%s190_s26 + $0x50] sm:$0xff] %v275_v10  ;;  %278 = vst [vmem:[%s190_s26 + $0x58] sm:$0xff] %v277_v11  ;;  %v281_v13 = vld [vmem:[%s1882_s11 + $0x478] sm:$0xff]  ;;  %v283_v14 = vld [vmem:[%s1882_s11 + $0x4d0] sm:$0xff] }
  0x30   : > { %280 = vst [vmem:[%s190_s26 + $0x60] sm:$0xff] %v279_v12  ;;  %282 = vst [vmem:[%s190_s26 + $0x68] sm:$0xff] %v281_v13  ;;  %v285_v15 = vld [vmem:[%s1882_s11 + $0x528] sm:$0xff] }
  0x31   : > { %284 = vst [vmem:[%s190_s26 + $0x70] sm:$0xff] %v283_v14  ;;  %286 = vst [vmem:[%s190_s26 + $0x78] sm:$0xff] %v285_v15 }
  0x32 PF: > { %292 = sbr.rel (!%p1857_p9) target bundleno = 81 (0x51), region = 58  ;;  %s294_s5 = sand.u32 (%p1857_p9), 1, %s1720_s18  }
  0x33   : > { %s1389_s29 = sshll.u32 (%p1857_p9), %s1740_s23, 6  ;;  %s1324_s30 = sshll.u32 (%p1857_p9), %s294_s5, 7 }
  0x34   : > { %s299_s8 = sadd.s32 (%p1857_p9), %s1744_s24, %s1389_s29  ;;  %s2159_s1 = sld [smem:[#allocation10_spill]] (%p1857_p9) }
  0x35   : > { %s1327_s6 = sshll.u32 (%p1857_p9), %s299_s8, 2  ;;  %s1913_s10 = scalar_lea.vmem (%p1857_p9), [#allocation4], %s1324_s30 }
  0x3a   : > { %s1908_s28 = scalar_lea.vmem %s2159_s1, %s1327_s6 }
  0x3b   : > { %v318_v16 = vld [vmem:[%s1908_s28] sm:$0xf]  ;;  %v320_v17 = vld [vmem:[%s1908_s28 + $0x8] sm:$0xf]  ;;  %v322_v18 = vld [vmem:[%s1908_s28 + $0x10] sm:$0xf] }
  0x3c   : > { %319 = vst [vmem:[%s1913_s10] sm:$0xf] %v318_v16  ;;  %321 = vst [vmem:[%s1913_s10 + $0x4] sm:$0xf] %v320_v17  ;;  %v324_v19 = vld [vmem:[%s1908_s28 + $0x18] sm:$0xf] }
  0x3d   : > { %323 = vst [vmem:[%s1913_s10 + $0x8] sm:$0xf] %v322_v18  ;;  %v326_v20 = vld [vmem:[%s1908_s28 + $0x20] sm:$0xf]  ;;  %v328_v21 = vld [vmem:[%s1908_s28 + $0x28] sm:$0xf] }
  0x3e   : > { %325 = vst [vmem:[%s1913_s10 + $0xc] sm:$0xf] %v324_v19  ;;  %327 = vst [vmem:[%s1913_s10 + $0x10] sm:$0xf] %v326_v20  ;;  %v330_v22 = vld [vmem:[%s1908_s28 + $0x30] sm:$0xf] }
  0x3f   : > { %329 = vst [vmem:[%s1913_s10 + $0x14] sm:$0xf] %v328_v21  ;;  %v332_v23 = vld [vmem:[%s1908_s28 + $0x38] sm:$0xf]  ;;  %v334_v24 = vld [vmem:[%s1908_s28 + $0x40] sm:$0xf] }
  0x40   : > { %331 = vst [vmem:[%s1913_s10 + $0x18] sm:$0xf] %v330_v22  ;;  %333 = vst [vmem:[%s1913_s10 + $0x1c] sm:$0xf] %v332_v23  ;;  %v336_v25 = vld [vmem:[%s1908_s28 + $0x48] sm:$0xf] }
  0x41   : > { %335 = vst [vmem:[%s1913_s10 + $0x20] sm:$0xf] %v334_v24  ;;  %v338_v26 = vld [vmem:[%s1908_s28 + $0x50] sm:$0xf]  ;;  %v340_v27 = vld [vmem:[%s1908_s28 + $0x58] sm:$0xf] }
  0x42   : > { %337 = vst [vmem:[%s1913_s10 + $0x24] sm:$0xf] %v336_v25  ;;  %339 = vst [vmem:[%s1913_s10 + $0x28] sm:$0xf] %v338_v26  ;;  %v342_v28 = vld [vmem:[%s1908_s28 + $0x60] sm:$0xf] }
  0x43   : > { %341 = vst [vmem:[%s1913_s10 + $0x2c] sm:$0xf] %v340_v27  ;;  %v344_v29 = vld [vmem:[%s1908_s28 + $0x68] sm:$0xf]  ;;  %v346_v30 = vld [vmem:[%s1908_s28 + $0x70] sm:$0xf] }
  0x44   : > { %343 = vst [vmem:[%s1913_s10 + $0x30] sm:$0xf] %v342_v28  ;;  %345 = vst [vmem:[%s1913_s10 + $0x34] sm:$0xf] %v344_v29  ;;  %v348_v31 = vld [vmem:[%s1908_s28 + $0x78] sm:$0xf] }
  0x45   : > { %347 = vst [vmem:[%s1913_s10 + $0x38] sm:$0xf] %v346_v30  ;;  %v350_v32 = vld [vmem:[%s1908_s28 + $0x80] sm:$0xf]  ;;  %v352_v33 = vld [vmem:[%s1908_s28 + $0x88] sm:$0xf] }
  0x46   : > { %349 = vst [vmem:[%s1913_s10 + $0x3c] sm:$0xf] %v348_v31  ;;  %351 = vst [vmem:[%s1913_s10 + $0x40] sm:$0xf] %v350_v32  ;;  %v354_v34 = vld [vmem:[%s1908_s28 + $0x90] sm:$0xf] }
  0x47   : > { %353 = vst [vmem:[%s1913_s10 + $0x44] sm:$0xf] %v352_v33  ;;  %v356_v35 = vld [vmem:[%s1908_s28 + $0x98] sm:$0xf]  ;;  %v358_v36 = vld [vmem:[%s1908_s28 + $0xa0] sm:$0xf] }
  0x48   : > { %355 = vst [vmem:[%s1913_s10 + $0x48] sm:$0xf] %v354_v34  ;;  %357 = vst [vmem:[%s1913_s10 + $0x4c] sm:$0xf] %v356_v35  ;;  %v360_v37 = vld [vmem:[%s1908_s28 + $0xa8] sm:$0xf] }
  0x49   : > { %359 = vst [vmem:[%s1913_s10 + $0x50] sm:$0xf] %v358_v36  ;;  %v362_v38 = vld [vmem:[%s1908_s28 + $0xb0] sm:$0xf]  ;;  %v364_v39 = vld [vmem:[%s1908_s28 + $0xb8] sm:$0xf] }
  0x4a   : > { %361 = vst [vmem:[%s1913_s10 + $0x54] sm:$0xf] %v360_v37  ;;  %363 = vst [vmem:[%s1913_s10 + $0x58] sm:$0xf] %v362_v38  ;;  %v366_v40 = vld [vmem:[%s1908_s28 + $0xc0] sm:$0xf] }
  0x4b   : > { %365 = vst [vmem:[%s1913_s10 + $0x5c] sm:$0xf] %v364_v39  ;;  %v368_v41 = vld [vmem:[%s1908_s28 + $0xc8] sm:$0xf]  ;;  %v370_v42 = vld [vmem:[%s1908_s28 + $0xd0] sm:$0xf] }
  0x4c   : > { %367 = vst [vmem:[%s1913_s10 + $0x60] sm:$0xf] %v366_v40  ;;  %369 = vst [vmem:[%s1913_s10 + $0x64] sm:$0xf] %v368_v41  ;;  %v372_v43 = vld [vmem:[%s1908_s28 + $0xd8] sm:$0xf] }
  0x4d   : > { %371 = vst [vmem:[%s1913_s10 + $0x68] sm:$0xf] %v370_v42  ;;  %v374_v44 = vld [vmem:[%s1908_s28 + $0xe0] sm:$0xf]  ;;  %v376_v45 = vld [vmem:[%s1908_s28 + $0xe8] sm:$0xf] }
  0x4e   : > { %373 = vst [vmem:[%s1913_s10 + $0x6c] sm:$0xf] %v372_v43  ;;  %375 = vst [vmem:[%s1913_s10 + $0x70] sm:$0xf] %v374_v44  ;;  %v378_v46 = vld [vmem:[%s1908_s28 + $0xf0] sm:$0xf] }
  0x4f   : > { %377 = vst [vmem:[%s1913_s10 + $0x74] sm:$0xf] %v376_v45  ;;  %v380_v47 = vld [vmem:[%s1908_s28 + $0xf8] sm:$0xf]  ;;  %379 = vst [vmem:[%s1913_s10 + $0x78] sm:$0xf] %v378_v46 }
  0x50   : > { %381 = vst [vmem:[%s1913_s10 + $0x7c] sm:$0xf] %v380_v47 }
  0x51 PF: > { %p1328_p0 = scmp.ge.s32.totalorder %s1748_s25, 1  ;;  %p480_p1 = scmp.lt.s32.totalorder %s1748_s25, 23 }
  0x53   : > { %p481_p2 = pnand %p1328_p0, %p480_p1 }
  0x54   : > { %s487_s0 = sand.u32 (!%p481_p2), 1, %s1724_s19   ;;  %s494_s11 = sand.u32 (!%p481_p2), 1, %s1716_s17  }
  0x55   : > { %484 = sbr.rel (%p481_p2) target bundleno = 399 (0x18f), region = 107  ;;  %s1329_s26 = sshll.u32 (!%p481_p2), %s487_s0, 7 }
  0x56   : > { %s1330_s5 = sshll.u32 (!%p481_p2), %s494_s11, 7  ;;  %s525_s28 = sand.u32 (!%p481_p2), 1, %s1708_s15  }
  0x57   : > { %p531_p3 = scmp.lt.s32.totalorder (!%p481_p2), %s1736_s22, 1  ;;  %s1331_s29 = sshll.u32 (!%p481_p2), %s525_s28, 6 }
  0x58   : > { %s1993_s24 = scalar_lea.vmem (!%p481_p2), [#allocation3], %s1329_s26  ;;  %s1995_s17 = scalar_lea.vmem (!%p481_p2), [#allocation4], %s1330_s5 }
  0x59   : > { %s1997_s19 = scalar_lea.vmem (!%p481_p2), [#allocation5], %s1331_s29  ;;  %p1332_p4 = scmp.ne.s32.totalorder (!%p481_p2), %s1732_s21, 0 }
  0x5a   : > { %s1983_s30 = scalar_select %p531_p3, %s1736_s22, 1 }
  0x5b   : > { %542 = sbr.rel (%p1332_p4) target bundleno = 105 (0x69), region = 119 }
  0x5c   : > { %s533_s9 = scalar_lea.vmem %s2144_s2, %s1983_s30  ;;  %s536_s27 = scalar_lea.vmem %s2145_s3, %s1983_s30 }
  0x60   : > { %v1750_v48 = vmov 0.0  }
  0x61   : > { %543 = vst [vmem:[#allocation2 + $0x30] sm:$0xff] %v1750_v48  ;;  %544 = vst [vmem:[#allocation2] sm:$0xff] %v1750_v48 }
  0x62   : > { %545 = vst [vmem:[#allocation2 + $0x58] sm:$0xff] %v1750_v48  ;;  %546 = vst [vmem:[#allocation2 + $0x18] sm:$0xff] %v1750_v48 }
  0x63   : > { %547 = vst [vmem:[#allocation2 + $0x50] sm:$0xff] %v1750_v48  ;;  %548 = vst [vmem:[#allocation2 + $0x68] sm:$0xff] %v1750_v48 }
  0x64   : > { %549 = vst [vmem:[#allocation2 + $0x8] sm:$0xff] %v1750_v48  ;;  %550 = vst [vmem:[#allocation2 + $0x48] sm:$0xff] %v1750_v48 }
  0x65   : > { %551 = vst [vmem:[#allocation2 + $0x40] sm:$0xff] %v1750_v48  ;;  %552 = vst [vmem:[#allocation2 + $0x20] sm:$0xff] %v1750_v48 }
  0x66   : > { %553 = vst [vmem:[#allocation2 + $0x10] sm:$0xff] %v1750_v48  ;;  %554 = vst [vmem:[#allocation2 + $0x38] sm:$0xff] %v1750_v48 }
  0x67   : > { %555 = vst [vmem:[#allocation2 + $0x60] sm:$0xff] %v1750_v48  ;;  %556 = vst [vmem:[#allocation2 + $0x70] sm:$0xff] %v1750_v48 }
  0x68   : > { %557 = vst [vmem:[#allocation2 + $0x78] sm:$0xff] %v1750_v48  ;;  %558 = vst [vmem:[#allocation2 + $0x28] sm:$0xff] %v1750_v48 }
  0x69 PF: > { %v1622_v49 = vld [vmem:[%s1995_s17 + $0x78] sm:$0xff]   ;;  %v1624_v51 = vld [vmem:[%s1995_s17 + $0x70] sm:$0xff]   ;;  %v1626_v53 = vld [vmem:[%s1995_s17 + $0x68] sm:$0xff]   ;;  %p1365_p5 = scmp.ne.s32.totalorder %s1732_s21, 10 }
  0x6a   : > { %v1623_v50 = vld [vmem:[%s1995_s17 + $0x38] sm:$0xff]   ;;  %1453 = vmatprep.subr.bf16.mxu0 %v1622_v49  ;;  %1517 = vmatprep.subr.bf16.mxu1 %v1622_v49  ;;  %v1625_v52 = vld [vmem:[%s1995_s17 + $0x30] sm:$0xff]   ;;  %v1627_v54 = vld [vmem:[%s1995_s17 + $0x28] sm:$0xff]  }
  0x6b   : > { %1454 = vmatpush3.bf16.msra.mxu0 %v1623_v50  ;;  %1525 = vmatpush3.bf16.msra.mxu1 %v1623_v50  ;;  %v1628_v55 = vld [vmem:[%s1995_s17 + $0x60] sm:$0xff]   ;;  %v1630_v57 = vld [vmem:[%s1995_s17 + $0x58] sm:$0xff]   ;;  %v1632_v59 = vld [vmem:[%s1995_s17 + $0x50] sm:$0xff]  }
  0x6c   : > { %1455 = vmatprep.subr.bf16.mxu0 %v1624_v51  ;;  %1518 = vmatprep.subr.bf16.mxu1 %v1624_v51  ;;  %v1629_v56 = vld [vmem:[%s1995_s17 + $0x20] sm:$0xff]   ;;  %v1631_v58 = vld [vmem:[%s1995_s17 + $0x18] sm:$0xff]   ;;  %v1633_v62 = vld [vmem:[%s1995_s17 + $0x10] sm:$0xff]  }
  0x6d   : > { %v1640_v60 = vld [vmem:[%s1993_s24 + $0x4] ss:$8 sps:$4 sm:$0xff]   ;;  %v1638_v3 = vld [vmem:[%s1993_s24] ss:$8 sps:$4 sm:$0xff]   ;;  %v1644_v5 = vld [vmem:[%s1993_s24 + $0x14] ss:$8 sps:$4 sm:$0xff]  }
  0x6e   : > { %v1643_v61 = vld [vmem:[%s1993_s24 + $0x44] ss:$8 sps:$4 sm:$0xff]   ;;  %831 = vmatprep.mubr.bf16.mxu0 %v1640_v60  ;;  %v1641_v4 = vld [vmem:[%s1993_s24 + $0x40] ss:$8 sps:$4 sm:$0xff]   ;;  %v1646_v6 = vld [vmem:[%s1993_s24 + $0x54] ss:$8 sps:$4 sm:$0xff]  }
  0x6f   : > { %1456 = vmatpush3.bf16.msra.mxu0 %v1625_v52  ;;  %1526 = vmatpush3.bf16.msra.mxu1 %v1625_v52  ;;  %v1634_v63 = vld [vmem:[%s1995_s17 + $0x48] sm:$0xff]   ;;  %v1636_v1 = vld [vmem:[%s1995_s17 + $0x40] sm:$0xff]   ;;  %v1648_v7 = vld [vmem:[%s1993_s24 + $0x10] ss:$8 sps:$4 sm:$0xff]  }
  0x70   : > { %1457 = vmatprep.subr.bf16.mxu0 %v1626_v53  ;;  %1519 = vmatprep.subr.bf16.mxu1 %v1626_v53  ;;  %v1635_v0 = vld [vmem:[%s1995_s17 + $0x8] sm:$0xff]   ;;  %v1637_v2 = vld [vmem:[%s1995_s17] sm:$0xff]   ;;  %v1649_v8 = vld [vmem:[%s1993_s24 + $0x50] ss:$8 sps:$4 sm:$0xff]  }
  0x71   : > { %863 = vmatprep.mubr.bf16.mxu1 %v1643_v61  ;;  %v1650_v9 = vld [vmem:[%s1993_s24 + $0x24] ss:$8 sps:$4 sm:$0xff]   ;;  %v1654_v11 = vld [vmem:[%s1993_s24 + $0x20] ss:$8 sps:$4 sm:$0xff]   ;;  %v1656_v13 = vld [vmem:[%s1993_s24 + $0x34] ss:$8 sps:$4 sm:$0xff]  }
  0x72   : > { %v1652_v10 = vld [vmem:[%s1993_s24 + $0x64] ss:$8 sps:$4 sm:$0xff]   ;;  %v1655_v12 = vld [vmem:[%s1993_s24 + $0x60] ss:$8 sps:$4 sm:$0xff]   ;;  %v1658_v14 = vld [vmem:[%s1993_s24 + $0x74] ss:$8 sps:$4 sm:$0xff]  }
  0x73   : > { %1458 = vmatpush3.bf16.msra.mxu0 %v1627_v54  ;;  %1527 = vmatpush3.bf16.msra.mxu1 %v1627_v54  ;;  %v1660_v15 = vld [vmem:[%s1993_s24 + $0x30] ss:$8 sps:$4 sm:$0xff]   ;;  %v567_v21 = vld [vmem:[#allocation2 + $0x40] sm:$0xff] }
  0x74   : > { %1459 = vmatprep.subr.bf16.mxu0 %v1628_v55  ;;  %1520 = vmatprep.subr.bf16.mxu1 %v1628_v55  ;;  %v1661_v16 = vld [vmem:[%s1993_s24 + $0x70] ss:$8 sps:$4 sm:$0xff]   ;;  %v560_v29 = vld [vmem:[#allocation2] sm:$0xff] }
  0x75   : > { %v559_v19 = vld [vmem:[#allocation2 + $0x30] sm:$0xff]  ;;  %v568_v31 = vld [vmem:[#allocation2 + $0x20] sm:$0xff]  ;;  %v561_v39 = vld [vmem:[#allocation2 + $0x58] sm:$0xff] }
  0x76   : > { %v569_v41 = vld [vmem:[#allocation2 + $0x10] sm:$0xff]  ;;  %v562_v49 = vld [vmem:[#allocation2 + $0x18] sm:$0xff]  ;;  %v571_v61 = vld [vmem:[#allocation2 + $0x60] sm:$0xff] }
  0x77   : > { %1460 = vmatpush3.bf16.msra.mxu0 %v1629_v56  ;;  %1528 = vmatpush3.bf16.msra.mxu1 %v1629_v56  ;;  %v570_v51 = vld [vmem:[#allocation2 + $0x38] sm:$0xff] }
  0x78   : > { %1461 = vmatprep.subr.bf16.mxu0 %v1630_v57  ;;  %1521 = vmatprep.subr.bf16.mxu1 %v1630_v57 }
  0x7b   : > { %1462 = vmatpush3.bf16.msra.mxu0 %v1631_v58  ;;  %1529 = vmatpush3.bf16.msra.mxu1 %v1631_v58 }
  0x7c   : > { %1463 = vmatprep.subr.bf16.mxu0 %v1632_v59  ;;  %1522 = vmatprep.subr.bf16.mxu1 %v1632_v59  ;;  %v563_v59 = vld [vmem:[#allocation2 + $0x50] sm:$0xff] }
  0x7f   : > { %1464 = vmatpush3.bf16.msra.mxu0 %v1633_v62  ;;  %1530 = vmatpush3.bf16.msra.mxu1 %v1633_v62 }
  0x80   : > { %1465 = vmatprep.subr.bf16.mxu0 %v1634_v63  ;;  %1523 = vmatprep.subr.bf16.mxu1 %v1634_v63 }
  0x83   : > { %1466 = vmatpush3.bf16.msra.mxu0 %v1635_v0  ;;  %1531 = vmatpush3.bf16.msra.mxu1 %v1635_v0 }
  0x84   : > { %1467 = vmatprep.subr.bf16.mxu0 %v1636_v1  ;;  %1524 = vmatprep.subr.bf16.mxu1 %v1636_v1 }
  0x87   : > { %1468 = vmatpush3.bf16.msra.mxu0 %v1637_v2  ;;  %1532 = vmatpush3.bf16.msra.mxu1 %v1637_v2 }
  0x8a   : > { %832 = vmatmul.mubr.bf16.vlgmr.msra.gmra.mxu0 %v1638_v3  ;;  %864 = vmatmul.mubr.bf16.vlgmr.msra.gmra.mxu1 %v1641_v4 }
  0x8b   : > { %839 = vmatprep.mubr.bf16.mxu0 %v1644_v5  ;;  %871 = vmatprep.mubr.bf16.mxu1 %v1646_v6  ;;  %v564_v5 = vld [vmem:[#allocation2 + $0x68] sm:$0xff] }
  0x92   : > { %840 = vmatmul.mubr.bf16.gmra.mxu0 %v1648_v7  ;;  %872 = vmatmul.mubr.bf16.gmra.mxu1 %v1649_v8  ;;  %v572_v7 = vld [vmem:[#allocation2 + $0x70] sm:$0xff] }
  0x93   : > { %847 = vmatprep.mubr.bf16.mxu0 %v1650_v9  ;;  %879 = vmatprep.mubr.bf16.mxu1 %v1652_v10 }
  0x9a   : > { %848 = vmatmul.mubr.bf16.gmra.mxu0 %v1654_v11  ;;  %880 = vmatmul.mubr.bf16.gmra.mxu1 %v1655_v12 }
  0x9b   : > { %855 = vmatprep.mubr.bf16.mxu0 %v1656_v13  ;;  %887 = vmatprep.mubr.bf16.mxu1 %v1658_v14 }
  0xa2   : > { %856 = vmatmul.mubr.bf16.gmra.mxu0 %v1660_v15  ;;  %888 = vmatmul.mubr.bf16.gmra.mxu1 %v1661_v16  ;;  %v565_v15 = vld [vmem:[#allocation2 + $0x8] sm:$0xff] }
 0x14a   : > { %v1469_v17 = vpop.f32.mrf.mxu0  ;;  %v1493_v18 = vpop.f32.mrf.mxu1 }
 0x14c   : > { %v1470_v20 = vpop.f32.mrf.mxu0  ;;  %v1494_v22 = vpop.f32.mrf.mxu1 }
 0x14d   : > { %v1471_v23 = vadd.f32 %v1470_v20, %v1469_v17  ;;  %v1495_v24 = vadd.f32 %v1494_v22, %v1493_v18  ;;  %v573_v17 = vld [vmem:[#allocation2 + $0x78] sm:$0xff] }
 0x14e   : > { %v1472_v25 = vpop.f32.mrf.mxu0  ;;  %v1496_v26 = vpop.f32.mrf.mxu1 }
 0x14f   : > { %v896_v27 = vadd.f32 %v1471_v23, %v559_v19  ;;  %v904_v28 = vadd.f32 %v1495_v24, %v567_v21 }
 0x150   : > { %v1473_v30 = vpop.f32.mrf.mxu0  ;;  %v1497_v32 = vpop.f32.mrf.mxu1 }
 0x151   : > { %912 = vst [vmem:[#allocation2 + $0x30] sm:$0xff] %v896_v27  ;;  %920 = vst [vmem:[#allocation2 + $0x40] sm:$0xff] %v904_v28  ;;  %v1474_v33 = vadd.f32 %v1473_v30, %v1472_v25  ;;  %v1498_v34 = vadd.f32 %v1497_v32, %v1496_v26  ;;  %v566_v25 = vld [vmem:[#allocation2 + $0x48] sm:$0xff] }
 0x152   : > { %v1475_v35 = vpop.f32.mrf.mxu0  ;;  %v1499_v36 = vpop.f32.mrf.mxu1  ;;  %v574_v27 = vld [vmem:[#allocation2 + $0x28] sm:$0xff] }
 0x153   : > { %v897_v37 = vadd.f32 %v1474_v33, %v560_v29  ;;  %v905_v38 = vadd.f32 %v1498_v34, %v568_v31 }
 0x154   : > { %v1476_v40 = vpop.f32.mrf.mxu0  ;;  %v1500_v42 = vpop.f32.mrf.mxu1 }
 0x155   : > { %913 = vst [vmem:[#allocation2] sm:$0xff] %v897_v37  ;;  %921 = vst [vmem:[#allocation2 + $0x20] sm:$0xff] %v905_v38  ;;  %v1477_v43 = vadd.f32 %v1476_v40, %v1475_v35  ;;  %v1501_v44 = vadd.f32 %v1500_v42, %v1499_v36 }
 0x156   : > { %v1478_v45 = vpop.f32.mrf.mxu0  ;;  %v1502_v46 = vpop.f32.mrf.mxu1 }
 0x157   : > { %v898_v47 = vadd.f32 %v1477_v43, %v561_v39  ;;  %v906_v48 = vadd.f32 %v1501_v44, %v569_v41 }
 0x158   : > { %v1479_v50 = vpop.f32.mrf.mxu0  ;;  %v1503_v52 = vpop.f32.mrf.mxu1 }
 0x159   : > { %914 = vst [vmem:[#allocation2 + $0x58] sm:$0xff] %v898_v47  ;;  %922 = vst [vmem:[#allocation2 + $0x10] sm:$0xff] %v906_v48  ;;  %v1480_v53 = vadd.f32 %v1479_v50, %v1478_v45  ;;  %v1504_v54 = vadd.f32 %v1503_v52, %v1502_v46 }
 0x15a   : > { %v1481_v55 = vpop.f32.mrf.mxu0  ;;  %v1505_v56 = vpop.f32.mrf.mxu1 }
 0x15b   : > { %v899_v57 = vadd.f32 %v1480_v53, %v562_v49  ;;  %v907_v58 = vadd.f32 %v1504_v54, %v570_v51 }
 0x15c   : > { %v1482_v60 = vpop.f32.mrf.mxu0  ;;  %v1506_v62 = vpop.f32.mrf.mxu1 }
 0x15d   : > { %915 = vst [vmem:[#allocation2 + $0x18] sm:$0xff] %v899_v57  ;;  %923 = vst [vmem:[#allocation2 + $0x38] sm:$0xff] %v907_v58  ;;  %v1483_v63 = vadd.f32 %v1482_v60, %v1481_v55  ;;  %v1507_v0 = vadd.f32 %v1506_v62, %v1505_v56 }
 0x15e   : > { %v1484_v1 = vpop.f32.mrf.mxu0  ;;  %v1508_v2 = vpop.f32.mrf.mxu1 }
 0x15f   : > { %v900_v3 = vadd.f32 %v1483_v63, %v563_v59  ;;  %v908_v4 = vadd.f32 %v1507_v0, %v571_v61 }
 0x160   : > { %v1485_v6 = vpop.f32.mrf.mxu0  ;;  %v1509_v8 = vpop.f32.mrf.mxu1 }
 0x161   : > { %916 = vst [vmem:[#allocation2 + $0x50] sm:$0xff] %v900_v3  ;;  %924 = vst [vmem:[#allocation2 + $0x60] sm:$0xff] %v908_v4  ;;  %v1486_v9 = vadd.f32 %v1485_v6, %v1484_v1  ;;  %v1510_v10 = vadd.f32 %v1509_v8, %v1508_v2 }
 0x162   : > { %v1487_v11 = vpop.f32.mrf.mxu0  ;;  %v1511_v12 = vpop.f32.mrf.mxu1 }
 0x163   : > { %v901_v13 = vadd.f32 %v1486_v9, %v564_v5  ;;  %v909_v14 = vadd.f32 %v1510_v10, %v572_v7 }
 0x164   : > { %v1488_v16 = vpop.f32.mrf.mxu0  ;;  %v1512_v18 = vpop.f32.mrf.mxu1 }
 0x165   : > { %917 = vst [vmem:[#allocation2 + $0x68] sm:$0xff] %v901_v13  ;;  %925 = vst [vmem:[#allocation2 + $0x70] sm:$0xff] %v909_v14  ;;  %v1489_v19 = vadd.f32 %v1488_v16, %v1487_v11  ;;  %v1513_v20 = vadd.f32 %v1512_v18, %v1511_v12 }
 0x166   : > { %v1490_v21 = vpop.f32.mrf.mxu0  ;;  %v1514_v22 = vpop.f32.mrf.mxu1 }
 0x167   : > { %v902_v23 = vadd.f32 %v1489_v19, %v565_v15  ;;  %v910_v24 = vadd.f32 %v1513_v20, %v573_v17 }
 0x168   : > { %v1491_v26 = vpop.f32.mrf.mxu0  ;;  %v1515_v28 = vpop.f32.mrf.mxu1 }
 0x169   : > { %918 = vst [vmem:[#allocation2 + $0x8] sm:$0xff] %v902_v23  ;;  %926 = vst [vmem:[#allocation2 + $0x78] sm:$0xff] %v910_v24  ;;  %v1492_v29 = vadd.f32 %v1491_v26, %v1490_v21  ;;  %v1516_v30 = vadd.f32 %v1515_v28, %v1514_v22  ;;  %931 = sbr.rel (%p1365_p5) target bundleno = 387 (0x183), region = 123 }
 0x16b   : > { %v903_v31 = vadd.f32 %v1492_v29, %v566_v25  ;;  %v911_v32 = vadd.f32 %v1516_v30, %v574_v27 }
 0x16d   : > { %919 = vst [vmem:[#allocation2 + $0x48] sm:$0xff] %v903_v31  ;;  %927 = vst [vmem:[#allocation2 + $0x28] sm:$0xff] %v911_v32 }
 0x16e   : > { %v932_v33 = vld [vmem:[#allocation2 + $0x30] sm:$0xff]  ;;  %v933_v34 = vld [vmem:[#allocation2] sm:$0xff]  ;;  %v934_v39 = vld [vmem:[#allocation2 + $0x58] sm:$0xff] }
 0x16f   : > { %v2038_v35 = vld [vmem:[%s533_s9] ss:$0 sm:$0xff]  ;;  %v935_v40 = vld [vmem:[#allocation2 + $0x18] sm:$0xff]  ;;  %v936_v43 = vld [vmem:[#allocation2 + $0x50] sm:$0xff] }
 0x170   : > { %v955_v36 = vmul.f32 %v2038_v35, %v932_v33  ;;  %v956_v37 = vmul.f32 %v2038_v35, %v933_v34  ;;  %v2047_v38 = vld [vmem:[%s536_s27] ss:$0 sm:$0xff]  ;;  %v957_v41 = vmul.f32 %v2038_v35, %v934_v39  ;;  %v958_v42 = vmul.f32 %v2038_v35, %v935_v40  ;;  %v937_v44 = vld [vmem:[#allocation2 + $0x68] sm:$0xff]  ;;  %v942_v1 = vld [vmem:[#allocation2 + $0x10] sm:$0xff] }
 0x171   : > { %v938_v45 = vld [vmem:[#allocation2 + $0x8] sm:$0xff]  ;;  %v959_v48 = vmul.f32 %v2038_v35, %v936_v43  ;;  %v960_v49 = vmul.f32 %v2038_v35, %v937_v44  ;;  %v940_v55 = vld [vmem:[#allocation2 + $0x40] sm:$0xff]  ;;  %v943_v2 = vld [vmem:[#allocation2 + $0x38] sm:$0xff]  ;;  %v965_v16 = vmul.f32 %v2038_v35, %v942_v1 }
 0x172   : > { %v978_v46 = vadd.f32 %v2047_v38, %v955_v36  ;;  %v979_v47 = vadd.f32 %v2047_v38, %v956_v37  ;;  %v980_v51 = vadd.f32 %v2047_v38, %v957_v41  ;;  %v981_v52 = vadd.f32 %v2047_v38, %v958_v42  ;;  %v941_v60 = vld [vmem:[#allocation2 + $0x20] sm:$0xff]  ;;  %v945_v8 = vld [vmem:[#allocation2 + $0x70] sm:$0xff]  ;;  %v946_v13 = vld [vmem:[#allocation2 + $0x78] sm:$0xff] }
 0x173   : > { %v961_v53 = vmul.f32 %v2038_v35, %v938_v45  ;;  %v982_v58 = vadd.f32 %v2047_v38, %v959_v48  ;;  %v983_v59 = vadd.f32 %v2047_v38, %v960_v49  ;;  %v963_v6 = vmul.f32 %v2038_v35, %v940_v55  ;;  %v944_v7 = vld [vmem:[#allocation2 + $0x60] sm:$0xff] }
 0x174   : > { %v939_v50 = vld [vmem:[#allocation2 + $0x48] sm:$0xff]  ;;  %v994_v56 = vmax.f32 %v978_v46, 0.0  ;;  %v995_v57 = vmax.f32 %v979_v47, 0.0  ;;  %v996_v61 = vmax.f32 %v980_v51, 0.0  ;;  %v997_v62 = vmax.f32 %v981_v52, 0.0 }
 0x175   : > { %v962_v54 = vmul.f32 %v2038_v35, %v939_v50  ;;  %v984_v63 = vadd.f32 %v2047_v38, %v961_v53  ;;  %v998_v4 = vmax.f32 %v982_v58, 0.0  ;;  %v999_v5 = vmax.f32 %v983_v59, 0.0  ;;  %v947_v18 = vld [vmem:[#allocation2 + $0x28] sm:$0xff] }
 0x176   : > { %v1409_v3 = vpack.c.bf16 %v995_v57, %v994_v56  ;;  %v1414_v9 = vpack.c.bf16 %v997_v62, %v996_v61  ;;  %v964_v12 = vmul.f32 %v2038_v35, %v941_v60  ;;  %v986_v15 = vadd.f32 %v2047_v38, %v963_v6 }
 0x177   : > { %v985_v0 = vadd.f32 %v2047_v38, %v962_v54  ;;  %v1000_v10 = vmax.f32 %v984_v63, 0.0  ;;  %v1419_v14 = vpack.c.bf16 %v999_v5, %v998_v4  ;;  %v966_v17 = vmul.f32 %v2038_v35, %v943_v2 }
 0x178   : > { %1410 = vst [vmem:[%s1997_s19] sm:$0xff] %v1409_v3   ;;  %1446 = vst [vmem:[%s1997_s19 + $0x8] sm:$0xff] %v1414_v9   ;;  %v987_v20 = vadd.f32 %v2047_v38, %v964_v12  ;;  %v967_v21 = vmul.f32 %v2038_v35, %v944_v7  ;;  %v968_v22 = vmul.f32 %v2038_v35, %v945_v8  ;;  %v1002_v23 = vmax.f32 %v986_v15, 0.0 }
 0x179   : > { %v1001_v11 = vmax.f32 %v985_v0, 0.0  ;;  %1447 = vst [vmem:[%s1997_s19 + $0x10] sm:$0xff] %v1419_v14   ;;  %v988_v24 = vadd.f32 %v2047_v38, %v965_v16  ;;  %v989_v25 = vadd.f32 %v2047_v38, %v966_v17  ;;  %v969_v26 = vmul.f32 %v2038_v35, %v946_v13 }
 0x17a   : > { %v1003_v27 = vmax.f32 %v987_v20, 0.0  ;;  %v990_v28 = vadd.f32 %v2047_v38, %v967_v21  ;;  %v991_v29 = vadd.f32 %v2047_v38, %v968_v22  ;;  %v970_v30 = vmul.f32 %v2038_v35, %v947_v18 }
 0x17b   : > { %v1424_v19 = vpack.c.bf16 %v1001_v11, %v1000_v10  ;;  %v1004_v31 = vmax.f32 %v988_v24, 0.0  ;;  %v1005_v32 = vmax.f32 %v989_v25, 0.0  ;;  %v992_v33 = vadd.f32 %v2047_v38, %v969_v26 }
 0x17c   : > { %v1429_v34 = vpack.c.bf16 %v1003_v27, %v1002_v23  ;;  %v1006_v36 = vmax.f32 %v990_v28, 0.0  ;;  %v1007_v37 = vmax.f32 %v991_v29, 0.0  ;;  %v993_v39 = vadd.f32 %v2047_v38, %v970_v30 }
 0x17d   : > { %1448 = vst [vmem:[%s1997_s19 + $0x18] sm:$0xff] %v1424_v19   ;;  %v1434_v40 = vpack.c.bf16 %v1005_v32, %v1004_v31  ;;  %v1008_v41 = vmax.f32 %v992_v33, 0.0 }
 0x17e   : > { %1449 = vst [vmem:[%s1997_s19 + $0x20] sm:$0xff] %v1429_v34   ;;  %v1439_v42 = vpack.c.bf16 %v1007_v37, %v1006_v36  ;;  %v1009_v43 = vmax.f32 %v993_v39, 0.0 }
 0x17f   : > { %1450 = vst [vmem:[%s1997_s19 + $0x28] sm:$0xff] %v1434_v40  }
 0x180   : > { %1451 = vst [vmem:[%s1997_s19 + $0x30] sm:$0xff] %v1439_v42   ;;  %v1444_v44 = vpack.c.bf16 %v1009_v43, %v1008_v41 }
 0x182   : > { %1452 = vst [vmem:[%s1997_s19 + $0x38] sm:$0xff] %v1444_v44  }
 0x183 PF: > { %1096 = sbr.rel (!%p1870_p12) target bundleno = 399 (0x18f), region = 127  ;;  %s1385_s21 = sshll.u32 (%p1870_p12), %s1736_s22, 2  ;;  %v1118_v35 = vld [vmem:[%s1997_s19] sm:$0xf] (%p1870_p12)  ;;  %v1120_v38 = vld [vmem:[%s1997_s19 + $0x4] sm:$0xf] (%p1870_p12) }
 0x184   : > { %s1101_s26 = scalar_lea.vmem (%p1870_p12), %s2146_s4, %s1385_s21  ;;  %v1122_v45 = vld [vmem:[%s1997_s19 + $0x8] sm:$0xf] (%p1870_p12)  ;;  %v1124_v46 = vld [vmem:[%s1997_s19 + $0xc] sm:$0xf] (%p1870_p12)  ;;  %v1126_v47 = vld [vmem:[%s1997_s19 + $0x10] sm:$0xf] (%p1870_p12) }
 0x185   : > { %1119 = vst [vmem:[%s1101_s26] sm:$0xf] (%p1870_p12), %v1118_v35  ;;  %1121 = vst [vmem:[%s1101_s26 + $0x8] sm:$0xf] (%p1870_p12), %v1120_v38  ;;  %v1128_v48 = vld [vmem:[%s1997_s19 + $0x14] sm:$0xf] (%p1870_p12) }
 0x186   : > { %1123 = vst [vmem:[%s1101_s26 + $0x10] sm:$0xf] (%p1870_p12), %v1122_v45  ;;  %1125 = vst [vmem:[%s1101_s26 + $0x18] sm:$0xf] (%p1870_p12), %v1124_v46  ;;  %v1130_v49 = vld [vmem:[%s1997_s19 + $0x18] sm:$0xf] (%p1870_p12) }
 0x187   : > { %1127 = vst [vmem:[%s1101_s26 + $0x20] sm:$0xf] (%p1870_p12), %v1126_v47  ;;  %v1132_v50 = vld [vmem:[%s1997_s19 + $0x1c] sm:$0xf] (%p1870_p12)  ;;  %1129 = vst [vmem:[%s1101_s26 + $0x28] sm:$0xf] (%p1870_p12), %v1128_v48 }
 0x188   : > { %1131 = vst [vmem:[%s1101_s26 + $0x30] sm:$0xf] %v1130_v49  ;;  %1133 = vst [vmem:[%s1101_s26 + $0x38] sm:$0xf] %v1132_v50  ;;  %v1134_v51 = vld [vmem:[%s1997_s19 + $0x20] sm:$0xf] }
 0x189   : > { %v1136_v52 = vld [vmem:[%s1997_s19 + $0x24] sm:$0xf]  ;;  %v1138_v53 = vld [vmem:[%s1997_s19 + $0x28] sm:$0xf]  ;;  %1135 = vst [vmem:[%s1101_s26 + $0x40] sm:$0xf] %v1134_v51 }
 0x18a   : > { %1137 = vst [vmem:[%s1101_s26 + $0x48] sm:$0xf] %v1136_v52  ;;  %1139 = vst [vmem:[%s1101_s26 + $0x50] sm:$0xf] %v1138_v53  ;;  %v1140_v54 = vld [vmem:[%s1997_s19 + $0x2c] sm:$0xf] }
 0x18b   : > { %v1142_v55 = vld [vmem:[%s1997_s19 + $0x30] sm:$0xf]  ;;  %v1144_v56 = vld [vmem:[%s1997_s19 + $0x34] sm:$0xf]  ;;  %1141 = vst [vmem:[%s1101_s26 + $0x58] sm:$0xf] %v1140_v54 }
 0x18c   : > { %1143 = vst [vmem:[%s1101_s26 + $0x60] sm:$0xf] %v1142_v55  ;;  %1145 = vst [vmem:[%s1101_s26 + $0x68] sm:$0xf] %v1144_v56  ;;  %v1146_v57 = vld [vmem:[%s1997_s19 + $0x38] sm:$0xf] }
 0x18d   : > { %v1148_v58 = vld [vmem:[%s1997_s19 + $0x3c] sm:$0xf]  ;;  %1147 = vst [vmem:[%s1101_s26 + $0x70] sm:$0xf] %v1146_v57 }
 0x18e   : > { %1149 = vst [vmem:[%s1101_s26 + $0x78] sm:$0xf] %v1148_v58 }
 0x18f PF: > { %s14_s25 = sadd.s32 1, %s1748_s25   ;;  %s2160_s22 = sld [smem:[#allocation6_spill]] }
 0x190   : > { %p11_p6 = scmp.ge.s32.totalorder %s14_s25, 24   ;;  %s2161_s14 = sld [smem:[#allocation7_spill]] }
 0x191   : > { %s2162_s24 = sld [smem:[#allocation8_spill]]  ;;  %s2163_s15 = smov %s1712_s16 }
 0x192   : > { %s2164_s16 = smov %s1868_s13  ;;  %s2165_s17 = smov %s1720_s18 }
 0x193   : > { %s2166_s18 = smov %s1865_s12  ;;  %s2167_s19 = smov %s1728_s20 }
 0x194   : > { %s2168_s20 = smov %s1851_s7  ;;  %s2169_s21 = smov %s1740_s23 }
 0x195   :  { %13 = sbr.rel (!%p11_p6) target bundleno = 9 (0x9), region = 213 }
 0x196   : > { %s2170_s23 = smov %s2161_s14 }

// kernel: deeplabv3plus_forward.29
= control target key start
LH: loop header
LB: loop body
LE: loop exit
PB: predicated region body
PF: predicated region fallthrough
CT: control target
= control target key end

     0   :  { %s776_s0 = inlined_call_operand.vmem [shape: s32[32], index: 0, kind: input, shape index: {}]   ;;  %s777_s3 = inlined_call_operand.vmem [shape: bf16[2,8,8,5], index: 3, kind: input, shape index: {}, may-alias: {3,4}]   ;;  %s778_s4 = inlined_call_operand.vmem [shape: bf16[2,8,8,5], index: 4, kind: input, shape index: {}, may-alias: {3,4}]   ;;  %s779_s5 = inlined_call_operand.vmem [shape: f32[32,8], index: 5, kind: input, shape index: {}]   ;;  %s780_s6 = inlined_call_operand.vmem [shape: f32[2,32,32,5], index: 6, kind: output, shape index: {}]   ;;  %s781_s1 = inlined_call_operand.vmem [shape: s32[32], index: 1, kind: input, shape index: {}]   ;;  %s782_s2 = inlined_call_operand.vmem [shape: s32[32], index: 2, kind: input, shape index: {}]  }
   0x1   :  { %s11_s23 = sshll.u32 %s776_s0, 4  ;;  %s15_s26 = sshll.u32 %s781_s1, 4  ;;  %s12_s23 = int_to_ptr.vmem [resolvable:$true] %s11_s23  ;;  %s16_s26 = int_to_ptr.vmem [resolvable:$true] %s15_s26 }
   0x2   :  { %s570_s27 = scalar_lea.vmem %s12_s23, 16  ;;  %p575_p1 = scmp.lt.s32.totalorder %s12_s23, %s12_s23 }
   0x3   :  { %p571_p0 = scmp.ne.s32.totalorder %s12_s23, %s570_s27  ;;  %p576_p2 = scmp.lt.s32.totalorder %s570_s27, %s570_s27 }
   0x5   :  { %p577_p3 = por %p576_p2, %p575_p1 }
   0x7   :  { %p578_p4 = pnand %p577_p3, %p571_p0 }
   0x9   :  { %581 = shalt.err (!%p578_p4)  }
   0xa   :  { %s648_s28 = smov [#allocation3]   ;;  %s582_s29 = scalar_lea.vmem %s16_s26, 16 }
   0xb   :  { %14 = dma.vmem_to_smem %s12_s23, 16, %s648_s28, [#allocation2] }
   0xc   :  { %p583_p5 = scmp.ne.s32.totalorder %s16_s26, %s582_s29  ;;  %p587_p6 = scmp.lt.s32.totalorder %s16_s26, %s16_s26 }
   0xd   :  { %p588_p7 = scmp.lt.s32.totalorder %s582_s29, %s582_s29 }
   0xf   :  { %p589_p8 = por %p588_p7, %p587_p6 }
  0x11   :  { %p590_p9 = pnand %p589_p8, %p583_p5 }
  0x13   :  { %593 = shalt.err (!%p590_p9)  }
  0x14   :  { %s649_s0 = smov [#allocation4]   ;;  %s19_s7 = sshll.u32 %s782_s2, 4  ;;  %s20_s7 = int_to_ptr.vmem [resolvable:$true] %s19_s7 }
  0x15   :  { %18 = dma.vmem_to_smem %s16_s26, 16, %s649_s0, [#allocation2] }
  0x16   :  { %s594_s8 = scalar_lea.vmem %s20_s7, 16  ;;  %p599_p11 = scmp.lt.s32.totalorder %s20_s7, %s20_s7 }
  0x17   :  { %p595_p10 = scmp.ne.s32.totalorder %s20_s7, %s594_s8  ;;  %p600_p12 = scmp.lt.s32.totalorder %s594_s8, %s594_s8 }
  0x19   :  { %p601_p13 = por %p600_p12, %p599_p11 }
  0x1b   :  { %p602_p0 = pnand %p601_p13, %p595_p10 }
  0x1d   :  { %605 = shalt.err (!%p602_p0)  }
  0x1e   :  { %s650_s9 = smov [#allocation5]  }
  0x1f   :  { %22 = dma.vmem_to_smem %s20_s7, 16, %s650_s9, [#allocation2] }
  0x20   :  { %626 = dma.done.wait [#allocation2], 48 }
  0x21   :  { %627 = vsyncadd [#allocation2], 4294967248 }
  0x22   :  { %24 = sfence }
  0x23   :  { %s695_s10 = smov 0   ;;  %s697_s11 = smov 0  }
  0x24   :  { %s699_s12 = smov 0   ;;  %s701_s2 = smov 0  }
  0x25   :  { %s703_s13 = smov 0  }
  0x26 LB: > { %s39_s14 = sadd.s32 1, %s638_s12  ;;  %s42_s15 = sadd.s32 1, %s642_s2  ;;  %s646_s13 = sphi %s703_s13, %s30_s13   ;;  %s642_s2 = sphi %s701_s2, %s786_s2   ;;  %s638_s12 = sphi %s699_s12, %s785_s12   ;;  %s634_s11 = sphi %s697_s11, %s784_s11   ;;  %s630_s10 = sphi %s695_s10, %s783_s10  }
  0x27   : > { %p40_p1 = scmp.ge.s32.totalorder %s39_s14, 32  ;;  %p498_p2 = scmp.ge.s32.totalorder %s646_s13, 1 }
  0x28   : > { %p196_p3 = scmp.lt.s32.totalorder %s646_s13, 65 }
  0x29   : > { %s788_s14 = smov (%p40_p1, %s39_s14), 0  ;;  %s790_s15 = smov (!%p40_p1, %s42_s15), %s642_s2 }
  0x2a   : > { %p197_p4 = pnand %p498_p2, %p196_p3  ;;  %p44_p5 = scmp.ge.s32.totalorder %s790_s15, 2 }
  0x2b   : > { %s237_s16 = sld [smem:[#allocation3 + %s630_s10]] (!%p197_p4)  ;;  %p238_p6 = scmp.lt.s32.totalorder (!%p197_p4), %s634_s11, 1 }
  0x2c   : > { %s792_s15 = smov (%p44_p5, %s790_s15), 0  ;;  %200 = sbr.rel (%p197_p4) target bundleno = 264 (0x108), region = 32 }
  0x2d   : > { %s247_s21 = sld [smem:[#allocation4 + %s630_s10]] (!%p197_p4)  ;;  %p259_p9 = scmp.lt.s32.totalorder (!%p197_p4), %s630_s10, 31 }
  0x2e   : > { %s266_s22 = sld [smem:[#allocation5 + %s630_s10]] (!%p197_p4) }
  0x31   : > { %v277_v0 = vld [vmem:[%s779_s5] sm:$0xff]  ;;  %vm281_vm0 = vcmask 64512   ;;  %v279_v1 = vld [vmem:[%s779_s5 + $0x10] sm:$0xff]  ;;  %s794_s11 = smov (!%p238_p6, %s634_s11), 1  ;;  %p240_p7 = scmp.lt.s32.totalorder %s237_s16, 7  ;;  %v278_v10 = vld [vmem:[%s779_s5 + $0x8] sm:$0xff] }
  0x32   : > { %519 = vmatprep.mubr.msk.f32.mxu0 %vm281_vm0, %v277_v0  ;;  %522 = vmatprep.mubr.msk.f32.mxu1 %vm281_vm0, %v279_v1  ;;  %s499_s23 = sshll.u32 %s794_s11, 3  ;;  %v280_v11 = vld [vmem:[%s779_s5 + $0x18] sm:$0xff]  ;;  %s800_s10 = smov (!%p259_p9, %s630_s10), 31  ;;  %vm379_vm1 = vcmask 39936  }
  0x33   : > { %p250_p8 = scmp.lt.s32.totalorder %s247_s21, 7  ;;  %s796_s16 = smov (!%p240_p7, %s237_s16), 7 }
  0x34   : > { %s243_s24 = sadd.s32 %s499_s23, %s796_s16  ;;  %s267_s25 = scvt.s32.f32 %s266_s22 }
  0x35   : > { %s798_s21 = smov (!%p250_p8, %s247_s21), 7  ;;  %s500_s26 = sshll.u32 %s243_s24, 2 }
  0x36   : > { %s253_s27 = sadd.s32 %s499_s23, %s798_s21  ;;  %s245_s0 = scalar_lea.vmem %s777_s3, %s500_s26 }
  0x37   : > { %s502_s1 = sshll.u32 %s253_s27, 2  ;;  %s268_s9 = smul.f32 1.5258789e-05, %s267_s25  ;;  %v269_v2 = vld [vmem:[%s245_s0] sm:$0xf] }
  0x38   : > { %s255_s8 = scalar_lea.vmem %s778_s4, %s502_s1  ;;  %v270_v3 = vunpack.c.l.bf16 %v269_v2  ;;  %s503_s20 = sshll.u32 %s800_s10, 2 }
  0x39   : > { %v271_v4 = vld [vmem:[%s255_s8] sm:$0xf]  ;;  %v274_v6 = vstv %s268_s9  ;;  %s504_s21 = sshll.u32 %s794_s11, 7 }
  0x3a   : > { %v272_v5 = vunpack.c.l.bf16 %v271_v4  ;;  %s263_s22 = sadd.s32 %s504_s21, %s503_s20 }
  0x3b   : > { %s505_s23 = sshll.u32 %s263_s22, 3 }
  0x3c   : > { %v273_v7 = vsub.f32 %v272_v5, %v270_v3  ;;  %s265_s26 = scalar_lea.vmem %s780_s6, %s505_s23 }
  0x3e   : > { %v275_v8 = vmul.f32 %v274_v6, %v273_v7 }
  0x40   : > { %v276_v9 = vadd.f32 %v275_v8, %v270_v3 }
  0x42   : > { %517 = vmatprep.subr.mxu0 %v276_v9  ;;  %525 = vmatprep.subr.mxu1 %v276_v9 }
  0x43   : > { %518 = vmatpush3.msra.mxu0 %v276_v9  ;;  %526 = vmatpush3.msra.mxu1 %v276_v9 }
  0x44   : > { %520 = vmatmul.mubr.msk.f32.vlgmr.msra.gmra.mxu0 %vm281_vm0, %v278_v10  ;;  %523 = vmatmul.mubr.msk.f32.vlgmr.msra.gmra.mxu1 %vm281_vm0, %v280_v11 }
 0x104   : > { %v521_v12 = vpop.f32.mrf.mxu0  ;;  %v524_v13 = vpop.f32.mrf.mxu1 }
 0x105   : > { %381 = vst.msk [vmem:[%s265_s26 + $0x8] sm:$0xff] %vm379_vm1, %v521_v12  ;;  %383 = vst.msk [vmem:[%s265_s26 + $0x18] sm:$0xff] %vm379_vm1, %v524_v13 }
 0x106   : > { %v360_v14 = vpop.f32.mrf.mxu0  ;;  %v370_v15 = vpop.f32.mrf.mxu1 }
 0x107   : > { %380 = vst.msk [vmem:[%s265_s26] sm:$0xff] %vm379_vm1, %v360_v14  ;;  %382 = vst.msk [vmem:[%s265_s26 + $0x10] sm:$0xff] %vm379_vm1, %v370_v15 }
 0x108 PF: > { %s30_s13 = sadd.s32 1, %s646_s13   ;;  %s783_s10 = smov %s638_s12 }
 0x109   : > { %p27_p10 = scmp.ge.s32.totalorder %s30_s13, 66   ;;  %s784_s11 = smov %s642_s2 }
 0x10a   : > { %s785_s12 = smov %s788_s14  ;;  %s786_s2 = smov %s792_s15 }
 0x10b   :  { %29 = sbr.rel (!%p27_p10) target bundleno = 38 (0x26), region = 65 }

// kernel: deeplabv3plus_forward.28
= control target key start
LH: loop header
LB: loop body
LE: loop exit
PB: predicated region body
PF: predicated region fallthrough
CT: control target
= control target key end

     0   :  { %s976_s1 = inlined_call_operand.vmem [shape: bf16[256,128], index: 1, kind: input, shape index: {}]   ;;  %s977_s0 = inlined_call_operand.vmem [shape: bf16[128,256], index: 0, kind: input, shape index: {}]   ;;  %s978_s2 = inlined_call_operand.vmem [shape: f32[1,128], index: 2, kind: input, shape index: {}]   ;;  %s979_s3 = inlined_call_operand.vmem [shape: f32[1,128], index: 3, kind: input, shape index: {}]   ;;  %s980_s4 = inlined_call_operand.vmem [shape: bf16[128,128], index: 4, kind: output, shape index: {}]  }
   0x1   :  { %v749_v0 = vld [vmem:[%s976_s1 + $0x78] sm:$0xff]   ;;  %v751_v2 = vld [vmem:[%s976_s1 + $0x70] sm:$0xff]   ;;  %v753_v4 = vld [vmem:[%s976_s1 + $0x68] sm:$0xff]  }
   0x2   :  { %v750_v1 = vld [vmem:[%s976_s1 + $0x38] sm:$0xff]   ;;  %669 = vmatprep.subr.bf16.mxu0 %v749_v0  ;;  %733 = vmatprep.subr.bf16.mxu1 %v749_v0  ;;  %v752_v3 = vld [vmem:[%s976_s1 + $0x30] sm:$0xff]   ;;  %v754_v5 = vld [vmem:[%s976_s1 + $0x28] sm:$0xff]  }
   0x3   :  { %670 = vmatpush3.bf16.msra.mxu0 %v750_v1  ;;  %741 = vmatpush3.bf16.msra.mxu1 %v750_v1  ;;  %v755_v6 = vld [vmem:[%s976_s1 + $0x60] sm:$0xff]   ;;  %v757_v8 = vld [vmem:[%s976_s1 + $0x58] sm:$0xff]   ;;  %v759_v10 = vld [vmem:[%s976_s1 + $0x50] sm:$0xff]  }
   0x4   :  { %671 = vmatprep.subr.bf16.mxu0 %v751_v2  ;;  %734 = vmatprep.subr.bf16.mxu1 %v751_v2  ;;  %v756_v7 = vld [vmem:[%s976_s1 + $0x20] sm:$0xff]   ;;  %v758_v9 = vld [vmem:[%s976_s1 + $0x18] sm:$0xff]   ;;  %v760_v13 = vld [vmem:[%s976_s1 + $0x10] sm:$0xff]  }
   0x5   :  { %v767_v11 = vld [vmem:[%s977_s0 + $0x4] ss:$8 sps:$4 sm:$0xff]   ;;  %v765_v18 = vld [vmem:[%s977_s0] ss:$8 sps:$4 sm:$0xff]   ;;  %v771_v20 = vld [vmem:[%s977_s0 + $0x14] ss:$8 sps:$4 sm:$0xff]  }
   0x6   :  { %v770_v12 = vld [vmem:[%s977_s0 + $0x44] ss:$8 sps:$4 sm:$0xff]   ;;  %310 = vmatprep.mubr.bf16.mxu0 %v767_v11  ;;  %v768_v19 = vld [vmem:[%s977_s0 + $0x40] ss:$8 sps:$4 sm:$0xff]   ;;  %v773_v21 = vld [vmem:[%s977_s0 + $0x54] ss:$8 sps:$4 sm:$0xff]  }
   0x7   :  { %672 = vmatpush3.bf16.msra.mxu0 %v752_v3  ;;  %742 = vmatpush3.bf16.msra.mxu1 %v752_v3  ;;  %v761_v14 = vld [vmem:[%s976_s1 + $0x48] sm:$0xff]   ;;  %v763_v16 = vld [vmem:[%s976_s1 + $0x40] sm:$0xff]   ;;  %v775_v22 = vld [vmem:[%s977_s0 + $0x10] ss:$8 sps:$4 sm:$0xff]  }
   0x8   :  { %673 = vmatprep.subr.bf16.mxu0 %v753_v4  ;;  %735 = vmatprep.subr.bf16.mxu1 %v753_v4  ;;  %v762_v15 = vld [vmem:[%s976_s1 + $0x8] sm:$0xff]   ;;  %v764_v17 = vld [vmem:[%s976_s1] sm:$0xff]   ;;  %v776_v23 = vld [vmem:[%s977_s0 + $0x50] ss:$8 sps:$4 sm:$0xff]  }
   0x9   :  { %342 = vmatprep.mubr.bf16.mxu1 %v770_v12  ;;  %v777_v24 = vld [vmem:[%s977_s0 + $0x24] ss:$8 sps:$4 sm:$0xff]   ;;  %v781_v26 = vld [vmem:[%s977_s0 + $0x20] ss:$8 sps:$4 sm:$0xff]   ;;  %v783_v28 = vld [vmem:[%s977_s0 + $0x34] ss:$8 sps:$4 sm:$0xff]  }
   0xa   :  { %v779_v25 = vld [vmem:[%s977_s0 + $0x64] ss:$8 sps:$4 sm:$0xff]   ;;  %v782_v27 = vld [vmem:[%s977_s0 + $0x60] ss:$8 sps:$4 sm:$0xff]   ;;  %v785_v29 = vld [vmem:[%s977_s0 + $0x74] ss:$8 sps:$4 sm:$0xff]  }
   0xb   :  { %674 = vmatpush3.bf16.msra.mxu0 %v754_v5  ;;  %743 = vmatpush3.bf16.msra.mxu1 %v754_v5  ;;  %v787_v30 = vld [vmem:[%s977_s0 + $0x30] ss:$8 sps:$4 sm:$0xff]   ;;  %v913_v37 = vld [vmem:[%s978_s2] ss:$0 sm:$0xff] }
   0xc   :  { %675 = vmatprep.subr.bf16.mxu0 %v755_v6  ;;  %736 = vmatprep.subr.bf16.mxu1 %v755_v6  ;;  %v788_v31 = vld [vmem:[%s977_s0 + $0x70] ss:$8 sps:$4 sm:$0xff]   ;;  %v920_v45 = vld [vmem:[%s979_s3] ss:$0 sm:$0xff] }
   0xf   :  { %676 = vmatpush3.bf16.msra.mxu0 %v756_v7  ;;  %744 = vmatpush3.bf16.msra.mxu1 %v756_v7 }
  0x10   :  { %677 = vmatprep.subr.bf16.mxu0 %v757_v8  ;;  %737 = vmatprep.subr.bf16.mxu1 %v757_v8 }
  0x13   :  { %678 = vmatpush3.bf16.msra.mxu0 %v758_v9  ;;  %745 = vmatpush3.bf16.msra.mxu1 %v758_v9 }
  0x14   :  { %679 = vmatprep.subr.bf16.mxu0 %v759_v10  ;;  %738 = vmatprep.subr.bf16.mxu1 %v759_v10 }
  0x17   :  { %680 = vmatpush3.bf16.msra.mxu0 %v760_v13  ;;  %746 = vmatpush3.bf16.msra.mxu1 %v760_v13 }
  0x18   :  { %681 = vmatprep.subr.bf16.mxu0 %v761_v14  ;;  %739 = vmatprep.subr.bf16.mxu1 %v761_v14 }
  0x1b   :  { %682 = vmatpush3.bf16.msra.mxu0 %v762_v15  ;;  %747 = vmatpush3.bf16.msra.mxu1 %v762_v15 }
  0x1c   :  { %683 = vmatprep.subr.bf16.mxu0 %v763_v16  ;;  %740 = vmatprep.subr.bf16.mxu1 %v763_v16 }
  0x1f   :  { %684 = vmatpush3.bf16.msra.mxu0 %v764_v17  ;;  %748 = vmatpush3.bf16.msra.mxu1 %v764_v17 }
  0x22   :  { %311 = vmatmul.mubr.bf16.vlgmr.msra.gmra.mxu0 %v765_v18  ;;  %343 = vmatmul.mubr.bf16.vlgmr.msra.gmra.mxu1 %v768_v19 }
  0x23   :  { %318 = vmatprep.mubr.bf16.mxu0 %v771_v20  ;;  %350 = vmatprep.mubr.bf16.mxu1 %v773_v21 }
  0x2a   :  { %319 = vmatmul.mubr.bf16.gmra.mxu0 %v775_v22  ;;  %351 = vmatmul.mubr.bf16.gmra.mxu1 %v776_v23 }
  0x2b   :  { %326 = vmatprep.mubr.bf16.mxu0 %v777_v24  ;;  %358 = vmatprep.mubr.bf16.mxu1 %v779_v25 }
  0x32   :  { %327 = vmatmul.mubr.bf16.gmra.mxu0 %v781_v26  ;;  %359 = vmatmul.mubr.bf16.gmra.mxu1 %v782_v27 }
  0x33   :  { %334 = vmatprep.mubr.bf16.mxu0 %v783_v28  ;;  %366 = vmatprep.mubr.bf16.mxu1 %v785_v29 }
  0x3a   :  { %335 = vmatmul.mubr.bf16.gmra.mxu0 %v787_v30  ;;  %367 = vmatmul.mubr.bf16.gmra.mxu1 %v788_v31 }
  0xe2   :  { %v685_v32 = vpop.f32.mrf.mxu0  ;;  %v709_v33 = vpop.f32.mrf.mxu1 }
  0xe4   :  { %v686_v34 = vpop.f32.mrf.mxu0  ;;  %v710_v35 = vpop.f32.mrf.mxu1 }
  0xe5   :  { %v687_v36 = vadd.f32 %v686_v34, %v685_v32  ;;  %v711_v38 = vadd.f32 %v710_v35, %v709_v33 }
  0xe6   :  { %v688_v39 = vpop.f32.mrf.mxu0  ;;  %v712_v40 = vpop.f32.mrf.mxu1 }
  0xe7   :  { %v433_v41 = vmul.f32 %v687_v36, %v913_v37  ;;  %v441_v42 = vmul.f32 %v711_v38, %v913_v37 }
  0xe8   :  { %v689_v43 = vpop.f32.mrf.mxu0  ;;  %v713_v44 = vpop.f32.mrf.mxu1 }
  0xe9   :  { %v690_v46 = vadd.f32 %v689_v43, %v688_v39  ;;  %v714_v47 = vadd.f32 %v713_v44, %v712_v40  ;;  %v456_v52 = vadd.f32 %v920_v45, %v433_v41  ;;  %v464_v53 = vadd.f32 %v920_v45, %v441_v42 }
  0xea   :  { %v691_v48 = vpop.f32.mrf.mxu0  ;;  %v715_v49 = vpop.f32.mrf.mxu1 }
  0xeb   :  { %v434_v50 = vmul.f32 %v690_v46, %v913_v37  ;;  %v442_v51 = vmul.f32 %v714_v47, %v913_v37 }
  0xec   :  { %v692_v54 = vpop.f32.mrf.mxu0  ;;  %v716_v55 = vpop.f32.mrf.mxu1 }
  0xed   :  { %v457_v56 = vadd.f32 %v920_v45, %v434_v50  ;;  %v465_v57 = vadd.f32 %v920_v45, %v442_v51  ;;  %v693_v58 = vadd.f32 %v692_v54, %v691_v48  ;;  %v717_v59 = vadd.f32 %v716_v55, %v715_v49 }
  0xee   :  { %v694_v60 = vpop.f32.mrf.mxu0  ;;  %v718_v61 = vpop.f32.mrf.mxu1 }
  0xef   :  { %v625_v62 = vpack.c.bf16 %v457_v56, %v456_v52  ;;  %v645_v63 = vpack.c.bf16 %v465_v57, %v464_v53  ;;  %v435_v0 = vmul.f32 %v693_v58, %v913_v37  ;;  %v443_v1 = vmul.f32 %v717_v59, %v913_v37 }
  0xf0   :  { %v695_v2 = vpop.f32.mrf.mxu0  ;;  %v719_v3 = vpop.f32.mrf.mxu1 }
  0xf1   :  { %626 = vst [vmem:[%s980_s4] sm:$0xff] %v625_v62   ;;  %665 = vst [vmem:[%s980_s4 + $0x20] sm:$0xff] %v645_v63   ;;  %v696_v4 = vadd.f32 %v695_v2, %v694_v60  ;;  %v720_v5 = vadd.f32 %v719_v3, %v718_v61  ;;  %v458_v10 = vadd.f32 %v920_v45, %v435_v0 }
  0xf2   :  { %v697_v6 = vpop.f32.mrf.mxu0  ;;  %v721_v7 = vpop.f32.mrf.mxu1  ;;  %v466_v11 = vadd.f32 %v920_v45, %v443_v1 }
  0xf3   :  { %v436_v8 = vmul.f32 %v696_v4, %v913_v37  ;;  %v444_v9 = vmul.f32 %v720_v5, %v913_v37 }
  0xf4   :  { %v698_v12 = vpop.f32.mrf.mxu0  ;;  %v722_v13 = vpop.f32.mrf.mxu1 }
  0xf5   :  { %v459_v14 = vadd.f32 %v920_v45, %v436_v8  ;;  %v467_v15 = vadd.f32 %v920_v45, %v444_v9  ;;  %v699_v16 = vadd.f32 %v698_v12, %v697_v6  ;;  %v723_v17 = vadd.f32 %v722_v13, %v721_v7 }
  0xf6   :  { %v700_v18 = vpop.f32.mrf.mxu0  ;;  %v724_v19 = vpop.f32.mrf.mxu1 }
  0xf7   :  { %v630_v20 = vpack.c.bf16 %v459_v14, %v458_v10  ;;  %v650_v21 = vpack.c.bf16 %v467_v15, %v466_v11  ;;  %v437_v22 = vmul.f32 %v699_v16, %v913_v37  ;;  %v445_v23 = vmul.f32 %v723_v17, %v913_v37 }
  0xf8   :  { %v701_v24 = vpop.f32.mrf.mxu0  ;;  %v725_v25 = vpop.f32.mrf.mxu1 }
  0xf9   :  { %662 = vst [vmem:[%s980_s4 + $0x8] sm:$0xff] %v630_v20   ;;  %666 = vst [vmem:[%s980_s4 + $0x28] sm:$0xff] %v650_v21   ;;  %v702_v26 = vadd.f32 %v701_v24, %v700_v18  ;;  %v726_v27 = vadd.f32 %v725_v25, %v724_v19  ;;  %v460_v32 = vadd.f32 %v920_v45, %v437_v22 }
  0xfa   :  { %v703_v28 = vpop.f32.mrf.mxu0  ;;  %v727_v29 = vpop.f32.mrf.mxu1  ;;  %v468_v33 = vadd.f32 %v920_v45, %v445_v23 }
  0xfb   :  { %v438_v30 = vmul.f32 %v702_v26, %v913_v37  ;;  %v446_v31 = vmul.f32 %v726_v27, %v913_v37 }
  0xfc   :  { %v704_v34 = vpop.f32.mrf.mxu0  ;;  %v728_v35 = vpop.f32.mrf.mxu1 }
  0xfd   :  { %v461_v36 = vadd.f32 %v920_v45, %v438_v30  ;;  %v469_v38 = vadd.f32 %v920_v45, %v446_v31  ;;  %v705_v39 = vadd.f32 %v704_v34, %v703_v28  ;;  %v729_v40 = vadd.f32 %v728_v35, %v727_v29 }
  0xfe   :  { %v706_v41 = vpop.f32.mrf.mxu0  ;;  %v730_v42 = vpop.f32.mrf.mxu1 }
  0xff   :  { %v635_v43 = vpack.c.bf16 %v461_v36, %v460_v32  ;;  %v655_v44 = vpack.c.bf16 %v469_v38, %v468_v33  ;;  %v439_v48 = vmul.f32 %v705_v39, %v913_v37  ;;  %v447_v49 = vmul.f32 %v729_v40, %v913_v37 }
 0x100   :  { %v707_v46 = vpop.f32.mrf.mxu0  ;;  %v731_v47 = vpop.f32.mrf.mxu1 }
 0x101   :  { %663 = vst [vmem:[%s980_s4 + $0x10] sm:$0xff] %v635_v43   ;;  %667 = vst [vmem:[%s980_s4 + $0x30] sm:$0xff] %v655_v44   ;;  %v708_v50 = vadd.f32 %v707_v46, %v706_v41  ;;  %v732_v51 = vadd.f32 %v731_v47, %v730_v42  ;;  %v462_v54 = vadd.f32 %v920_v45, %v439_v48 }
 0x102   :  { %v470_v55 = vadd.f32 %v920_v45, %v447_v49 }
 0x103   :  { %v440_v52 = vmul.f32 %v708_v50, %v913_v37  ;;  %v448_v53 = vmul.f32 %v732_v51, %v913_v37 }
 0x105   :  { %v463_v56 = vadd.f32 %v920_v45, %v440_v52  ;;  %v471_v57 = vadd.f32 %v920_v45, %v448_v53 }
 0x107   :  { %v640_v58 = vpack.c.bf16 %v463_v56, %v462_v54  ;;  %v660_v59 = vpack.c.bf16 %v471_v57, %v470_v55 }
 0x109   :  { %664 = vst [vmem:[%s980_s4 + $0x18] sm:$0xff] %v640_v58   ;;  %668 = vst [vmem:[%s980_s4 + $0x38] sm:$0xff] %v660_v59  }

</bundles_post_ra>
